<compile_context>
chip_gen: v7x
topology: tpu7x:2x2x1
jax: 0.10.0
libtpu: 0.0.40
codegen_flags: <defaults>
</compile_context>

<pallas_src>
import functools

import jax
import jax.numpy as jnp
from jax.experimental import pallas as pl
from jax.experimental.pallas import tpu as pltpu


# bf16 MXU operands, f32 accumulate. Elementwise math stays f32 (v5e has no
# bf16 VPU/EUP path).
_USE_BF16_MXU = True


# ---------------------------------------------------------------------------
# Fused Pallas kernel (one batch element per grid step)
# ---------------------------------------------------------------------------

def _make_fused_kernel(n_layers, H, W, Cin, nf, Cout):
    n_in = 3 + 2 * n_layers + 5  # x, embed_w, embed_b, (w,b)*L, mu_w, mu_b, lv_w, lv_b, eps

    def conv3x3(x_hwc, w2d, b):
        """3x3 'same' conv as a single im2col matmul.

        x_hwc: (H, W, C) f32, w2d: (9*C, Co) [bf16 or f32], b: (1, Co) f32.
        Returns (H*W, Co) f32.
        """
        Hh, Ww, C = x_hwc.shape
        # Zero halo built in VMEM (no HBM padded copies).
        zr = jnp.zeros((1, Ww, C), jnp.float32)
        xp = jnp.concatenate([zr, x_hwc, zr], axis=0)            # (H+2, W, C)
        zc = jnp.zeros((Hh + 2, 1, C), jnp.float32)
        xp = jnp.concatenate([zc, xp, zc], axis=1)               # (H+2, W+2, C)
        cols = [xp[dy:dy + Hh, dx:dx + Ww, :]
                for dy in range(3) for dx in range(3)]
        patches = jnp.concatenate(cols, axis=-1).reshape(Hh * Ww, 9 * C)
        if _USE_BF16_MXU:
            patches = patches.astype(jnp.bfloat16)
        out = jnp.dot(patches, w2d, preferred_element_type=jnp.float32)
        return out + b                                           # (H*W, Co)

    def kernel(*refs):
        in_refs, out_refs = refs[:n_in], refs[n_in:]
        x_ref, embed_w_ref, embed_b_ref = in_refs[0:3]
        lstm_refs = in_refs[3:3 + 2 * n_layers]
        mu_w_ref, mu_b_ref, lv_w_ref, lv_b_ref, eps_ref = in_refs[3 + 2 * n_layers:]
        z_ref, mu_ref, lv_ref = out_refs[0:3]
        hc_refs = out_refs[3:]                                   # h0, c0, h1, c1, ...

        x = x_ref[0].astype(jnp.float32)                         # (H, W, Cin)

        # embed conv
        h2d = conv3x3(x, embed_w_ref[...], embed_b_ref[...])     # (H*W, nf)

        # ConvLSTM layers with zero initial (h, c): gh conv reduces to its bias
        # (folded wrapper-side into the gate bias) and forget*c_prev vanishes.
        for l in range(n_layers):
            w_l = lstm_refs[2 * l][...]                          # (9*nf, 4*nf)
            b_l = lstm_refs[2 * l + 1][...]                      # (1, 4*nf) = b_ih + b_hh
            gates = conv3x3(h2d.reshape(H, W, nf), w_l, b_l)     # (H*W, 4*nf)
            i_g = jax.nn.sigmoid(gates[:, 0:nf])
            g_g = jnp.tanh(gates[:, 2 * nf:3 * nf])
            o_g = jax.nn.sigmoid(gates[:, 3 * nf:4 * nf])
            c2d = i_g * g_g                                      # + sigmoid(f)*0
            h2d = o_g * jnp.tanh(c2d)
            hc_refs[2 * l][0] = h2d.astype(hc_refs[2 * l].dtype)
            hc_refs[2 * l + 1][0] = c2d.astype(hc_refs[2 * l + 1].dtype)

        h_img = h2d.reshape(H, W, nf)
        mu2d = conv3x3(h_img, mu_w_ref[...], mu_b_ref[...])      # (H*W, Cout)
        lv2d = conv3x3(h_img, lv_w_ref[...], lv_b_ref[...])      # (H*W, Cout)

        # Reparameterize: z = eps * exp(0.5*logvar) + mu.
        # eps is a tiny (N,H*W,Cout) f32 array fed from the host RNG for
        # determinism; in-kernel pltpu PRNG would only save ~4 KB of HBM.
        sigma = jnp.exp(0.5 * lv2d)
        z2d = eps_ref[0].astype(jnp.float32) * sigma + mu2d

        z_ref[0] = z2d.astype(z_ref.dtype)
        mu_ref[0] = mu2d.astype(mu_ref.dtype)
        lv_ref[0] = lv2d.astype(lv_ref.dtype)

    return kernel


# ---------------------------------------------------------------------------
# Parameter init (PyTorch-style layouts; no non-array metadata in the pytree)
# ---------------------------------------------------------------------------

def init_params(key, in_channels, out_channels, hidden_channels,
                n_layers=1, multiplier=1, scale=0.1):
    nf = hidden_channels * multiplier
    keys = iter(jax.random.split(key, 6 + 4 * n_layers))
    p = {
        "embed_w": scale * jax.random.normal(next(keys), (nf, in_channels, 3, 3), jnp.float32),
        "embed_b": scale * jax.random.normal(next(keys), (nf,), jnp.float32),
        "mu_w": scale * jax.random.normal(next(keys), (out_channels, nf, 3, 3), jnp.float32),
        "mu_b": scale * jax.random.normal(next(keys), (out_channels,), jnp.float32),
        "logvar_w": scale * jax.random.normal(next(keys), (out_channels, nf, 3, 3), jnp.float32),
        "logvar_b": scale * jax.random.normal(next(keys), (out_channels,), jnp.float32),
        "lstm": [],
    }
    for _ in range(n_layers):
        p["lstm"].append({
            "w_ih": scale * jax.random.normal(next(keys), (4 * nf, nf, 3, 3), jnp.float32),
            "b_ih": scale * jax.random.normal(next(keys), (4 * nf,), jnp.float32),
            "w_hh": scale * jax.random.normal(next(keys), (4 * nf, nf, 3, 3), jnp.float32),
            "b_hh": scale * jax.random.normal(next(keys), (4 * nf,), jnp.float32),
        })
    # NOTE: nf / n_layers are derived from array shapes & pytree structure in
    # the forward (storing them as ints here made them tracers under jit).
    return p


# ---------------------------------------------------------------------------
# Forward wrapper
# ---------------------------------------------------------------------------

@jax.jit
def gaussian_conv_lstm_forward(x_nchw, params, eps_key):
    """Matches GaussianConvLSTM.forward(input, hidden=None).

    Returns (z, mu, logvar, hidden) as NCHW arrays (PyTorch convention);
    hidden is a list of (h, c) per layer.
    """
    N, Cin, H, W = x_nchw.shape
    nf = params["embed_w"].shape[0]          # static (from shape, not a tracer)
    Cout = params["mu_w"].shape[0]
    n_layers = len(params["lstm"])           # static (pytree structure)

    x = jnp.transpose(x_nchw, (0, 2, 3, 1))  # NCHW -> NHWC

    wdt = jnp.bfloat16 if _USE_BF16_MXU else jnp.float32

    def w2d(w):  # PyTorch (Co, Ci, 3, 3) -> im2col (9*Ci, Co)
        Co, Ci = w.shape[0], w.shape[1]
        return jnp.transpose(w, (2, 3, 1, 0)).reshape(9 * Ci, Co).astype(wdt)

    embed_w = w2d(params["embed_w"])
    embed_b = params["embed_b"].reshape(1, nf).astype(jnp.float32)
    mu_w, mu_b = w2d(params["mu_w"]), params["mu_b"].reshape(1, Cout).astype(jnp.float32)
    lv_w, lv_b = w2d(params["logvar_w"]), params["logvar_b"].reshape(1, Cout).astype(jnp.float32)

    inputs = [x, embed_w, embed_b]
    in_specs = [
        pl.BlockSpec((1, H, W, Cin), lambda n: (n, 0, 0, 0)),
        pl.BlockSpec((9 * Cin, nf), lambda n: (0, 0)),
        pl.BlockSpec((1, nf), lambda n: (0, 0)),
    ]
    for lp in params["lstm"]:
        # zero-hidden ConvLSTM: conv_hh(0) == b_hh, so fold biases together.
        inputs.append(w2d(lp["w_ih"]))
        inputs.append((lp["b_ih"] + lp["b_hh"]).reshape(1, 4 * nf).astype(jnp.float32))
        in_specs.append(pl.BlockSpec((9 * nf, 4 * nf), lambda n: (0, 0)))
        in_specs.append(pl.BlockSpec((1, 4 * nf), lambda n: (0, 0)))

    eps = jax.random.normal(eps_key, (N, H * W, Cout), jnp.float32)  # torch.randn_like
    inputs += [mu_w, mu_b, lv_w, lv_b, eps]
    in_specs += [
        pl.BlockSpec((9 * nf, Cout), lambda n: (0, 0)),
        pl.BlockSpec((1, Cout), lambda n: (0, 0)),
        pl.BlockSpec((9 * nf, Cout), lambda n: (0, 0)),
        pl.BlockSpec((1, Cout), lambda n: (0, 0)),
        pl.BlockSpec((1, H * W, Cout), lambda n: (n, 0, 0)),
    ]

    out_shapes = [jax.ShapeDtypeStruct((N, H * W, Cout), x.dtype)] * 3
    out_specs = [pl.BlockSpec((1, H * W, Cout), lambda n: (n, 0, 0))] * 3
    for _ in range(n_layers):
        out_shapes += [jax.ShapeDtypeStruct((N, H * W, nf), x.dtype)] * 2
        out_specs += [pl.BlockSpec((1, H * W, nf), lambda n: (n, 0, 0))] * 2

    kernel = _make_fused_kernel(n_layers, H, W, Cin, nf, Cout)

    outs = pl.pallas_call(
        kernel,
        out_shape=tuple(out_shapes),
        grid=(N,),
        in_specs=in_specs,
        out_specs=tuple(out_specs),
        compiler_params=pltpu.CompilerParams(
            dimension_semantics=("parallel",)),   # v7x: shard batch over 2 TCs
    )(*inputs)

    z2d, mu2d, lv2d = outs[0], outs[1], outs[2]
    hidden2d = [(outs[3 + 2 * l], outs[4 + 2 * l]) for l in range(n_layers)]

    def to_nchw(a, C):
        return jnp.transpose(a.reshape(N, H, W, C), (0, 3, 1, 2))

    z = to_nchw(z2d, Cout)
    mu = to_nchw(mu2d, Cout)
    logvar = to_nchw(lv2d, Cout)
    hidden = [(to_nchw(h, nf), to_nchw(c, nf)) for (h, c) in hidden2d]
    return z, mu, logvar, hidden


# ---------------------------------------------------------------------------
# Main
# ---------------------------------------------------------------------------

if __name__ == "__main__":
    key = jax.random.PRNGKey(0)
    k_x, k_p, k_eps = jax.random.split(key, 3)

    batch, in_channels, out_channels, hidden_channels, spatial = 2, 4, 4, 8, 16
    x = jax.random.normal(k_x, (batch, in_channels, spatial, spatial), jnp.float32)
    params = init_params(k_p, in_channels, out_channels, hidden_channels,
                         n_layers=1, multiplier=1)

    z, mu, logvar, hidden = gaussian_conv_lstm_forward(x, params, k_eps)
    jax.block_until_ready((z, mu, logvar, hidden))

    assert z.shape == (batch, out_channels, spatial, spatial)
    assert mu.shape == (batch, out_channels, spatial, spatial)
    assert logvar.shape == (batch, out_channels, spatial, spatial)
    assert len(hidden) == 1
    assert hidden[0][0].shape == (batch, hidden_channels, spatial, spatial)
    assert hidden[0][1].shape == (batch, hidden_channels, spatial, spatial)
    assert bool(jnp.all(jnp.isfinite(z)))
    assert bool(jnp.all(jnp.isfinite(mu)))
    assert bool(jnp.all(jnp.isfinite(logvar)))

    print("KERNEL_OK")
</pallas_src>

<mosaic_0001>
module attributes {stable_mosaic.version = 11 : i64} {
  func.func @kernel(%arg0: i32, %arg1: memref<1x16x16x4xf32, #tpu.memory_space<vmem>>, %arg2: memref<36x8xbf16, #tpu.memory_space<vmem>>, %arg3: memref<1x8xf32, #tpu.memory_space<vmem>>, %arg4: memref<72x32xbf16, #tpu.memory_space<vmem>>, %arg5: memref<1x32xf32, #tpu.memory_space<vmem>>, %arg6: memref<72x4xbf16, #tpu.memory_space<vmem>>, %arg7: memref<1x4xf32, #tpu.memory_space<vmem>>, %arg8: memref<72x4xbf16, #tpu.memory_space<vmem>>, %arg9: memref<1x4xf32, #tpu.memory_space<vmem>>, %arg10: memref<1x256x4xf32, #tpu.memory_space<vmem>>, %arg11: memref<1x256x4xf32, #tpu.memory_space<vmem>>, %arg12: memref<1x256x4xf32, #tpu.memory_space<vmem>>, %arg13: memref<1x256x4xf32, #tpu.memory_space<vmem>>, %arg14: memref<1x256x8xf32, #tpu.memory_space<vmem>>, %arg15: memref<1x256x8xf32, #tpu.memory_space<vmem>>) attributes {dimension_semantics = [#tpu.dimension_semantics<parallel>], iteration_bounds = array<i64: 2>, scalar_prefetch = 0 : i64, scratch_operands = 0 : i64, tpu.core_type = #tpu.core_type<tc>, window_params = [{transform_indices = @transform_0, window_bounds = array<i64: 1, 16, 16, 4>}, {pipeline_mode = #tpu.pipeline_mode<synchronous>, transform_indices = @transform_1, window_bounds = array<i64: 36, 8>}, {pipeline_mode = #tpu.pipeline_mode<synchronous>, transform_indices = @transform_2, window_bounds = array<i64: 1, 8>}, {pipeline_mode = #tpu.pipeline_mode<synchronous>, transform_indices = @transform_3, window_bounds = array<i64: 72, 32>}, {pipeline_mode = #tpu.pipeline_mode<synchronous>, transform_indices = @transform_4, window_bounds = array<i64: 1, 32>}, {pipeline_mode = #tpu.pipeline_mode<synchronous>, transform_indices = @transform_5, window_bounds = array<i64: 72, 4>}, {pipeline_mode = #tpu.pipeline_mode<synchronous>, transform_indices = @transform_6, window_bounds = array<i64: 1, 4>}, {pipeline_mode = #tpu.pipeline_mode<synchronous>, transform_indices = @transform_7, window_bounds = array<i64: 72, 4>}, {pipeline_mode = #tpu.pipeline_mode<synchronous>, transform_indices = @transform_8, window_bounds = array<i64: 1, 4>}, {transform_indices = @transform_9, window_bounds = array<i64: 1, 256, 4>}, {transform_indices = @transform_10, window_bounds = array<i64: 1, 256, 4>}, {transform_indices = @transform_11, window_bounds = array<i64: 1, 256, 4>}, {transform_indices = @transform_12, window_bounds = array<i64: 1, 256, 4>}, {transform_indices = @transform_13, window_bounds = array<i64: 1, 256, 8>}, {transform_indices = @transform_14, window_bounds = array<i64: 1, 256, 8>}]} {
    %c0 = arith.constant 0 : index
    %c0_0 = arith.constant 0 : index
    %c0_1 = arith.constant 0 : index
    %c0_2 = arith.constant 0 : index
    %0 = vector.load %arg1[%c0, %c0_0, %c0_1, %c0_2] : memref<1x16x16x4xf32, #tpu.memory_space<vmem>>, vector<1x16x16x4xf32>
    %1 = vector.shape_cast %0 : vector<1x16x16x4xf32> to vector<16x16x4xf32>
    %c0_3 = arith.constant 0 : index
    %c0_4 = arith.constant 0 : index
    %2 = vector.load %arg2[%c0_3, %c0_4] : memref<36x8xbf16, #tpu.memory_space<vmem>>, vector<36x8xbf16>
    %c0_5 = arith.constant 0 : index
    %c0_6 = arith.constant 0 : index
    %3 = vector.load %arg3[%c0_5, %c0_6] : memref<1x8xf32, #tpu.memory_space<vmem>>, vector<1x8xf32>
    %cst = arith.constant 0.000000e+00 : f32
    %4 = vector.broadcast %cst : f32 to vector<1x16x4xf32>
    %5 = tpu.concatenate %4, %1, %4 in 0 : vector<1x16x4xf32>, vector<16x16x4xf32>, vector<1x16x4xf32> -> vector<18x16x4xf32>
    %cst_7 = arith.constant 0.000000e+00 : f32
    %6 = vector.broadcast %cst_7 : f32 to vector<18x1x4xf32>
    %7 = tpu.concatenate %6, %5, %6 in 1 : vector<18x1x4xf32>, vector<18x16x4xf32>, vector<18x1x4xf32> -> vector<18x18x4xf32>
    %8 = vector.extract_strided_slice %7 {offsets = [0, 0, 0], sizes = [16, 16, 4], strides = [1, 1, 1]} : vector<18x18x4xf32> to vector<16x16x4xf32>
    %9 = vector.extract_strided_slice %7 {offsets = [0, 1, 0], sizes = [16, 16, 4], strides = [1, 1, 1]} : vector<18x18x4xf32> to vector<16x16x4xf32>
    %10 = vector.extract_strided_slice %7 {offsets = [0, 2, 0], sizes = [16, 16, 4], strides = [1, 1, 1]} : vector<18x18x4xf32> to vector<16x16x4xf32>
    %11 = vector.extract_strided_slice %7 {offsets = [1, 0, 0], sizes = [16, 16, 4], strides = [1, 1, 1]} : vector<18x18x4xf32> to vector<16x16x4xf32>
    %12 = vector.extract_strided_slice %7 {offsets = [1, 1, 0], sizes = [16, 16, 4], strides = [1, 1, 1]} : vector<18x18x4xf32> to vector<16x16x4xf32>
    %13 = vector.extract_strided_slice %7 {offsets = [1, 2, 0], sizes = [16, 16, 4], strides = [1, 1, 1]} : vector<18x18x4xf32> to vector<16x16x4xf32>
    %14 = vector.extract_strided_slice %7 {offsets = [2, 0, 0], sizes = [16, 16, 4], strides = [1, 1, 1]} : vector<18x18x4xf32> to vector<16x16x4xf32>
    %15 = vector.extract_strided_slice %7 {offsets = [2, 1, 0], sizes = [16, 16, 4], strides = [1, 1, 1]} : vector<18x18x4xf32> to vector<16x16x4xf32>
    %16 = vector.extract_strided_slice %7 {offsets = [2, 2, 0], sizes = [16, 16, 4], strides = [1, 1, 1]} : vector<18x18x4xf32> to vector<16x16x4xf32>
    %17 = tpu.concatenate %8, %9, %10, %11, %12, %13, %14, %15, %16 in 2 : vector<16x16x4xf32>, vector<16x16x4xf32>, vector<16x16x4xf32>, vector<16x16x4xf32>, vector<16x16x4xf32>, vector<16x16x4xf32>, vector<16x16x4xf32>, vector<16x16x4xf32>, vector<16x16x4xf32> -> vector<16x16x36xf32>
    %18 = vector.shape_cast %17 : vector<16x16x36xf32> to vector<256x36xf32>
    %19 = arith.truncf %18 : vector<256x36xf32> to vector<256x36xbf16>
    %cst_8 = arith.constant dense<0.000000e+00> : vector<256x8xf32>
    %20 = tpu.matmul %19, %2, %cst_8 {dimension_numbers = #tpu.dot_dimension_numbers<[1], [0], [0], [1], [0, 0, 1, 1], [], []>} : vector<256x36xbf16>, vector<36x8xbf16>, vector<256x8xf32> -> vector<256x8xf32>
    %21 = vector.broadcast %3 : vector<1x8xf32> to vector<256x8xf32>
    %22 = arith.addf %20, %21 : vector<256x8xf32>
    %c0_9 = arith.constant 0 : index
    %c0_10 = arith.constant 0 : index
    %23 = vector.load %arg4[%c0_9, %c0_10] : memref<72x32xbf16, #tpu.memory_space<vmem>>, vector<72x32xbf16>
    %c0_11 = arith.constant 0 : index
    %c0_12 = arith.constant 0 : index
    %24 = vector.load %arg5[%c0_11, %c0_12] : memref<1x32xf32, #tpu.memory_space<vmem>>, vector<1x32xf32>
    %25 = vector.shape_cast %22 : vector<256x8xf32> to vector<16x16x8xf32>
    %cst_13 = arith.constant 0.000000e+00 : f32
    %26 = vector.broadcast %cst_13 : f32 to vector<1x16x8xf32>
    %27 = tpu.concatenate %26, %25, %26 in 0 : vector<1x16x8xf32>, vector<16x16x8xf32>, vector<1x16x8xf32> -> vector<18x16x8xf32>
    %cst_14 = arith.constant 0.000000e+00 : f32
    %28 = vector.broadcast %cst_14 : f32 to vector<18x1x8xf32>
    %29 = tpu.concatenate %28, %27, %28 in 1 : vector<18x1x8xf32>, vector<18x16x8xf32>, vector<18x1x8xf32> -> vector<18x18x8xf32>
    %30 = vector.extract_strided_slice %29 {offsets = [0, 0, 0], sizes = [16, 16, 8], strides = [1, 1, 1]} : vector<18x18x8xf32> to vector<16x16x8xf32>
    %31 = vector.extract_strided_slice %29 {offsets = [0, 1, 0], sizes = [16, 16, 8], strides = [1, 1, 1]} : vector<18x18x8xf32> to vector<16x16x8xf32>
    %32 = vector.extract_strided_slice %29 {offsets = [0, 2, 0], sizes = [16, 16, 8], strides = [1, 1, 1]} : vector<18x18x8xf32> to vector<16x16x8xf32>
    %33 = vector.extract_strided_slice %29 {offsets = [1, 0, 0], sizes = [16, 16, 8], strides = [1, 1, 1]} : vector<18x18x8xf32> to vector<16x16x8xf32>
    %34 = vector.extract_strided_slice %29 {offsets = [1, 1, 0], sizes = [16, 16, 8], strides = [1, 1, 1]} : vector<18x18x8xf32> to vector<16x16x8xf32>
    %35 = vector.extract_strided_slice %29 {offsets = [1, 2, 0], sizes = [16, 16, 8], strides = [1, 1, 1]} : vector<18x18x8xf32> to vector<16x16x8xf32>
    %36 = vector.extract_strided_slice %29 {offsets = [2, 0, 0], sizes = [16, 16, 8], strides = [1, 1, 1]} : vector<18x18x8xf32> to vector<16x16x8xf32>
    %37 = vector.extract_strided_slice %29 {offsets = [2, 1, 0], sizes = [16, 16, 8], strides = [1, 1, 1]} : vector<18x18x8xf32> to vector<16x16x8xf32>
    %38 = vector.extract_strided_slice %29 {offsets = [2, 2, 0], sizes = [16, 16, 8], strides = [1, 1, 1]} : vector<18x18x8xf32> to vector<16x16x8xf32>
    %39 = tpu.concatenate %30, %31, %32, %33, %34, %35, %36, %37, %38 in 2 : vector<16x16x8xf32>, vector<16x16x8xf32>, vector<16x16x8xf32>, vector<16x16x8xf32>, vector<16x16x8xf32>, vector<16x16x8xf32>, vector<16x16x8xf32>, vector<16x16x8xf32>, vector<16x16x8xf32> -> vector<16x16x72xf32>
    %40 = vector.shape_cast %39 : vector<16x16x72xf32> to vector<256x72xf32>
    %41 = arith.truncf %40 : vector<256x72xf32> to vector<256x72xbf16>
    %cst_15 = arith.constant dense<0.000000e+00> : vector<256x32xf32>
    %42 = tpu.matmul %41, %23, %cst_15 {dimension_numbers = #tpu.dot_dimension_numbers<[1], [0], [0], [1], [0, 0, 1, 1], [], []>} : vector<256x72xbf16>, vector<72x32xbf16>, vector<256x32xf32> -> vector<256x32xf32>
    %43 = vector.broadcast %24 : vector<1x32xf32> to vector<256x32xf32>
    %44 = arith.addf %42, %43 : vector<256x32xf32>
    %45 = vector.extract_strided_slice %44 {offsets = [0, 0], sizes = [256, 8], strides = [1, 1]} : vector<256x32xf32> to vector<256x8xf32>
    %46 = arith.negf %45 : vector<256x8xf32>
    %47 = math.exp %46 : vector<256x8xf32>
    %cst_16 = arith.constant 1.000000e+00 : f32
    %48 = vector.broadcast %cst_16 : f32 to vector<256x8xf32>
    %49 = arith.addf %48, %47 : vector<256x8xf32>
    %50 = arith.divf %48, %49 : vector<256x8xf32>
    %51 = vector.extract_strided_slice %44 {offsets = [0, 16], sizes = [256, 8], strides = [1, 1]} : vector<256x32xf32> to vector<256x8xf32>
    %52 = math.tanh %51 : vector<256x8xf32>
    %53 = vector.extract_strided_slice %44 {offsets = [0, 24], sizes = [256, 8], strides = [1, 1]} : vector<256x32xf32> to vector<256x8xf32>
    %54 = arith.negf %53 : vector<256x8xf32>
    %55 = math.exp %54 : vector<256x8xf32>
    %cst_17 = arith.constant 1.000000e+00 : f32
    %56 = vector.broadcast %cst_17 : f32 to vector<256x8xf32>
    %57 = arith.addf %56, %55 : vector<256x8xf32>
    %58 = arith.divf %56, %57 : vector<256x8xf32>
    %59 = arith.mulf %50, %52 : vector<256x8xf32>
    %60 = math.tanh %59 : vector<256x8xf32>
    %61 = arith.mulf %58, %60 : vector<256x8xf32>
    %c0_18 = arith.constant 0 : index
    %c0_19 = arith.constant 0 : index
    %c0_20 = arith.constant 0 : index
    %62 = vector.load %arg14[%c0_18, %c0_19, %c0_20] : memref<1x256x8xf32, #tpu.memory_space<vmem>>, vector<1x256x8xf32>
    %63 = vector.shape_cast %62 : vector<1x256x8xf32> to vector<256x8xf32>
    %64 = vector.shape_cast %61 : vector<256x8xf32> to vector<1x256x8xf32>
    tpu.vector_store %arg14[%c0_18, %c0_19, %c0_20], %64 {strides = array<i32>} : memref<1x256x8xf32, #tpu.memory_space<vmem>>, vector<1x256x8xf32>,
    %c0_21 = arith.constant 0 : index
    %c0_22 = arith.constant 0 : index
    %c0_23 = arith.constant 0 : index
    %65 = vector.load %arg15[%c0_21, %c0_22, %c0_23] : memref<1x256x8xf32, #tpu.memory_space<vmem>>, vector<1x256x8xf32>
    %66 = vector.shape_cast %65 : vector<1x256x8xf32> to vector<256x8xf32>
    %67 = vector.shape_cast %59 : vector<256x8xf32> to vector<1x256x8xf32>
    tpu.vector_store %arg15[%c0_21, %c0_22, %c0_23], %67 {strides = array<i32>} : memref<1x256x8xf32, #tpu.memory_space<vmem>>, vector<1x256x8xf32>,
    %68 = vector.shape_cast %61 : vector<256x8xf32> to vector<16x16x8xf32>
    %c0_24 = arith.constant 0 : index
    %c0_25 = arith.constant 0 : index
    %69 = vector.load %arg6[%c0_24, %c0_25] : memref<72x4xbf16, #tpu.memory_space<vmem>>, vector<72x4xbf16>
    %c0_26 = arith.constant 0 : index
    %c0_27 = arith.constant 0 : index
    %70 = vector.load %arg7[%c0_26, %c0_27] : memref<1x4xf32, #tpu.memory_space<vmem>>, vector<1x4xf32>
    %cst_28 = arith.constant 0.000000e+00 : f32
    %71 = vector.broadcast %cst_28 : f32 to vector<1x16x8xf32>
    %72 = tpu.concatenate %71, %68, %71 in 0 : vector<1x16x8xf32>, vector<16x16x8xf32>, vector<1x16x8xf32> -> vector<18x16x8xf32>
    %cst_29 = arith.constant 0.000000e+00 : f32
    %73 = vector.broadcast %cst_29 : f32 to vector<18x1x8xf32>
    %74 = tpu.concatenate %73, %72, %73 in 1 : vector<18x1x8xf32>, vector<18x16x8xf32>, vector<18x1x8xf32> -> vector<18x18x8xf32>
    %75 = vector.extract_strided_slice %74 {offsets = [0, 0, 0], sizes = [16, 16, 8], strides = [1, 1, 1]} : vector<18x18x8xf32> to vector<16x16x8xf32>
    %76 = vector.extract_strided_slice %74 {offsets = [0, 1, 0], sizes = [16, 16, 8], strides = [1, 1, 1]} : vector<18x18x8xf32> to vector<16x16x8xf32>
    %77 = vector.extract_strided_slice %74 {offsets = [0, 2, 0], sizes = [16, 16, 8], strides = [1, 1, 1]} : vector<18x18x8xf32> to vector<16x16x8xf32>
    %78 = vector.extract_strided_slice %74 {offsets = [1, 0, 0], sizes = [16, 16, 8], strides = [1, 1, 1]} : vector<18x18x8xf32> to vector<16x16x8xf32>
    %79 = vector.extract_strided_slice %74 {offsets = [1, 1, 0], sizes = [16, 16, 8], strides = [1, 1, 1]} : vector<18x18x8xf32> to vector<16x16x8xf32>
    %80 = vector.extract_strided_slice %74 {offsets = [1, 2, 0], sizes = [16, 16, 8], strides = [1, 1, 1]} : vector<18x18x8xf32> to vector<16x16x8xf32>
    %81 = vector.extract_strided_slice %74 {offsets = [2, 0, 0], sizes = [16, 16, 8], strides = [1, 1, 1]} : vector<18x18x8xf32> to vector<16x16x8xf32>
    %82 = vector.extract_strided_slice %74 {offsets = [2, 1, 0], sizes = [16, 16, 8], strides = [1, 1, 1]} : vector<18x18x8xf32> to vector<16x16x8xf32>
    %83 = vector.extract_strided_slice %74 {offsets = [2, 2, 0], sizes = [16, 16, 8], strides = [1, 1, 1]} : vector<18x18x8xf32> to vector<16x16x8xf32>
    %84 = tpu.concatenate %75, %76, %77, %78, %79, %80, %81, %82, %83 in 2 : vector<16x16x8xf32>, vector<16x16x8xf32>, vector<16x16x8xf32>, vector<16x16x8xf32>, vector<16x16x8xf32>, vector<16x16x8xf32>, vector<16x16x8xf32>, vector<16x16x8xf32>, vector<16x16x8xf32> -> vector<16x16x72xf32>
    %85 = vector.shape_cast %84 : vector<16x16x72xf32> to vector<256x72xf32>
    %86 = arith.truncf %85 : vector<256x72xf32> to vector<256x72xbf16>
    %cst_30 = arith.constant dense<0.000000e+00> : vector<256x4xf32>
    %87 = tpu.matmul %86, %69, %cst_30 {dimension_numbers = #tpu.dot_dimension_numbers<[1], [0], [0], [1], [0, 0, 1, 1], [], []>} : vector<256x72xbf16>, vector<72x4xbf16>, vector<256x4xf32> -> vector<256x4xf32>
    %88 = vector.broadcast %70 : vector<1x4xf32> to vector<256x4xf32>
    %89 = arith.addf %87, %88 : vector<256x4xf32>
    %c0_31 = arith.constant 0 : index
    %c0_32 = arith.constant 0 : index
    %90 = vector.load %arg8[%c0_31, %c0_32] : memref<72x4xbf16, #tpu.memory_space<vmem>>, vector<72x4xbf16>
    %c0_33 = arith.constant 0 : index
    %c0_34 = arith.constant 0 : index
    %91 = vector.load %arg9[%c0_33, %c0_34] : memref<1x4xf32, #tpu.memory_space<vmem>>, vector<1x4xf32>
    %cst_35 = arith.constant 0.000000e+00 : f32
    %92 = vector.broadcast %cst_35 : f32 to vector<1x16x8xf32>
    %93 = tpu.concatenate %92, %68, %92 in 0 : vector<1x16x8xf32>, vector<16x16x8xf32>, vector<1x16x8xf32> -> vector<18x16x8xf32>
    %cst_36 = arith.constant 0.000000e+00 : f32
    %94 = vector.broadcast %cst_36 : f32 to vector<18x1x8xf32>
    %95 = tpu.concatenate %94, %93, %94 in 1 : vector<18x1x8xf32>, vector<18x16x8xf32>, vector<18x1x8xf32> -> vector<18x18x8xf32>
    %96 = vector.extract_strided_slice %95 {offsets = [0, 0, 0], sizes = [16, 16, 8], strides = [1, 1, 1]} : vector<18x18x8xf32> to vector<16x16x8xf32>
    %97 = vector.extract_strided_slice %95 {offsets = [0, 1, 0], sizes = [16, 16, 8], strides = [1, 1, 1]} : vector<18x18x8xf32> to vector<16x16x8xf32>
    %98 = vector.extract_strided_slice %95 {offsets = [0, 2, 0], sizes = [16, 16, 8], strides = [1, 1, 1]} : vector<18x18x8xf32> to vector<16x16x8xf32>
    %99 = vector.extract_strided_slice %95 {offsets = [1, 0, 0], sizes = [16, 16, 8], strides = [1, 1, 1]} : vector<18x18x8xf32> to vector<16x16x8xf32>
    %100 = vector.extract_strided_slice %95 {offsets = [1, 1, 0], sizes = [16, 16, 8], strides = [1, 1, 1]} : vector<18x18x8xf32> to vector<16x16x8xf32>
    %101 = vector.extract_strided_slice %95 {offsets = [1, 2, 0], sizes = [16, 16, 8], strides = [1, 1, 1]} : vector<18x18x8xf32> to vector<16x16x8xf32>
    %102 = vector.extract_strided_slice %95 {offsets = [2, 0, 0], sizes = [16, 16, 8], strides = [1, 1, 1]} : vector<18x18x8xf32> to vector<16x16x8xf32>
    %103 = vector.extract_strided_slice %95 {offsets = [2, 1, 0], sizes = [16, 16, 8], strides = [1, 1, 1]} : vector<18x18x8xf32> to vector<16x16x8xf32>
    %104 = vector.extract_strided_slice %95 {offsets = [2, 2, 0], sizes = [16, 16, 8], strides = [1, 1, 1]} : vector<18x18x8xf32> to vector<16x16x8xf32>
    %105 = tpu.concatenate %96, %97, %98, %99, %100, %101, %102, %103, %104 in 2 : vector<16x16x8xf32>, vector<16x16x8xf32>, vector<16x16x8xf32>, vector<16x16x8xf32>, vector<16x16x8xf32>, vector<16x16x8xf32>, vector<16x16x8xf32>, vector<16x16x8xf32>, vector<16x16x8xf32> -> vector<16x16x72xf32>
    %106 = vector.shape_cast %105 : vector<16x16x72xf32> to vector<256x72xf32>
    %107 = arith.truncf %106 : vector<256x72xf32> to vector<256x72xbf16>
    %cst_37 = arith.constant dense<0.000000e+00> : vector<256x4xf32>
    %108 = tpu.matmul %107, %90, %cst_37 {dimension_numbers = #tpu.dot_dimension_numbers<[1], [0], [0], [1], [0, 0, 1, 1], [], []>} : vector<256x72xbf16>, vector<72x4xbf16>, vector<256x4xf32> -> vector<256x4xf32>
    %109 = vector.broadcast %91 : vector<1x4xf32> to vector<256x4xf32>
    %110 = arith.addf %108, %109 : vector<256x4xf32>
    %cst_38 = arith.constant 5.000000e-01 : f32
    %111 = vector.broadcast %cst_38 : f32 to vector<256x4xf32>
    %112 = arith.mulf %111, %110 : vector<256x4xf32>
    %113 = math.exp %112 : vector<256x4xf32>
    %c0_39 = arith.constant 0 : index
    %c0_40 = arith.constant 0 : index
    %c0_41 = arith.constant 0 : index
    %114 = vector.load %arg10[%c0_39, %c0_40, %c0_41] : memref<1x256x4xf32, #tpu.memory_space<vmem>>, vector<1x256x4xf32>
    %115 = vector.shape_cast %114 : vector<1x256x4xf32> to vector<256x4xf32>
    %116 = arith.mulf %115, %113 : vector<256x4xf32>
    %117 = arith.addf %116, %89 : vector<256x4xf32>
    %c0_42 = arith.constant 0 : index
    %c0_43 = arith.constant 0 : index
    %c0_44 = arith.constant 0 : index
    %118 = vector.load %arg11[%c0_42, %c0_43, %c0_44] : memref<1x256x4xf32, #tpu.memory_space<vmem>>, vector<1x256x4xf32>
    %119 = vector.shape_cast %118 : vector<1x256x4xf32> to vector<256x4xf32>
    %120 = vector.shape_cast %117 : vector<256x4xf32> to vector<1x256x4xf32>
    tpu.vector_store %arg11[%c0_42, %c0_43, %c0_44], %120 {strides = array<i32>} : memref<1x256x4xf32, #tpu.memory_space<vmem>>, vector<1x256x4xf32>,
    %c0_45 = arith.constant 0 : index
    %c0_46 = arith.constant 0 : index
    %c0_47 = arith.constant 0 : index
    %121 = vector.load %arg12[%c0_45, %c0_46, %c0_47] : memref<1x256x4xf32, #tpu.memory_space<vmem>>, vector<1x256x4xf32>
    %122 = vector.shape_cast %121 : vector<1x256x4xf32> to vector<256x4xf32>
    %123 = vector.shape_cast %89 : vector<256x4xf32> to vector<1x256x4xf32>
    tpu.vector_store %arg12[%c0_45, %c0_46, %c0_47], %123 {strides = array<i32>} : memref<1x256x4xf32, #tpu.memory_space<vmem>>, vector<1x256x4xf32>,
    %c0_48 = arith.constant 0 : index
    %c0_49 = arith.constant 0 : index
    %c0_50 = arith.constant 0 : index
    %124 = vector.load %arg13[%c0_48, %c0_49, %c0_50] : memref<1x256x4xf32, #tpu.memory_space<vmem>>, vector<1x256x4xf32>
    %125 = vector.shape_cast %124 : vector<1x256x4xf32> to vector<256x4xf32>
    %126 = vector.shape_cast %110 : vector<256x4xf32> to vector<1x256x4xf32>
    tpu.vector_store %arg13[%c0_48, %c0_49, %c0_50], %126 {strides = array<i32>} : memref<1x256x4xf32, #tpu.memory_space<vmem>>, vector<1x256x4xf32>,
    return
  }
  func.func @transform_0(%arg0: i32) -> (i32, i32, i32, i32) {
    %c0_i32 = arith.constant 0 : i32
    %c0_i32_0 = arith.constant 0 : i32
    %c0_i32_1 = arith.constant 0 : i32
    %c0_i32_2 = arith.constant 0 : i32
    return %arg0, %c0_i32, %c0_i32_0, %c0_i32_1 : i32, i32, i32, i32
  }
  func.func @transform_1(%arg0: i32) -> (i32, i32) {
    %c0_i32 = arith.constant 0 : i32
    %c0_i32_0 = arith.constant 0 : i32
    %c0_i32_1 = arith.constant 0 : i32
    return %c0_i32, %c0_i32_0 : i32, i32
  }
  func.func @transform_2(%arg0: i32) -> (i32, i32) {
    %c0_i32 = arith.constant 0 : i32
    %c0_i32_0 = arith.constant 0 : i32
    %c0_i32_1 = arith.constant 0 : i32
    return %c0_i32, %c0_i32_0 : i32, i32
  }
  func.func @transform_3(%arg0: i32) -> (i32, i32) {
    %c0_i32 = arith.constant 0 : i32
    %c0_i32_0 = arith.constant 0 : i32
    %c0_i32_1 = arith.constant 0 : i32
    return %c0_i32, %c0_i32_0 : i32, i32
  }
  func.func @transform_4(%arg0: i32) -> (i32, i32) {
    %c0_i32 = arith.constant 0 : i32
    %c0_i32_0 = arith.constant 0 : i32
    %c0_i32_1 = arith.constant 0 : i32
    return %c0_i32, %c0_i32_0 : i32, i32
  }
  func.func @transform_5(%arg0: i32) -> (i32, i32) {
    %c0_i32 = arith.constant 0 : i32
    %c0_i32_0 = arith.constant 0 : i32
    %c0_i32_1 = arith.constant 0 : i32
    return %c0_i32, %c0_i32_0 : i32, i32
  }
  func.func @transform_6(%arg0: i32) -> (i32, i32) {
    %c0_i32 = arith.constant 0 : i32
    %c0_i32_0 = arith.constant 0 : i32
    %c0_i32_1 = arith.constant 0 : i32
    return %c0_i32, %c0_i32_0 : i32, i32
  }
  func.func @transform_7(%arg0: i32) -> (i32, i32) {
    %c0_i32 = arith.constant 0 : i32
    %c0_i32_0 = arith.constant 0 : i32
    %c0_i32_1 = arith.constant 0 : i32
    return %c0_i32, %c0_i32_0 : i32, i32
  }
  func.func @transform_8(%arg0: i32) -> (i32, i32) {
    %c0_i32 = arith.constant 0 : i32
    %c0_i32_0 = arith.constant 0 : i32
    %c0_i32_1 = arith.constant 0 : i32
    return %c0_i32, %c0_i32_0 : i32, i32
  }
  func.func @transform_9(%arg0: i32) -> (i32, i32, i32) {
    %c0_i32 = arith.constant 0 : i32
    %c0_i32_0 = arith.constant 0 : i32
    %c0_i32_1 = arith.constant 0 : i32
    return %arg0, %c0_i32, %c0_i32_0 : i32, i32, i32
  }
  func.func @transform_10(%arg0: i32) -> (i32, i32, i32) {
    %c0_i32 = arith.constant 0 : i32
    %c0_i32_0 = arith.constant 0 : i32
    %c0_i32_1 = arith.constant 0 : i32
    return %arg0, %c0_i32, %c0_i32_0 : i32, i32, i32
  }
  func.func @transform_11(%arg0: i32) -> (i32, i32, i32) {
    %c0_i32 = arith.constant 0 : i32
    %c0_i32_0 = arith.constant 0 : i32
    %c0_i32_1 = arith.constant 0 : i32
    return %arg0, %c0_i32, %c0_i32_0 : i32, i32, i32
  }
  func.func @transform_12(%arg0: i32) -> (i32, i32, i32) {
    %c0_i32 = arith.constant 0 : i32
    %c0_i32_0 = arith.constant 0 : i32
    %c0_i32_1 = arith.constant 0 : i32
    return %arg0, %c0_i32, %c0_i32_0 : i32, i32, i32
  }
  func.func @transform_13(%arg0: i32) -> (i32, i32, i32) {
    %c0_i32 = arith.constant 0 : i32
    %c0_i32_0 = arith.constant 0 : i32
    %c0_i32_1 = arith.constant 0 : i32
    return %arg0, %c0_i32, %c0_i32_0 : i32, i32, i32
  }
  func.func @transform_14(%arg0: i32) -> (i32, i32, i32) {
    %c0_i32 = arith.constant 0 : i32
    %c0_i32_0 = arith.constant 0 : i32
    %c0_i32_1 = arith.constant 0 : i32
    return %arg0, %c0_i32, %c0_i32_0 : i32, i32, i32
  }
}

</mosaic_0001>

<bundles_post_ra>
// kernel: gaussian_conv_lstm_forward.1
= control target key start
LH: loop header
LB: loop body
LE: loop exit
PB: predicated region body
PF: predicated region fallthrough
CT: control target
= control target key end

     0   :  { %s9676_s29 = smov 0   ;;  %s15475_s0 = inlined_call_operand.vmem [shape: f32[2,16,16,4], index: 0, kind: input, shape index: {}]   ;;  %s15476_s1 = inlined_call_operand.vmem [shape: bf16[36,8], index: 1, kind: input, shape index: {}]   ;;  %s15477_s2 = inlined_call_operand.vmem [shape: f32[1,8], index: 2, kind: input, shape index: {}]   ;;  %s15478_s3 = inlined_call_operand.vmem [shape: bf16[72,32], index: 3, kind: input, shape index: {}]   ;;  %s15479_s4 = inlined_call_operand.vmem [shape: f32[1,32], index: 4, kind: input, shape index: {}]   ;;  %s15480_s5 = inlined_call_operand.vmem [shape: bf16[72,4], index: 5, kind: input, shape index: {}]   ;;  %s15481_s6 = inlined_call_operand.vmem [shape: f32[1,4], index: 6, kind: input, shape index: {}]   ;;  %s15482_s7 = inlined_call_operand.vmem [shape: bf16[72,4], index: 7, kind: input, shape index: {}]   ;;  %s15483_s8 = inlined_call_operand.vmem [shape: f32[1,4], index: 8, kind: input, shape index: {}]   ;;  %s15484_s9 = inlined_call_operand.vmem [shape: f32[2,256,4], index: 9, kind: input, shape index: {}]   ;;  %s15485_s10 = inlined_call_operand.vmem [shape: f32[2,256,4], index: 10, kind: output, shape index: {0}]   ;;  %s15486_s11 = inlined_call_operand.vmem [shape: f32[2,256,4], index: 11, kind: output, shape index: {1}]   ;;  %s15487_s12 = inlined_call_operand.vmem [shape: f32[2,256,4], index: 12, kind: output, shape index: {2}]   ;;  %s15488_s13 = inlined_call_operand.vmem [shape: f32[2,256,8], index: 13, kind: output, shape index: {3}]   ;;  %s15489_s14 = inlined_call_operand.vmem [shape: f32[2,256,8], index: 14, kind: output, shape index: {4}]  }
   0x1 LB: > { %s6926_s30 = sadd.s32 4294967295, %s9584_s29   ;;  %p6930_p0 = scmp.ge.s32.totalorder %s9584_s29, 1  ;;  %s9584_s29 = sphi %s9676_s29, %s25_s29  }
   0x2   : > { %p431_p1 = scmp.lt.s32.totalorder %s9584_s29, 3 }
   0x4   : > { %p432_p2 = pnand %p6930_p0, %p431_p1 }
   0x6   : > { %435 = sbr.rel (%p432_p2) target bundleno = 2107 (0x83b), region = 60 }
   0xd   : > { %vm609_vm0 = vcmask 1040384   ;;  %p502_p3 = scmp.lt.s32.totalorder %s6926_s30, 1  ;;  %v9586_v0 = vmov 0.0   ;;  %vm775_vm1 = vcmask 1046528   ;;  %vm952_vm2 = vcmask 1045504   ;;  %s9587_s19 = smov 4  }
   0xe   : > { %v9684_v1 = vrot.slane %v9586_v0, 7  ;;  %s9588_s20 = smov 8   ;;  %s9589_s21 = smov 12   ;;  %vm2067_vm3 = vcmask 1041408   ;;  %vm1717_vm4 = vcmask 31744   ;;  %vm1750_vm5 = vcmask 64512  }
   0xf   : > { %s16233_s30 = smov (!%p502_p3, %s6926_s30), 1  ;;  %s9590_s22 = smov 16   ;;  %vm1783_vm6 = vcmask 97280   ;;  %vm1816_vm7 = vcmask 130048   ;;  %vm1849_vm8 = vcmask 162816   ;;  %vm1882_vm9 = vcmask 195584  }
  0x10   : > { %15733 = vst [vmem:[#allocation2_spill] sm:$0xff] %v9684_v1  ;;  %v9688_v2 = vsel %vm609_vm0, 0.0, %v9684_v1  ;;  %v726_v3 = vsel %vm609_vm0, %v9684_v1, 0.0  ;;  %v777_v4 = vrot.slane %v9684_v1, 1  ;;  %v954_v5 = vrot.slane %v9684_v1, 2  ;;  %s9695_s15 = sshll.u32 %s16233_s30, 8 }
  0x11   : > { %15734 = vst [vmem:[#allocation3_spill] sm:$0xff] %v9688_v2  ;;  %v776_v6 = vrot.slane %v9688_v2, 1  ;;  %v779_v7 = vrot.slane %v726_v3, 1  ;;  %v956_v8 = vrot.slane %v726_v3, 2  ;;  %v953_v9 = vrot.slane %v9688_v2, 2  ;;  %s9702_s18 = scalar_lea.vmem %s15475_s0, %s9695_s15  ;;  %s9591_s23 = smov 20  }
  0x12   : > { %v540_v12 = vld [vmem:[%s9702_s18 + $0x10] sm:$0xff]  ;;  %v541_v13 = vld [vmem:[%s9702_s18 + $0x18] sm:$0xff]  ;;  %v538_v14 = vld [vmem:[%s9702_s18] sm:$0xff]  ;;  %s9592_s24 = smov 24   ;;  %s9593_s25 = smov 28   ;;  %vm1915_vm10 = vcmask 228352  }
  0x13   : > { %v778_v10 = vsel %vm775_vm1, %v776_v6, %v777_v4  ;;  %v780_v11 = vsel %vm775_vm1, %v777_v4, %v779_v7  ;;  %v9710_v15 = vsel %vm952_vm2, %v953_v9, %v954_v5  ;;  %v615_v17 = vrot.slane %v540_v12, 7  ;;  %v539_v19 = vld [vmem:[%s9702_s18 + $0x8] sm:$0xff]  ;;  %v542_v21 = vld [vmem:[%s9702_s18 + $0x20] sm:$0xff]  ;;  %v544_v43 = vld [vmem:[%s9702_s18 + $0x30] sm:$0xff]  ;;  %s9597_s28 = smov 56   ;;  %s9598_s30 = smov 64  }
  0x14   : > { %v9712_v16 = vpack.i.bf16 %v780_v11, %v778_v10  ;;  %v616_v18 = vrot.slane %v541_v13, 7  ;;  %v612_v20 = vrot.slane %v538_v14, 7  ;;  %v543_v22 = vld [vmem:[%s9702_s18 + $0x28] sm:$0xff]  ;;  %v613_v23 = vrot.slane %v539_v19, 7  ;;  %v545_v44 = vld [vmem:[%s9702_s18 + $0x38] sm:$0xff]  ;;  %v546_v45 = vld [vmem:[%s9702_s18 + $0x40] sm:$0xff]  ;;  %s13541_s27 = scalar_lea.vmem %s15489_s14, %s9695_s15  ;;  %s15150_s26 = scalar_lea.vmem %s15487_s12, %s9695_s15 }
  0x15   : > { %v618_v24 = vrot.slane %v542_v21, 7  ;;  %v619_v25 = vrot.slane %v543_v22, 7  ;;  %v9718_v26 = vsel %vm952_vm2, %v954_v5, %v956_v8  ;;  %v9726_v28 = vsel %vm609_vm0, 0.0, %v615_v17  ;;  %v547_v50 = vld [vmem:[%s9702_s18 + $0x48] sm:$0xff]  ;;  %v548_v51 = vld [vmem:[%s9702_s18 + $0x50] sm:$0xff]  ;;  %v549_v63 = vld [vmem:[%s9702_s18 + $0x58] sm:$0xff]  ;;  %s15180_s17 = scalar_lea.vmem %s15484_s9, %s9695_s15 }
  0x16   : > { %15735 = vst [vmem:[#allocation4_spill] sm:$0xff] %v9712_v16  ;;  %7346 = vrot.lane.b32.xlu0 %v9712_v16, %s9587_s19  ;;  %v9723_v27 = vsel %vm609_vm0, %v615_v17, %v616_v18  ;;  %v9729_v29 = vsel %vm609_vm0, %v616_v18, 0.0  ;;  %v9732_v30 = vsel %vm609_vm0, 0.0, %v612_v20  ;;  %v786_v31 = vrot.slane %v9726_v28, 1  ;;  %v550_v11 = vld [vmem:[%s9702_s18 + $0x60] sm:$0xff]  ;;  %v551_v12 = vld [vmem:[%s9702_s18 + $0x68] sm:$0xff] }
  0x17   : > { %v787_v32 = vrot.slane %v9723_v27, 1  ;;  %v789_v33 = vrot.slane %v9729_v29, 1  ;;  %v9739_v35 = vsel %vm609_vm0, %v612_v20, %v613_v23  ;;  %v9742_v36 = vsel %vm609_vm0, %v613_v23, 0.0  ;;  %v552_v19 = vld [vmem:[%s9702_s18 + $0x70] sm:$0xff]  ;;  %s9600_s16 = smov 104  }
  0x18   : > { %v781_v37 = vrot.slane %v9732_v30, 1  ;;  %v9746_v38 = vsel %vm609_vm0, %v618_v24, %v619_v25  ;;  %v782_v41 = vrot.slane %v9739_v35, 1  ;;  %v784_v42 = vrot.slane %v9742_v36, 1 }
  0x19   : > { %v788_v39 = vsel %vm775_vm1, %v786_v31, %v787_v32  ;;  %v790_v40 = vsel %vm775_vm1, %v787_v32, %v789_v33  ;;  %v9758_v47 = vsel %vm609_vm0, 0.0, %v618_v24  ;;  %v9761_v48 = vsel %vm609_vm0, %v619_v25, 0.0  ;;  %v553_v33 = vld [vmem:[%s9702_s18 + $0x78] sm:$0xff] }
  0x1a   : > { %v9755_v46 = vpack.i.bf16 %v790_v40, %v788_v39  ;;  %v792_v49 = vrot.slane %v9746_v38, 1  ;;  %v783_v52 = vsel %vm775_vm1, %v781_v37, %v782_v41  ;;  %v785_v53 = vsel %vm775_vm1, %v782_v41, %v784_v42  ;;  %v554_v37 = vld [vmem:[%s9702_s18 + $0x80] sm:$0xff] }
  0x1b   : > { %v791_v54 = vrot.slane %v9758_v47, 1  ;;  %v794_v55 = vrot.slane %v9761_v48, 1  ;;  %v9772_v56 = vpack.i.bf16 %v785_v53, %v783_v52  ;;  %v621_v57 = vrot.slane %v544_v43, 7  ;;  %v555_v53 = vld [vmem:[%s9702_s18 + $0x88] sm:$0xff] }
  0x1c   : > { %15736 = vst [vmem:[#allocation5_spill] sm:$0xff] %v9755_v46  ;;  %7356 = vrot.lane.b32.xlu1 %v9755_v46, %s9587_s19  ;;  %v622_v58 = vrot.slane %v545_v44, 7  ;;  %v624_v59 = vrot.slane %v546_v45, 7  ;;  %v625_v62 = vrot.slane %v547_v50, 7  ;;  %v627_v0 = vrot.slane %v548_v51, 7 }
  0x1d   : > { %v793_v60 = vsel %vm775_vm1, %v791_v54, %v792_v49  ;;  %v795_v61 = vsel %vm775_vm1, %v792_v49, %v794_v55  ;;  %7351 = vrot.lane.b32.xlu0 %v9772_v56, %s9587_s19  ;;  %v9785_v5 = vsel %vm609_vm0, 0.0, %v621_v57  ;;  %v628_v18 = vrot.slane %v549_v63, 7 }
  0x1e   : > { %v9779_v3 = vpack.i.bf16 %v795_v61, %v793_v60  ;;  %v9782_v4 = vsel %vm609_vm0, %v621_v57, %v622_v58  ;;  %15739 = vst [vmem:[#allocation8_spill] sm:$0xff] %v9785_v5  ;;  %v9788_v6 = vsel %vm609_vm0, %v622_v58, 0.0  ;;  %v796_v7 = vrot.slane %v9785_v5, 1 }
  0x1f   : > { %15738 = vst [vmem:[#allocation7_spill] sm:$0xff] %v9782_v4  ;;  %v797_v8 = vrot.slane %v9782_v4, 1  ;;  %v799_v9 = vrot.slane %v9788_v6, 1  ;;  %v9794_v10 = vsel %vm609_vm0, %v624_v59, %v625_v62  ;;  %v9801_v13 = vsel %vm609_vm0, 0.0, %v624_v59 }
  0x20   : > { %15737 = vst [vmem:[#allocation6_spill] sm:$0xff] %v9779_v3  ;;  %15740 = vst [vmem:[#allocation9_spill] sm:$0xff] %v9794_v10  ;;  %7361 = vrot.lane.b32.xlu1 %v9779_v3, %s9587_s19  ;;  %v9804_v14 = vsel %vm609_vm0, %v625_v62, 0.0  ;;  %v802_v17 = vrot.slane %v9794_v10, 1  ;;  %v801_v22 = vrot.slane %v9801_v13, 1  ;;  %v9815_v25 = vsel %vm609_vm0, %v627_v0, %v628_v18 }
  0x21   : > { %15741 = vst [vmem:[#allocation10_spill] sm:$0xff] %v9801_v13  ;;  %v798_v20 = vsel %vm775_vm1, %v796_v7, %v797_v8  ;;  %v800_v21 = vsel %vm775_vm1, %v797_v8, %v799_v9  ;;  %v804_v23 = vrot.slane %v9804_v14, 1  ;;  %15743 = vst [vmem:[#allocation12_spill] sm:$0xff] %v9815_v25  ;;  %v9818_v31 = vsel %vm609_vm0, 0.0, %v627_v0  ;;  %v556_v0 = vld [vmem:[%s9702_s18 + $0x90] sm:$0xff]  ;;  %v557_v7 = vld [vmem:[%s9702_s18 + $0x98] sm:$0xff] }
  0x22   : > { %v9812_v24 = vpack.i.bf16 %v800_v21, %v798_v20  ;;  %15744 = vst [vmem:[#allocation13_spill] sm:$0xff] %v9818_v31  ;;  %v9821_v32 = vsel %vm609_vm0, %v628_v18, 0.0  ;;  %v803_v39 = vsel %vm775_vm1, %v801_v22, %v802_v17  ;;  %v806_v41 = vrot.slane %v9818_v31, 1  ;;  %v559_v18 = vld [vmem:[%s9702_s18 + $0xa8] sm:$0xff] }
  0x23   : > { %v805_v40 = vsel %vm775_vm1, %v802_v17, %v804_v23  ;;  %v807_v42 = vrot.slane %v9815_v25, 1  ;;  %v809_v44 = vrot.slane %v9821_v32, 1  ;;  %v630_v45 = vrot.slane %v550_v11, 7  ;;  %v558_v17 = vld [vmem:[%s9702_s18 + $0xa0] sm:$0xff] }
  0x24   : > { %15742 = vst [vmem:[#allocation11_spill] sm:$0xff] %v9812_v24  ;;  %7366 = vrot.lane.b32.xlu0 %v9812_v24, %s9587_s19  ;;  %v9831_v43 = vpack.i.bf16 %v805_v40, %v803_v39  ;;  %v631_v49 = vrot.slane %v551_v12, 7  ;;  %v633_v51 = vrot.slane %v552_v19, 7  ;;  %v634_v52 = vrot.slane %v553_v33, 7 }
  0x25   : > { %v808_v50 = vsel %vm775_vm1, %v806_v41, %v807_v42  ;;  %v636_v54 = vrot.slane %v554_v37, 7  ;;  %v810_v55 = vsel %vm775_vm1, %v807_v42, %v809_v44  ;;  %v9843_v58 = vsel %vm609_vm0, 0.0, %v630_v45 }
  0x26   : > { %15745 = vst [vmem:[#allocation14_spill] sm:$0xff] %v9831_v43  ;;  %7371 = vrot.lane.b32.xlu1 %v9831_v43, %s9587_s19  ;;  %v9840_v57 = vsel %vm609_vm0, %v630_v45, %v631_v49  ;;  %15747 = vst [vmem:[#allocation16_spill] sm:$0xff] %v9843_v58  ;;  %v9846_v59 = vsel %vm609_vm0, %v631_v49, 0.0  ;;  %v9848_v60 = vpack.i.bf16 %v810_v55, %v808_v50  ;;  %v811_v61 = vrot.slane %v9843_v58, 1 }
  0x27   : > { %15746 = vst [vmem:[#allocation15_spill] sm:$0xff] %v9840_v57  ;;  %v812_v62 = vrot.slane %v9840_v57, 1  ;;  %v814_v63 = vrot.slane %v9846_v59, 1  ;;  %v9856_v8 = vsel %vm609_vm0, %v633_v51, %v634_v52  ;;  %v9859_v9 = vsel %vm609_vm0, 0.0, %v633_v51 }
  0x28   : > { %15748 = vst [vmem:[#allocation17_spill] sm:$0xff] %v9848_v60  ;;  %15749 = vst [vmem:[#allocation18_spill] sm:$0xff] %v9856_v8  ;;  %v9862_v11 = vsel %vm609_vm0, %v634_v52, 0.0  ;;  %v637_v12 = vrot.slane %v555_v53, 7  ;;  %7376 = vrot.lane.b32.xlu0 %v9848_v60, %s9587_s19  ;;  %v816_v21 = vrot.slane %v9859_v9, 1  ;;  %v817_v22 = vrot.slane %v9856_v8, 1 }
  0x29   : > { %15750 = vst [vmem:[#allocation19_spill] sm:$0xff] %v9859_v9  ;;  %v813_v19 = vsel %vm775_vm1, %v811_v61, %v812_v62  ;;  %v815_v20 = vsel %vm775_vm1, %v812_v62, %v814_v63  ;;  %v819_v33 = vrot.slane %v9862_v11, 1  ;;  %v9879_v39 = vsel %vm609_vm0, 0.0, %v636_v54  ;;  %v560_v52 = vld [vmem:[%s9702_s18 + $0xb0] sm:$0xff] }
  0x2a   : > { %v9872_v23 = vpack.i.bf16 %v815_v20, %v813_v19  ;;  %v9876_v37 = vsel %vm609_vm0, %v636_v54, %v637_v12  ;;  %15753 = vst [vmem:[#allocation22_spill] sm:$0xff] %v9879_v39  ;;  %v818_v40 = vsel %vm775_vm1, %v816_v21, %v817_v22  ;;  %v9883_v41 = vsel %vm609_vm0, %v637_v12, 0.0  ;;  %v561_v20 = vld [vmem:[%s9702_s18 + $0xb8] sm:$0xff] }
  0x2b   : > { %15752 = vst [vmem:[#allocation21_spill] sm:$0xff] %v9876_v37  ;;  %v821_v42 = vrot.slane %v9879_v39, 1  ;;  %v822_v44 = vrot.slane %v9876_v37, 1  ;;  %v820_v45 = vsel %vm775_vm1, %v817_v22, %v819_v33  ;;  %v824_v49 = vrot.slane %v9883_v41, 1 }
  0x2c   : > { %15751 = vst [vmem:[#allocation20_spill] sm:$0xff] %v9872_v23  ;;  %7381 = vrot.lane.b32.xlu1 %v9872_v23, %s9587_s19  ;;  %v639_v50 = vrot.slane %v556_v0, 7  ;;  %v640_v51 = vrot.slane %v557_v7, 7  ;;  %v9892_v53 = vpack.i.bf16 %v820_v45, %v818_v40  ;;  %v642_v55 = vrot.slane %v558_v17, 7 }
  0x2d   : > { %v823_v54 = vsel %vm775_vm1, %v821_v42, %v822_v44  ;;  %v643_v61 = vrot.slane %v559_v18, 7  ;;  %v825_v62 = vsel %vm775_vm1, %v822_v44, %v824_v49  ;;  %v645_v40 = vrot.slane %v560_v52, 7  ;;  %v562_v42 = vld [vmem:[%s9702_s18 + $0xc0] sm:$0xff]  ;;  %v563_v44 = vld [vmem:[%s9702_s18 + $0xc8] sm:$0xff] }
  0x2e   : > { %15754 = vst [vmem:[#allocation23_spill] sm:$0xff] %v9892_v53  ;;  %v9897_v63 = vsel %vm609_vm0, %v639_v50, %v640_v51  ;;  %v9900_v12 = vsel %vm609_vm0, 0.0, %v639_v50  ;;  %v9903_v0 = vsel %vm609_vm0, %v640_v51, 0.0  ;;  %7386 = vrot.lane.b32.xlu0 %v9892_v53, %s9587_s19  ;;  %v9907_v7 = vpack.i.bf16 %v825_v62, %v823_v54  ;;  %v564_v54 = vld [vmem:[%s9702_s18 + $0xd0] sm:$0xff] }
  0x2f   : > { %15755 = vst [vmem:[#allocation24_spill] sm:$0xff] %v9897_v63  ;;  %15756 = vst [vmem:[#allocation25_spill] sm:$0xff] %v9900_v12  ;;  %v826_v17 = vrot.slane %v9900_v12, 1  ;;  %v827_v18 = vrot.slane %v9897_v63, 1  ;;  %v829_v19 = vrot.slane %v9903_v0, 1  ;;  %v9914_v21 = vsel %vm609_vm0, %v642_v55, %v643_v61 }
  0x30   : > { %15757 = vst [vmem:[#allocation26_spill] sm:$0xff] %v9907_v7  ;;  %15758 = vst [vmem:[#allocation27_spill] sm:$0xff] %v9914_v21  ;;  %v9917_v22 = vsel %vm609_vm0, 0.0, %v642_v55  ;;  %v9920_v33 = vsel %vm609_vm0, %v643_v61, 0.0  ;;  %7391 = vrot.lane.b32.xlu1 %v9907_v7, %s9587_s19  ;;  %v832_v51 = vrot.slane %v9914_v21, 1  ;;  %v646_v52 = vrot.slane %v561_v20, 7 }
  0x31   : > { %15759 = vst [vmem:[#allocation28_spill] sm:$0xff] %v9917_v22  ;;  %v828_v45 = vsel %vm775_vm1, %v826_v17, %v827_v18  ;;  %v830_v49 = vsel %vm775_vm1, %v827_v18, %v829_v19  ;;  %v831_v50 = vrot.slane %v9917_v22, 1  ;;  %v834_v61 = vrot.slane %v9920_v33, 1  ;;  %v565_v18 = vld [vmem:[%s9702_s18 + $0xd8] sm:$0xff]  ;;  %v566_v7 = vld [vmem:[%s9702_s18 + $0xe0] sm:$0xff] }
  0x32   : > { %v9931_v55 = vpack.i.bf16 %v830_v49, %v828_v45  ;;  %v9935_v62 = vsel %vm609_vm0, 0.0, %v645_v40  ;;  %v648_v17 = vrot.slane %v562_v42, 7  ;;  %v649_v1 = vrot.slane %v563_v44, 7 }
  0x33   : > { %15761 = vst [vmem:[#allocation30_spill] sm:$0xff] %v9935_v62  ;;  %v833_v34 = vsel %vm775_vm1, %v831_v50, %v832_v51  ;;  %v836_v16 = vrot.slane %v9935_v62, 1  ;;  %v835_v19 = vsel %vm775_vm1, %v832_v51, %v834_v61  ;;  %v9944_v45 = vsel %vm609_vm0, %v645_v40, %v646_v52 }
  0x34   : > { %15760 = vst [vmem:[#allocation29_spill] sm:$0xff] %v9931_v55  ;;  %7396 = vrot.lane.b32.xlu0 %v9931_v55, %s9587_s19  ;;  %15762 = vst [vmem:[#allocation31_spill] sm:$0xff] %v9944_v45  ;;  %v9947_v20 = vsel %vm609_vm0, %v646_v52, 0.0  ;;  %v651_v49 = vrot.slane %v564_v54, 7  ;;  %v9949_v50 = vpack.i.bf16 %v835_v19, %v833_v34  ;;  %v837_v42 = vrot.slane %v9944_v45, 1 }
  0x35   : > { %v839_v44 = vrot.slane %v9947_v20, 1  ;;  %v9954_v2 = vsel %vm609_vm0, %v648_v17, %v649_v1  ;;  %v9957_v51 = vsel %vm609_vm0, 0.0, %v648_v17  ;;  %v9960_v40 = vsel %vm609_vm0, %v649_v1, 0.0  ;;  %v567_v17 = vld [vmem:[%s9702_s18 + $0xe8] sm:$0xff] }
  0x36   : > { %15763 = vst [vmem:[#allocation32_spill] sm:$0xff] %v9949_v50  ;;  %15764 = vst [vmem:[#allocation33_spill] sm:$0xff] %v9954_v2  ;;  %v842_v61 = vrot.slane %v9954_v2, 1  ;;  %v652_v52 = vrot.slane %v565_v18, 7  ;;  %7401 = vrot.lane.b32.xlu1 %v9949_v50, %s9587_s19  ;;  %v838_v34 = vsel %vm775_vm1, %v836_v16, %v837_v42  ;;  %v841_v19 = vrot.slane %v9957_v51, 1 }
  0x37   : > { %15765 = vst [vmem:[#allocation34_spill] sm:$0xff] %v9957_v51  ;;  %v840_v54 = vsel %vm775_vm1, %v837_v42, %v839_v44  ;;  %v844_v55 = vrot.slane %v9960_v40, 1  ;;  %v9977_v18 = vsel %vm609_vm0, 0.0, %v651_v49  ;;  %v655_v60 = vrot.slane %v567_v17, 7 }
  0x38   : > { %v9971_v53 = vpack.i.bf16 %v840_v54, %v838_v34  ;;  %v9974_v1 = vsel %vm609_vm0, %v651_v49, %v652_v52  ;;  %15768 = vst [vmem:[#allocation37_spill] sm:$0xff] %v9977_v18  ;;  %v9980_v50 = vsel %vm609_vm0, %v652_v52, 0.0  ;;  %v843_v16 = vsel %vm775_vm1, %v841_v19, %v842_v61 }
  0x39   : > { %15767 = vst [vmem:[#allocation36_spill] sm:$0xff] %v9974_v1  ;;  %v845_v42 = vsel %vm775_vm1, %v842_v61, %v844_v55  ;;  %v846_v44 = vrot.slane %v9977_v18, 1  ;;  %v847_v23 = vrot.slane %v9974_v1, 1  ;;  %v849_v54 = vrot.slane %v9980_v50, 1 }
  0x3a   : > { %15766 = vst [vmem:[#allocation35_spill] sm:$0xff] %v9971_v53  ;;  %7406 = vrot.lane.b32.xlu0 %v9971_v53, %s9587_s19  ;;  %v9988_v34 = vpack.i.bf16 %v845_v42, %v843_v16  ;;  %v654_v49 = vrot.slane %v566_v7, 7  ;;  %v958_v43 = vrot.slane %v9732_v30, 2  ;;  %v959_v19 = vrot.slane %v9739_v35, 2 }
  0x3b   : > { %v848_v52 = vsel %vm775_vm1, %v846_v44, %v847_v23  ;;  %v961_v55 = vrot.slane %v9742_v36, 2  ;;  %v850_v61 = vsel %vm775_vm1, %v847_v23, %v849_v54  ;;  %v10005_v7 = vsel %vm609_vm0, %v655_v60, 0.0 }
  0x3c   : > { %15769 = vst [vmem:[#allocation38_spill] sm:$0xff] %v9988_v34  ;;  %7411 = vrot.lane.b32.xlu1 %v9988_v34, %s9587_s19  ;;  %v9999_v16 = vsel %vm609_vm0, %v654_v49, %v655_v60  ;;  %v10002_v42 = vsel %vm609_vm0, 0.0, %v654_v49  ;;  %v10007_v17 = vpack.i.bf16 %v850_v61, %v848_v52  ;;  %v854_v53 = vrot.slane %v10005_v7, 1 }
  0x3d   : > { %15770 = vst [vmem:[#allocation39_spill] sm:$0xff] %v9999_v16  ;;  %15771 = vst [vmem:[#allocation40_spill] sm:$0xff] %v10002_v42  ;;  %v851_v44 = vrot.slane %v10002_v42, 1  ;;  %v852_v36 = vrot.slane %v9999_v16, 1  ;;  %v960_v34 = vsel %vm952_vm2, %v958_v43, %v959_v19  ;;  %v962_v23 = vsel %vm952_vm2, %v959_v19, %v961_v55 }
  0x3e   : > { %15772 = vst [vmem:[#allocation41_spill] sm:$0xff] %v10007_v17  ;;  %v963_v54 = vrot.slane %v9726_v28, 2  ;;  %v964_v49 = vrot.slane %v9723_v27, 2  ;;  %7416 = vrot.lane.b32.xlu0 %v10007_v17, %s9587_s19  ;;  %v10022_v61 = vpack.i.bf16 %v9718_v26, %v9710_v15  ;;  %v968_v24 = vrot.slane %v9758_v47, 2 }
  0x3f   : > { %v853_v60 = vsel %vm775_vm1, %v851_v44, %v852_v36  ;;  %v855_v52 = vsel %vm775_vm1, %v852_v36, %v854_v53  ;;  %v15774_v55 = vrot.slane %v9729_v29, 2  ;;  %v969_v17 = vrot.slane %v9746_v38, 2 }
  0x40   : > { %15773 = vst [vmem:[#allocation42_spill] sm:$0xff] %v10022_v61  ;;  %v10025_v43 = vpack.i.bf16 %v855_v52, %v853_v60  ;;  %v965_v19 = vsel %vm952_vm2, %v963_v54, %v964_v49  ;;  %v10032_v46 = vpack.i.bf16 %v962_v23, %v960_v34  ;;  %v971_v53 = vrot.slane %v9761_v48, 2 }
  0x41   : > { %v967_v3 = vsel %vm952_vm2, %v964_v49, %v15774_v55  ;;  %v973_v44 = vrot.slane %v9785_v5, 2  ;;  %v974_v15 = vrot.slane %v9782_v4, 2  ;;  %v976_v36 = vrot.slane %v9788_v6, 2 }
  0x42   : > { %7421 = vrot.lane.b32.xlu1 %v10025_v43, %s9587_s19  ;;  %v10039_v26 = vpack.i.bf16 %v967_v3, %v965_v19  ;;  %v978_v29 = vrot.slane %v9801_v13, 2  ;;  %v979_v54 = vrot.slane %v9794_v10, 2  ;;  %7426 = vrot.lane.b32.xlu0 %v10022_v61, %s9588_s20  ;;  %v970_v48 = vsel %vm952_vm2, %v968_v24, %v969_v17  ;;  %s9599_s19 = smov 112  }
  0x43   : > { %v972_v34 = vsel %vm952_vm2, %v969_v17, %v971_v53  ;;  %v981_v23 = vrot.slane %v9804_v14, 2  ;;  %v983_v49 = vrot.slane %v9818_v31, 2  ;;  %v975_v3 = vsel %vm952_vm2, %v973_v44, %v974_v15 }
  0x44   : > { %v977_v6 = vsel %vm952_vm2, %v974_v15, %v976_v36  ;;  %v984_v60 = vrot.slane %v9815_v25, 2  ;;  %v986_v52 = vrot.slane %v9821_v32, 2  ;;  %v988_v19 = vrot.slane %v9843_v58, 2 }
  0x45   : > { %v10057_v24 = vpack.i.bf16 %v972_v34, %v970_v48  ;;  %v980_v17 = vsel %vm952_vm2, %v978_v29, %v979_v54  ;;  %v989_v14 = vrot.slane %v9840_v57, 2  ;;  %v991_v55 = vrot.slane %v9846_v59, 2 }
  0x46   : > { %7431 = vrot.lane.b32.xlu1 %v10032_v46, %s9588_s20  ;;  %7436 = vrot.lane.b32.xlu0 %v10039_v26, %s9588_s20  ;;  %v10064_v53 = vpack.i.bf16 %v977_v6, %v975_v3  ;;  %v982_v32 = vsel %vm952_vm2, %v979_v54, %v981_v23  ;;  %v985_v44 = vsel %vm952_vm2, %v983_v49, %v984_v60  ;;  %v993_v36 = vrot.slane %v9859_v9, 2 }
  0x47   : > { %v987_v15 = vsel %vm952_vm2, %v984_v60, %v986_v52  ;;  %v994_v48 = vrot.slane %v9856_v8, 2  ;;  %v996_v29 = vrot.slane %v9862_v11, 2  ;;  %v998_v34 = vrot.slane %v9879_v39, 2 }
  0x48   : > { %15775 = vst [vmem:[#allocation43_spill] sm:$0xff] %v10064_v53  ;;  %v990_v59 = vsel %vm952_vm2, %v988_v19, %v989_v14  ;;  %v992_v61 = vsel %vm952_vm2, %v989_v14, %v991_v55  ;;  %v999_v3 = vrot.slane %v9876_v37, 2  ;;  %v10078_v54 = vpack.i.bf16 %v982_v32, %v980_v17 }
  0x49   : > { %v1001_v23 = vrot.slane %v9883_v41, 2  ;;  %v1003_v49 = vrot.slane %v9900_v12, 2  ;;  %v1004_v6 = vrot.slane %v9897_v63, 2  ;;  %v10085_v11 = vpack.i.bf16 %v987_v15, %v985_v44 }
  0x4a   : > { %7441 = vrot.lane.b32.xlu1 %v10057_v24, %s9588_s20  ;;  %7446 = vrot.lane.b32.xlu0 %v10064_v53, %s9588_s20  ;;  %v1006_v60 = vrot.slane %v9903_v0, 2  ;;  %v10088_v52 = vpack.i.bf16 %v992_v61, %v990_v59  ;;  %v995_v19 = vsel %vm952_vm2, %v993_v36, %v994_v48  ;;  %v997_v17 = vsel %vm952_vm2, %v994_v48, %v996_v29 }
  0x4b   : > { %v1000_v14 = vsel %vm952_vm2, %v998_v34, %v999_v3  ;;  %v1002_v41 = vsel %vm952_vm2, %v999_v3, %v1001_v23  ;;  %v1008_v55 = vrot.slane %v9917_v22, 2  ;;  %v1009_v32 = vrot.slane %v9914_v21, 2 }
  0x4c   : > { %v1011_v53 = vrot.slane %v9920_v33, 2  ;;  %v1005_v0 = vsel %vm952_vm2, %v1003_v49, %v1004_v6  ;;  %v1007_v61 = vsel %vm952_vm2, %v1004_v6, %v1006_v60  ;;  %v1013_v44 = vrot.slane %v9935_v62, 2 }
  0x4d   : > { %v1014_v15 = vrot.slane %v9944_v45, 2  ;;  %v10105_v36 = vpack.i.bf16 %v997_v17, %v995_v19  ;;  %v1016_v48 = vrot.slane %v9947_v20, 2  ;;  %v10108_v33 = vpack.i.bf16 %v1002_v41, %v1000_v14  ;;  %v568_v14 = vld [vmem:[%s9702_s18 + $0xf0] sm:$0xff]  ;;  %v569_v41 = vld [vmem:[%s9702_s18 + $0xf8] sm:$0xff]  ;;  %s9594_s18 = smov 32  }
  0x4e   : > { %7451 = vrot.lane.b32.xlu1 %v10078_v54, %s9588_s20  ;;  %7456 = vrot.lane.b32.xlu0 %v10085_v11, %s9588_s20  ;;  %v10110_v29 = vpack.i.bf16 %v1007_v61, %v1005_v0  ;;  %v1010_v34 = vsel %vm952_vm2, %v1008_v55, %v1009_v32  ;;  %v1012_v59 = vsel %vm952_vm2, %v1009_v32, %v1011_v53  ;;  %v1018_v23 = vrot.slane %v9957_v51, 2 }
  0x4f   : > { %v1015_v3 = vsel %vm952_vm2, %v1013_v44, %v1014_v15  ;;  %v1019_v49 = vrot.slane %v9954_v2, 2  ;;  %v1021_v20 = vrot.slane %v9960_v40, 2  ;;  %v1017_v6 = vsel %vm952_vm2, %v1014_v15, %v1016_v48 }
  0x50   : > { %v1023_v60 = vrot.slane %v9977_v18, 2  ;;  %v1024_v53 = vrot.slane %v9974_v1, 2  ;;  %v1026_v19 = vrot.slane %v9980_v50, 2  ;;  %v10126_v17 = vpack.i.bf16 %v1012_v59, %v1010_v34 }
  0x51   : > { %v10132_v55 = vpack.i.bf16 %v1017_v6, %v1015_v3  ;;  %v1020_v40 = vsel %vm952_vm2, %v1018_v23, %v1019_v49  ;;  %v1028_v32 = vrot.slane %v10002_v42, 2  ;;  %v1029_v0 = vrot.slane %v9999_v16, 2 }
  0x52   : > { %7461 = vrot.lane.b32.xlu1 %v10088_v52, %s9588_s20  ;;  %7466 = vrot.lane.b32.xlu0 %v10105_v36, %s9588_s20  ;;  %v1022_v50 = vsel %vm952_vm2, %v1019_v49, %v1021_v20  ;;  %v1025_v61 = vsel %vm952_vm2, %v1023_v60, %v1024_v53  ;;  %v1027_v44 = vsel %vm952_vm2, %v1024_v53, %v1026_v19  ;;  %v1031_v15 = vrot.slane %v10005_v7, 2 }
  0x53   : > { %v657_v48 = vrot.slane %v568_v14, 7  ;;  %v658_v34 = vrot.slane %v569_v41, 7  ;;  %v10145_v59 = vpack.i.bf16 %v1022_v50, %v1020_v40  ;;  %v10147_v3 = vpack.i.bf16 %v1027_v44, %v1025_v61 }
  0x54   : > { %v1030_v23 = vsel %vm952_vm2, %v1028_v32, %v1029_v0  ;;  %v1032_v49 = vsel %vm952_vm2, %v1029_v0, %v1031_v15  ;;  %v7505_v41 = vpack.i.bf16 %v9739_v35, %v9732_v30  ;;  %v10172_v50 = vpack.i.bf16 %v9723_v27, %v9726_v28 }
  0x55   : > { %v659_v20 = vsel %vm609_vm0, %v657_v48, %v658_v34  ;;  %v725_v7 = vsel %vm609_vm0, 0.0, %v657_v48  ;;  %v742_v6 = vsel %vm609_vm0, %v658_v34, 0.0  ;;  %v10158_v19 = vpack.i.bf16 %v1032_v49, %v1030_v23 }
  0x56   : > { %7471 = vrot.lane.b32.xlu1 %v10108_v33, %s9588_s20  ;;  %7476 = vrot.lane.b32.xlu0 %v10110_v29, %s9588_s20  ;;  %v1227_v60 = vrot.slane %v725_v7, 1  ;;  %v1228_v53 = vrot.slane %v659_v20, 1  ;;  %v1230_v14 = vrot.slane %v742_v6, 1  ;;  %v10177_v61 = vpack.i.bf16 %v9746_v38, %v9758_v47 }
  0x57   : > { %v1328_v44 = vrot.slane %v725_v7, 2  ;;  %v1329_v15 = vrot.slane %v659_v20, 2  ;;  %v1331_v48 = vrot.slane %v742_v6, 2  ;;  %v10185_v49 = vpack.i.bf16 %v9782_v4, %v9785_v5  ;;  %v15794_v5 = vld [vmem:[#allocation43_spill] sm:$0xff] }
  0x58   : > { %v1229_v40 = vsel %vm775_vm1, %v1227_v60, %v1228_v53  ;;  %v1231_v32 = vsel %vm775_vm1, %v1228_v53, %v1230_v14  ;;  %v10193_v53 = vpack.i.bf16 %v9794_v10, %v9801_v13  ;;  %v10195_v6 = vpack.i.bf16 %v659_v20, %v725_v7 }
  0x59   : > { %v10166_v0 = vpack.i.bf16 %v1231_v32, %v1229_v40  ;;  %v1330_v34 = vsel %vm952_vm2, %v1328_v44, %v1329_v15  ;;  %v1332_v23 = vsel %vm952_vm2, %v1329_v15, %v1331_v48  ;;  %v10201_v14 = vpack.i.bf16 %v9815_v25, %v9818_v31 }
  0x5a   : > { %7481 = vrot.lane.b32.xlu1 %v10126_v17, %s9588_s20  ;;  %7486 = vrot.lane.b32.xlu0 %v10132_v55, %s9588_s20  ;;  %v10187_v60 = vpack.i.bf16 %v1332_v23, %v1330_v34  ;;  %v10213_v20 = vpack.i.bf16 %v9856_v8, %v9859_v9  ;;  %v10219_v7 = vpack.i.bf16 %v9876_v37, %v9879_v39  ;;  %v15776_v23 = vld [vmem:[#allocation5_spill] sm:$0xff]  ;;  %v15785_v39 = vld [vmem:[#allocation32_spill] sm:$0xff]  ;;  %v15786_v9 = vld [vmem:[#allocation35_spill] sm:$0xff]  ;;  %vm1948_vm11 = vcmask 261120  }
  0x5b   : > { %v10225_v40 = vpack.i.bf16 %v9897_v63, %v9900_v12  ;;  %v10231_v32 = vpack.i.bf16 %v9914_v21, %v9917_v22  ;;  %v10237_v44 = vpack.i.bf16 %v9944_v45, %v9935_v62  ;;  %v10243_v15 = vpack.i.bf16 %v9954_v2, %v9957_v51  ;;  %v15780_v51 = vld [vmem:[#allocation17_spill] sm:$0xff]  ;;  %v15782_v45 = vld [vmem:[#allocation23_spill] sm:$0xff]  ;;  %v15783_v21 = vld [vmem:[#allocation26_spill] sm:$0xff] }
  0x5c   : > { %v10249_v48 = vpack.i.bf16 %v9974_v1, %v9977_v18  ;;  %v10255_v34 = vpack.i.bf16 %v9999_v16, %v10002_v42  ;;  %v15777_v18 = vld [vmem:[#allocation6_spill] sm:$0xff]  ;;  %v15778_v42 = vld [vmem:[#allocation11_spill] sm:$0xff]  ;;  %v15784_v12 = vld [vmem:[#allocation29_spill] sm:$0xff]  ;;  %vm2018_vm12 = vcmask 293888   ;;  %vm3719_vm13 = vcmask 1043456  }
  0x5d   : > { %v15779_v1 = vld [vmem:[#allocation14_spill] sm:$0xff]  ;;  %vm3489_vm14 = vcmask 326656   ;;  %vm3522_vm15 = vcmask 392192  }
  0x5e   : > { %7491 = vrot.lane.b32.xlu1 %v10145_v59, %s9588_s20  ;;  %7496 = vrot.lane.b32.xlu0 %v10147_v3, %s9588_s20  ;;  %v15787_v8 = vld [vmem:[#allocation38_spill] sm:$0xff] }
  0x62   : > { %7501 = vrot.lane.b32.xlu1 %v10158_v19, %s9588_s20  ;;  %7506 = vrot.lane.b32.xlu0 %v7505_v41, %s9589_s21  ;;  %v10207_v41 = vpack.i.bf16 %v9840_v57, %v9843_v58  ;;  %v15788_v57 = vld [vmem:[#allocation41_spill] sm:$0xff] }
  0x66   : > { %7511 = vrot.lane.b32.xlu1 %v10172_v50, %s9589_s21  ;;  %7516 = vrot.lane.b32.xlu0 %v10177_v61, %s9589_s21 }
  0x6a   : > { %7521 = vrot.lane.b32.xlu1 %v10185_v49, %s9589_s21  ;;  %7526 = vrot.lane.b32.xlu0 %v10193_v53, %s9589_s21 }
  0x6e   : > { %7531 = vrot.lane.b32.xlu1 %v10201_v14, %s9589_s21  ;;  %7536 = vrot.lane.b32.xlu0 %v10207_v41, %s9589_s21 }
  0x72   : > { %7541 = vrot.lane.b32.xlu1 %v10213_v20, %s9589_s21  ;;  %7546 = vrot.lane.b32.xlu0 %v10219_v7, %s9589_s21 }
  0x76   : > { %7551 = vrot.lane.b32.xlu1 %v10225_v40, %s9589_s21  ;;  %7556 = vrot.lane.b32.xlu0 %v10231_v32, %s9589_s21 }
  0x7a   : > { %7561 = vrot.lane.b32.xlu1 %v10237_v44, %s9589_s21  ;;  %7566 = vrot.lane.b32.xlu0 %v10243_v15, %s9589_s21 }
  0x7e   : > { %7571 = vrot.lane.b32.xlu1 %v10249_v48, %s9589_s21  ;;  %7576 = vrot.lane.b32.xlu0 %v10255_v34, %s9589_s21 }
  0x82   : > { %7581 = vrot.lane.b32.xlu1 %v10195_v6, %s9589_s21  ;;  %7586 = vrot.lane.b32.xlu0 %v9772_v56, %s9590_s22  ;;  %v15781_v56 = vld [vmem:[#allocation20_spill] sm:$0xff]  ;;  %s13820_s21 = scalar_lea.vmem %s15488_s13, %s9695_s15 }
  0x86   : > { %7591 = vrot.lane.b32.xlu1 %v15776_v23, %s9590_s22  ;;  %7596 = vrot.lane.b32.xlu0 %v15777_v18, %s9590_s22 }
  0x88   : > { %v10271_v16 = vpop.permute.xlu0 %7346 }
  0x8a   : > { %7601 = vrot.lane.b32.xlu1 %v15778_v42, %s9590_s22  ;;  %7606 = vrot.lane.b32.xlu0 %v15779_v1, %s9590_s22 }
  0x8e   : > { %7611 = vrot.lane.b32.xlu1 %v15780_v51, %s9590_s22  ;;  %v10277_v2 = vpop.permute.xlu1 %7356  ;;  %7616 = vrot.lane.b32.xlu0 %v15781_v56, %s9590_s22 }
  0x8f   : > { %v10281_v62 = vpop.permute.xlu0 %7351 }
  0x92   : > { %7621 = vrot.lane.b32.xlu1 %v15782_v45, %s9590_s22  ;;  %v10285_v22 = vpop.permute.xlu1 %7361  ;;  %7626 = vrot.lane.b32.xlu0 %v15783_v21, %s9590_s22 }
  0x96   : > { %7631 = vrot.lane.b32.xlu1 %v15784_v12, %s9590_s22  ;;  %v10291_v63 = vpop.permute.xlu0 %7366  ;;  %7636 = vrot.lane.b32.xlu0 %v15785_v39, %s9590_s22 }
  0x98   : > { %v10295_v37 = vpop.permute.xlu1 %7371 }
  0x9a   : > { %7641 = vrot.lane.b32.xlu1 %v15786_v9, %s9590_s22  ;;  %7646 = vrot.lane.b32.xlu0 %v15787_v8, %s9590_s22  ;;  %v10301_v58 = vpop.permute.xlu0 %7376 }
  0x9e   : > { %7651 = vrot.lane.b32.xlu1 %v15788_v57, %s9590_s22  ;;  %v10305_v31 = vpop.permute.xlu1 %7381  ;;  %7656 = vrot.lane.b32.xlu0 %v10025_v43, %s9590_s22 }
  0x9f   : > { %15789 = vst [vmem:[#allocation5_spill] sm:$0xff] %v10305_v31 }
  0xa0   : > { %v10309_v25 = vpop.permute.xlu0 %7386 }
  0xa1   : > { %15790 = vst [vmem:[#allocation6_spill] sm:$0xff] %v10309_v25 }
  0xa2   : > { %7661 = vrot.lane.b32.xlu1 %v10166_v0, %s9590_s22  ;;  %7666 = vrot.lane.b32.xlu0 %v10032_v46, %s9591_s23  ;;  %v10314_v13 = vpop.permute.xlu1 %7391 }
  0xa3   : > { %15791 = vst [vmem:[#allocation11_spill] sm:$0xff] %v10314_v13 }
  0xa6   : > { %7671 = vrot.lane.b32.xlu1 %v10039_v26, %s9591_s23  ;;  %v10317_v10 = vpop.permute.xlu0 %7396  ;;  %7676 = vrot.lane.b32.xlu0 %v10057_v24, %s9591_s23 }
  0xa7   : > { %15792 = vst [vmem:[#allocation14_spill] sm:$0xff] %v10317_v10 }
  0xa8   : > { %v10320_v31 = vpop.permute.xlu1 %7401 }
  0xa9   : > { %15793 = vst [vmem:[#allocation17_spill] sm:$0xff] %v10320_v31 }
  0xaa   : > { %7681 = vrot.lane.b32.xlu1 %v15794_v5, %s9591_s23  ;;  %7686 = vrot.lane.b32.xlu0 %v10078_v54, %s9591_s23 }
  0xac   : > { %v10324_v25 = vpop.permute.xlu0 %7406 }
  0xad   : > { %15795 = vst [vmem:[#allocation20_spill] sm:$0xff] %v10324_v25 }
  0xae   : > { %7691 = vrot.lane.b32.xlu1 %v10085_v11, %s9591_s23  ;;  %v10327_v4 = vpop.permute.xlu1 %7411  ;;  %7696 = vrot.lane.b32.xlu0 %v10088_v52, %s9591_s23 }
  0xaf   : > { %15796 = vst [vmem:[#allocation23_spill] sm:$0xff] %v10327_v4 }
  0xb0   : > { %v10330_v46 = vpop.permute.xlu0 %7416 }
  0xb1   : > { %15797 = vst [vmem:[#allocation26_spill] sm:$0xff] %v10330_v46 }
  0xb2   : > { %7701 = vrot.lane.b32.xlu1 %v10105_v36, %s9591_s23  ;;  %7706 = vrot.lane.b32.xlu0 %v10108_v33, %s9591_s23 }
  0xb4   : > { %v10334_v10 = vpop.permute.xlu1 %7421  ;;  %v10336_v31 = vpop.permute.xlu0 %7426 }
  0xb5   : > { %15798 = vst [vmem:[#allocation29_spill] sm:$0xff] %v10334_v10  ;;  %15799 = vst [vmem:[#allocation32_spill] sm:$0xff] %v10336_v31 }
  0xb6   : > { %7711 = vrot.lane.b32.xlu1 %v10110_v29, %s9591_s23  ;;  %7716 = vrot.lane.b32.xlu0 %v10126_v17, %s9591_s23 }
  0xb8   : > { %v10340_v25 = vpop.permute.xlu1 %7431  ;;  %v10342_v13 = vpop.permute.xlu0 %7436 }
  0xb9   : > { %15800 = vst [vmem:[#allocation35_spill] sm:$0xff] %v10340_v25  ;;  %15801 = vst [vmem:[#allocation38_spill] sm:$0xff] %v10342_v13 }
  0xba   : > { %7721 = vrot.lane.b32.xlu1 %v10132_v55, %s9591_s23  ;;  %7726 = vrot.lane.b32.xlu0 %v10145_v59, %s9591_s23 }
  0xbc   : > { %v10346_v46 = vpop.permute.xlu1 %7441  ;;  %v10348_v4 = vpop.permute.xlu0 %7446 }
  0xbd   : > { %15802 = vst [vmem:[#allocation41_spill] sm:$0xff] %v10348_v4 }
  0xbe   : > { %7731 = vrot.lane.b32.xlu1 %v10147_v3, %s9591_s23  ;;  %7736 = vrot.lane.b32.xlu0 %v10158_v19, %s9591_s23 }
  0xc0   : > { %v10352_v31 = vpop.permute.xlu1 %7451  ;;  %v10354_v10 = vpop.permute.xlu0 %7456 }
  0xc1   : > { %15803 = vst [vmem:[#allocation43_spill] sm:$0xff] %v10352_v31 }
  0xc2   : > { %7741 = vrot.lane.b32.xlu1 %v10187_v60, %s9591_s23  ;;  %7746 = vrot.lane.b32.xlu0 %v10172_v50, %s9592_s24  ;;  %s9595_s23 = smov 48  }
  0xc4   : > { %v10359_v13 = vpop.permute.xlu1 %7461  ;;  %v10361_v25 = vpop.permute.xlu0 %7466 }
  0xc5   : > { %15804 = vst [vmem:[#allocation44_spill] sm:$0xff] %v10359_v13 }
  0xc6   : > { %7751 = vrot.lane.b32.xlu1 %v10177_v61, %s9592_s24  ;;  %7756 = vrot.lane.b32.xlu0 %v10185_v49, %s9592_s24 }
  0xc8   : > { %v10367_v4 = vpop.permute.xlu1 %7471  ;;  %v10369_v31 = vpop.permute.xlu0 %7476 }
  0xca   : > { %7761 = vrot.lane.b32.xlu1 %v10193_v53, %s9592_s24  ;;  %7766 = vrot.lane.b32.xlu0 %v10201_v14, %s9592_s24 }
  0xcc   : > { %v10375_v50 = vpop.permute.xlu1 %7481  ;;  %v10377_v13 = vpop.permute.xlu0 %7486 }
  0xce   : > { %7771 = vrot.lane.b32.xlu1 %v10207_v41, %s9592_s24  ;;  %7776 = vrot.lane.b32.xlu0 %v10213_v20, %s9592_s24 }
  0xd0   : > { %v10383_v61 = vpop.permute.xlu1 %7491  ;;  %v10385_v49 = vpop.permute.xlu0 %7496 }
  0xd2   : > { %7781 = vrot.lane.b32.xlu1 %v10219_v7, %s9592_s24  ;;  %7786 = vrot.lane.b32.xlu0 %v10225_v40, %s9592_s24 }
  0xd4   : > { %v10391_v53 = vpop.permute.xlu1 %7501  ;;  %v10393_v14 = vpop.permute.xlu0 %7506 }
  0xd5   : > { %15805 = vst [vmem:[#allocation45_spill] sm:$0xff] %v10393_v14  ;;  %v15808_v14 = vld [vmem:[#allocation2_spill] sm:$0xff] }
  0xd6   : > { %7791 = vrot.lane.b32.xlu1 %v10231_v32, %s9592_s24  ;;  %7796 = vrot.lane.b32.xlu0 %v10237_v44, %s9592_s24  ;;  %v15807_v32 = vld [vmem:[#allocation3_spill] sm:$0xff] }
  0xd7   : > { %v10415_v44 = vpack.i.bf16 %v15808_v14, %v15807_v32 }
  0xd8   : > { %v10399_v41 = vpop.permute.xlu1 %7511  ;;  %v10401_v20 = vpop.permute.xlu0 %7516 }
  0xd9   : > { %15806 = vst [vmem:[#allocation46_spill] sm:$0xff] %v10401_v20  ;;  %15809 = vst [vmem:[#allocation47_spill] sm:$0xff] %v10415_v44 }
  0xda   : > { %7801 = vrot.lane.b32.xlu1 %v10243_v15, %s9592_s24  ;;  %7806 = vrot.lane.b32.xlu0 %v10249_v48, %s9592_s24 }
  0xdc   : > { %v10407_v7 = vpop.permute.xlu1 %7521  ;;  %v10409_v40 = vpop.permute.xlu0 %7526 }
  0xde   : > { %7811 = vrot.lane.b32.xlu1 %v10255_v34, %s9592_s24  ;;  %7816 = vrot.lane.b32.xlu0 %v10195_v6, %s9592_s24 }
  0xe0   : > { %v10419_v20 = vpop.permute.xlu1 %7531  ;;  %v10421_v15 = vpop.permute.xlu0 %7536 }
  0xe1   : > { %15810 = vst [vmem:[#allocation48_spill] sm:$0xff] %v10419_v20  ;;  %15811 = vst [vmem:[#allocation49_spill] sm:$0xff] %v10421_v15 }
  0xe2   : > { %7821 = vrot.lane.b32.xlu1 %v10415_v44, %s9592_s24  ;;  %7826 = vrot.lane.b32.xlu0 %v15776_v23, %s9593_s25 }
  0xe4   : > { %v10427_v48 = vpop.permute.xlu1 %7541  ;;  %v10429_v34 = vpop.permute.xlu0 %7546 }
  0xe5   : > { %15812 = vst [vmem:[#allocation50_spill] sm:$0xff] %v10427_v48  ;;  %15813 = vst [vmem:[#allocation51_spill] sm:$0xff] %v10429_v34  ;;  %v15896_v34 = vld [vmem:[#allocation40_spill] sm:$0xff]  ;;  %v15897_v48 = vld [vmem:[#allocation43_spill] sm:$0xff] }
  0xe6   : > { %7831 = vrot.lane.b32.xlu1 %v15777_v18, %s9593_s25  ;;  %7836 = vrot.lane.b32.xlu0 %v15778_v42, %s9593_s25 }
  0xe8   : > { %v10435_v6 = vpop.permute.xlu1 %7551  ;;  %v10437_v15 = vpop.permute.xlu0 %7556 }
  0xe9   : > { %15814 = vst [vmem:[#allocation52_spill] sm:$0xff] %v10435_v6  ;;  %15815 = vst [vmem:[#allocation53_spill] sm:$0xff] %v10437_v15  ;;  %v15893_v15 = vld [vmem:[#allocation41_spill] sm:$0xff] }
  0xea   : > { %7841 = vrot.lane.b32.xlu1 %v15779_v1, %s9593_s25  ;;  %7846 = vrot.lane.b32.xlu0 %v15780_v51, %s9593_s25  ;;  %v9240_v1 = vld [vmem:[%s15476_s1] sm:$0xff]  }
  0xeb   : > { %7154 = vmatprep.subr.bf16.mxu0 %v9240_v1 }
  0xec   : > { %v10443_v23 = vpop.permute.xlu1 %7561  ;;  %v10445_v44 = vpop.permute.xlu0 %7566  ;;  %7155 = vmatpush3.bf16.msra.mxu0 %v9240_v1  ;;  %v9242_v1 = vld [vmem:[%s15476_s1 + $0x10] ss:$0 sps:$4 sm:$0x33]  }
  0xed   : > { %15816 = vst [vmem:[#allocation54_spill] sm:$0xff] %v10443_v23  ;;  %15817 = vst [vmem:[#allocation55_spill] sm:$0xff] %v10445_v44  ;;  %v15891_v44 = vld [vmem:[#allocation38_spill] sm:$0xff] }
  0xee   : > { %7851 = vrot.lane.b32.xlu1 %v15781_v56, %s9593_s25  ;;  %7856 = vrot.lane.b32.xlu0 %v15782_v45, %s9593_s25  ;;  %v9241_v45 = vld [vmem:[%s15476_s1 + $0x8] sm:$0xff]   ;;  %v7439_v23 = vunpack.i.h.bf16 %v15891_v44 }
  0xef   : > { %7156 = vmatprep.subr.bf16.mxu0 %v9241_v45 }
  0xf0   : > { %v10451_v18 = vpop.permute.xlu1 %7571  ;;  %v10453_v42 = vpop.permute.xlu0 %7576  ;;  %7157 = vmatpush3.bf16.msra.mxu0 %v9241_v45 }
  0xf1   : > { %15818 = vst [vmem:[#allocation56_spill] sm:$0xff] %v10451_v18  ;;  %15819 = vst [vmem:[#allocation57_spill] sm:$0xff] %v10453_v42  ;;  %7318 = vmatprep.subr.msk.bf16.mxu0 %vm2067_vm3, %v9242_v1 }
  0xf2   : > { %7861 = vrot.lane.b32.xlu1 %v15783_v21, %s9593_s25  ;;  %7866 = vrot.lane.b32.xlu0 %v15784_v12, %s9593_s25 }
  0xf4   : > { %v10462_v51 = vpop.permute.xlu1 %7581  ;;  %v10464_v56 = vpop.permute.xlu0 %7586 }
  0xf5   : > { %15820 = vst [vmem:[#allocation58_spill] sm:$0xff] %v10462_v51  ;;  %15821 = vst [vmem:[#allocation59_spill] sm:$0xff] %v10464_v56 }
  0xf6   : > { %7871 = vrot.lane.b32.xlu1 %v15785_v39, %s9593_s25  ;;  %7876 = vrot.lane.b32.xlu0 %v15786_v9, %s9593_s25  ;;  %v2069_v39 = vsel %vm2067_vm3, %v9242_v1, 0  ;;  %vm3555_vm3 = vcmask 457728  }
  0xf7   : > { %7159 = vmatpush3.bf16.msra.mxu0 %v2069_v39 }
  0xf8   : > { %v10473_v21 = vpop.permute.xlu1 %7591  ;;  %v10475_v12 = vpop.permute.xlu0 %7596 }
  0xf9   : > { %15822 = vst [vmem:[#allocation60_spill] sm:$0xff] %v10473_v21  ;;  %15823 = vst [vmem:[#allocation61_spill] sm:$0xff] %v10475_v12  ;;  %v15828_v12 = vld [vmem:[#allocation4_spill] sm:$0xff]  ;;  %v15879_v21 = vld [vmem:[#allocation27_spill] sm:$0xff] }
  0xfa   : > { %7881 = vrot.lane.b32.xlu1 %v15787_v8, %s9593_s25  ;;  %7886 = vrot.lane.b32.xlu0 %v15788_v57, %s9593_s25 }
  0xfc   : > { %v10484_v9 = vpop.permute.xlu1 %7601  ;;  %v10486_v51 = vpop.permute.xlu0 %7606 }
  0xfd   : > { %15824 = vst [vmem:[#allocation62_spill] sm:$0xff] %v10484_v9  ;;  %15825 = vst [vmem:[#allocation63_spill] sm:$0xff] %v10486_v51  ;;  %v15874_v51 = vld [vmem:[#allocation21_spill] sm:$0xff]  ;;  %v15876_v9 = vld [vmem:[#allocation24_spill] sm:$0xff] }
  0xfe   : > { %7891 = vrot.lane.b32.xlu1 %v10025_v43, %s9593_s25  ;;  %7896 = vrot.lane.b32.xlu0 %v10166_v0, %s9593_s25 }
 0x100   : > { %v10492_v45 = vpop.permute.xlu1 %7611  ;;  %v10494_v8 = vpop.permute.xlu0 %7616 }
 0x101   : > { %15826 = vst [vmem:[#allocation64_spill] sm:$0xff] %v10492_v45  ;;  %15827 = vst [vmem:[#allocation65_spill] sm:$0xff] %v10494_v8 }
 0x102   : > { %7901 = vrot.lane.b32.xlu1 %v15828_v12, %s9593_s25  ;;  %7906 = vrot.lane.b32.xlu0 %v10039_v26, %s9594_s18  ;;  %v15845_v12 = vld [vmem:[#allocation42_spill] sm:$0xff]  ;;  %s9596_s25 = smov 40  }
 0x104   : > { %v10500_v57 = vpop.permute.xlu1 %7621  ;;  %v10502_v1 = vpop.permute.xlu0 %7626 }
 0x105   : > { %15829 = vst [vmem:[#allocation66_spill] sm:$0xff] %v10500_v57  ;;  %15830 = vst [vmem:[#allocation67_spill] sm:$0xff] %v10502_v1  ;;  %v15870_v1 = vld [vmem:[#allocation23_spill] sm:$0xff]  ;;  %v15871_v57 = vld [vmem:[#allocation18_spill] sm:$0xff] }
 0x106   : > { %7911 = vrot.lane.b32.xlu1 %v10057_v24, %s9594_s18  ;;  %7916 = vrot.lane.b32.xlu0 %v15794_v5, %s9594_s18 }
 0x108   : > { %v10508_v43 = vpop.permute.xlu1 %7631  ;;  %v10510_v0 = vpop.permute.xlu0 %7636 }
 0x109   : > { %15831 = vst [vmem:[#allocation68_spill] sm:$0xff] %v10508_v43  ;;  %15832 = vst [vmem:[#allocation69_spill] sm:$0xff] %v10510_v0 }
 0x10a   : > { %7921 = vrot.lane.b32.xlu1 %v10078_v54, %s9594_s18  ;;  %7926 = vrot.lane.b32.xlu0 %v10085_v11, %s9594_s18 }
 0x10c   : > { %v10516_v26 = vpop.permute.xlu1 %7641  ;;  %v10518_v39 = vpop.permute.xlu0 %7646 }
 0x10d   : > { %15833 = vst [vmem:[#allocation70_spill] sm:$0xff] %v10516_v26  ;;  %15834 = vst [vmem:[#allocation71_spill] sm:$0xff] %v10518_v39 }
 0x10e   : > { %7931 = vrot.lane.b32.xlu1 %v10088_v52, %s9594_s18  ;;  %7936 = vrot.lane.b32.xlu0 %v10105_v36, %s9594_s18 }
 0x110   : > { %v10524_v5 = vpop.permute.xlu1 %7651  ;;  %v10526_v24 = vpop.permute.xlu0 %7656 }
 0x111   : > { %15835 = vst [vmem:[#allocation72_spill] sm:$0xff] %v10524_v5  ;;  %15836 = vst [vmem:[#allocation73_spill] sm:$0xff] %v10526_v24  ;;  %v15863_v24 = vld [vmem:[#allocation14_spill] sm:$0xff] }
 0x112   : > { %7941 = vrot.lane.b32.xlu1 %v10108_v33, %s9594_s18  ;;  %7946 = vrot.lane.b32.xlu0 %v10110_v29, %s9594_s18  ;;  %v7399_v5 = vunpack.i.h.bf16 %v15863_v24 }
 0x114   : > { %v10532_v54 = vpop.permute.xlu1 %7661  ;;  %v10534_v11 = vpop.permute.xlu0 %7666 }
 0x115   : > { %15837 = vst [vmem:[#allocation74_spill] sm:$0xff] %v10532_v54  ;;  %15838 = vst [vmem:[#allocation75_spill] sm:$0xff] %v10534_v11  ;;  %v7348_v54 = vunpack.i.l.bf16 %v10271_v16 }
 0x116   : > { %7951 = vrot.lane.b32.xlu1 %v10126_v17, %s9594_s18  ;;  %7956 = vrot.lane.b32.xlu0 %v10132_v55, %s9594_s18 }
 0x118   : > { %v10540_v52 = vpop.permute.xlu1 %7671  ;;  %v10542_v36 = vpop.permute.xlu0 %7676 }
 0x119   : > { %15839 = vst [vmem:[#allocation76_spill] sm:$0xff] %v10540_v52  ;;  %15840 = vst [vmem:[#allocation77_spill] sm:$0xff] %v10542_v36  ;;  %v7374_v52 = vunpack.i.h.bf16 %v10295_v37 }
 0x11a   : > { %7961 = vrot.lane.b32.xlu1 %v10145_v59, %s9594_s18  ;;  %7966 = vrot.lane.b32.xlu0 %v10147_v3, %s9594_s18 }
 0x11c   : > { %v10548_v33 = vpop.permute.xlu1 %7681  ;;  %v10550_v29 = vpop.permute.xlu0 %7686 }
 0x11d   : > { %15841 = vst [vmem:[#allocation78_spill] sm:$0xff] %v10548_v33  ;;  %15842 = vst [vmem:[#allocation79_spill] sm:$0xff] %v10550_v29 }
 0x11e   : > { %7971 = vrot.lane.b32.xlu1 %v10158_v19, %s9594_s18  ;;  %7976 = vrot.lane.b32.xlu0 %v10187_v60, %s9594_s18  ;;  %v7349_v19 = vunpack.i.h.bf16 %v10271_v16  ;;  %v7359_v60 = vunpack.i.h.bf16 %v10277_v2  ;;  %v7368_v16 = vunpack.i.l.bf16 %v10291_v63 }
 0x120   : > { %v10556_v17 = vpop.permute.xlu1 %7691  ;;  %v10558_v55 = vpop.permute.xlu0 %7696  ;;  %v10597_v11 = vsel %vm1717_vm4, %v9723_v27, %v7359_v60 }
 0x121   : > { %15843 = vst [vmem:[#allocation80_spill] sm:$0xff] %v10556_v17  ;;  %15844 = vst [vmem:[#allocation81_spill] sm:$0xff] %v10558_v55  ;;  %v7358_v55 = vunpack.i.l.bf16 %v10277_v2  ;;  %v7354_v17 = vunpack.i.h.bf16 %v10281_v62  ;;  %v10587_v2 = vsel %vm1717_vm4, %v15808_v14, %v7349_v19  ;;  %v7378_v14 = vunpack.i.l.bf16 %v10301_v58 }
 0x122   : > { %7981 = vrot.lane.b32.xlu1 %v15845_v12, %s9594_s18 }
 0x123   : > { %v10605_v19 = vsel %vm1717_vm4, %v9739_v35, %v7354_v17 }
 0x124   : > { %v10562_v59 = vpop.permute.xlu1 %7701  ;;  %v10564_v3 = vpop.permute.xlu0 %7706 }
 0x125   : > { %15846 = vst [vmem:[#allocation82_spill] sm:$0xff] %v10562_v59  ;;  %15847 = vst [vmem:[#allocation83_spill] sm:$0xff] %v10564_v3  ;;  %v7353_v59 = vunpack.i.l.bf16 %v10281_v62  ;;  %v7364_v3 = vunpack.i.h.bf16 %v10285_v22  ;;  %v7373_v62 = vunpack.i.l.bf16 %v10295_v37 }
 0x127   : > { %v10612_v37 = vsel %vm1717_vm4, %v9732_v30, %v7353_v59  ;;  %v10616_v27 = vsel %vm1717_vm4, %v9746_v38, %v7364_v3  ;;  %v15856_v30 = vld [vmem:[#allocation9_spill] sm:$0xff] }
 0x128   : > { %v10566_v33 = vpop.permute.xlu1 %7711  ;;  %v10568_v29 = vpop.permute.xlu0 %7716  ;;  %v10634_v59 = vsel %vm1717_vm4, %v15856_v30, %v7374_v52  ;;  %v15857_v38 = vld [vmem:[#allocation5_spill] sm:$0xff]  ;;  %v15862_v30 = vld [vmem:[#allocation11_spill] sm:$0xff] }
 0x129   : > { %15848 = vst [vmem:[#allocation84_spill] sm:$0xff] %v10566_v33  ;;  %15849 = vst [vmem:[#allocation85_spill] sm:$0xff] %v10568_v29  ;;  %v7363_v33 = vunpack.i.l.bf16 %v10285_v22  ;;  %v7369_v29 = vunpack.i.h.bf16 %v10291_v63  ;;  %v7379_v22 = vunpack.i.h.bf16 %v10301_v58  ;;  %v10601_v63 = vsel %vm1717_vm4, %v9726_v28, %v7358_v55  ;;  %v15853_v55 = vld [vmem:[#allocation7_spill] sm:$0xff]  ;;  %v15855_v58 = vld [vmem:[#allocation8_spill] sm:$0xff] }
 0x12a   : > { %v10630_v60 = vsel %vm1717_vm4, %v15855_v58, %v7368_v16  ;;  %v7384_v3 = vunpack.i.h.bf16 %v15857_v38  ;;  %v15861_v58 = vld [vmem:[#allocation13_spill] sm:$0xff] }
 0x12b   : > { %v10620_v28 = vsel %vm1717_vm4, %v9758_v47, %v7363_v33  ;;  %v10624_v35 = vsel %vm1717_vm4, %v15853_v55, %v7369_v29  ;;  %v15858_v47 = vld [vmem:[#allocation10_spill] sm:$0xff]  ;;  %v15859_v29 = vld [vmem:[#allocation12_spill] sm:$0xff]  ;;  %v10650_v52 = vsel %vm1717_vm4, %v15861_v58, %v7378_v14  ;;  %v15868_v14 = vld [vmem:[#allocation15_spill] sm:$0xff] }
 0x12c   : > { %v10575_v12 = vpop.permute.xlu1 %7721  ;;  %v10581_v36 = vpop.permute.xlu0 %7726  ;;  %v10640_v33 = vsel %vm1717_vm4, %v15858_v47, %v7373_v62  ;;  %v10644_v55 = vsel %vm1717_vm4, %v15859_v29, %v7379_v22  ;;  %v7398_v22 = vunpack.i.l.bf16 %v15863_v24  ;;  %v15865_v47 = vld [vmem:[#allocation17_spill] sm:$0xff]  ;;  %v10665_v58 = vsel %vm1717_vm4, %v15868_v14, %v7384_v3  ;;  %v15873_v3 = vld [vmem:[#allocation26_spill] sm:$0xff] }
 0x12d   : > { %15850 = vst [vmem:[#allocation86_spill] sm:$0xff] %v10575_v12  ;;  %15851 = vst [vmem:[#allocation87_spill] sm:$0xff] %v10581_v36  ;;  %v10591_v12 = vsel %vm1717_vm4, %v15807_v32, %v7348_v54  ;;  %v7383_v32 = vunpack.i.l.bf16 %v15857_v38  ;;  %v7394_v36 = vunpack.i.h.bf16 %v15862_v30  ;;  %v7393_v38 = vunpack.i.l.bf16 %v15862_v30  ;;  %v15869_v30 = vld [vmem:[#allocation16_spill] sm:$0xff] }
 0x12e   : > { %v7404_v29 = vunpack.i.h.bf16 %v15865_v47  ;;  %v7403_v39 = vunpack.i.l.bf16 %v15865_v47  ;;  %v7414_v24 = vunpack.i.h.bf16 %v15870_v1  ;;  %v15872_v47 = vld [vmem:[#allocation19_spill] sm:$0xff]  ;;  %v7419_v14 = vunpack.i.h.bf16 %v15873_v3 }
 0x12f   : > { %v10669_v43 = vsel %vm1717_vm4, %v15869_v30, %v7383_v32  ;;  %v10685_v32 = vsel %vm1717_vm4, %v15874_v51, %v7394_v36  ;;  %v15875_v30 = vld [vmem:[#allocation22_spill] sm:$0xff]  ;;  %v15880_v36 = vld [vmem:[#allocation28_spill] sm:$0xff] }
 0x130   : > { %v10608_v54 = vpop.permute.xlu1 %7731  ;;  %v10626_v17 = vpop.permute.xlu0 %7736  ;;  %v10704_v51 = vsel %vm1717_vm4, %v15879_v21, %v7404_v29  ;;  %v15885_v21 = vld [vmem:[#allocation29_spill] sm:$0xff] }
 0x131   : > { %15852 = vst [vmem:[#allocation88_spill] sm:$0xff] %v10608_v54  ;;  %15854 = vst [vmem:[#allocation7_spill] sm:$0xff] %v10626_v17  ;;  %v15860_v17 = vld [vmem:[#allocation6_spill] sm:$0xff]  ;;  %v7424_v29 = vunpack.i.h.bf16 %v15885_v21  ;;  %v7423_v56 = vunpack.i.l.bf16 %v15885_v21 }
 0x132   : > { %v7389_v54 = vunpack.i.h.bf16 %v15860_v17  ;;  %v7388_v16 = vunpack.i.l.bf16 %v15860_v17  ;;  %v15866_v17 = vld [vmem:[#allocation20_spill] sm:$0xff] }
 0x133   : > { %v7409_v26 = vunpack.i.h.bf16 %v15866_v17 }
 0x134   : > { %v10655_v62 = vpop.permute.xlu1 %7741  ;;  %v10661_v0 = vpop.permute.xlu0 %7746  ;;  %v10675_v8 = vsel %vm1717_vm4, %v15871_v57, %v7389_v54  ;;  %v10679_v45 = vsel %vm1717_vm4, %v15872_v47, %v7388_v16  ;;  %v10693_v57 = vsel %vm1717_vm4, %v15876_v9, %v7399_v5  ;;  %v7418_v54 = vunpack.i.l.bf16 %v15873_v3  ;;  %v15878_v47 = vld [vmem:[#allocation25_spill] sm:$0xff]  ;;  %v15883_v3 = vld [vmem:[#allocation30_spill] sm:$0xff] }
 0x135   : > { %15864 = vst [vmem:[#allocation8_spill] sm:$0xff] %v10655_v62  ;;  %15867 = vst [vmem:[#allocation9_spill] sm:$0xff] %v10661_v0  ;;  %v7408_v62 = vunpack.i.l.bf16 %v15866_v17  ;;  %v7413_v0 = vunpack.i.l.bf16 %v15870_v1  ;;  %v10689_v17 = vsel %vm1717_vm4, %v15875_v30, %v7393_v38  ;;  %v10700_v1 = vsel %vm1717_vm4, %v15878_v47, %v7398_v22  ;;  %v15881_v30 = vld [vmem:[#allocation31_spill] sm:$0xff]  ;;  %v15884_v22 = vld [vmem:[#allocation33_spill] sm:$0xff] }
 0x136   : > { %v10708_v38 = vsel %vm1717_vm4, %v15880_v36, %v7403_v39  ;;  %v10712_v9 = vsel %vm1717_vm4, %v15881_v30, %v7409_v26  ;;  %v10722_v47 = vsel %vm1717_vm4, %v15884_v22, %v7414_v24  ;;  %v15886_v39 = vld [vmem:[#allocation34_spill] sm:$0xff]  ;;  %v15887_v26 = vld [vmem:[#allocation36_spill] sm:$0xff]  ;;  %v15890_v22 = vld [vmem:[#allocation35_spill] sm:$0xff] }
 0x137   : > { %v10728_v36 = vsel %vm1717_vm4, %v15886_v39, %v7413_v0  ;;  %v10732_v30 = vsel %vm1717_vm4, %v15887_v26, %v7419_v14  ;;  %v7434_v18 = vunpack.i.h.bf16 %v15890_v22  ;;  %v7433_v21 = vunpack.i.l.bf16 %v15890_v22 }
 0x138   : > { %v10696_v16 = vpop.permute.xlu1 %7751  ;;  %v10714_v5 = vpop.permute.xlu0 %7756  ;;  %v7438_v39 = vunpack.i.l.bf16 %v15891_v44  ;;  %v7444_v14 = vunpack.i.h.bf16 %v10346_v46  ;;  %v7443_v26 = vunpack.i.l.bf16 %v10346_v46  ;;  %v10757_v22 = vsel %vm1717_vm4, %v15896_v34, %v7423_v56 }
 0x139   : > { %15877 = vst [vmem:[#allocation5_spill] sm:$0xff] %v10696_v16  ;;  %15882 = vst [vmem:[#allocation10_spill] sm:$0xff] %v10714_v5  ;;  %v10718_v16 = vsel %vm1717_vm4, %v15883_v3, %v7408_v62  ;;  %v15888_v5 = vld [vmem:[#allocation32_spill] sm:$0xff]  ;;  %v15889_v3 = vld [vmem:[#allocation37_spill] sm:$0xff]  ;;  %v7454_v44 = vunpack.i.h.bf16 %v15897_v48  ;;  %v10773_v34 = vsel %vm1750_vm5, %v10612_v37, %v7433_v21  ;;  %v7459_v56 = vunpack.i.h.bf16 %v10354_v10 }
 0x13a   : > { %v7429_v42 = vunpack.i.h.bf16 %v15888_v5  ;;  %v7428_v62 = vunpack.i.l.bf16 %v15888_v5  ;;  %v10738_v24 = vsel %vm1717_vm4, %v15889_v3, %v7418_v54  ;;  %v7448_v5 = vunpack.i.l.bf16 %v15893_v15  ;;  %v15895_v54 = vld [vmem:[#allocation39_spill] sm:$0xff] }
 0x13b   : > { %v10753_v3 = vsel %vm1717_vm4, %v15895_v54, %v7424_v29  ;;  %v7458_v29 = vunpack.i.l.bf16 %v10354_v10  ;;  %v7474_v21 = vunpack.i.h.bf16 %v10367_v4 }
 0x13c   : > { %v10743_v0 = vpop.permute.xlu1 %7761  ;;  %v10749_v6 = vpop.permute.xlu0 %7766  ;;  %v10763_v20 = vsel %vm1750_vm5, %v10587_v2, %v7429_v42  ;;  %v10767_v46 = vsel %vm1750_vm5, %v10591_v12, %v7428_v62  ;;  %v10781_v42 = vsel %vm1750_vm5, %v10597_v11, %v7439_v23  ;;  %v10792_v2 = vsel %vm1750_vm5, %v10616_v27, %v7444_v14 }
 0x13d   : > { %15892 = vst [vmem:[#allocation12_spill] sm:$0xff] %v10743_v0  ;;  %15894 = vst [vmem:[#allocation6_spill] sm:$0xff] %v10749_v6  ;;  %v7449_v0 = vunpack.i.h.bf16 %v15893_v15  ;;  %v7453_v6 = vunpack.i.l.bf16 %v15897_v48  ;;  %v10777_v15 = vsel %vm1750_vm5, %v10605_v19, %v7434_v18  ;;  %v10788_v48 = vsel %vm1750_vm5, %v10601_v63, %v7438_v39  ;;  %v15898_v19 = vld [vmem:[#allocation44_spill] sm:$0xff] }
 0x13e   : > { %v10796_v18 = vsel %vm1750_vm5, %v10620_v28, %v7443_v26  ;;  %v10800_v23 = vsel %vm1750_vm5, %v10630_v60, %v7448_v5  ;;  %v10810_v63 = vsel %vm1750_vm5, %v10634_v59, %v7454_v44  ;;  %v7464_v37 = vunpack.i.h.bf16 %v15898_v19 }
 0x13f   : > { %v10806_v10 = vsel %vm1750_vm5, %v10624_v35, %v7449_v0  ;;  %v7463_v27 = vunpack.i.l.bf16 %v15898_v19  ;;  %v10816_v28 = vsel %vm1750_vm5, %v10640_v33, %v7453_v6  ;;  %v10820_v60 = vsel %vm1750_vm5, %v10650_v52, %v7458_v29 }
 0x140   : > { %v10784_v12 = vpop.permute.xlu1 %7771  ;;  %v10802_v11 = vpop.permute.xlu0 %7776  ;;  %v7469_v62 = vunpack.i.h.bf16 %v10361_v25  ;;  %v7468_v35 = vunpack.i.l.bf16 %v10361_v25  ;;  %v10826_v59 = vsel %vm1750_vm5, %v10644_v55, %v7459_v56  ;;  %v7473_v0 = vunpack.i.l.bf16 %v10367_v4 }
 0x141   : > { %v7478_v39 = vunpack.i.l.bf16 %v10369_v31  ;;  %v7479_v33 = vunpack.i.h.bf16 %v10369_v31  ;;  %v7484_v52 = vunpack.i.h.bf16 %v10375_v50  ;;  %v7483_v14 = vunpack.i.l.bf16 %v10375_v50 }
 0x142   : > { %v7488_v25 = vunpack.i.l.bf16 %v10377_v13  ;;  %v10841_v55 = vsel %vm1750_vm5, %v10665_v58, %v7464_v37  ;;  %v10845_v4 = vsel %vm1750_vm5, %v10669_v43, %v7463_v27  ;;  %v7489_v5 = vunpack.i.h.bf16 %v10377_v13  ;;  %v15899_v37 = vld [vmem:[#allocation45_spill] sm:$0xff] }
 0x143   : > { %v7494_v31 = vunpack.i.h.bf16 %v10383_v61  ;;  %v10851_v54 = vsel %vm1750_vm5, %v10679_v45, %v7468_v35  ;;  %v10855_v50 = vsel %vm1750_vm5, %v10675_v8, %v7469_v62  ;;  %v7493_v44 = vunpack.i.l.bf16 %v10383_v61  ;;  %v15900_v35 = vld [vmem:[#allocation46_spill] sm:$0xff] }
 0x144   : > { %v10831_v6 = vpop.permute.xlu1 %7781  ;;  %v10837_v26 = vpop.permute.xlu0 %7786  ;;  %v7498_v58 = vunpack.i.l.bf16 %v10385_v49  ;;  %v10861_v43 = vsel %vm1750_vm5, %v10685_v32, %v7474_v21  ;;  %v10865_v13 = vsel %vm1750_vm5, %v10689_v17, %v7473_v0  ;;  %v10869_v45 = vsel %vm1750_vm5, %v10700_v1, %v7478_v39 }
 0x145   : > { %v7499_v29 = vunpack.i.h.bf16 %v10385_v49  ;;  %v10876_v61 = vsel %vm1750_vm5, %v10693_v57, %v7479_v33  ;;  %v10880_v32 = vsel %vm1750_vm5, %v10704_v51, %v7484_v52  ;;  %v10884_v17 = vsel %vm1750_vm5, %v10708_v38, %v7483_v14 }
 0x146   : > { %v10888_v1 = vsel %vm1750_vm5, %v10718_v16, %v7488_v25  ;;  %v10894_v49 = vsel %vm1750_vm5, %v10712_v9, %v7489_v5  ;;  %v10898_v57 = vsel %vm1750_vm5, %v10722_v47, %v7494_v31  ;;  %v7504_v51 = vunpack.i.h.bf16 %v10391_v53  ;;  %v15905_v25 = vld [vmem:[#allocation48_spill] sm:$0xff] }
 0x147   : > { %v7503_v19 = vunpack.i.l.bf16 %v10391_v53  ;;  %v10904_v38 = vsel %vm1750_vm5, %v10728_v36, %v7493_v44  ;;  %v10908_v16 = vsel %vm1750_vm5, %v10738_v24, %v7498_v58  ;;  %v7509_v27 = vunpack.i.h.bf16 %v15899_v37 }
 0x148   : > { %v10872_v8 = vpop.permute.xlu1 %7791  ;;  %v10890_v56 = vpop.permute.xlu0 %7796  ;;  %v7508_v9 = vunpack.i.l.bf16 %v15899_v37  ;;  %v10914_v47 = vsel %vm1750_vm5, %v10732_v30, %v7499_v29  ;;  %v7514_v62 = vunpack.i.h.bf16 %v10399_v41  ;;  %v7513_v53 = vunpack.i.l.bf16 %v10399_v41 }
 0x149   : > { %v7518_v21 = vunpack.i.l.bf16 %v15900_v35  ;;  %v7519_v0 = vunpack.i.h.bf16 %v15900_v35  ;;  %v7524_v24 = vunpack.i.h.bf16 %v10407_v7  ;;  %v7523_v39 = vunpack.i.l.bf16 %v10407_v7  ;;  %v15911_v35 = vld [vmem:[#allocation52_spill] sm:$0xff] }
 0x14a   : > { %v7528_v33 = vunpack.i.l.bf16 %v10409_v40  ;;  %v10929_v30 = vsel %vm1750_vm5, %v10753_v3, %v7504_v51  ;;  %v10933_v41 = vsel %vm1750_vm5, %v10757_v22, %v7503_v19  ;;  %v7529_v14 = vunpack.i.h.bf16 %v10409_v40  ;;  %v15906_v3 = vld [vmem:[#allocation49_spill] sm:$0xff] }
 0x14b   : > { %15903 = vst [vmem:[#allocation14_spill] sm:$0xff] %v10929_v30  ;;  %15904 = vst [vmem:[#allocation17_spill] sm:$0xff] %v10933_v41  ;;  %v7533_v5 = vunpack.i.l.bf16 %v15905_v25  ;;  %v10939_v31 = vsel %vm1783_vm6, %v10767_v46, %v7508_v9  ;;  %v10943_v7 = vsel %vm1783_vm6, %v10763_v20, %v7509_v27  ;;  %v7534_v44 = vunpack.i.h.bf16 %v15905_v25  ;;  %v15924_v30 = vld [vmem:[#allocation64_spill] sm:$0xff] }
 0x14c   : > { %v10919_v36 = vpop.permute.xlu1 %7801  ;;  %v10925_v52 = vpop.permute.xlu0 %7806  ;;  %v7538_v58 = vunpack.i.l.bf16 %v15906_v3  ;;  %v10949_v22 = vsel %vm1783_vm6, %v10773_v34, %v7513_v53  ;;  %v10953_v40 = vsel %vm1783_vm6, %v10777_v15, %v7514_v62  ;;  %v10957_v46 = vsel %vm1783_vm6, %v10788_v48, %v7518_v21  ;;  %v15910_v62 = vld [vmem:[#allocation51_spill] sm:$0xff] }
 0x14d   : > { %15901 = vst [vmem:[#allocation13_spill] sm:$0xff] %v10919_v36  ;;  %15902 = vst [vmem:[#allocation11_spill] sm:$0xff] %v10925_v52  ;;  %v7539_v29 = vunpack.i.h.bf16 %v15906_v3  ;;  %v10964_v51 = vsel %vm1783_vm6, %v10781_v42, %v7519_v0  ;;  %v10968_v34 = vsel %vm1783_vm6, %v10796_v18, %v7523_v39  ;;  %v10972_v15 = vsel %vm1783_vm6, %v10792_v2, %v7524_v24  ;;  %v15909_v18 = vld [vmem:[#allocation50_spill] sm:$0xff]  ;;  %v15912_v24 = vld [vmem:[#allocation53_spill] sm:$0xff] }
 0x14e   : > { %v10976_v48 = vsel %vm1783_vm6, %v10800_v23, %v7528_v33  ;;  %v10982_v37 = vsel %vm1783_vm6, %v10806_v10, %v7529_v14  ;;  %v10986_v42 = vsel %vm1783_vm6, %v10816_v28, %v7533_v5  ;;  %v7544_v27 = vunpack.i.h.bf16 %v15909_v18  ;;  %v15914_v33 = vld [vmem:[#allocation54_spill] sm:$0xff]  ;;  %v15915_v5 = vld [vmem:[#allocation55_spill] sm:$0xff] }
 0x14f   : > { %v7543_v9 = vunpack.i.l.bf16 %v15909_v18  ;;  %v10992_v2 = vsel %vm1783_vm6, %v10810_v63, %v7534_v44  ;;  %v10996_v23 = vsel %vm1783_vm6, %v10820_v60, %v7538_v58  ;;  %v7549_v53 = vunpack.i.h.bf16 %v15910_v62  ;;  %v15916_v18 = vld [vmem:[#allocation56_spill] sm:$0xff] }
 0x150   : > { %v10960_v20 = vpop.permute.xlu1 %7811  ;;  %v10978_v19 = vpop.permute.xlu0 %7816  ;;  %v7548_v10 = vunpack.i.l.bf16 %v15910_v62  ;;  %v11002_v28 = vsel %vm1783_vm6, %v10826_v59, %v7539_v29  ;;  %v7554_v21 = vunpack.i.h.bf16 %v15911_v35  ;;  %v7553_v0 = vunpack.i.l.bf16 %v15911_v35 }
 0x151   : > { %15907 = vst [vmem:[#allocation20_spill] sm:$0xff] %v10960_v20  ;;  %15908 = vst [vmem:[#allocation15_spill] sm:$0xff] %v10978_v19  ;;  %v7558_v63 = vunpack.i.l.bf16 %v15912_v24  ;;  %v7559_v60 = vunpack.i.h.bf16 %v15912_v24  ;;  %v7564_v14 = vunpack.i.h.bf16 %v15914_v33  ;;  %v7563_v25 = vunpack.i.l.bf16 %v15914_v33 }
 0x152   : > { %v7568_v44 = vunpack.i.l.bf16 %v15915_v5  ;;  %v11017_v59 = vsel %vm1783_vm6, %v10845_v4, %v7543_v9  ;;  %v11021_v58 = vsel %vm1783_vm6, %v10841_v55, %v7544_v27  ;;  %v7569_v29 = vunpack.i.h.bf16 %v15915_v5  ;;  %v15917_v4 = vld [vmem:[#allocation57_spill] sm:$0xff] }
 0x153   : > { %v7573_v62 = vunpack.i.l.bf16 %v15916_v18  ;;  %v11027_v35 = vsel %vm1783_vm6, %v10851_v54, %v7548_v10  ;;  %v11031_v24 = vsel %vm1783_vm6, %v10855_v50, %v7549_v53  ;;  %v7574_v33 = vunpack.i.h.bf16 %v15916_v18  ;;  %v15920_v5 = vld [vmem:[#allocation61_spill] sm:$0xff]  ;;  %v15921_v18 = vld [vmem:[#allocation62_spill] sm:$0xff] }
 0x154   : > { %v11007_v39 = vpop.permute.xlu1 %7821  ;;  %v11013_v3 = vpop.permute.xlu0 %7826  ;;  %v7578_v9 = vunpack.i.l.bf16 %v15917_v4  ;;  %v11037_v55 = vsel %vm1783_vm6, %v10865_v13, %v7553_v0  ;;  %v11041_v27 = vsel %vm1783_vm6, %v10861_v43, %v7554_v21  ;;  %v11045_v54 = vsel %vm1783_vm6, %v10869_v45, %v7558_v63 }
 0x155   : > { %15913 = vst [vmem:[#allocation16_spill] sm:$0xff] %v11007_v39  ;;  %v7579_v10 = vunpack.i.h.bf16 %v15917_v4  ;;  %v11052_v53 = vsel %vm1783_vm6, %v10876_v61, %v7559_v60  ;;  %v11056_v13 = vsel %vm1783_vm6, %v10884_v17, %v7563_v25  ;;  %v11060_v43 = vsel %vm1783_vm6, %v10880_v32, %v7564_v14  ;;  %v15918_v17 = vld [vmem:[#allocation59_spill] sm:$0xff]  ;;  %v15919_v14 = vld [vmem:[#allocation60_spill] sm:$0xff] }
 0x156   : > { %v11064_v45 = vsel %vm1783_vm6, %v10888_v1, %v7568_v44  ;;  %v11070_v0 = vsel %vm1783_vm6, %v10894_v49, %v7569_v29  ;;  %v11074_v61 = vsel %vm1783_vm6, %v10904_v38, %v7573_v62  ;;  %v7589_v63 = vunpack.i.h.bf16 %v15918_v17 }
 0x157   : > { %v7588_v60 = vunpack.i.l.bf16 %v15918_v17  ;;  %v11080_v32 = vsel %vm1783_vm6, %v10898_v57, %v7574_v33  ;;  %v11084_v1 = vsel %vm1783_vm6, %v10908_v16, %v7578_v9  ;;  %v7594_v25 = vunpack.i.h.bf16 %v15919_v14  ;;  %v15923_v17 = vld [vmem:[#allocation63_spill] sm:$0xff]  ;;  %v15930_v33 = vld [vmem:[#allocation70_spill] sm:$0xff] }
 0x158   : > { %v11048_v50 = vpop.permute.xlu1 %7831  ;;  %v11066_v21 = vpop.permute.xlu0 %7836  ;;  %v7593_v49 = vunpack.i.l.bf16 %v15919_v14  ;;  %v11090_v38 = vsel %vm1783_vm6, %v10914_v47, %v7579_v10  ;;  %v7599_v44 = vunpack.i.h.bf16 %v15920_v5  ;;  %v7598_v29 = vunpack.i.l.bf16 %v15920_v5 }
 0x159   : > { %v7603_v62 = vunpack.i.l.bf16 %v15921_v18  ;;  %v7604_v9 = vunpack.i.h.bf16 %v15921_v18  ;;  %v7608_v14 = vunpack.i.l.bf16 %v15923_v17  ;;  %v11105_v47 = vsel %vm1816_vm7, %v10939_v31, %v7588_v60  ;;  %v15925_v31 = vld [vmem:[#allocation65_spill] sm:$0xff] }
 0x15a   : > { %v11109_v10 = vsel %vm1816_vm7, %v10943_v7, %v7589_v63  ;;  %v7609_v5 = vunpack.i.h.bf16 %v15923_v17  ;;  %v7613_v4 = vunpack.i.l.bf16 %v15924_v30  ;;  %v11115_v16 = vsel %vm1816_vm7, %v10949_v22, %v7593_v49 }
 0x15b   : > { %v11119_v18 = vsel %vm1816_vm7, %v10953_v40, %v7594_v25  ;;  %v7614_v41 = vunpack.i.h.bf16 %v15924_v30  ;;  %v7618_v60 = vunpack.i.l.bf16 %v15925_v31  ;;  %v11125_v7 = vsel %vm1816_vm7, %v10957_v46, %v7598_v29  ;;  %v15926_v25 = vld [vmem:[#allocation66_spill] sm:$0xff] }
 0x15c   : > { %v11095_v57 = vpop.permute.xlu1 %7841  ;;  %v11101_v39 = vpop.permute.xlu0 %7846  ;;  %v11129_v63 = vsel %vm1816_vm7, %v10964_v51, %v7599_v44  ;;  %v11133_v22 = vsel %vm1816_vm7, %v10968_v34, %v7603_v62  ;;  %v7619_v49 = vunpack.i.h.bf16 %v15925_v31  ;;  %v11140_v30 = vsel %vm1816_vm7, %v10972_v15, %v7604_v9  ;;  %v15927_v15 = vld [vmem:[#allocation67_spill] sm:$0xff]  ;;  %v15928_v31 = vld [vmem:[#allocation68_spill] sm:$0xff] }
 0x15d   : > { %v11144_v46 = vsel %vm1816_vm7, %v10976_v48, %v7608_v14  ;;  %v7624_v29 = vunpack.i.h.bf16 %v15926_v25  ;;  %v7623_v51 = vunpack.i.l.bf16 %v15926_v25  ;;  %v11152_v34 = vsel %vm1816_vm7, %v10982_v37, %v7609_v5 }
 0x15e   : > { %v11156_v62 = vsel %vm1816_vm7, %v10986_v42, %v7613_v4  ;;  %v7629_v9 = vunpack.i.h.bf16 %v15927_v15  ;;  %v7628_v17 = vunpack.i.l.bf16 %v15927_v15  ;;  %v11162_v48 = vsel %vm1816_vm7, %v10992_v2, %v7614_v41  ;;  %v15929_v4 = vld [vmem:[#allocation69_spill] sm:$0xff] }
 0x15f   : > { %v11166_v14 = vsel %vm1816_vm7, %v10996_v23, %v7618_v60  ;;  %v7634_v37 = vunpack.i.h.bf16 %v15928_v31  ;;  %v7633_v5 = vunpack.i.l.bf16 %v15928_v31  ;;  %v11172_v42 = vsel %vm1816_vm7, %v11002_v28, %v7619_v49  ;;  %v15931_v28 = vld [vmem:[#allocation71_spill] sm:$0xff] }
 0x160   : > { %v11136_v40 = vpop.permute.xlu1 %7851  ;;  %v11148_v44 = vpop.permute.xlu0 %7856  ;;  %v7639_v25 = vunpack.i.h.bf16 %v15929_v4  ;;  %v7638_v15 = vunpack.i.l.bf16 %v15929_v4  ;;  %v7643_v19 = vunpack.i.l.bf16 %v15930_v33  ;;  %v11181_v2 = vsel %vm1816_vm7, %v11017_v59, %v7623_v51  ;;  %v15932_v51 = vld [vmem:[#allocation72_spill] sm:$0xff] }
 0x161   : > { %v11185_v23 = vsel %vm1816_vm7, %v11021_v58, %v7624_v29  ;;  %v7644_v60 = vunpack.i.h.bf16 %v15930_v33  ;;  %v7648_v49 = vunpack.i.l.bf16 %v15931_v28  ;;  %v11193_v4 = vsel %vm1816_vm7, %v11027_v35, %v7628_v17  ;;  %v15933_v35 = vld [vmem:[#allocation73_spill] sm:$0xff] }
 0x162   : > { %v11197_v20 = vsel %vm1816_vm7, %v11031_v24, %v7629_v9  ;;  %v7649_v59 = vunpack.i.h.bf16 %v15931_v28  ;;  %v7653_v52 = vunpack.i.l.bf16 %v15932_v51  ;;  %v11203_v58 = vsel %vm1816_vm7, %v11037_v55, %v7633_v5 }
 0x163   : > { %v11207_v33 = vsel %vm1816_vm7, %v11041_v27, %v7634_v37  ;;  %v7654_v29 = vunpack.i.h.bf16 %v15932_v51  ;;  %v7658_v17 = vunpack.i.l.bf16 %v15933_v35  ;;  %v11213_v24 = vsel %vm1816_vm7, %v11045_v54, %v7638_v15  ;;  %v15936_v15 = vld [vmem:[#allocation75_spill] sm:$0xff] }
 0x164   : > { %v11177_v41 = vpop.permute.xlu1 %7861  ;;  %v11189_v31 = vpop.permute.xlu0 %7866  ;;  %v11217_v9 = vsel %vm1816_vm7, %v11052_v53, %v7639_v25  ;;  %v11221_v55 = vsel %vm1816_vm7, %v11056_v13, %v7643_v19  ;;  %v7659_v5 = vunpack.i.h.bf16 %v15933_v35  ;;  %v11228_v37 = vsel %vm1816_vm7, %v11060_v43, %v7644_v60  ;;  %v15939_v43 = vld [vmem:[#allocation76_spill] sm:$0xff]  ;;  %v15942_v35 = vld [vmem:[#allocation77_spill] sm:$0xff] }
 0x165   : > { %15934 = vst [vmem:[#allocation23_spill] sm:$0xff] %v11228_v37  ;;  %v11232_v54 = vsel %vm1816_vm7, %v11064_v45, %v7648_v49  ;;  %v7669_v53 = vunpack.i.h.bf16 %v15936_v15  ;;  %v7668_v25 = vunpack.i.l.bf16 %v15936_v15  ;;  %v11240_v19 = vsel %vm1816_vm7, %v11070_v0, %v7649_v59 }
 0x166   : > { %15935 = vst [vmem:[#allocation18_spill] sm:$0xff] %v11232_v54  ;;  %15937 = vst [vmem:[#allocation19_spill] sm:$0xff] %v11240_v19  ;;  %v11244_v13 = vsel %vm1816_vm7, %v11074_v61, %v7653_v52  ;;  %v7674_v60 = vunpack.i.h.bf16 %v15939_v43  ;;  %v7673_v51 = vunpack.i.l.bf16 %v15939_v43  ;;  %v11250_v45 = vsel %vm1816_vm7, %v11080_v32, %v7654_v29 }
 0x167   : > { %15938 = vst [vmem:[#allocation26_spill] sm:$0xff] %v11244_v13  ;;  %15940 = vst [vmem:[#allocation21_spill] sm:$0xff] %v11250_v45  ;;  %v11254_v49 = vsel %vm1816_vm7, %v11084_v1, %v7658_v17  ;;  %v7679_v15 = vunpack.i.h.bf16 %v15942_v35  ;;  %v7678_v0 = vunpack.i.l.bf16 %v15942_v35  ;;  %v11260_v52 = vsel %vm1816_vm7, %v11090_v38, %v7659_v5  ;;  %v15945_v13 = vld [vmem:[#allocation78_spill] sm:$0xff]  ;;  %v15947_v35 = vld [vmem:[#allocation79_spill] sm:$0xff] }
 0x168   : > { %v11224_v27 = vpop.permute.xlu1 %7871  ;;  %v11236_v28 = vpop.permute.xlu0 %7876  ;;  %15941 = vst [vmem:[#allocation22_spill] sm:$0xff] %v11254_v49  ;;  %15943 = vst [vmem:[#allocation24_spill] sm:$0xff] %v11260_v52  ;;  %v7683_v19 = vunpack.i.l.bf16 %v15945_v13  ;;  %v1850_v1 = vsel %vm1849_vm8, %v11105_v47, %v7668_v25  ;;  %v1851_v29 = vsel %vm1849_vm8, %v11109_v10, %v7669_v53  ;;  %v7684_v17 = vunpack.i.h.bf16 %v15945_v13  ;;  %v15949_v52 = vld [vmem:[#allocation80_spill] sm:$0xff]  ;;  %v15950_v13 = vld [vmem:[#allocation9_spill] sm:$0xff] }
 0x169   : > { %v7688_v38 = vunpack.i.l.bf16 %v15947_v35  ;;  %v1852_v59 = vsel %vm1849_vm8, %v11115_v16, %v7673_v51  ;;  %v1853_v43 = vsel %vm1849_vm8, %v11119_v18, %v7674_v60  ;;  %v7689_v61 = vunpack.i.h.bf16 %v15947_v35  ;;  %v15951_v60 = vld [vmem:[#allocation5_spill] sm:$0xff] }
 0x16a   : > { %v7693_v47 = vunpack.i.l.bf16 %v15949_v52  ;;  %v1854_v10 = vsel %vm1849_vm8, %v11125_v7, %v7678_v0  ;;  %v1855_v53 = vsel %vm1849_vm8, %v11129_v63, %v7679_v15  ;;  %v7694_v25 = vunpack.i.h.bf16 %v15949_v52  ;;  %v15953_v15 = vld [vmem:[#allocation10_spill] sm:$0xff] }
 0x16b   : > { %v7748_v49 = vunpack.i.l.bf16 %v15950_v13  ;;  %v11289_v16 = vsel %vm1849_vm8, %v11133_v22, %v7683_v19  ;;  %v7749_v18 = vunpack.i.h.bf16 %v15950_v13  ;;  %v7754_v51 = vunpack.i.h.bf16 %v15951_v60 }
 0x16c   : > { %v11265_v32 = vpop.permute.xlu1 %7881  ;;  %v11273_v5 = vpop.permute.xlu0 %7886  ;;  %v7753_v35 = vunpack.i.l.bf16 %v15951_v60  ;;  %v11298_v7 = vsel %vm1849_vm8, %v11140_v30, %v7684_v17  ;;  %v11302_v63 = vsel %vm1849_vm8, %v11144_v46, %v7688_v38  ;;  %v7759_v22 = vunpack.i.h.bf16 %v15953_v15  ;;  %v15955_v30 = vld [vmem:[#allocation81_spill] sm:$0xff] }
 0x16d   : > { %15946 = vst [vmem:[#allocation25_spill] sm:$0xff] %v11265_v32  ;;  %15948 = vst [vmem:[#allocation27_spill] sm:$0xff] %v11273_v5  ;;  %v7758_v19 = vunpack.i.l.bf16 %v15953_v15  ;;  %v11310_v52 = vsel %vm1849_vm8, %v11152_v34, %v7689_v61  ;;  %v11314_v13 = vsel %vm1849_vm8, %v11156_v62, %v7693_v47  ;;  %v7699_v17 = vunpack.i.h.bf16 %v15955_v30 }
 0x16e   : > { %v7698_v60 = vunpack.i.l.bf16 %v15955_v30  ;;  %v11320_v46 = vsel %vm1849_vm8, %v11162_v48, %v7694_v25  ;;  %v7829_v38 = vunpack.i.h.bf16 %v11013_v3  ;;  %v7828_v15 = vunpack.i.l.bf16 %v11013_v3  ;;  %v15957_v25 = vld [vmem:[#allocation12_spill] sm:$0xff] }
 0x16f   : > { %v1885_v34 = vsel %vm1882_vm9, %v1852_v59, %v7753_v35  ;;  %v1886_v61 = vsel %vm1882_vm9, %v1853_v43, %v7754_v51  ;;  %v7833_v62 = vunpack.i.l.bf16 %v11048_v50  ;;  %v1884_v30 = vsel %vm1882_vm9, %v1851_v29, %v7749_v18  ;;  %v15958_v35 = vld [vmem:[#allocation6_spill] sm:$0xff] }
 0x170   : > { %v11294_v45 = vpop.permute.xlu1 %7891  ;;  %v11306_v0 = vpop.permute.xlu0 %7896  ;;  %v1888_v48 = vsel %vm1882_vm9, %v1855_v53, %v7759_v22  ;;  %v7764_v54 = vunpack.i.h.bf16 %v15957_v25  ;;  %v7834_v3 = vunpack.i.h.bf16 %v11048_v50  ;;  %v7838_v59 = vunpack.i.l.bf16 %v11066_v21 }
 0x171   : > { %15952 = vst [vmem:[#allocation28_spill] sm:$0xff] %v11294_v45  ;;  %15954 = vst [vmem:[#allocation31_spill] sm:$0xff] %v11306_v0  ;;  %v1883_v0 = vsel %vm1882_vm9, %v1850_v1, %v7748_v49  ;;  %v1887_v45 = vsel %vm1882_vm9, %v1854_v10, %v7758_v19  ;;  %v7839_v49 = vunpack.i.h.bf16 %v11066_v21  ;;  %v7763_v51 = vunpack.i.l.bf16 %v15957_v25 }
 0x172   : > { %v1916_v29 = vsel %vm1915_vm10, %v1883_v0, %v7828_v15  ;;  %v1917_v10 = vsel %vm1915_vm10, %v1884_v30, %v7829_v38  ;;  %v7768_v53 = vunpack.i.l.bf16 %v15958_v35  ;;  %v1918_v18 = vsel %vm1915_vm10, %v1885_v34, %v7833_v62 }
 0x173   : > { %v1919_v21 = vsel %vm1915_vm10, %v1886_v61, %v7834_v3  ;;  %v1920_v37 = vsel %vm1915_vm10, %v1887_v45, %v7838_v59  ;;  %v1921_v0 = vsel %vm1915_vm10, %v1888_v48, %v7839_v49  ;;  %v7844_v30 = vunpack.i.h.bf16 %v11095_v57 }
 0x174   : > { %v11328_v47 = vpop.permute.xlu1 %7901  ;;  %v7907_v5 = vpop.permute.xlu0 %7906  ;;  %v7843_v34 = vunpack.i.l.bf16 %v11095_v57  ;;  %v7849_v61 = vunpack.i.h.bf16 %v11101_v39  ;;  %v7848_v49 = vunpack.i.l.bf16 %v11101_v39  ;;  %v1889_v39 = vsel %vm1882_vm9, %v11289_v16, %v7763_v51 }
 0x175   : > { %15956 = vst [vmem:[#allocation30_spill] sm:$0xff] %v11328_v47  ;;  %v7909_v43 = vunpack.i.h.bf16 %v7907_v5  ;;  %v7908_v1 = vunpack.i.l.bf16 %v7907_v5  ;;  %v7769_v47 = vunpack.i.h.bf16 %v15958_v35 }
 0x177   : > { %v1949_v22 = vsel %vm1948_vm11, %v1916_v29, %v7908_v1  ;;  %v1950_v19 = vsel %vm1948_vm11, %v1917_v10, %v7909_v43 }
 0x178   : > { %v7912_v50 = vpop.permute.xlu1 %7911  ;;  %v7917_v25 = vpop.permute.xlu0 %7916  ;;  %v1981_v36 = vpack.c.bf16 %v1950_v19, %v1949_v22  ;;  %v1890_v19 = vsel %vm1882_vm9, %v11298_v7, %v7764_v54  ;;  %v15960_v7 = vld [vmem:[#allocation83_spill] sm:$0xff] }
 0x179   : > { %v7914_v5 = vunpack.i.h.bf16 %v7912_v50  ;;  %v7913_v32 = vunpack.i.l.bf16 %v7912_v50  ;;  %v7919_v38 = vunpack.i.h.bf16 %v7917_v25  ;;  %v7918_v15 = vunpack.i.l.bf16 %v7917_v25 }
 0x17a   : > { %7160 = vmatprep.mubr.msk.bf16.mxu0 %vm2018_vm12, %v1981_v36  ;;  %v1863_v36 = vsel %vm1849_vm8, %v11172_v42, %v7699_v17  ;;  %v1892_v42 = vsel %vm1882_vm9, %v11310_v52, %v7769_v47  ;;  %v1922_v17 = vsel %vm1915_vm10, %v1889_v39, %v7843_v34  ;;  %v7709_v51 = vunpack.i.h.bf16 %v15960_v7 }
 0x17b   : > { %v1951_v62 = vsel %vm1948_vm11, %v1918_v18, %v7913_v32  ;;  %v1952_v43 = vsel %vm1948_vm11, %v1919_v21, %v7914_v5  ;;  %v1953_v3 = vsel %vm1948_vm11, %v1920_v37, %v7918_v15  ;;  %v1954_v45 = vsel %vm1948_vm11, %v1921_v0, %v7919_v38  ;;  %v15959_v37 = vld [vmem:[#allocation82_spill] sm:$0xff] }
 0x17c   : > { %v7922_v59 = vpop.permute.xlu1 %7921  ;;  %v1982_v48 = vpack.c.bf16 %v1952_v43, %v1951_v62  ;;  %v7927_v29 = vpop.permute.xlu0 %7926  ;;  %v1983_v57 = vpack.c.bf16 %v1954_v45, %v1953_v3  ;;  %v1862_v32 = vsel %vm1849_vm8, %v11166_v14, %v7698_v60  ;;  %v7704_v50 = vunpack.i.h.bf16 %v15959_v37 }
 0x17d   : > { %v7924_v1 = vunpack.i.h.bf16 %v7922_v59  ;;  %v7923_v35 = vunpack.i.l.bf16 %v7922_v59  ;;  %v7929_v10 = vunpack.i.h.bf16 %v7927_v29  ;;  %v7928_v18 = vunpack.i.l.bf16 %v7927_v29 }
 0x17e   : > { %7161 = vmatmul.mubr.msk.bf16.vlgmr.msra.gmra.mrb[0].mxu0 %vm2018_vm12, %v1982_v48  ;;  %v7703_v22 = vunpack.i.l.bf16 %v15959_v37  ;;  %v1891_v14 = vsel %vm1882_vm9, %v11302_v63, %v7768_v53  ;;  %v1923_v60 = vsel %vm1915_vm10, %v1890_v19, %v7844_v30  ;;  %v1925_v5 = vsel %vm1915_vm10, %v1892_v42, %v7849_v61  ;;  %v15961_v37 = vld [vmem:[#allocation84_spill] sm:$0xff] }
 0x17f   : > { %7164 = vmatprep.mubr.msk.bf16.mxu0 %vm2018_vm12, %v1983_v57  ;;  %v1924_v21 = vsel %vm1915_vm10, %v1891_v14, %v7848_v49  ;;  %v1955_v16 = vsel %vm1948_vm11, %v1922_v17, %v7923_v35  ;;  %v1956_v54 = vsel %vm1948_vm11, %v1923_v60, %v7924_v1  ;;  %v7708_v25 = vunpack.i.l.bf16 %v15960_v7 }
 0x180   : > { %v1957_v63 = vsel %vm1948_vm11, %v1924_v21, %v7928_v18  ;;  %v1958_v52 = vsel %vm1948_vm11, %v1925_v5, %v7929_v10  ;;  %v7932_v47 = vpop.permute.xlu1 %7931  ;;  %v7774_v53 = vunpack.i.h.bf16 %v10784_v12  ;;  %v7773_v0 = vunpack.i.l.bf16 %v10784_v12  ;;  %v7937_v30 = vpop.permute.xlu0 %7936 }
 0x181   : > { %v7779_v38 = vunpack.i.h.bf16 %v10802_v11  ;;  %v7778_v15 = vunpack.i.l.bf16 %v10802_v11  ;;  %v7854_v34 = vunpack.i.h.bf16 %v11136_v40  ;;  %v7853_v62 = vunpack.i.l.bf16 %v11136_v40 }
 0x182   : > { %v7859_v43 = vunpack.i.h.bf16 %v11148_v44  ;;  %v1984_v61 = vpack.c.bf16 %v1956_v54, %v1955_v16  ;;  %v7858_v3 = vunpack.i.l.bf16 %v11148_v44  ;;  %v7934_v45 = vunpack.i.h.bf16 %v7932_v47 }
 0x183   : > { %v7933_v59 = vunpack.i.l.bf16 %v7932_v47  ;;  %v1985_v48 = vpack.c.bf16 %v1958_v52, %v1957_v63  ;;  %v1864_v12 = vsel %vm1849_vm8, %v11181_v2, %v7703_v22  ;;  %v1865_v49 = vsel %vm1849_vm8, %v11185_v23, %v7704_v50  ;;  %v15962_v63 = vld [vmem:[#allocation85_spill] sm:$0xff] }
 0x184   : > { %v7939_v11 = vunpack.i.h.bf16 %v7937_v30  ;;  %v7938_v1 = vunpack.i.l.bf16 %v7937_v30  ;;  %v1866_v40 = vsel %vm1849_vm8, %v11193_v4, %v7708_v25  ;;  %v1867_v35 = vsel %vm1849_vm8, %v11197_v20, %v7709_v51  ;;  %v7942_v22 = vpop.permute.xlu1 %7941  ;;  %v7947_v17 = vpop.permute.xlu0 %7946 }
 0x185   : > { %v1893_v44 = vsel %vm1882_vm9, %v11314_v13, %v7773_v0  ;;  %v1894_v29 = vsel %vm1882_vm9, %v11320_v46, %v7774_v53  ;;  %v1895_v2 = vsel %vm1882_vm9, %v1862_v32, %v7778_v15  ;;  %v1896_v23 = vsel %vm1882_vm9, %v1863_v36, %v7779_v38 }
 0x186   : > { %7165 = vmatmul.mubr.msk.bf16.gmra.mrb[4].mxu0 %vm2018_vm12, %v1984_v61  ;;  %v1926_v57 = vsel %vm1915_vm10, %v1893_v44, %v7853_v62  ;;  %v1927_v10 = vsel %vm1915_vm10, %v1894_v29, %v7854_v34  ;;  %v1928_v4 = vsel %vm1915_vm10, %v1895_v2, %v7858_v3  ;;  %v1929_v20 = vsel %vm1915_vm10, %v1896_v23, %v7859_v43 }
 0x187   : > { %7168 = vmatprep.mubr.msk.bf16.mxu0 %vm2018_vm12, %v1985_v48  ;;  %v1959_v18 = vsel %vm1948_vm11, %v1926_v57, %v7933_v59  ;;  %v1960_v13 = vsel %vm1948_vm11, %v1927_v10, %v7934_v45  ;;  %v7714_v46 = vunpack.i.h.bf16 %v15961_v37  ;;  %v7713_v50 = vunpack.i.l.bf16 %v15961_v37  ;;  %v15963_v10 = vld [vmem:[#allocation86_spill] sm:$0xff] }
 0x188   : > { %v1961_v32 = vsel %vm1948_vm11, %v1928_v4, %v7938_v1  ;;  %v1962_v36 = vsel %vm1948_vm11, %v1929_v20, %v7939_v11  ;;  %v7784_v39 = vunpack.i.h.bf16 %v10831_v6  ;;  %v7783_v19 = vunpack.i.l.bf16 %v10831_v6  ;;  %v7952_v48 = vpop.permute.xlu1 %7951 }
 0x189   : > { %v7789_v14 = vunpack.i.h.bf16 %v10837_v26  ;;  %v7788_v42 = vunpack.i.l.bf16 %v10837_v26  ;;  %v7864_v60 = vunpack.i.h.bf16 %v11177_v41  ;;  %v7863_v21 = vunpack.i.l.bf16 %v11177_v41 }
 0x18a   : > { %v7869_v5 = vunpack.i.h.bf16 %v11189_v31  ;;  %v1986_v16 = vpack.c.bf16 %v1960_v13, %v1959_v18  ;;  %v7868_v54 = vunpack.i.l.bf16 %v11189_v31  ;;  %v7944_v7 = vunpack.i.h.bf16 %v7942_v22 }
 0x18b   : > { %v7943_v51 = vunpack.i.l.bf16 %v7942_v22  ;;  %v1987_v25 = vpack.c.bf16 %v1962_v36, %v1961_v32  ;;  %v7719_v52 = vunpack.i.h.bf16 %v15962_v63  ;;  %v7718_v6 = vunpack.i.l.bf16 %v15962_v63 }
 0x18c   : > { %v7949_v47 = vunpack.i.h.bf16 %v7947_v17  ;;  %v7948_v53 = vunpack.i.l.bf16 %v7947_v17  ;;  %v1868_v26 = vsel %vm1849_vm8, %v11203_v58, %v7713_v50  ;;  %v1869_v41 = vsel %vm1849_vm8, %v11207_v33, %v7714_v46  ;;  %v15965_v17 = vld [vmem:[#allocation23_spill] sm:$0xff] }
 0x18d   : > { %v1897_v0 = vsel %vm1882_vm9, %v1864_v12, %v7783_v19  ;;  %v1898_v31 = vsel %vm1882_vm9, %v1865_v49, %v7784_v39  ;;  %v1899_v38 = vsel %vm1882_vm9, %v1866_v40, %v7788_v42  ;;  %v1900_v15 = vsel %vm1882_vm9, %v1867_v35, %v7789_v14  ;;  %v7957_v40 = vpop.permute.xlu0 %7956 }
 0x18e   : > { %7169 = vmatmul.mubr.msk.bf16.gmra.mrb[8].mxu0 %vm2018_vm12, %v1986_v16  ;;  %v1930_v30 = vsel %vm1915_vm10, %v1897_v0, %v7863_v21  ;;  %v1931_v34 = vsel %vm1915_vm10, %v1898_v31, %v7864_v60  ;;  %v1932_v62 = vsel %vm1915_vm10, %v1899_v38, %v7868_v54  ;;  %v1933_v58 = vsel %vm1915_vm10, %v1900_v15, %v7869_v5  ;;  %v7962_v16 = vpop.permute.xlu1 %7961  ;;  %v15966_v54 = vld [vmem:[#allocation13_spill] sm:$0xff] }
 0x18f   : > { %7172 = vmatprep.mubr.msk.bf16.mxu0 %vm2018_vm12, %v1987_v25  ;;  %v1963_v33 = vsel %vm1948_vm11, %v1930_v30, %v7943_v51  ;;  %v1964_v43 = vsel %vm1948_vm11, %v1931_v34, %v7944_v7  ;;  %v1870_v61 = vsel %vm1849_vm8, %v11213_v24, %v7718_v6  ;;  %v1871_v3 = vsel %vm1849_vm8, %v11217_v9, %v7719_v52  ;;  %v15967_v25 = vld [vmem:[#allocation11_spill] sm:$0xff]  ;;  %v15970_v34 = vld [vmem:[#allocation18_spill] sm:$0xff] }
 0x190   : > { %v1965_v45 = vsel %vm1948_vm11, %v1932_v62, %v7948_v53  ;;  %v1966_v59 = vsel %vm1948_vm11, %v1933_v58, %v7949_v47  ;;  %v7794_v12 = vunpack.i.h.bf16 %v10872_v8  ;;  %v7793_v49 = vunpack.i.l.bf16 %v10872_v8  ;;  %v15968_v47 = vld [vmem:[#allocation25_spill] sm:$0xff]  ;;  %v15971_v58 = vld [vmem:[#allocation19_spill] sm:$0xff] }
 0x191   : > { %v7799_v11 = vunpack.i.h.bf16 %v10890_v56  ;;  %v7798_v1 = vunpack.i.l.bf16 %v10890_v56  ;;  %v7874_v35 = vunpack.i.h.bf16 %v11224_v27  ;;  %v7873_v24 = vunpack.i.l.bf16 %v11224_v27  ;;  %v15964_v56 = vld [vmem:[#allocation87_spill] sm:$0xff]  ;;  %v7967_v6 = vpop.permute.xlu0 %7966 }
 0x192   : > { %v7879_v9 = vunpack.i.h.bf16 %v11236_v28  ;;  %v1988_v44 = vpack.c.bf16 %v1964_v43, %v1963_v33  ;;  %v7878_v29 = vunpack.i.l.bf16 %v11236_v28  ;;  %v7954_v2 = vunpack.i.h.bf16 %v7952_v48 }
 0x193   : > { %v7953_v23 = vunpack.i.l.bf16 %v7952_v48  ;;  %v1989_v57 = vpack.c.bf16 %v1966_v59, %v1965_v45  ;;  %v7724_v4 = vunpack.i.h.bf16 %v15963_v10  ;;  %v7723_v8 = vunpack.i.l.bf16 %v15963_v10 }
 0x194   : > { %v7959_v20 = vunpack.i.h.bf16 %v7957_v40  ;;  %v7958_v18 = vunpack.i.l.bf16 %v7957_v40  ;;  %v7729_v13 = vunpack.i.h.bf16 %v15964_v56  ;;  %v7728_v27 = vunpack.i.l.bf16 %v15964_v56  ;;  %v15975_v56 = vld [vmem:[#allocation15_spill] sm:$0xff] }
 0x195   : > { %v1901_v37 = vsel %vm1882_vm9, %v1868_v26, %v7793_v49  ;;  %v1902_v46 = vsel %vm1882_vm9, %v1869_v41, %v7794_v12  ;;  %v1903_v28 = vsel %vm1882_vm9, %v1870_v61, %v7798_v1  ;;  %v1904_v50 = vsel %vm1882_vm9, %v1871_v3, %v7799_v11  ;;  %v15969_v26 = vld [vmem:[#allocation27_spill] sm:$0xff]  ;;  %v15972_v3 = vld [vmem:[#allocation88_spill] sm:$0xff] }
 0x196   : > { %7173 = vmatmul.mubr.msk.bf16.gmra.mrb[12].mxu0 %vm2018_vm12, %v1988_v44  ;;  %v1934_v32 = vsel %vm1915_vm10, %v1901_v37, %v7873_v24  ;;  %v1935_v36 = vsel %vm1915_vm10, %v1902_v46, %v7874_v35  ;;  %v1936_v22 = vsel %vm1915_vm10, %v1903_v28, %v7878_v29  ;;  %v1937_v39 = vsel %vm1915_vm10, %v1904_v50, %v7879_v9  ;;  %v15973_v29 = vld [vmem:[#allocation7_spill] sm:$0xff]  ;;  %v7977_v37 = vpop.permute.xlu0 %7976  ;;  %v15976_v46 = vld [vmem:[#allocation28_spill] sm:$0xff] }
 0x197   : > { %7176 = vmatprep.mubr.msk.bf16.mxu0 %vm2018_vm12, %v1989_v57  ;;  %v1967_v19 = vsel %vm1948_vm11, %v1934_v32, %v7953_v23  ;;  %v1968_v14 = vsel %vm1948_vm11, %v1935_v36, %v7954_v2  ;;  %v1872_v42 = vsel %vm1849_vm8, %v11221_v55, %v7723_v8  ;;  %v1873_v60 = vsel %vm1849_vm8, %v15965_v17, %v7724_v4  ;;  %v7972_v4 = vpop.permute.xlu1 %7971  ;;  %v15974_v8 = vld [vmem:[#allocation20_spill] sm:$0xff]  ;;  %v15977_v32 = vld [vmem:[#allocation31_spill] sm:$0xff]  ;;  %v15978_v17 = vld [vmem:[#allocation26_spill] sm:$0xff] }
 0x198   : > { %v1969_v21 = vsel %vm1948_vm11, %v1936_v22, %v7958_v18  ;;  %v1970_v5 = vsel %vm1948_vm11, %v1937_v39, %v7959_v20  ;;  %v7804_v7 = vunpack.i.h.bf16 %v15966_v54  ;;  %v7803_v51 = vunpack.i.l.bf16 %v15966_v54 }
 0x199   : > { %v7809_v63 = vunpack.i.h.bf16 %v15967_v25  ;;  %v7808_v52 = vunpack.i.l.bf16 %v15967_v25  ;;  %v7884_v53 = vunpack.i.h.bf16 %v15968_v47  ;;  %v7883_v55 = vunpack.i.l.bf16 %v15968_v47  ;;  %v15981_v25 = vld [vmem:[#allocation24_spill] sm:$0xff] }
 0x19a   : > { %v7889_v41 = vunpack.i.h.bf16 %v15969_v26  ;;  %v1990_v0 = vpack.c.bf16 %v1968_v14, %v1967_v19  ;;  %v7888_v31 = vunpack.i.l.bf16 %v15969_v26  ;;  %v7964_v38 = vunpack.i.h.bf16 %v7962_v16 }
 0x19b   : > { %v7963_v15 = vunpack.i.l.bf16 %v7962_v16  ;;  %v1991_v30 = vpack.c.bf16 %v1970_v5, %v1969_v21  ;;  %v1874_v62 = vsel %vm1849_vm8, %v15970_v34, %v7728_v27  ;;  %v1875_v33 = vsel %vm1849_vm8, %v15971_v58, %v7729_v13  ;;  %v15979_v21 = vld [vmem:[#allocation21_spill] sm:$0xff] }
 0x19c   : > { %v7969_v43 = vunpack.i.h.bf16 %v7967_v6  ;;  %v7968_v61 = vunpack.i.l.bf16 %v7967_v6  ;;  %v7734_v45 = vunpack.i.h.bf16 %v15972_v3  ;;  %v7733_v59 = vunpack.i.l.bf16 %v15972_v3  ;;  %v15985_v3 = vld [vmem:[#allocation17_spill] sm:$0xff] }
 0x19d   : > { %v1905_v48 = vsel %vm1882_vm9, %v1872_v42, %v7803_v51  ;;  %v1906_v12 = vsel %vm1882_vm9, %v1873_v60, %v7804_v7  ;;  %v1907_v49 = vsel %vm1882_vm9, %v1874_v62, %v7808_v52  ;;  %v1908_v11 = vsel %vm1882_vm9, %v1875_v33, %v7809_v63  ;;  %v15980_v7 = vld [vmem:[#allocation22_spill] sm:$0xff]  ;;  %v7982_v33 = vpop.permute.xlu1 %7981 }
 0x19e   : > { %7177 = vmatmul.mubr.msk.bf16.gmra.mrb[16].mxu0 %vm2018_vm12, %v1990_v0  ;;  %v1938_v1 = vsel %vm1915_vm10, %v1905_v48, %v7883_v55  ;;  %v1939_v40 = vsel %vm1915_vm10, %v1906_v12, %v7884_v53  ;;  %v1940_v35 = vsel %vm1915_vm10, %v1907_v49, %v7888_v31  ;;  %v1941_v24 = vsel %vm1915_vm10, %v1908_v11, %v7889_v41  ;;  %v15987_v48 = vld [vmem:[#allocation14_spill] sm:$0xff]  ;;  %v15988_v49 = vld [vmem:[#allocation16_spill] sm:$0xff] }
 0x19f   : > { %7180 = vmatprep.mubr.msk.bf16.mxu0 %vm2018_vm12, %v1991_v30  ;;  %v1971_v9 = vsel %vm1948_vm11, %v1938_v1, %v7963_v15  ;;  %v1972_v44 = vsel %vm1948_vm11, %v1939_v40, %v7964_v38  ;;  %v7739_v2 = vunpack.i.h.bf16 %v15973_v29  ;;  %v7738_v23 = vunpack.i.l.bf16 %v15973_v29  ;;  %v15982_v15 = vld [vmem:[#allocation8_spill] sm:$0xff]  ;;  %v15989_v40 = vld [vmem:[#allocation74_spill] sm:$0xff] }
 0x1a0   : > { %v1973_v57 = vsel %vm1948_vm11, %v1940_v35, %v7968_v61  ;;  %v1974_v10 = vsel %vm1948_vm11, %v1941_v24, %v7969_v43  ;;  %v7814_v20 = vunpack.i.h.bf16 %v15974_v8  ;;  %v7813_v18 = vunpack.i.l.bf16 %v15974_v8  ;;  %v15983_v43 = vld [vmem:[#allocation58_spill] sm:$0xff] }
 0x1a1   : > { %v7819_v13 = vunpack.i.h.bf16 %v15975_v56  ;;  %v7818_v27 = vunpack.i.l.bf16 %v15975_v56  ;;  %v7894_v28 = vunpack.i.h.bf16 %v15976_v46  ;;  %v7893_v50 = vunpack.i.l.bf16 %v15976_v46 }
 0x1a2   : > { %v7899_v36 = vunpack.i.h.bf16 %v15977_v32  ;;  %v1992_v22 = vpack.c.bf16 %v1972_v44, %v1971_v9  ;;  %v7898_v39 = vunpack.i.l.bf16 %v15977_v32  ;;  %v7974_v19 = vunpack.i.h.bf16 %v7972_v4  ;;  %v15991_v9 = vld [vmem:[#allocation30_spill] sm:$0xff]  ;;  %v15993_v32 = vld [vmem:[#allocation4_spill] sm:$0xff] }
 0x1a3   : > { %v7973_v14 = vunpack.i.l.bf16 %v7972_v4  ;;  %v1993_v42 = vpack.c.bf16 %v1974_v10, %v1973_v57  ;;  %v1876_v60 = vsel %vm1849_vm8, %v15978_v17, %v7733_v59  ;;  %v1877_v5 = vsel %vm1849_vm8, %v15979_v21, %v7734_v45  ;;  %7986 = vrot.lane.b32.xlu0 %v15993_v32, %s9588_s20 }
 0x1a4   : > { %v7979_v16 = vunpack.i.h.bf16 %v7977_v37  ;;  %v7978_v54 = vunpack.i.l.bf16 %v7977_v37  ;;  %v1878_v51 = vsel %vm1849_vm8, %v15980_v7, %v7738_v23  ;;  %v1879_v63 = vsel %vm1849_vm8, %v15981_v25, %v7739_v2 }
 0x1a5   : > { %v1909_v52 = vsel %vm1882_vm9, %v1876_v60, %v7813_v18  ;;  %v1910_v6 = vsel %vm1882_vm9, %v1877_v5, %v7814_v20  ;;  %v1911_v47 = vsel %vm1882_vm9, %v1878_v51, %v7818_v27  ;;  %v1912_v53 = vsel %vm1882_vm9, %v1879_v63, %v7819_v13 }
 0x1a6   : > { %7181 = vmatmul.mubr.msk.bf16.gmra.mrb[20].mxu0 %vm2018_vm12, %v1992_v22  ;;  %v1942_v55 = vsel %vm1915_vm10, %v1909_v52, %v7893_v50  ;;  %v1943_v26 = vsel %vm1915_vm10, %v1910_v6, %v7894_v28  ;;  %v1944_v41 = vsel %vm1915_vm10, %v1911_v47, %v7898_v39  ;;  %v1945_v0 = vsel %vm1915_vm10, %v1912_v53, %v7899_v36  ;;  %v15994_v36 = vld [vmem:[#allocation42_spill] sm:$0xff] }
 0x1a7   : > { %7184 = vmatprep.mubr.msk.bf16.mxu0 %vm2018_vm12, %v1993_v42  ;;  %v1975_v31 = vsel %vm1948_vm11, %v1942_v55, %v7973_v14  ;;  %v1976_v38 = vsel %vm1948_vm11, %v1943_v26, %v7974_v19  ;;  %v7744_v30 = vunpack.i.h.bf16 %v15982_v15  ;;  %v7743_v34 = vunpack.i.l.bf16 %v15982_v15  ;;  %7991 = vrot.lane.b32.xlu0 %v15994_v36, %s9590_s22  ;;  %v11577_v22 = vld [vmem:[%s15477_s2] ss:$0 sm:$0xff] }
 0x1a8   : > { %v1977_v62 = vsel %vm1948_vm11, %v1944_v41, %v7978_v54  ;;  %v1978_v58 = vsel %vm1948_vm11, %v1945_v0, %v7979_v16  ;;  %v15984_v61 = vunpack.i.l.bf16 %v15983_v43  ;;  %v15986_v59 = vunpack.i.h.bf16 %v15983_v43 }
 0x1a9   : > { %v7824_v11 = vunpack.i.h.bf16 %v15988_v49  ;;  %v7823_v1 = vunpack.i.l.bf16 %v15988_v49  ;;  %v15990_v35 = vunpack.i.l.bf16 %v15989_v40  ;;  %v7904_v44 = vunpack.i.h.bf16 %v15991_v9 }
 0x1aa   : > { %v1814_v45 = vsel %vm1783_vm6, %v15985_v3, %v15984_v61  ;;  %v1815_v12 = vsel %vm1783_vm6, %v15987_v48, %v15986_v59  ;;  %v7903_v29 = vunpack.i.l.bf16 %v15991_v9  ;;  %v1994_v2 = vpack.c.bf16 %v1976_v38, %v1975_v31 }
 0x1ab   : > { %v1847_v24 = vsel %vm1816_vm7, %v1814_v45, %v15990_v35  ;;  %v15992_v23 = vunpack.i.h.bf16 %v15989_v40  ;;  %v7984_v10 = vunpack.i.h.bf16 %v7982_v33  ;;  %v7983_v4 = vunpack.i.l.bf16 %v7982_v33 }
 0x1ac   : > { %v1995_v8 = vpack.c.bf16 %v1978_v58, %v1977_v62  ;;  %v1880_v20 = vsel %vm1849_vm8, %v1847_v24, %v7743_v34  ;;  %vm3588_vm6 = vcmask 523264  }
 0x1ad   : > { %v1848_v57 = vsel %vm1816_vm7, %v1815_v12, %v15992_v23  ;;  %v1913_v56 = vsel %vm1882_vm9, %v1880_v20, %v7823_v1 }
 0x1ae   : > { %v1881_v18 = vsel %vm1849_vm8, %v1848_v57, %v7744_v30  ;;  %7185 = vmatmul.mubr.msk.bf16.gmra.mrb[24].mxu0 %vm2018_vm12, %v1994_v2  ;;  %v1946_v27 = vsel %vm1915_vm10, %v1913_v56, %v7903_v29  ;;  %vm3670_vm8 = vcmask 588800  }
 0x1af   : > { %v1914_v13 = vsel %vm1882_vm9, %v1881_v18, %v7824_v11  ;;  %7188 = vmatprep.mubr.msk.bf16.mxu0 %vm2018_vm12, %v1995_v8  ;;  %v1979_v46 = vsel %vm1948_vm11, %v1946_v27, %v7983_v4 }
 0x1b0   : > { %v1947_v37 = vsel %vm1915_vm10, %v1914_v13, %v7904_v44 }
 0x1b1   : > { %v1980_v28 = vsel %vm1948_vm11, %v1947_v37, %v7984_v10 }
 0x1b2   : > { %v1996_v50 = vpack.c.bf16 %v1980_v28, %v1979_v46 }
 0x1b6   : > { %7189 = vmatmul.mubr.msk.bf16.gmra.mrb[28].mxu0 %vm2018_vm12, %v1996_v50 }
 0x251   : > { %v7162_v39 = vpop.f32.mrb[0].mxu0 }
 0x252   : > { %v2114_v19 = vadd.f32 %v7162_v39, %v11577_v22  ;;  %v2105_v14 = vpop.f32.mrb[1].mxu0 }
 0x253   : > { %v7163_v42 = vpop.f32.mrb[2].mxu0  ;;  %v2106_v60 = vadd.f32 %v11577_v22, %v2105_v14 }
 0x254   : > { %v2277_v17 = vrot.slane %v2114_v19, 7  ;;  %v2117_v21 = vadd.f32 %v7163_v42, %v11577_v22  ;;  %v2108_v5 = vpop.f32.mrb[3].mxu0 }
 0x255   : > { %v2109_v16 = vadd.f32 %v11577_v22, %v2108_v5  ;;  %v2274_v25 = vrot.slane %v2106_v60, 7 }
 0x256   : > { %v2278_v54 = vrot.slane %v2117_v21, 7  ;;  %v11584_v51 = vsel %vm609_vm0, 0.0, %v2277_v17 }
 0x257   : > { %v2275_v7 = vrot.slane %v2109_v16, 7  ;;  %15995 = vst [vmem:[#allocation33_spill] sm:$0xff] %v11584_v51  ;;  %v2436_v0 = vrot.slane %v11584_v51, 1  ;;  %v11601_v15 = vsel %vm609_vm0, 0.0, %v2274_v25  ;;  %v2607_v11 = vrot.slane %v11584_v51, 2 }
 0x258   : > { %v11587_v63 = vsel %vm609_vm0, %v2277_v17, %v2278_v54  ;;  %v2386_v52 = vsel %vm609_vm0, %v2278_v54, 0.0  ;;  %15998 = vst [vmem:[#allocation36_spill] sm:$0xff] %v11601_v15  ;;  %v2431_v8 = vrot.slane %v11601_v15, 1  ;;  %v2602_v60 = vrot.slane %v11601_v15, 2 }
 0x259   : > { %15996 = vst [vmem:[#allocation29_spill] sm:$0xff] %v11587_v63  ;;  %v2437_v6 = vrot.slane %v11587_v63, 1  ;;  %v2439_v47 = vrot.slane %v2386_v52, 1  ;;  %v7166_v53 = vpop.f32.mrb[4].mxu0  ;;  %v11592_v55 = vsel %vm609_vm0, %v2274_v25, %v2275_v7  ;;  %v8000_v41 = vpack.i.bf16 %v11587_v63, %v11584_v51 }
 0x25a   : > { %15997 = vst [vmem:[#allocation34_spill] sm:$0xff] %v11592_v55  ;;  %v2121_v26 = vpop.f32.mrb[5].mxu0  ;;  %v11598_v31 = vadd.f32 %v7166_v53, %v11577_v22  ;;  %v2608_v61 = vrot.slane %v11587_v63, 2  ;;  %v2610_v3 = vrot.slane %v2386_v52, 2  ;;  %v8005_v45 = vpack.i.bf16 %v11592_v55, %v11601_v15 }
 0x25b   : > { %v7167_v38 = vpop.f32.mrb[6].mxu0  ;;  %v2440_v30 = vsel %vm775_vm1, %v2437_v6, %v2439_v47  ;;  %v11605_v34 = vadd.f32 %v11577_v22, %v2121_v26  ;;  %8001 = vrot.lane.b32.xlu0 %v8000_v41, %s9595_s23  ;;  %v2438_v43 = vsel %vm775_vm1, %v2436_v0, %v2437_v6  ;;  %7996 = vrot.lane.b32.xlu1 %v8000_v41, %s9592_s24  ;;  %v2385_v24 = vsel %vm609_vm0, %v2275_v7, 0.0 }
 0x25c   : > { %v2124_v62 = vpop.f32.mrb[7].mxu0  ;;  %v2133_v58 = vadd.f32 %v7167_v38, %v11577_v22  ;;  %v2283_v59 = vrot.slane %v11598_v31, 7  ;;  %v11619_v49 = vpack.i.bf16 %v2440_v30, %v2438_v43  ;;  %v2611_v44 = vsel %vm952_vm2, %v2608_v61, %v2610_v3 }
 0x25d   : > { %v11610_v33 = vadd.f32 %v11577_v22, %v2124_v62  ;;  %v2280_v1 = vrot.slane %v11605_v34, 7  ;;  %v2432_v29 = vrot.slane %v11592_v55, 1  ;;  %v2609_v23 = vsel %vm952_vm2, %v2607_v11, %v2608_v61 }
 0x25e   : > { %v2284_v48 = vrot.slane %v2133_v58, 7  ;;  %15999 = vst [vmem:[#allocation32_spill] sm:$0xff] %v11619_v49  ;;  %v2434_v20 = vrot.slane %v2385_v24, 1  ;;  %v11647_v56 = vpack.i.bf16 %v2611_v44, %v2609_v23  ;;  %v2603_v46 = vrot.slane %v11592_v55, 2 }
 0x25f   : > { %v2281_v12 = vrot.slane %v11610_v33, 7  ;;  %8006 = vrot.lane.b32.xlu0 %v8005_v45, %s9592_s24  ;;  %8021 = vrot.lane.b32.xlu1 %v11619_v49, %s9594_s18  ;;  %v2433_v37 = vsel %vm775_vm1, %v2431_v8, %v2432_v29  ;;  %v2605_v28 = vrot.slane %v2385_v24, 2  ;;  %v11702_v62 = vsel %vm609_vm0, 0.0, %v2283_v59 }
 0x260   : > { %v11625_v40 = vsel %vm609_vm0, %v2283_v59, %v2284_v48  ;;  %16002 = vst [vmem:[#allocation38_spill] sm:$0xff] %v11647_v56  ;;  %v2435_v42 = vsel %vm775_vm1, %v2432_v29, %v2434_v20  ;;  %v2604_v25 = vsel %vm952_vm2, %v2602_v60, %v2603_v46  ;;  %v2388_v31 = vsel %vm609_vm0, %v2284_v48, 0.0  ;;  %16005 = vst [vmem:[#allocation40_spill] sm:$0xff] %v11702_v62 }
 0x261   : > { %16000 = vst [vmem:[#allocation37_spill] sm:$0xff] %v11625_v40  ;;  %v7170_v35 = vpop.f32.mrb[8].mxu0  ;;  %v11633_v2 = vsel %vm609_vm0, %v2280_v1, %v2281_v12  ;;  %v8030_v21 = vpack.i.bf16 %v2435_v42, %v2433_v37  ;;  %v2606_v52 = vsel %vm952_vm2, %v2603_v46, %v2605_v28  ;;  %v11707_v61 = vsel %vm609_vm0, 0.0, %v2280_v1 }
 0x262   : > { %v2137_v9 = vpop.f32.mrb[9].mxu0  ;;  %16001 = vst [vmem:[#allocation35_spill] sm:$0xff] %v11633_v2  ;;  %v11639_v10 = vadd.f32 %v7170_v35, %v11577_v22  ;;  %v8035_v41 = vpack.i.bf16 %v2606_v52, %v2604_v25  ;;  %16006 = vst [vmem:[#allocation43_spill] sm:$0xff] %v11707_v61  ;;  %v11719_v59 = vpack.i.bf16 %v11625_v40, %v11702_v62  ;;  %v2447_v11 = vrot.slane %v11625_v40, 1 }
 0x263   : > { %v7171_v57 = vpop.f32.mrb[10].mxu0  ;;  %8011 = vrot.lane.b32.xlu0 %v11619_v49, %s9588_s20  ;;  %v11645_v18 = vadd.f32 %v11577_v22, %v2137_v9  ;;  %8026 = vrot.lane.b32.xlu1 %v11647_v56, %s9596_s25  ;;  %v2449_v35 = vrot.slane %v2388_v31, 1  ;;  %v8055_v1 = vpack.i.bf16 %v11633_v2, %v11707_v61  ;;  %v2387_v44 = vsel %vm609_vm0, %v2281_v12, 0.0 }
 0x264   : > { %v2140_v4 = vpop.f32.mrb[11].mxu0  ;;  %v11650_v13 = vadd.f32 %v7171_v57, %v11577_v22  ;;  %v2289_v50 = vrot.slane %v11639_v10, 7  ;;  %v2446_v23 = vrot.slane %v11702_v62, 1  ;;  %v2617_v57 = vrot.slane %v11702_v62, 2 }
 0x265   : > { %v11653_v27 = vadd.f32 %v11577_v22, %v2140_v4  ;;  %v2286_v39 = vrot.slane %v11645_v18, 7  ;;  %v2441_v4 = vrot.slane %v11707_v61, 1  ;;  %v2618_v8 = vrot.slane %v11625_v40, 2 }
 0x266   : > { %v2290_v19 = vrot.slane %v11650_v13, 7  ;;  %v2450_v20 = vsel %vm775_vm1, %v2447_v11, %v2449_v35  ;;  %v2620_v37 = vrot.slane %v2388_v31, 2  ;;  %v2442_v46 = vrot.slane %v11633_v2, 1 }
 0x267   : > { %v2287_v14 = vrot.slane %v11653_v27, 7  ;;  %8016 = vrot.lane.b32.xlu0 %v11647_v56, %s9590_s22  ;;  %8031 = vrot.lane.b32.xlu1 %v8030_v21, %s9588_s20  ;;  %v2444_v28 = vrot.slane %v2387_v44, 1  ;;  %v15634_v52 = vrot.slane %v11633_v2, 2 }
 0x268   : > { %v11672_v16 = vsel %vm609_vm0, %v2289_v50, %v2290_v19  ;;  %v2621_v10 = vsel %vm952_vm2, %v2618_v8, %v2620_v37  ;;  %v2390_v18 = vsel %vm609_vm0, %v2290_v19, 0.0 }
 0x269   : > { %v7174_v17 = vpop.f32.mrb[12].mxu0  ;;  %16003 = vst [vmem:[#allocation41_spill] sm:$0xff] %v11672_v16  ;;  %v11679_v54 = vsel %vm609_vm0, %v2286_v39, %v2287_v14  ;;  %v2459_v37 = vrot.slane %v2390_v18, 1 }
 0x26a   : > { %v2153_v5 = vpop.f32.mrb[13].mxu0  ;;  %16004 = vst [vmem:[#allocation39_spill] sm:$0xff] %v11679_v54  ;;  %v11685_v47 = vadd.f32 %v7174_v17, %v11577_v22 }
 0x26b   : > { %v7175_v7 = vpop.f32.mrb[14].mxu0  ;;  %8041 = vrot.lane.b32.xlu0 %v8030_v21, %s9594_s18  ;;  %v11689_v53 = vadd.f32 %v11577_v22, %v2153_v5  ;;  %8036 = vrot.lane.b32.xlu1 %v8035_v41, %s9590_s22 }
 0x26c   : > { %v2156_v6 = vpop.f32.mrb[15].mxu0  ;;  %v11692_v26 = vadd.f32 %v7175_v7, %v11577_v22  ;;  %v2295_v38 = vrot.slane %v11685_v47, 7  ;;  %v2448_v7 = vsel %vm775_vm1, %v2446_v23, %v2447_v11  ;;  %v16021_v47 = vrot.slane %v11633_v2, 2 }
 0x26d   : > { %v11695_v0 = vadd.f32 %v11577_v22, %v2156_v6  ;;  %v15635_v3 = vrot.slane %v11689_v53, 7  ;;  %v2615_v6 = vrot.slane %v2387_v44, 2  ;;  %v11762_v31 = vpack.i.bf16 %v2450_v20, %v2448_v7 }
 0x26e   : > { %v2296_v30 = vrot.slane %v11692_v26, 7  ;;  %v15643_v20 = vrot.slane %v11672_v16, 1  ;;  %v15637_v7 = vrot.slane %v11679_v54, 1 }
 0x26f   : > { %v2293_v58 = vrot.slane %v11695_v0, 7  ;;  %8046 = vrot.lane.b32.xlu0 %v8035_v41, %s9596_s25  ;;  %8051 = vrot.lane.b32.xlu1 %v11719_v59, %s9592_s24  ;;  %16009 = vst [vmem:[#allocation46_spill] sm:$0xff] %v11762_v31  ;;  %v2616_v19 = vsel %vm952_vm2, %v15634_v52, %v2615_v6  ;;  %v15636_v6 = vrot.slane %v11679_v54, 2  ;;  %v11878_v0 = vsel %vm609_vm0, 0.0, %v2295_v38 }
 0x270   : > { %v11715_v45 = vsel %vm609_vm0, %v2295_v38, %v2296_v30  ;;  %16016 = vst [vmem:[#allocation54_spill] sm:$0xff] %v11878_v0  ;;  %v16022_v38 = vrot.slane %v11707_v61, 2 }
 0x271   : > { %v7178_v34 = vpop.f32.mrb[16].mxu0  ;;  %16007 = vst [vmem:[#allocation44_spill] sm:$0xff] %v11715_v45  ;;  %v11729_v9 = vsel %vm609_vm0, %v15635_v3, %v2293_v58 }
 0x272   : > { %v2169_v43 = vpop.f32.mrb[17].mxu0  ;;  %16008 = vst [vmem:[#allocation45_spill] sm:$0xff] %v11729_v9  ;;  %v11737_v29 = vadd.f32 %v7178_v34, %v11577_v22 }
 0x273   : > { %v7179_v48 = vpop.f32.mrb[18].mxu0  ;;  %8056 = vrot.lane.b32.xlu0 %v8055_v1, %s9592_s24  ;;  %v11746_v33 = vadd.f32 %v11577_v22, %v2169_v43  ;;  %8061 = vrot.lane.b32.xlu1 %v8055_v1, %s9595_s23  ;;  %v11767_v43 = vsel %vm609_vm0, 0.0, %v2289_v50  ;;  %v2445_v50 = vsel %vm775_vm1, %v2442_v46, %v2444_v28  ;;  %v15639_v28 = vrot.slane %v11672_v16, 2 }
 0x274   : > { %v2172_v24 = vpop.f32.mrb[19].mxu0  ;;  %v11749_v12 = vadd.f32 %v7179_v48, %v11577_v22  ;;  %v15633_v21 = vrot.slane %v11737_v29, 7  ;;  %16010 = vst [vmem:[#allocation48_spill] sm:$0xff] %v11767_v43  ;;  %v11772_v48 = vsel %vm609_vm0, 0.0, %v2286_v39  ;;  %v2389_v39 = vsel %vm609_vm0, %v2287_v14, 0.0 }
 0x275   : > { %v11753_v42 = vadd.f32 %v11577_v22, %v2172_v24  ;;  %16011 = vst [vmem:[#allocation49_spill] sm:$0xff] %v11772_v48  ;;  %v15631_v11 = vrot.slane %v11746_v33, 7 }
 0x276   : > { %v15632_v5 = vrot.slane %v11749_v12, 7 }
 0x277   : > { %v15630_v41 = vrot.slane %v11753_v42, 7  ;;  %8066 = vrot.lane.b32.xlu0 %v11762_v31, %s9588_s20  ;;  %8076 = vrot.lane.b32.xlu1 %v11762_v31, %s9594_s18  ;;  %v16080_v31 = vrot.slane %v11715_v45, 2 }
 0x278   : > { %v11780_v35 = vsel %vm609_vm0, %v15633_v21, %v15632_v5  ;;  %v2619_v5 = vsel %vm952_vm2, %v2617_v57, %v2618_v8  ;;  %v2443_v8 = vsel %vm775_vm1, %v2441_v4, %v2442_v46 }
 0x279   : > { %v7182_v17 = vpop.f32.mrb[20].mxu0  ;;  %16012 = vst [vmem:[#allocation50_spill] sm:$0xff] %v11780_v35  ;;  %v11797_v24 = vsel %vm609_vm0, %v15631_v11, %v15630_v41  ;;  %v2625_v41 = vrot.slane %v2389_v39, 2 }
 0x27a   : > { %v2185_v25 = vpop.f32.mrb[21].mxu0  ;;  %16013 = vst [vmem:[#allocation51_spill] sm:$0xff] %v11797_v24  ;;  %v11800_v44 = vadd.f32 %v7182_v17, %v11577_v22  ;;  %v2630_v17 = vrot.slane %v2390_v18, 2  ;;  %v11824_v18 = vpack.i.bf16 %v2621_v10, %v2619_v5 }
 0x27b   : > { %v7183_v34 = vpop.f32.mrb[22].mxu0  ;;  %v11819_v23 = vadd.f32 %v11577_v22, %v2185_v25  ;;  %v11855_v10 = vsel %vm952_vm2, %v15636_v6, %v2625_v41 }
 0x27c   : > { %v2188_v1 = vpop.f32.mrb[23].mxu0  ;;  %v11803_v13 = vadd.f32 %v7183_v34, %v11577_v22  ;;  %v2454_v34 = vrot.slane %v2389_v39, 1  ;;  %v15641_v14 = vrot.slane %v11800_v44, 7  ;;  %16014 = vst [vmem:[#allocation52_spill] sm:$0xff] %v11824_v18  ;;  %v11832_v39 = vsel %vm775_vm1, %v15643_v20, %v2459_v37  ;;  %8071 = vrot.lane.b32.xlu0 %v11824_v18, %s9590_s22  ;;  %8081 = vrot.lane.b32.xlu1 %v11824_v18, %s9596_s25 }
 0x27d   : > { %v11827_v52 = vadd.f32 %v11577_v22, %v2188_v1  ;;  %v11837_v25 = vsel %vm952_vm2, %v15639_v28, %v2630_v17  ;;  %v2392_v37 = vsel %vm609_vm0, %v2296_v30, 0.0  ;;  %v2391_v17 = vsel %vm609_vm0, %v2293_v58, 0.0 }
 0x27e   : > { %v15642_v27 = vrot.slane %v11803_v13, 7  ;;  %v11850_v1 = vsel %vm775_vm1, %v15637_v7, %v2454_v34  ;;  %v15640_v4 = vrot.slane %v11819_v23, 7  ;;  %v16017_v30 = vrot.slane %v11689_v53, 7 }
 0x27f   : > { %v15638_v46 = vrot.slane %v11827_v52, 7  ;;  %v11885_v34 = vpack.i.bf16 %v2445_v50, %v2443_v8  ;;  %v2469_v6 = vrot.slane %v2392_v37, 1  ;;  %v2614_v53 = vsel %vm952_vm2, %v16022_v38, %v16021_v47 }
 0x280   : > { %v11844_v57 = vsel %vm609_vm0, %v15641_v14, %v15642_v27  ;;  %v11883_v58 = vsel %vm609_vm0, 0.0, %v16017_v30  ;;  %v2640_v50 = vrot.slane %v2392_v37, 2  ;;  %v2464_v30 = vrot.slane %v2391_v17, 1 }
 0x281   : > { %v7186_v11 = vpop.f32.mrb[24].mxu0  ;;  %16015 = vst [vmem:[#allocation53_spill] sm:$0xff] %v11844_v57  ;;  %16018 = vst [vmem:[#allocation55_spill] sm:$0xff] %v11883_v58  ;;  %8096 = vrot.lane.b32.xlu0 %v11885_v34, %s9594_s18  ;;  %8086 = vrot.lane.b32.xlu1 %v11885_v34, %s9588_s20  ;;  %v11917_v20 = vpack.i.bf16 %v2616_v19, %v2614_v53  ;;  %v2635_v60 = vrot.slane %v2391_v17, 2  ;;  %v16028_v53 = vrot.slane %v11715_v45, 1  ;;  %v16040_v40 = vrot.slane %v11803_v13, 7 }
 0x282   : > { %v2201_v21 = vpop.f32.mrb[25].mxu0  ;;  %v11870_v41 = vadd.f32 %v7186_v11, %v11577_v22  ;;  %16019 = vst [vmem:[#allocation56_spill] sm:$0xff] %v11885_v34  ;;  %v16083_v49 = vrot.slane %v11883_v58, 1 }
 0x283   : > { %v7187_v3 = vpop.f32.mrb[26].mxu0  ;;  %v11908_v28 = vadd.f32 %v11577_v22, %v2201_v21  ;;  %16023 = vst [vmem:[#allocation59_spill] sm:$0xff] %v11917_v20  ;;  %v16024_v21 = vrot.slane %v11737_v29, 7  ;;  %v11936_v27 = vsel %vm775_vm1, %v16028_v53, %v2469_v6  ;;  %v16029_v29 = vrot.slane %v11715_v45, 2 }
 0x284   : > { %v2204_v5 = vpop.f32.mrb[27].mxu0  ;;  %v11873_v26 = vadd.f32 %v7187_v3, %v11577_v22  ;;  %v11893_v3 = vsel %vm609_vm0, %v15640_v4, %v15638_v46  ;;  %v2396_v32 = vsel %vm609_vm0, %v16040_v40, 0.0  ;;  %v16041_v40 = vrot.slane %v11800_v44, 7 }
 0x285   : > { %16020 = vst [vmem:[#allocation57_spill] sm:$0xff] %v11893_v3  ;;  %v11912_v38 = vadd.f32 %v11577_v22, %v2204_v5  ;;  %v11923_v46 = vsel %vm609_vm0, 0.0, %v16024_v21  ;;  %v16026_v5 = vrot.slane %v11870_v41, 7  ;;  %v11941_v17 = vsel %vm952_vm2, %v16029_v29, %v2640_v50  ;;  %8101 = vrot.lane.b32.xlu0 %v11917_v20, %s9596_s25  ;;  %8091 = vrot.lane.b32.xlu1 %v11917_v20, %s9590_s22 }
 0x286   : > { %v15644_v47 = vrot.slane %v11873_v26, 7  ;;  %16025 = vst [vmem:[#allocation60_spill] sm:$0xff] %v11923_v46  ;;  %v16030_v21 = vrot.slane %v11729_v9, 1  ;;  %v15647_v6 = vrot.slane %v11908_v28, 7  ;;  %v11959_v29 = vpack.i.bf16 %v11679_v54, %v11772_v48 }
 0x287   : > { %v15648_v53 = vrot.slane %v11912_v38, 7  ;;  %v12034_v13 = vsel %vm609_vm0, 0.0, %v16041_v40  ;;  %v16047_v40 = vrot.slane %v11780_v35, 1 }
 0x288   : > { %v11930_v4 = vsel %vm609_vm0, %v16026_v5, %v15644_v47  ;;  %v11946_v11 = vsel %vm775_vm1, %v16030_v21, %v2464_v30  ;;  %v16031_v5 = vrot.slane %v11749_v12, 7  ;;  %v16032_v21 = vrot.slane %v11729_v9, 2  ;;  %16042 = vst [vmem:[#allocation65_spill] sm:$0xff] %v12034_v13 }
 0x289   : > { %v7190_v7 = vpop.f32.mrb[28].mxu0  ;;  %16027 = vst [vmem:[#allocation61_spill] sm:$0xff] %v11930_v4  ;;  %v16035_v47 = vrot.slane %v11767_v43, 1  ;;  %8111 = vrot.lane.b32.xlu0 %v11959_v29, %s9592_s24 }
 0x28a   : > { %v2217_v37 = vpop.f32.mrb[29].mxu0  ;;  %v2394_v19 = vsel %vm609_vm0, %v16031_v5, 0.0  ;;  %v11962_v30 = vadd.f32 %v7190_v7, %v11577_v22  ;;  %v11967_v12 = vsel %vm952_vm2, %v16032_v21, %v2635_v60  ;;  %v11976_v5 = vsel %vm609_vm0, %v15647_v6, %v15648_v53 }
 0x28b   : > { %v7191_v8 = vpop.f32.mrb[30].mxu0  ;;  %16033 = vst [vmem:[#allocation62_spill] sm:$0xff] %v11976_v5  ;;  %v16034_v7 = vrot.slane %v11672_v16, 1  ;;  %v16036_v21 = vrot.slane %v11746_v33, 7  ;;  %v2479_v2 = vrot.slane %v2394_v19, 1  ;;  %v16038_v6 = vrot.slane %v11753_v42, 7 }
 0x28c   : > { %v2220_v14 = vpop.f32.mrb[31].mxu0  ;;  %v11979_v50 = vadd.f32 %v7191_v8, %v11577_v22  ;;  %v15652_v33 = vrot.slane %v11962_v30, 7  ;;  %v12005_v61 = vadd.f32 %v11577_v22, %v2217_v37  ;;  %v16045_v37 = vrot.slane %v11672_v16, 2 }
 0x28d   : > { %v2458_v60 = vsel %vm775_vm1, %v16035_v47, %v16034_v7  ;;  %v11989_v36 = vsel %vm609_vm0, 0.0, %v16036_v21  ;;  %v2393_v53 = vsel %vm609_vm0, %v16038_v6, 0.0  ;;  %v12000_v47 = vpack.i.bf16 %v11672_v16, %v11767_v43 }
 0x28e   : > { %16037 = vst [vmem:[#allocation63_spill] sm:$0xff] %v11989_v36  ;;  %v15651_v7 = vrot.slane %v11979_v50, 7  ;;  %v2650_v21 = vrot.slane %v2394_v19, 2  ;;  %v12008_v42 = vpack.i.bf16 %v11832_v39, %v2458_v60  ;;  %v12011_v6 = vadd.f32 %v11577_v22, %v2220_v14 }
 0x28f   : > { %v2474_v62 = vrot.slane %v2393_v53, 1  ;;  %8106 = vrot.lane.b32.xlu1 %v12000_v47, %s9592_s24  ;;  %v2645_v19 = vrot.slane %v2393_v53, 2  ;;  %v16043_v60 = vrot.slane %v11819_v23, 7  ;;  %v2316_v14 = vrot.slane %v12005_v61, 7 }
 0x290   : > { %16039 = vst [vmem:[#allocation64_spill] sm:$0xff] %v12008_v42  ;;  %v12024_v39 = vsel %vm609_vm0, %v15652_v33, %v15651_v7  ;;  %8116 = vrot.lane.b32.xlu0 %v12008_v42, %s9588_s20  ;;  %v2489_v33 = vrot.slane %v2396_v32, 1  ;;  %v2317_v53 = vrot.slane %v12011_v6, 7  ;;  %v16046_v8 = vrot.slane %v11767_v43, 2 }
 0x291   : > { %v12039_v7 = vsel %vm609_vm0, 0.0, %v16043_v60  ;;  %v12052_v23 = vsel %vm775_vm1, %v16047_v40, %v2479_v2  ;;  %v16048_v60 = vrot.slane %v11780_v35, 2  ;;  %v16049_v61 = vrot.slane %v11797_v24, 1 }
 0x292   : > { %16044 = vst [vmem:[#allocation66_spill] sm:$0xff] %v12039_v7  ;;  %v2629_v44 = vsel %vm952_vm2, %v16046_v8, %v16045_v37  ;;  %v16051_v2 = vrot.slane %v11827_v52, 7  ;;  %v16055_v43 = vrot.slane %v11797_v24, 2  ;;  %v16056_v37 = vrot.slane %v11844_v57, 1 }
 0x293   : > { %v12057_v22 = vsel %vm952_vm2, %v16048_v60, %v2650_v21  ;;  %v12062_v6 = vsel %vm775_vm1, %v16049_v61, %v2474_v62  ;;  %8126 = vrot.lane.b32.xlu1 %v12008_v42, %s9594_s18  ;;  %v12067_v8 = vpack.i.bf16 %v11837_v25, %v2629_v44  ;;  %v12074_v21 = vsel %vm609_vm0, %v2316_v14, %v2317_v53 }
 0x294   : > { %v2395_v40 = vsel %vm609_vm0, %v16051_v2, 0.0  ;;  %16052 = vst [vmem:[#allocation68_spill] sm:$0xff] %v12074_v21  ;;  %v16053_v60 = vrot.slane %v11679_v54, 1  ;;  %v16054_v62 = vrot.slane %v11772_v48, 1  ;;  %v12084_v25 = vsel %vm952_vm2, %v16055_v43, %v2645_v19 }
 0x295   : > { %16050 = vst [vmem:[#allocation67_spill] sm:$0xff] %v12067_v8  ;;  %8121 = vrot.lane.b32.xlu0 %v12067_v8, %s9590_s22  ;;  %v12094_v16 = vsel %vm775_vm1, %v16056_v37, %v2489_v33  ;;  %v2484_v19 = vrot.slane %v2395_v40, 1  ;;  %v16057_v44 = vrot.slane %v11873_v26, 7  ;;  %v2655_v33 = vrot.slane %v2395_v40, 2 }
 0x296   : > { %v2453_v61 = vsel %vm775_vm1, %v16054_v62, %v16053_v60  ;;  %v2660_v62 = vrot.slane %v2396_v32, 2  ;;  %v16059_v37 = vrot.slane %v11912_v38, 7  ;;  %v16060_v43 = vrot.slane %v11679_v54, 2 }
 0x297   : > { %v2398_v52 = vsel %vm609_vm0, %v16057_v44, 0.0  ;;  %8131 = vrot.lane.b32.xlu1 %v12067_v8, %s9596_s25  ;;  %v12104_v2 = vpack.i.bf16 %v11850_v1, %v2453_v61  ;;  %v16061_v60 = vrot.slane %v11772_v48, 2  ;;  %v16062_v44 = vrot.slane %v11870_v41, 7 }
 0x298   : > { %v2397_v32 = vsel %vm609_vm0, %v16059_v37, 0.0  ;;  %v16064_v1 = vrot.slane %v11908_v28, 7  ;;  %v2499_v40 = vrot.slane %v2398_v52, 1  ;;  %v2670_v51 = vrot.slane %v2398_v52, 2 }
 0x299   : > { %16058 = vst [vmem:[#allocation69_spill] sm:$0xff] %v12104_v2  ;;  %v2624_v26 = vsel %vm952_vm2, %v16061_v60, %v16060_v43  ;;  %v12118_v63 = vsel %vm609_vm0, 0.0, %v16062_v44  ;;  %8146 = vrot.lane.b32.xlu0 %v12104_v2, %s9594_s18  ;;  %v2494_v41 = vrot.slane %v2397_v32, 1  ;;  %v2665_v44 = vrot.slane %v2397_v32, 2 }
 0x29a   : > { %16063 = vst [vmem:[#allocation70_spill] sm:$0xff] %v12118_v63  ;;  %v12123_v61 = vsel %vm609_vm0, 0.0, %v16064_v1  ;;  %v12134_v28 = vpack.i.bf16 %v11855_v10, %v2624_v26  ;;  %v16067_v1 = vrot.slane %v11844_v57, 2  ;;  %v16068_v37 = vrot.slane %v11893_v3, 1 }
 0x29b   : > { %16065 = vst [vmem:[#allocation71_spill] sm:$0xff] %v12123_v61  ;;  %8136 = vrot.lane.b32.xlu1 %v12104_v2, %s9588_s20  ;;  %v16069_v60 = vrot.slane %v11893_v3, 2  ;;  %v2496_v43 = vrot.slane %v12118_v63, 1  ;;  %v2491_v26 = vrot.slane %v12123_v61, 1  ;;  %v2399_v48 = vsel %vm609_vm0, %v2317_v53, 0.0 }
 0x29c   : > { %16066 = vst [vmem:[#allocation72_spill] sm:$0xff] %v12134_v28  ;;  %v12139_v38 = vsel %vm952_vm2, %v16067_v1, %v2660_v62  ;;  %v12144_v52 = vsel %vm775_vm1, %v16068_v37, %v2484_v19  ;;  %v2662_v62 = vrot.slane %v12123_v61, 2  ;;  %v16070_v19 = vrot.slane %v11930_v4, 1 }
 0x29d   : > { %v12149_v32 = vsel %vm952_vm2, %v16069_v60, %v2655_v33  ;;  %8151 = vrot.lane.b32.xlu0 %v12134_v28, %s9596_s25  ;;  %v16071_v33 = vrot.slane %v11930_v4, 2  ;;  %v16072_v1 = vrot.slane %v11962_v30, 7  ;;  %v16073_v53 = vrot.slane %v11976_v5, 1 }
 0x29e   : > { %v12161_v37 = vsel %vm775_vm1, %v16070_v19, %v2499_v40  ;;  %v16074_v15 = vrot.slane %v11976_v5, 2  ;;  %v16075_v40 = vrot.slane %v11979_v50, 7  ;;  %v12191_v30 = vsel %vm609_vm0, 0.0, %v2316_v14 }
 0x29f   : > { %v12166_v60 = vsel %vm952_vm2, %v16071_v33, %v2670_v51  ;;  %v2384_v10 = vsel %vm609_vm0, 0.0, %v16072_v1  ;;  %v12174_v54 = vsel %vm775_vm1, %v16073_v53, %v2494_v41  ;;  %8141 = vrot.lane.b32.xlu1 %v12134_v28, %s9590_s22  ;;  %v12188_v51 = vpack.i.bf16 %v11729_v9, %v11883_v58  ;;  %16077 = vst [vmem:[#allocation75_spill] sm:$0xff] %v12191_v30 }
 0x2a0   : > { %v12179_v55 = vsel %vm952_vm2, %v16074_v15, %v2665_v44  ;;  %v2400_v19 = vsel %vm609_vm0, %v16075_v40, 0.0  ;;  %v2502_v41 = vrot.slane %v12074_v21, 1  ;;  %v2504_v33 = vrot.slane %v2399_v48, 1 }
 0x2a1   : > { %16076 = vst [vmem:[#allocation73_spill] sm:$0xff] %v12188_v51  ;;  %v16078_v15 = vrot.slane %v11715_v45, 1  ;;  %v16079_v44 = vrot.slane %v11878_v0, 1  ;;  %v2871_v1 = vrot.slane %v2384_v10, 1  ;;  %v2673_v53 = vrot.slane %v12074_v21, 2  ;;  %8161 = vrot.lane.b32.xlu0 %v12188_v51, %s9592_s24 }
 0x2a2   : > { %v2675_v40 = vrot.slane %v2399_v48, 2  ;;  %v12204_v14 = vpack.i.bf16 %v11715_v45, %v11878_v0  ;;  %v2972_v8 = vrot.slane %v2384_v10, 2  ;;  %v2872_v42 = vrot.slane %v12024_v39, 1 }
 0x2a3   : > { %v2468_v50 = vsel %vm775_vm1, %v16079_v44, %v16078_v15  ;;  %v2874_v18 = vrot.slane %v2400_v19, 1  ;;  %v16081_v28 = vrot.slane %v11878_v0, 2  ;;  %v2501_v44 = vrot.slane %v12191_v30, 1 }
 0x2a4   : > { %v2973_v48 = vrot.slane %v12024_v39, 2  ;;  %8156 = vrot.lane.b32.xlu1 %v12204_v14, %s9592_s24  ;;  %v12217_v56 = vpack.i.bf16 %v11936_v27, %v2468_v50  ;;  %v16082_v2 = vrot.slane %v11729_v9, 1  ;;  %v2672_v0 = vrot.slane %v12191_v30, 2 }
 0x2a5   : > { %v2639_v15 = vsel %vm952_vm2, %v16081_v28, %v16080_v31  ;;  %v2975_v20 = vrot.slane %v2400_v19, 2  ;;  %v2505_v31 = vsel %vm775_vm1, %v2502_v41, %v2504_v33  ;;  %v16084_v28 = vrot.slane %v11729_v9, 2 }
 0x2a6   : > { %v2463_v45 = vsel %vm775_vm1, %v16083_v49, %v16082_v2  ;;  %v16085_v51 = vrot.slane %v11883_v58, 2  ;;  %v2676_v27 = vsel %vm952_vm2, %v2673_v53, %v2675_v40  ;;  %8166 = vrot.lane.b32.xlu0 %v12217_v56, %s9588_s20  ;;  %v12235_v50 = vpack.i.bf16 %v11941_v17, %v2639_v15 }
 0x2a7   : > { %v12238_v49 = vpack.i.bf16 %v12024_v39, %v2384_v10  ;;  %v12241_v2 = vpack.i.bf16 %v11946_v11, %v2463_v45  ;;  %v2873_v19 = vsel %vm775_vm1, %v2871_v1, %v2872_v42  ;;  %v2875_v33 = vsel %vm775_vm1, %v2872_v42, %v2874_v18 }
 0x2a8   : > { %v2634_v34 = vsel %vm952_vm2, %v16085_v51, %v16084_v28  ;;  %8176 = vrot.lane.b32.xlu1 %v12217_v56, %s9594_s18  ;;  %v12250_v40 = vpack.i.bf16 %v2875_v33, %v2873_v19  ;;  %v2974_v17 = vsel %vm952_vm2, %v2972_v8, %v2973_v48  ;;  %v16086_v39 = vrot.slane %v11780_v35, 1  ;;  %v16112_v9 = vld [vmem:[#allocation73_spill] sm:$0xff] }
 0x2a9   : > { %v12248_v51 = vpack.i.bf16 %v11967_v12, %v2634_v34  ;;  %v16087_v10 = vrot.slane %v11923_v46, 1  ;;  %v16088_v11 = vrot.slane %v11780_v35, 2  ;;  %v16089_v18 = vrot.slane %v11923_v46, 2 }
 0x2aa   : > { %v16090_v1 = vrot.slane %v11797_v24, 1  ;;  %v16091_v34 = vrot.slane %v11989_v36, 1  ;;  %v2976_v8 = vsel %vm952_vm2, %v2973_v48, %v2975_v20  ;;  %8171 = vrot.lane.b32.xlu0 %v12235_v50, %s9590_s22  ;;  %v16092_v15 = vrot.slane %v11797_v24, 2 }
 0x2ab   : > { %v2478_v45 = vsel %vm775_vm1, %v16087_v10, %v16086_v39  ;;  %v2649_v42 = vsel %vm952_vm2, %v16089_v18, %v16088_v11  ;;  %v16093_v28 = vrot.slane %v11989_v36, 2  ;;  %v16094_v33 = vrot.slane %v11844_v57, 1 }
 0x2ac   : > { %v2473_v12 = vsel %vm775_vm1, %v16091_v34, %v16090_v1  ;;  %v16095_v39 = vrot.slane %v12034_v13, 1  ;;  %v16096_v11 = vrot.slane %v11844_v57, 2  ;;  %v16097_v18 = vrot.slane %v12034_v13, 2  ;;  %8181 = vrot.lane.b32.xlu1 %v12235_v50, %s9596_s25 }
 0x2ad   : > { %v2644_v19 = vsel %vm952_vm2, %v16093_v28, %v16092_v15  ;;  %v12286_v48 = vpack.i.bf16 %v2976_v8, %v2974_v17  ;;  %v16098_v1 = vrot.slane %v11893_v3, 1  ;;  %v16099_v34 = vrot.slane %v12039_v7, 1 }
 0x2ae   : > { %v2488_v10 = vsel %vm775_vm1, %v16095_v39, %v16094_v33  ;;  %v2659_v20 = vsel %vm952_vm2, %v16097_v18, %v16096_v11  ;;  %v16100_v28 = vrot.slane %v11893_v3, 2  ;;  %v16101_v58 = vrot.slane %v12039_v7, 2  ;;  %8196 = vrot.lane.b32.xlu0 %v12241_v2, %s9594_s18 }
 0x2af   : > { %v2483_v15 = vsel %vm775_vm1, %v16099_v34, %v16098_v1  ;;  %v16102_v39 = vrot.slane %v11930_v4, 1  ;;  %v16103_v8 = vrot.slane %v11976_v5, 1  ;;  %v16104_v18 = vrot.slane %v11976_v5, 2 }
 0x2b0   : > { %v2654_v33 = vsel %vm952_vm2, %v16101_v58, %v16100_v28  ;;  %v12312_v58 = vpack.i.bf16 %v12062_v6, %v2473_v12  ;;  %v12315_v34 = vpack.i.bf16 %v12052_v23, %v2478_v45  ;;  %v12318_v28 = vpack.i.bf16 %v12084_v25, %v2644_v19  ;;  %8186 = vrot.lane.b32.xlu1 %v12241_v2, %s9588_s20 }
 0x2b1   : > { %v2498_v17 = vsel %vm775_vm1, %v2496_v43, %v16102_v39  ;;  %v2493_v11 = vsel %vm775_vm1, %v2491_v26, %v16103_v8  ;;  %v2664_v1 = vsel %vm952_vm2, %v2662_v62, %v16104_v18  ;;  %v16105_v43 = vrot.slane %v11930_v4, 2 }
 0x2b2   : > { %v16106_v26 = vrot.slane %v12118_v63, 2  ;;  %v2503_v62 = vsel %vm775_vm1, %v2501_v44, %v2502_v41  ;;  %v12329_v6 = vpack.i.bf16 %v12057_v22, %v2649_v42  ;;  %v12332_v23 = vpack.i.bf16 %v12144_v52, %v2483_v15  ;;  %8201 = vrot.lane.b32.xlu0 %v12248_v51, %s9596_s25 }
 0x2b3   : > { %v2674_v25 = vsel %vm952_vm2, %v2672_v0, %v2673_v53  ;;  %v12336_v45 = vpack.i.bf16 %v12094_v16, %v2488_v10  ;;  %v12339_v12 = vpack.i.bf16 %v12149_v32, %v2654_v33  ;;  %v12342_v19 = vpack.i.bf16 %v12139_v38, %v2659_v20 }
 0x2b4   : > { %v2669_v39 = vsel %vm952_vm2, %v16106_v26, %v16105_v43  ;;  %v12347_v22 = vpack.i.bf16 %v12174_v54, %v2493_v11  ;;  %v12350_v52 = vpack.i.bf16 %v12161_v37, %v2498_v17  ;;  %v12353_v0 = vpack.i.bf16 %v12179_v55, %v2664_v1  ;;  %8191 = vrot.lane.b32.xlu1 %v12248_v51, %s9590_s22  ;;  %v12382_v37 = vpop.permute.xlu0 %7986 }
 0x2b5   : > { %v12356_v16 = vpack.i.bf16 %v12166_v60, %v2669_v39  ;;  %v12358_v32 = vpack.i.bf16 %v2505_v31, %v2503_v62  ;;  %v12364_v38 = vpack.i.bf16 %v11797_v24, %v11989_v36  ;;  %v12366_v54 = vpack.i.bf16 %v2676_v27, %v2674_v25 }
 0x2b6   : > { %v12372_v55 = vpack.i.bf16 %v11780_v35, %v11923_v46  ;;  %v12398_v41 = vpack.i.bf16 %v11893_v3, %v12039_v7  ;;  %v12404_v53 = vpack.i.bf16 %v11844_v57, %v12034_v13  ;;  %v12444_v8 = vpack.i.bf16 %v11976_v5, %v12123_v61  ;;  %v9244_v13 = vld [vmem:[%s15478_s3 + $0x8] sm:$0xff]  }
 0x2b7   : > { %8211 = vrot.lane.b32.xlu0 %v12364_v38, %s9592_s24  ;;  %v12450_v11 = vpack.i.bf16 %v11930_v4, %v12118_v63  ;;  %v12486_v5 = vpack.i.bf16 %v12074_v21, %v12191_v30  ;;  %v9243_v21 = vld [vmem:[%s15478_s3] sm:$0xff]  }
 0x2b8   : > { %8206 = vrot.lane.b32.xlu1 %v12372_v55, %s9592_s24  ;;  %v12390_v60 = vpop.permute.xlu0 %7991  ;;  %7192 = vmatprep.subr.bf16.mxu1 %v9243_v21 }
 0x2b9   : > { %7193 = vmatpush3.bf16.msra.mxu1 %v9243_v21  ;;  %v9245_v21 = vld [vmem:[%s15478_s3 + $0x10] sm:$0xff]  }
 0x2ba   : > { %7194 = vmatprep.subr.bf16.mxu1 %v9244_v13 }
 0x2bb   : > { %8216 = vrot.lane.b32.xlu0 %v12315_v34, %s9588_s20 }
 0x2bc   : > { %8226 = vrot.lane.b32.xlu1 %v12315_v34, %s9594_s18 }
 0x2bd   : > { %7195 = vmatpush3.bf16.msra.mxu1 %v9244_v13 }
 0x2be   : > { %7196 = vmatprep.subr.bf16.mxu1 %v9245_v21 }
 0x2bf   : > { %8221 = vrot.lane.b32.xlu0 %v12329_v6, %s9590_s22 }
 0x2c0   : > { %8231 = vrot.lane.b32.xlu1 %v12329_v6, %s9596_s25 }
 0x2c1   : > { %7197 = vmatpush3.bf16.msra.mxu1 %v9245_v21  ;;  %v16111_v21 = vld [vmem:[#allocation56_spill] sm:$0xff] }
 0x2c3   : > { %8246 = vrot.lane.b32.xlu0 %v12312_v58, %s9594_s18 }
 0x2c4   : > { %8236 = vrot.lane.b32.xlu1 %v12312_v58, %s9588_s20 }
 0x2c7   : > { %8251 = vrot.lane.b32.xlu0 %v12318_v28, %s9596_s25 }
 0x2c8   : > { %8241 = vrot.lane.b32.xlu1 %v12318_v28, %s9590_s22 }
 0x2cb   : > { %8261 = vrot.lane.b32.xlu0 %v12398_v41, %s9592_s24 }
 0x2cc   : > { %8256 = vrot.lane.b32.xlu1 %v12404_v53, %s9592_s24 }
 0x2cd   : > { %v12406_v44 = vpop.permute.xlu0 %8001  ;;  %v12410_v31 = vpop.permute.xlu1 %7996 }
 0x2cf   : > { %8266 = vrot.lane.b32.xlu0 %v12336_v45, %s9588_s20 }
 0x2d0   : > { %8276 = vrot.lane.b32.xlu1 %v12336_v45, %s9594_s18 }
 0x2d1   : > { %v12414_v27 = vpop.permute.xlu0 %8006  ;;  %v12418_v42 = vpop.permute.xlu1 %8021 }
 0x2d3   : > { %8271 = vrot.lane.b32.xlu0 %v12342_v19, %s9590_s22 }
 0x2d4   : > { %8281 = vrot.lane.b32.xlu1 %v12342_v19, %s9596_s25 }
 0x2d5   : > { %v12422_v10 = vpop.permute.xlu0 %8011  ;;  %v12428_v20 = vpop.permute.xlu1 %8026 }
 0x2d7   : > { %8296 = vrot.lane.b32.xlu0 %v12332_v23, %s9594_s18 }
 0x2d8   : > { %8286 = vrot.lane.b32.xlu1 %v12332_v23, %s9588_s20 }
 0x2d9   : > { %v12430_v15 = vpop.permute.xlu0 %8016  ;;  %v12436_v33 = vpop.permute.xlu1 %8031 }
 0x2db   : > { %8301 = vrot.lane.b32.xlu0 %v12339_v12, %s9596_s25 }
 0x2dc   : > { %8291 = vrot.lane.b32.xlu1 %v12339_v12, %s9590_s22 }
 0x2dd   : > { %v12438_v17 = vpop.permute.xlu0 %8041  ;;  %v12452_v18 = vpop.permute.xlu1 %8036 }
 0x2df   : > { %8311 = vrot.lane.b32.xlu0 %v12444_v8, %s9592_s24 }
 0x2e0   : > { %8306 = vrot.lane.b32.xlu1 %v12450_v11, %s9592_s24 }
 0x2e1   : > { %v12456_v1 = vpop.permute.xlu0 %8046  ;;  %v12460_v43 = vpop.permute.xlu1 %8051 }
 0x2e3   : > { %8316 = vrot.lane.b32.xlu0 %v12350_v52, %s9588_s20 }
 0x2e4   : > { %8326 = vrot.lane.b32.xlu1 %v12350_v52, %s9594_s18 }
 0x2e5   : > { %v12466_v26 = vpop.permute.xlu0 %8056  ;;  %v12470_v39 = vpop.permute.xlu1 %8061 }
 0x2e7   : > { %8321 = vrot.lane.b32.xlu0 %v12356_v16, %s9590_s22 }
 0x2e8   : > { %8331 = vrot.lane.b32.xlu1 %v12356_v16, %s9596_s25 }
 0x2e9   : > { %v12476_v62 = vpop.permute.xlu0 %8066  ;;  %v12478_v25 = vpop.permute.xlu1 %8076 }
 0x2eb   : > { %8346 = vrot.lane.b32.xlu0 %v12347_v22, %s9594_s18 }
 0x2ec   : > { %8336 = vrot.lane.b32.xlu1 %v12347_v22, %s9588_s20 }
 0x2ee   : > { %v12490_v61 = vpop.permute.xlu0 %8071  ;;  %v12492_v63 = vpop.permute.xlu1 %8081 }
 0x2ef   : > { %8351 = vrot.lane.b32.xlu0 %v12353_v0, %s9596_s25 }
 0x2f0   : > { %8341 = vrot.lane.b32.xlu1 %v12353_v0, %s9590_s22 }
 0x2f3   : > { %8361 = vrot.lane.b32.xlu0 %v12486_v5, %s9592_s24  ;;  %v12498_v4 = vpop.permute.xlu0 %8096  ;;  %v12502_v30 = vpop.permute.xlu1 %8086 }
 0x2f4   : > { %8356 = vrot.lane.b32.xlu1 %v12238_v49, %s9592_s24 }
 0x2f7   : > { %8386 = vrot.lane.b32.xlu0 %v12358_v32, %s9594_s18  ;;  %v12509_v3 = vpop.permute.xlu0 %8101  ;;  %v12516_v57 = vpop.permute.xlu1 %8091 }
 0x2f8   : > { %8366 = vrot.lane.b32.xlu1 %v12250_v40, %s9594_s18 }
 0x2fb   : > { %8391 = vrot.lane.b32.xlu0 %v12366_v54, %s9596_s25  ;;  %v12520_v7 = vpop.permute.xlu0 %8111 }
 0x2fc   : > { %8371 = vrot.lane.b32.xlu1 %v12286_v48, %s9596_s25 }
 0x2ff   : > { %8396 = vrot.lane.b32.xlu0 %v11719_v59, %s9595_s23  ;;  %v9246_v59 = vld [vmem:[%s15478_s3 + $0x18] sm:$0xff]  }
 0x300   : > { %8376 = vrot.lane.b32.xlu1 %v12358_v32, %s9588_s20  ;;  %7198 = vmatprep.subr.bf16.mxu1 %v9246_v59 }
 0x301   : > { %v12527_v46 = vpop.permute.xlu1 %8106  ;;  %7199 = vmatpush3.bf16.msra.mxu1 %v9246_v59  ;;  %v16114_v59 = vld [vmem:[#allocation59_spill] sm:$0xff] }
 0x302   : > { %v12531_v35 = vpop.permute.xlu0 %8116 }
 0x303   : > { %8406 = vrot.lane.b32.xlu0 %v12000_v47, %s9595_s23  ;;  %16107 = vst [vmem:[#allocation76_spill] sm:$0xff] %v12531_v35  ;;  %v9247_v47 = vld [vmem:[%s15478_s3 + $0x20] ss:$0 sps:$4 sm:$0xff]   ;;  %v16121_v35 = vld [vmem:[#allocation72_spill] sm:$0xff] }
 0x304   : > { %8381 = vrot.lane.b32.xlu1 %v12366_v54, %s9590_s22  ;;  %7319 = vmatprep.subr.msk.bf16.mxu1 %vm3719_vm13, %v9247_v47 }
 0x305   : > { %v12538_v13 = vpop.permute.xlu1 %8126 }
 0x306   : > { %16108 = vst [vmem:[#allocation77_spill] sm:$0xff] %v12538_v13 }
 0x307   : > { %8416 = vrot.lane.b32.xlu0 %v12204_v14, %s9595_s23  ;;  %v12547_v36 = vpop.permute.xlu0 %8121  ;;  %v3721_v14 = vsel %vm3719_vm13, %v9247_v47, 0  ;;  %v16117_v47 = vld [vmem:[#allocation69_spill] sm:$0xff] }
 0x308   : > { %8401 = vrot.lane.b32.xlu1 %v11959_v29, %s9595_s23  ;;  %16109 = vst [vmem:[#allocation78_spill] sm:$0xff] %v12547_v36  ;;  %7201 = vmatpush3.bf16.msra.mxu1 %v3721_v14 }
 0x309   : > { %v12549_v24 = vpop.permute.xlu1 %8131 }
 0x30a   : > { %16110 = vst [vmem:[#allocation79_spill] sm:$0xff] %v12549_v24  ;;  %v16115_v24 = vld [vmem:[#allocation32_spill] sm:$0xff] }
 0x30b   : > { %8426 = vrot.lane.b32.xlu0 %v16111_v21, %s9597_s28  ;;  %v12557_v13 = vpop.permute.xlu0 %8146 }
 0x30c   : > { %8411 = vrot.lane.b32.xlu1 %v16112_v9, %s9595_s23  ;;  %16113 = vst [vmem:[#allocation80_spill] sm:$0xff] %v12557_v13  ;;  %v16118_v9 = vld [vmem:[#allocation38_spill] sm:$0xff] }
 0x30d   : > { %v12559_v29 = vpop.permute.xlu1 %8136 }
 0x30f   : > { %8436 = vrot.lane.b32.xlu0 %v16114_v59, %s9598_s30  ;;  %v12565_v21 = vpop.permute.xlu0 %8151  ;;  %v16122_v59 = vld [vmem:[#allocation46_spill] sm:$0xff] }
 0x310   : > { %8421 = vrot.lane.b32.xlu1 %v16115_v24, %s9597_s28  ;;  %16116 = vst [vmem:[#allocation9_spill] sm:$0xff] %v12565_v21 }
 0x311   : > { %v12567_v36 = vpop.permute.xlu1 %8141 }
 0x313   : > { %8446 = vrot.lane.b32.xlu0 %v16117_v47, %s9597_s28  ;;  %v12573_v14 = vpop.permute.xlu0 %8161  ;;  %v16124_v47 = vld [vmem:[#allocation52_spill] sm:$0xff] }
 0x314   : > { %8431 = vrot.lane.b32.xlu1 %v16118_v9, %s9598_s30  ;;  %16119 = vst [vmem:[#allocation5_spill] sm:$0xff] %v12573_v14 }
 0x316   : > { %v12575_v13 = vpop.permute.xlu1 %8156 }
 0x317   : > { %16120 = vst [vmem:[#allocation10_spill] sm:$0xff] %v12575_v13  ;;  %8456 = vrot.lane.b32.xlu0 %v16121_v35, %s9598_s30  ;;  %v16125_v35 = vld [vmem:[#allocation64_spill] sm:$0xff] }
 0x318   : > { %8441 = vrot.lane.b32.xlu1 %v16122_v59, %s9597_s28  ;;  %v12581_v24 = vpop.permute.xlu0 %8166 }
 0x31a   : > { %v12583_v21 = vpop.permute.xlu1 %8176 }
 0x31b   : > { %16123 = vst [vmem:[#allocation81_spill] sm:$0xff] %v12583_v21  ;;  %8466 = vrot.lane.b32.xlu0 %v12241_v2, %s9597_s28  ;;  %v16126_v2 = vld [vmem:[#allocation67_spill] sm:$0xff] }
 0x31c   : > { %8451 = vrot.lane.b32.xlu1 %v16124_v47, %s9598_s30  ;;  %v12589_v9 = vpop.permute.xlu0 %8171 }
 0x31e   : > { %v12591_v14 = vpop.permute.xlu1 %8181 }
 0x31f   : > { %8476 = vrot.lane.b32.xlu0 %v12248_v51, %s9598_s30 }
 0x320   : > { %8461 = vrot.lane.b32.xlu1 %v16125_v35, %s9597_s28  ;;  %v12597_v59 = vpop.permute.xlu0 %8196 }
 0x322   : > { %v12599_v13 = vpop.permute.xlu1 %8186 }
 0x323   : > { %8486 = vrot.lane.b32.xlu0 %v12217_v56, %s9597_s28 }
 0x324   : > { %8471 = vrot.lane.b32.xlu1 %v16126_v2, %s9598_s30  ;;  %v12605_v47 = vpop.permute.xlu0 %8201 }
 0x326   : > { %v12607_v21 = vpop.permute.xlu1 %8191 }
 0x327   : > { %8496 = vrot.lane.b32.xlu0 %v12235_v50, %s9598_s30 }
 0x328   : > { %8481 = vrot.lane.b32.xlu1 %v12364_v38, %s9595_s23 }
 0x329   : > { %v12613_v51 = vpop.permute.xlu0 %8211 }
 0x32a   : > { %v12615_v35 = vpop.permute.xlu1 %8206 }
 0x32b   : > { %8506 = vrot.lane.b32.xlu0 %v12372_v55, %s9595_s23 }
 0x32c   : > { %8491 = vrot.lane.b32.xlu1 %v12312_v58, %s9597_s28 }
 0x32d   : > { %v12621_v56 = vpop.permute.xlu0 %8216 }
 0x32e   : > { %v12623_v2 = vpop.permute.xlu1 %8226 }
 0x32f   : > { %8516 = vrot.lane.b32.xlu0 %v12315_v34, %s9597_s28 }
 0x330   : > { %8501 = vrot.lane.b32.xlu1 %v12318_v28, %s9598_s30 }
 0x331   : > { %v12629_v50 = vpop.permute.xlu0 %8221 }
 0x332   : > { %v12631_v38 = vpop.permute.xlu1 %8231 }
 0x333   : > { %16127 = vst [vmem:[#allocation12_spill] sm:$0xff] %v12631_v38  ;;  %8526 = vrot.lane.b32.xlu0 %v12329_v6, %s9598_s30 }
 0x334   : > { %8511 = vrot.lane.b32.xlu1 %v12398_v41, %s9595_s23 }
 0x335   : > { %v12637_v58 = vpop.permute.xlu0 %8246 }
 0x336   : > { %v12639_v55 = vpop.permute.xlu1 %8236 }
 0x337   : > { %8536 = vrot.lane.b32.xlu0 %v12404_v53, %s9595_s23 }
 0x338   : > { %8521 = vrot.lane.b32.xlu1 %v12332_v23, %s9597_s28 }
 0x339   : > { %v12645_v34 = vpop.permute.xlu0 %8251 }
 0x33a   : > { %v12647_v28 = vpop.permute.xlu1 %8241 }
 0x33b   : > { %8546 = vrot.lane.b32.xlu0 %v12336_v45, %s9597_s28 }
 0x33c   : > { %8531 = vrot.lane.b32.xlu1 %v12339_v12, %s9598_s30 }
 0x33d   : > { %v12653_v6 = vpop.permute.xlu0 %8261 }
 0x33e   : > { %v12655_v41 = vpop.permute.xlu1 %8256 }
 0x33f   : > { %16128 = vst [vmem:[#allocation6_spill] sm:$0xff] %v12655_v41  ;;  %8556 = vrot.lane.b32.xlu0 %v12342_v19, %s9598_s30  ;;  %v7989_v19 = vunpack.i.h.bf16 %v12382_v37  ;;  %v8039_v41 = vunpack.i.h.bf16 %v12452_v18 }
 0x340   : > { %8541 = vrot.lane.b32.xlu1 %v12444_v8, %s9595_s23  ;;  %v7988_v8 = vunpack.i.l.bf16 %v12382_v37 }
 0x341   : > { %v12661_v23 = vpop.permute.xlu0 %8266 }
 0x342   : > { %16129 = vst [vmem:[#allocation82_spill] sm:$0xff] %v12661_v23  ;;  %v12663_v53 = vpop.permute.xlu1 %8276  ;;  %v16136_v23 = vld [vmem:[#allocation3_spill] sm:$0xff] }
 0x343   : > { %16130 = vst [vmem:[#allocation83_spill] sm:$0xff] %v12663_v53  ;;  %8566 = vrot.lane.b32.xlu0 %v12450_v11, %s9595_s23  ;;  %v3361_v37 = vsel %vm1750_vm5, %v16136_v23, %v7988_v8  ;;  %v7999_v8 = vunpack.i.h.bf16 %v12410_v31 }
 0x344   : > { %8551 = vrot.lane.b32.xlu1 %v12347_v22, %s9597_s28  ;;  %v7994_v22 = vunpack.i.h.bf16 %v12390_v60 }
 0x345   : > { %v12669_v45 = vpop.permute.xlu0 %8271 }
 0x346   : > { %16131 = vst [vmem:[#allocation84_spill] sm:$0xff] %v12669_v45  ;;  %v12671_v12 = vpop.permute.xlu1 %8281  ;;  %v16135_v45 = vld [vmem:[#allocation2_spill] sm:$0xff] }
 0x347   : > { %16132 = vst [vmem:[#allocation85_spill] sm:$0xff] %v12671_v12  ;;  %8576 = vrot.lane.b32.xlu0 %v12350_v52, %s9597_s28  ;;  %v7993_v12 = vunpack.i.l.bf16 %v12390_v60  ;;  %v3362_v52 = vsel %vm1750_vm5, %v16135_v45, %v7989_v19  ;;  %v8038_v60 = vunpack.i.l.bf16 %v12452_v18  ;;  %v8008_v45 = vunpack.i.l.bf16 %v12414_v27 }
 0x348   : > { %8561 = vrot.lane.b32.xlu1 %v12353_v0, %s9598_s30  ;;  %v8014_v19 = vunpack.i.h.bf16 %v12422_v10 }
 0x349   : > { %v12679_v53 = vpop.permute.xlu0 %8296  ;;  %v12705_v23 = vsel %vm1816_vm7, %v3361_v37, %v7993_v12 }
 0x34a   : > { %16133 = vst [vmem:[#allocation86_spill] sm:$0xff] %v12679_v53  ;;  %v12681_v11 = vpop.permute.xlu1 %8286  ;;  %v8034_v53 = vunpack.i.h.bf16 %v12436_v33  ;;  %16139 = vst [vmem:[#allocation11_spill] sm:$0xff] %v12705_v23 }
 0x34b   : > { %16134 = vst [vmem:[#allocation87_spill] sm:$0xff] %v12681_v11  ;;  %8586 = vrot.lane.b32.xlu0 %v12356_v16, %s9598_s30  ;;  %v8009_v11 = vunpack.i.h.bf16 %v12414_v27  ;;  %v8033_v16 = vunpack.i.l.bf16 %v12436_v33  ;;  %v8003_v33 = vunpack.i.l.bf16 %v12406_v44 }
 0x34c   : > { %8571 = vrot.lane.b32.xlu1 %v12486_v5, %s9595_s23  ;;  %v12708_v5 = vsel %vm1816_vm7, %v3362_v52, %v7994_v22  ;;  %v16142_v22 = vld [vmem:[#allocation34_spill] sm:$0xff]  ;;  %v16143_v52 = vld [vmem:[#allocation36_spill] sm:$0xff] }
 0x34d   : > { %v12693_v0 = vpop.permute.xlu0 %8301  ;;  %16140 = vst [vmem:[#allocation25_spill] sm:$0xff] %v12708_v5  ;;  %v3426_v12 = vsel %vm1882_vm9, %v12708_v5, %v8009_v11  ;;  %v3364_v27 = vsel %vm1750_vm5, %v16142_v22, %v8034_v53  ;;  %v3363_v37 = vsel %vm1750_vm5, %v16143_v52, %v8033_v16  ;;  %v8019_v53 = vunpack.i.h.bf16 %v12430_v15 }
 0x34e   : > { %16137 = vst [vmem:[#allocation23_spill] sm:$0xff] %v12693_v0  ;;  %v12700_v38 = vpop.permute.xlu1 %8291  ;;  %v8013_v0 = vunpack.i.l.bf16 %v12422_v10  ;;  %v8018_v11 = vunpack.i.l.bf16 %v12430_v15  ;;  %v8044_v16 = vunpack.i.h.bf16 %v12438_v17  ;;  %v8024_v10 = vunpack.i.h.bf16 %v12418_v42 }
 0x34f   : > { %16138 = vst [vmem:[#allocation13_spill] sm:$0xff] %v12700_v38  ;;  %8596 = vrot.lane.b32.xlu0 %v12238_v49, %s9595_s23  ;;  %v7998_v49 = vunpack.i.l.bf16 %v12410_v31  ;;  %v3425_v31 = vsel %vm1882_vm9, %v12705_v23, %v8008_v45  ;;  %v8048_v15 = vunpack.i.l.bf16 %v12456_v1  ;;  %v8029_v52 = vunpack.i.h.bf16 %v12428_v20  ;;  %v16145_v23 = vld [vmem:[#allocation33_spill] sm:$0xff] }
 0x350   : > { %8581 = vrot.lane.b32.xlu1 %v12358_v32, %s9597_s28  ;;  %v3395_v32 = vsel %vm1816_vm7, %v3363_v37, %v8038_v60  ;;  %v8023_v60 = vunpack.i.l.bf16 %v12418_v42  ;;  %v8028_v37 = vunpack.i.l.bf16 %v12428_v20  ;;  %v16144_v42 = vld [vmem:[#allocation29_spill] sm:$0xff] }
 0x351   : > { %v12716_v18 = vpop.permute.xlu0 %8311 }
 0x352   : > { %16141 = vst [vmem:[#allocation27_spill] sm:$0xff] %v12716_v18  ;;  %v3396_v18 = vsel %vm1816_vm7, %v3364_v27, %v8039_v41  ;;  %v12729_v38 = vpop.permute.xlu1 %8306  ;;  %v8043_v41 = vunpack.i.l.bf16 %v12438_v17  ;;  %v8049_v27 = vunpack.i.h.bf16 %v12456_v1  ;;  %v3366_v17 = vsel %vm1750_vm5, %v16144_v42, %v8014_v19 }
 0x353   : > { %8606 = vrot.lane.b32.xlu0 %v12250_v40, %s9597_s28  ;;  %v3427_v40 = vsel %vm1882_vm9, %v3395_v32, %v7998_v49  ;;  %v3428_v45 = vsel %vm1882_vm9, %v3396_v18, %v7999_v8  ;;  %v3398_v18 = vsel %vm1816_vm7, %v3366_v17, %v8019_v53  ;;  %v3458_v1 = vsel %vm1948_vm11, %v3426_v12, %v8044_v16  ;;  %v16146_v32 = vld [vmem:[#allocation47_spill] sm:$0xff] }
 0x354   : > { %8591 = vrot.lane.b32.xlu1 %v12366_v54, %s9598_s30  ;;  %v3365_v54 = vsel %vm1750_vm5, %v16145_v23, %v8013_v0  ;;  %v3457_v49 = vsel %vm1948_vm11, %v3425_v31, %v8043_v41  ;;  %v3459_v20 = vsel %vm1948_vm11, %v3427_v40, %v8023_v60  ;;  %v3460_v19 = vsel %vm1948_vm11, %v3428_v45, %v8024_v10 }
 0x355   : > { %v12743_v22 = vpop.permute.xlu0 %8316  ;;  %v3397_v8 = vsel %vm1816_vm7, %v3365_v54, %v8018_v11  ;;  %v3490_v23 = vsel %vm3489_vm14, %v3457_v49, %v8048_v15  ;;  %v8059_v11 = vunpack.i.h.bf16 %v12466_v26  ;;  %v8058_v53 = vunpack.i.l.bf16 %v12466_v26 }
 0x356   : > { %v12755_v5 = vpop.permute.xlu1 %8326  ;;  %v8064_v12 = vunpack.i.h.bf16 %v12470_v39  ;;  %v8063_v31 = vunpack.i.l.bf16 %v12470_v39  ;;  %v8069_v16 = vunpack.i.h.bf16 %v12476_v62  ;;  %v8068_v10 = vunpack.i.l.bf16 %v12476_v62  ;;  %v16147_v39 = vld [vmem:[#allocation4_spill] sm:$0xff] }
 0x357   : > { %8616 = vrot.lane.b32.xlu0 %v12286_v48, %s9598_s30  ;;  %v3491_v48 = vsel %vm3489_vm14, %v3458_v1, %v8049_v27  ;;  %v8054_v41 = vunpack.i.h.bf16 %v12460_v43  ;;  %v8053_v40 = vunpack.i.l.bf16 %v12460_v43  ;;  %v3492_v45 = vsel %vm3489_vm14, %v3459_v20, %v8028_v37  ;;  %v16150_v20 = vld [vmem:[#allocation40_spill] sm:$0xff] }
 0x358   : > { %8601 = vrot.lane.b32.xlu1 %v16146_v32, %s9595_s23  ;;  %v3493_v27 = vsel %vm3489_vm14, %v3460_v19, %v8029_v52  ;;  %v8089_v26 = vunpack.i.h.bf16 %v12502_v30  ;;  %v8088_v15 = vunpack.i.l.bf16 %v12502_v30  ;;  %v12790_v62 = vsel %vm3522_vm15, %v3490_v23, %v8003_v33  ;;  %v16149_v33 = vld [vmem:[#allocation37_spill] sm:$0xff] }
 0x359   : > { %v12767_v0 = vpop.permute.xlu0 %8321  ;;  %v16148_v17 = vunpack.i.h.bf16 %v12406_v44  ;;  %v3430_v37 = vsel %vm1882_vm9, %v3398_v18, %v8059_v11  ;;  %v3429_v52 = vsel %vm1882_vm9, %v3397_v8, %v8058_v53  ;;  %v8094_v54 = vunpack.i.h.bf16 %v12516_v57  ;;  %v16151_v53 = vld [vmem:[#allocation35_spill] sm:$0xff] }
 0x35a   : > { %v12777_v60 = vpop.permute.xlu1 %8331  ;;  %v8093_v30 = vunpack.i.l.bf16 %v12516_v57  ;;  %v12802_v1 = vsel %vm3522_vm15, %v3492_v45, %v8063_v31  ;;  %v12805_v49 = vsel %vm3522_vm15, %v3493_v27, %v8064_v12  ;;  %v3370_v44 = vsel %vm1750_vm5, %v16149_v33, %v8069_v16  ;;  %v16152_v31 = vld [vmem:[#allocation43_spill] sm:$0xff] }
 0x35b   : > { %v12795_v43 = vsel %vm3522_vm15, %v3491_v48, %v16148_v17  ;;  %v3369_v19 = vsel %vm1750_vm5, %v16150_v20, %v8068_v10  ;;  %v8074_v8 = vunpack.i.h.bf16 %v12490_v61  ;;  %v8073_v18 = vunpack.i.l.bf16 %v12490_v61  ;;  %v16153_v10 = vld [vmem:[#allocation42_spill] sm:$0xff] }
 0x35c   : > { %8611 = vrot.lane.b32.xlu1 %v16147_v39, %s9597_s28  ;;  %v8099_v57 = vunpack.i.h.bf16 %v12498_v4  ;;  %v8098_v23 = vunpack.i.l.bf16 %v12498_v4  ;;  %v8079_v48 = vunpack.i.h.bf16 %v12478_v25  ;;  %v8078_v11 = vunpack.i.l.bf16 %v12478_v25 }
 0x35d   : > { %v12787_v42 = vpop.permute.xlu0 %8346  ;;  %v3368_v12 = vsel %vm1750_vm5, %v16151_v53, %v8089_v26  ;;  %v3367_v16 = vsel %vm1750_vm5, %v16152_v31, %v8088_v15  ;;  %v8104_v61 = vunpack.i.h.bf16 %v12509_v3  ;;  %v8103_v27 = vunpack.i.l.bf16 %v12509_v3 }
 0x35e   : > { %v12811_v32 = vpop.permute.xlu1 %8336  ;;  %v3399_v4 = vsel %vm1816_vm7, %v3367_v16, %v8093_v30  ;;  %v3400_v39 = vsel %vm1816_vm7, %v3368_v12, %v8094_v54  ;;  %v8084_v25 = vunpack.i.h.bf16 %v12492_v63  ;;  %v8083_v26 = vunpack.i.l.bf16 %v12492_v63 }
 0x35f   : > { %v8114_v17 = vunpack.i.h.bf16 %v12520_v7  ;;  %v8113_v15 = vunpack.i.l.bf16 %v12520_v7  ;;  %v3401_v20 = vsel %vm1816_vm7, %v3369_v19, %v8073_v18  ;;  %v3402_v53 = vsel %vm1816_vm7, %v3370_v44, %v8074_v8  ;;  %v16155_v18 = vld [vmem:[#allocation76_spill] sm:$0xff] }
 0x360   : > { %8621 = vrot.lane.b32.xlu1 %v16153_v10, %s9598_s30  ;;  %v3461_v3 = vsel %vm1948_vm11, %v3429_v52, %v8098_v23  ;;  %v3462_v30 = vsel %vm1948_vm11, %v3430_v37, %v8099_v57  ;;  %v3431_v54 = vsel %vm1882_vm9, %v3399_v4, %v8053_v40  ;;  %v3432_v12 = vsel %vm1882_vm9, %v3400_v39, %v8054_v41  ;;  %v16157_v39 = vld [vmem:[#allocation39_spill] sm:$0xff] }
 0x361   : > { %v12825_v45 = vpop.permute.xlu0 %8351  ;;  %v8139_v63 = vunpack.i.h.bf16 %v12559_v29  ;;  %v8138_v31 = vunpack.i.l.bf16 %v12559_v29  ;;  %v12848_v7 = vsel %vm3489_vm14, %v3461_v3, %v8103_v27  ;;  %v12851_v19 = vsel %vm3489_vm14, %v3462_v30, %v8104_v61  ;;  %v16156_v27 = vld [vmem:[#allocation78_spill] sm:$0xff] }
 0x362   : > { %v12835_v33 = vpop.permute.xlu1 %8341  ;;  %v8144_v52 = vunpack.i.h.bf16 %v12567_v36  ;;  %v8143_v37 = vunpack.i.l.bf16 %v12567_v36  ;;  %v3433_v40 = vsel %vm1882_vm9, %v3401_v20, %v8113_v15  ;;  %v3434_v41 = vsel %vm1882_vm9, %v3402_v53, %v8114_v17  ;;  %v16158_v15 = vld [vmem:[#allocation49_spill] sm:$0xff]  ;;  %v16159_v53 = vld [vmem:[#allocation80_spill] sm:$0xff] }
 0x363   : > { %v8109_v44 = vunpack.i.h.bf16 %v12527_v46  ;;  %v8108_v29 = vunpack.i.l.bf16 %v12527_v46  ;;  %v8119_v57 = vunpack.i.h.bf16 %v16155_v18  ;;  %v8118_v23 = vunpack.i.l.bf16 %v16155_v18 }
 0x364   : > { %v3463_v10 = vsel %vm1948_vm11, %v3431_v54, %v8078_v11  ;;  %v3464_v61 = vsel %vm1948_vm11, %v3432_v12, %v8079_v48  ;;  %v8124_v36 = vunpack.i.h.bf16 %v16156_v27  ;;  %v8123_v4 = vunpack.i.l.bf16 %v16156_v27  ;;  %v16160_v54 = vld [vmem:[#allocation9_spill] sm:$0xff] }
 0x365   : > { %v12845_v16 = vpop.permute.xlu0 %8361  ;;  %v3372_v17 = vsel %vm1750_vm5, %v16157_v39, %v8139_v63  ;;  %v3371_v46 = vsel %vm1750_vm5, %v16158_v15, %v8138_v31  ;;  %v8149_v3 = vunpack.i.h.bf16 %v16159_v53  ;;  %v8148_v30 = vunpack.i.l.bf16 %v16159_v53  ;;  %v16162_v39 = vld [vmem:[#allocation41_spill] sm:$0xff]  ;;  %v16163_v53 = vld [vmem:[#allocation48_spill] sm:$0xff] }
 0x366   : > { %v12859_v8 = vpop.permute.xlu1 %8356  ;;  %v3403_v11 = vsel %vm1816_vm7, %v3371_v46, %v8143_v37  ;;  %v3404_v48 = vsel %vm1816_vm7, %v3372_v17, %v8144_v52  ;;  %v8154_v12 = vunpack.i.h.bf16 %v16160_v54  ;;  %v8153_v18 = vunpack.i.l.bf16 %v16160_v54  ;;  %v16164_v46 = vld [vmem:[#allocation77_spill] sm:$0xff] }
 0x367   : > { %16154 = vst [vmem:[#allocation18_spill] sm:$0xff] %v12859_v8  ;;  %v12882_v63 = vsel %vm3489_vm14, %v3463_v10, %v8083_v26  ;;  %v12885_v31 = vsel %vm3489_vm14, %v3464_v61, %v8084_v25  ;;  %v3374_v15 = vsel %vm1750_vm5, %v16162_v39, %v8119_v57  ;;  %v3373_v37 = vsel %vm1750_vm5, %v16163_v53, %v8118_v23  ;;  %v16165_v8 = vld [vmem:[#allocation5_spill] sm:$0xff]  ;;  %v16167_v53 = vld [vmem:[#allocation79_spill] sm:$0xff] }
 0x368   : > { %v8129_v52 = vunpack.i.h.bf16 %v16164_v46  ;;  %v8128_v17 = vunpack.i.l.bf16 %v16164_v46  ;;  %v3435_v54 = vsel %vm1882_vm9, %v3403_v11, %v8108_v29  ;;  %v8164_v26 = vunpack.i.h.bf16 %v16165_v8 }
 0x369   : > { %v12871_v20 = vpop.permute.xlu0 %8386  ;;  %v8163_v10 = vunpack.i.l.bf16 %v16165_v8  ;;  %v3405_v61 = vsel %vm1816_vm7, %v3373_v37, %v8123_v4  ;;  %v3406_v57 = vsel %vm1816_vm7, %v3374_v15, %v8124_v36  ;;  %v3465_v23 = vsel %vm1948_vm11, %v3433_v40, %v8148_v30  ;;  %v16169_v15 = vld [vmem:[#allocation10_spill] sm:$0xff] }
 0x36a   : > { %v12879_v27 = vpop.permute.xlu1 %8366  ;;  %v3466_v39 = vsel %vm1948_vm11, %v3434_v41, %v8149_v3  ;;  %v8134_v46 = vunpack.i.h.bf16 %v16167_v53  ;;  %v8133_v29 = vunpack.i.l.bf16 %v16167_v53  ;;  %v8169_v4 = vunpack.i.h.bf16 %v12581_v24 }
 0x36b   : > { %16161 = vst [vmem:[#allocation19_spill] sm:$0xff] %v12879_v27  ;;  %v3436_v27 = vsel %vm1882_vm9, %v3404_v48, %v8109_v44  ;;  %v12906_v44 = vsel %vm3489_vm14, %v3465_v23, %v8153_v18  ;;  %v12909_v11 = vsel %vm3489_vm14, %v3466_v39, %v8154_v12  ;;  %v8168_v36 = vunpack.i.l.bf16 %v12581_v24 }
 0x36c   : > { %v3467_v40 = vsel %vm1948_vm11, %v3435_v54, %v8128_v17  ;;  %v3468_v41 = vsel %vm1948_vm11, %v3436_v27, %v8129_v52  ;;  %v3437_v3 = vsel %vm1882_vm9, %v3405_v61, %v8163_v10  ;;  %v3438_v30 = vsel %vm1882_vm9, %v3406_v57, %v8164_v26  ;;  %v16171_v10 = vld [vmem:[#allocation44_spill] sm:$0xff]  ;;  %v16172_v57 = vld [vmem:[#allocation54_spill] sm:$0xff] }
 0x36d   : > { %v12897_v25 = vpop.permute.xlu0 %8391  ;;  %v8189_v48 = vunpack.i.h.bf16 %v12599_v13  ;;  %v8188_v18 = vunpack.i.l.bf16 %v12599_v13  ;;  %v8159_v37 = vunpack.i.h.bf16 %v16169_v15  ;;  %v8158_v23 = vunpack.i.l.bf16 %v16169_v15  ;;  %v16173_v15 = vld [vmem:[#allocation81_spill] sm:$0xff] }
 0x36e   : > { %16166 = vst [vmem:[#allocation88_spill] sm:$0xff] %v12897_v25  ;;  %v12911_v8 = vpop.permute.xlu1 %8371  ;;  %v8194_v24 = vunpack.i.h.bf16 %v12607_v21  ;;  %v8193_v17 = vunpack.i.l.bf16 %v12607_v21  ;;  %v8174_v27 = vunpack.i.h.bf16 %v12589_v9  ;;  %v8173_v52 = vunpack.i.l.bf16 %v12589_v9 }
 0x36f   : > { %16168 = vst [vmem:[#allocation7_spill] sm:$0xff] %v12911_v8  ;;  %v12932_v26 = vsel %vm3489_vm14, %v3467_v40, %v8133_v29  ;;  %v12935_v13 = vsel %vm3489_vm14, %v3468_v41, %v8134_v46  ;;  %v3378_v61 = vsel %vm1750_vm5, %v16171_v10, %v8169_v4  ;;  %v3377_v39 = vsel %vm1750_vm5, %v16172_v57, %v8168_v36  ;;  %v16175_v40 = vld [vmem:[#allocation55_spill] sm:$0xff] }
 0x370   : > { %v8199_v21 = vunpack.i.h.bf16 %v12597_v59  ;;  %v8198_v53 = vunpack.i.l.bf16 %v12597_v59  ;;  %v8179_v9 = vunpack.i.h.bf16 %v16173_v15  ;;  %v8178_v8 = vunpack.i.l.bf16 %v16173_v15 }
 0x371   : > { %v12921_v12 = vpop.permute.xlu0 %8396  ;;  %v3375_v46 = vsel %vm1750_vm5, %v16175_v40, %v8188_v18  ;;  %v8204_v4 = vunpack.i.h.bf16 %v12605_v47  ;;  %v8203_v36 = vunpack.i.l.bf16 %v12605_v47  ;;  %v3409_v57 = vsel %vm1816_vm7, %v3377_v39, %v8173_v52 }
 0x372   : > { %v12929_v54 = vpop.permute.xlu1 %8376  ;;  %v3407_v10 = vsel %vm1816_vm7, %v3375_v46, %v8193_v17  ;;  %v3410_v15 = vsel %vm1816_vm7, %v3378_v61, %v8174_v27  ;;  %v8214_v25 = vunpack.i.h.bf16 %v12613_v51  ;;  %v8184_v18 = vunpack.i.h.bf16 %v12591_v14 }
 0x373   : > { %16170 = vst [vmem:[#allocation20_spill] sm:$0xff] %v12929_v54  ;;  %v16174_v54 = vld [vmem:[#allocation45_spill] sm:$0xff]  ;;  %v8183_v40 = vunpack.i.l.bf16 %v12591_v14  ;;  %v3469_v47 = vsel %vm1948_vm11, %v3437_v3, %v8198_v53  ;;  %v3470_v17 = vsel %vm1948_vm11, %v3438_v30, %v8199_v21  ;;  %v8239_v27 = vunpack.i.h.bf16 %v12639_v55 }
 0x374   : > { %v3376_v29 = vsel %vm1750_vm5, %v16174_v54, %v8189_v48  ;;  %v8213_v48 = vunpack.i.l.bf16 %v12613_v51  ;;  %v8238_v61 = vunpack.i.l.bf16 %v12639_v55  ;;  %v12972_v51 = vsel %vm3489_vm14, %v3469_v47, %v8203_v36 }
 0x375   : > { %v12949_v41 = vpop.permute.xlu0 %8406  ;;  %v3408_v59 = vsel %vm1816_vm7, %v3376_v29, %v8194_v24  ;;  %v3439_v24 = vsel %vm1882_vm9, %v3407_v10, %v8158_v23  ;;  %v12975_v29 = vsel %vm3489_vm14, %v3470_v17, %v8204_v4  ;;  %v8244_v14 = vunpack.i.h.bf16 %v12647_v28 }
 0x376   : > { %v12959_v54 = vpop.permute.xlu1 %8381  ;;  %v3440_v52 = vsel %vm1882_vm9, %v3408_v59, %v8159_v37  ;;  %v8243_v3 = vunpack.i.l.bf16 %v12647_v28  ;;  %v3441_v30 = vsel %vm1882_vm9, %v3409_v57, %v8213_v48  ;;  %v3442_v37 = vsel %vm1882_vm9, %v3410_v15, %v8214_v25  ;;  %v16176_v59 = vld [vmem:[#allocation51_spill] sm:$0xff] }
 0x377   : > { %v8209_v23 = vunpack.i.h.bf16 %v12615_v35  ;;  %v8208_v55 = vunpack.i.l.bf16 %v12615_v35  ;;  %v8219_v53 = vunpack.i.h.bf16 %v12621_v56  ;;  %v8218_v46 = vunpack.i.l.bf16 %v12621_v56  ;;  %v16177_v57 = vld [vmem:[#allocation63_spill] sm:$0xff] }
 0x378   : > { %v3471_v4 = vsel %vm1948_vm11, %v3439_v24, %v8178_v8  ;;  %v3472_v36 = vsel %vm1948_vm11, %v3440_v52, %v8179_v9  ;;  %v8224_v28 = vunpack.i.h.bf16 %v12629_v50  ;;  %v8223_v10 = vunpack.i.l.bf16 %v12629_v50 }
 0x379   : > { %v12969_v39 = vpop.permute.xlu0 %8416  ;;  %v3380_v25 = vsel %vm1750_vm5, %v16176_v59, %v8239_v27  ;;  %v3379_v35 = vsel %vm1750_vm5, %v16177_v57, %v8238_v61  ;;  %v8249_v48 = vunpack.i.h.bf16 %v12637_v58  ;;  %v8248_v56 = vunpack.i.l.bf16 %v12637_v58  ;;  %v16178_v27 = vld [vmem:[#allocation50_spill] sm:$0xff]  ;;  %v16179_v61 = vld [vmem:[#allocation60_spill] sm:$0xff] }
 0x37a   : > { %v12983_v21 = vpop.permute.xlu1 %8401  ;;  %v3411_v8 = vsel %vm1816_vm7, %v3379_v35, %v8243_v3  ;;  %v3412_v9 = vsel %vm1816_vm7, %v3380_v25, %v8244_v14  ;;  %v8254_v47 = vunpack.i.h.bf16 %v12645_v34  ;;  %v8253_v50 = vunpack.i.l.bf16 %v12645_v34  ;;  %v16180_v35 = vld [vmem:[#allocation12_spill] sm:$0xff] }
 0x37b   : > { %v13004_v24 = vsel %vm3489_vm14, %v3471_v4, %v8183_v40  ;;  %v13007_v52 = vsel %vm3489_vm14, %v3472_v36, %v8184_v18  ;;  %v3382_v58 = vsel %vm1750_vm5, %v16178_v27, %v8219_v53  ;;  %v3381_v3 = vsel %vm1750_vm5, %v16179_v61, %v8218_v46 }
 0x37c   : > { %v8229_v14 = vunpack.i.h.bf16 %v12623_v2  ;;  %v8228_v59 = vunpack.i.l.bf16 %v12623_v2  ;;  %v3413_v34 = vsel %vm1816_vm7, %v3381_v3, %v8223_v10  ;;  %v3414_v25 = vsel %vm1816_vm7, %v3382_v58, %v8224_v28 }
 0x37d   : > { %v8427_v15 = vpop.permute.xlu0 %8426  ;;  %v3443_v40 = vsel %vm1882_vm9, %v3411_v8, %v8208_v55  ;;  %v3444_v4 = vsel %vm1882_vm9, %v3412_v9, %v8209_v23  ;;  %v3473_v36 = vsel %vm1948_vm11, %v3441_v30, %v8248_v56  ;;  %v3474_v53 = vsel %vm1948_vm11, %v3442_v37, %v8249_v48 }
 0x37e   : > { %v13001_v17 = vpop.permute.xlu1 %8411  ;;  %v8264_v57 = vunpack.i.h.bf16 %v12653_v6  ;;  %v8263_v46 = vunpack.i.l.bf16 %v12653_v6  ;;  %v8234_v2 = vunpack.i.h.bf16 %v16180_v35  ;;  %v8233_v10 = vunpack.i.l.bf16 %v16180_v35 }
 0x37f   : > { %v13026_v28 = vsel %vm3489_vm14, %v3473_v36, %v8253_v50  ;;  %v13029_v55 = vsel %vm3489_vm14, %v3474_v53, %v8254_v47  ;;  %v8429_v8 = vunpack.i.h.bf16 %v8427_v15  ;;  %v8428_v30 = vunpack.i.l.bf16 %v8427_v15  ;;  %v16181_v47 = vld [vmem:[#allocation6_spill] sm:$0xff] }
 0x380   : > { %v3475_v37 = vsel %vm1948_vm11, %v3443_v40, %v8228_v59  ;;  %v3476_v48 = vsel %vm1948_vm11, %v3444_v4, %v8229_v14  ;;  %v13034_v61 = vsel %vm1882_vm9, %v3413_v34, %v8263_v46  ;;  %v13037_v50 = vsel %vm1882_vm9, %v3414_v25, %v8264_v57  ;;  %v16182_v15 = vld [vmem:[#allocation82_spill] sm:$0xff] }
 0x381   : > { %v8437_v18 = vpop.permute.xlu0 %8436  ;;  %v8269_v53 = vunpack.i.h.bf16 %v16182_v15  ;;  %v8268_v59 = vunpack.i.l.bf16 %v16182_v15  ;;  %v13044_v40 = vsel %vm3489_vm14, %v3475_v37, %v8233_v10  ;;  %v13047_v4 = vsel %vm3489_vm14, %v3476_v48, %v8234_v2 }
 0x382   : > { %v8422_v23 = vpop.permute.xlu1 %8421  ;;  %v8439_v56 = vunpack.i.h.bf16 %v8437_v18  ;;  %v8438_v6 = vunpack.i.l.bf16 %v8437_v18  ;;  %v3558_v34 = vsel %vm3555_vm3, %v12802_v1, %v8428_v30  ;;  %v3559_v25 = vsel %vm3555_vm3, %v12805_v49, %v8429_v8  ;;  %v16183_v8 = vld [vmem:[#allocation84_spill] sm:$0xff] }
 0x383   : > { %v8424_v9 = vunpack.i.h.bf16 %v8422_v23  ;;  %v8423_v27 = vunpack.i.l.bf16 %v8422_v23  ;;  %v8399_v37 = vunpack.i.h.bf16 %v12921_v12  ;;  %v8398_v1 = vunpack.i.l.bf16 %v12921_v12 }
 0x384   : > { %v3591_v46 = vsel %vm3588_vm6, %v3558_v34, %v8438_v6  ;;  %v3592_v35 = vsel %vm3588_vm6, %v3559_v25, %v8439_v56  ;;  %v8404_v6 = vunpack.i.h.bf16 %v12983_v21  ;;  %v8403_v56 = vunpack.i.l.bf16 %v12983_v21 }
 0x385   : > { %v8447_v58 = vpop.permute.xlu0 %8446  ;;  %v3556_v10 = vsel %vm3555_vm3, %v12790_v62, %v8423_v27  ;;  %v3557_v2 = vsel %vm3555_vm3, %v12795_v43, %v8424_v9  ;;  %v8273_v62 = vunpack.i.l.bf16 %v16183_v8  ;;  %v3622_v9 = vpack.c.bf16 %v3592_v35, %v3591_v46 }
 0x386   : > { %v8432_v14 = vpop.permute.xlu1 %8431  ;;  %v8449_v27 = vunpack.i.h.bf16 %v8447_v58  ;;  %v8448_v43 = vunpack.i.l.bf16 %v8447_v58  ;;  %v3527_v21 = vsel %vm3522_vm15, %v12848_v7, %v8398_v1  ;;  %v8409_v58 = vunpack.i.h.bf16 %v12949_v41 }
 0x387   : > { %v8434_v18 = vunpack.i.h.bf16 %v8432_v14  ;;  %v8433_v57 = vunpack.i.l.bf16 %v8432_v14  ;;  %v8408_v46 = vunpack.i.l.bf16 %v12949_v41  ;;  %v3529_v35 = vsel %vm3522_vm15, %v12882_v63, %v8403_v56 }
 0x388   : > { %v8419_v63 = vunpack.i.h.bf16 %v12969_v39 }
 0x389   : > { %v8457_v23 = vpop.permute.xlu0 %8456  ;;  %v3589_v30 = vsel %vm3588_vm6, %v3556_v10, %v8433_v57  ;;  %v3590_v49 = vsel %vm3588_vm6, %v3557_v2, %v8434_v18  ;;  %v16184_v57 = vld [vmem:[#allocation86_spill] sm:$0xff]  ;;  %v16185_v2 = vld [vmem:[#allocation87_spill] sm:$0xff] }
 0x38a   : > { %v8442_v14 = vpop.permute.xlu1 %8441  ;;  %v3621_v34 = vpack.c.bf16 %v3590_v49, %v3589_v30  ;;  %v8459_v25 = vunpack.i.h.bf16 %v8457_v23  ;;  %v8458_v3 = vunpack.i.l.bf16 %v8457_v23  ;;  %v8298_v10 = vunpack.i.l.bf16 %v16184_v57 }
 0x38b   : > { %v8444_v12 = vunpack.i.h.bf16 %v8442_v14  ;;  %v8443_v36 = vunpack.i.l.bf16 %v8442_v14  ;;  %v3528_v30 = vsel %vm3522_vm15, %v12851_v19, %v8399_v37  ;;  %v3530_v23 = vsel %vm3522_vm15, %v12885_v31, %v8404_v6 }
 0x38c   : > { %7202 = vmatprep.mubr.msk.bf16.mxu1 %vm3670_vm8, %v3621_v34  ;;  %v3562_v14 = vsel %vm3555_vm3, %v3529_v35, %v8448_v43  ;;  %v3563_v7 = vsel %vm3555_vm3, %v3530_v23, %v8449_v27  ;;  %v8418_v31 = vunpack.i.l.bf16 %v12969_v39  ;;  %v8288_v27 = vunpack.i.l.bf16 %v16185_v2 }
 0x38d   : > { %v8467_v18 = vpop.permute.xlu0 %8466  ;;  %7203 = vmatmul.mubr.msk.bf16.vlgmr.msra.gmra.mrb[0].mxu1 %vm3670_vm8, %v3622_v9  ;;  %v3595_v19 = vsel %vm3588_vm6, %v3562_v14, %v8458_v3  ;;  %v3596_v37 = vsel %vm3588_vm6, %v3563_v7, %v8459_v25  ;;  %v3561_v9 = vsel %vm3555_vm3, %v3528_v30, %v8444_v12  ;;  %v3560_v41 = vsel %vm3555_vm3, %v3527_v21, %v8443_v36  ;;  %v16186_v12 = vld [vmem:[#allocation13_spill] sm:$0xff] }
 0x38e   : > { %v8452_v49 = vpop.permute.xlu1 %8451  ;;  %v8414_v43 = vunpack.i.h.bf16 %v13001_v17  ;;  %v8413_v3 = vunpack.i.l.bf16 %v13001_v17  ;;  %v8293_v30 = vunpack.i.l.bf16 %v16186_v12  ;;  %v8469_v36 = vunpack.i.h.bf16 %v8467_v18 }
 0x38f   : > { %v8454_v1 = vunpack.i.h.bf16 %v8452_v49  ;;  %v8453_v34 = vunpack.i.l.bf16 %v8452_v49  ;;  %v8468_v21 = vunpack.i.l.bf16 %v8467_v18  ;;  %v3624_v23 = vpack.c.bf16 %v3596_v37, %v3595_v19 }
 0x390   : > { %v3532_v17 = vsel %vm3522_vm15, %v12909_v11, %v8409_v58  ;;  %v3536_v18 = vsel %vm3522_vm15, %v12975_v29, %v8419_v63  ;;  %v3534_v19 = vsel %vm3522_vm15, %v12935_v13, %v8414_v43 }
 0x391   : > { %v8477_v48 = vpop.permute.xlu0 %8476  ;;  %v3593_v6 = vsel %vm3588_vm6, %v3560_v41, %v8453_v34  ;;  %v3594_v56 = vsel %vm3588_vm6, %v3561_v9, %v8454_v1  ;;  %v3531_v34 = vsel %vm3522_vm15, %v12906_v44, %v8408_v46  ;;  %v3535_v9 = vsel %vm3522_vm15, %v12972_v51, %v8418_v31 }
 0x392   : > { %v8462_v25 = vpop.permute.xlu1 %8461  ;;  %v3623_v35 = vpack.c.bf16 %v3594_v56, %v3593_v6  ;;  %v8479_v49 = vunpack.i.h.bf16 %v8477_v48  ;;  %v8478_v14 = vunpack.i.l.bf16 %v8477_v48  ;;  %v3533_v48 = vsel %vm3522_vm15, %v12932_v26, %v8413_v3 }
 0x393   : > { %v8464_v39 = vunpack.i.h.bf16 %v8462_v25  ;;  %v8463_v7 = vunpack.i.l.bf16 %v8462_v25  ;;  %v3566_v46 = vsel %vm3555_vm3, %v3533_v48, %v8468_v21  ;;  %v3567_v11 = vsel %vm3555_vm3, %v3534_v19, %v8469_v36  ;;  %v16187_v25 = vld [vmem:[#allocation66_spill] sm:$0xff]  ;;  %v16190_v19 = vld [vmem:[#allocation83_spill] sm:$0xff] }
 0x394   : > { %7206 = vmatprep.mubr.msk.bf16.mxu1 %vm3670_vm8, %v3623_v35  ;;  %v3599_v31 = vsel %vm3588_vm6, %v3566_v46, %v8478_v14  ;;  %v3600_v29 = vsel %vm3588_vm6, %v3567_v11, %v8479_v49  ;;  %v3383_v35 = vsel %vm1750_vm5, %v16187_v25, %v8288_v27  ;;  %v8294_v14 = vunpack.i.h.bf16 %v16186_v12  ;;  %v16189_v27 = vld [vmem:[#allocation65_spill] sm:$0xff]  ;;  %v16197_v25 = vld [vmem:[#allocation27_spill] sm:$0xff] }
 0x395   : > { %v8487_v1 = vpop.permute.xlu0 %8486  ;;  %7207 = vmatmul.mubr.msk.bf16.gmra.mrb[4].mxu1 %vm3670_vm8, %v3624_v23  ;;  %v3565_v63 = vsel %vm3555_vm3, %v3532_v17, %v8464_v39  ;;  %v3564_v26 = vsel %vm3555_vm3, %v3531_v34, %v8463_v7  ;;  %v16188_v34 = vld [vmem:[#allocation53_spill] sm:$0xff]  ;;  %v8299_v46 = vunpack.i.h.bf16 %v16184_v57  ;;  %v3477_v11 = vsel %vm1948_vm11, %v13034_v61, %v8298_v10 }
 0x396   : > { %v8489_v37 = vunpack.i.h.bf16 %v8487_v1  ;;  %v8488_v41 = vunpack.i.l.bf16 %v8487_v1  ;;  %v8472_v44 = vpop.permute.xlu1 %8471  ;;  %v3626_v1 = vpack.c.bf16 %v3600_v29, %v3599_v31  ;;  %v3386_v17 = vsel %vm1750_vm5, %v16188_v34, %v8269_v53 }
 0x397   : > { %v8474_v58 = vunpack.i.h.bf16 %v8472_v44  ;;  %v8473_v51 = vunpack.i.l.bf16 %v8472_v44  ;;  %v16191_v53 = vunpack.i.h.bf16 %v16183_v8  ;;  %v16195_v29 = vunpack.i.l.bf16 %v16181_v47 }
 0x398   : > { %v3568_v36 = vsel %vm3555_vm3, %v3535_v9, %v8488_v41  ;;  %v3569_v21 = vsel %vm3555_vm3, %v3536_v18, %v8489_v37  ;;  %v3385_v9 = vsel %vm1750_vm5, %v16189_v27, %v8268_v59  ;;  %v3415_v18 = vsel %vm1816_vm7, %v3383_v35, %v8293_v30  ;;  %v16192_v59 = vld [vmem:[#allocation85_spill] sm:$0xff] }
 0x399   : > { %v8497_v6 = vpop.permute.xlu0 %8496  ;;  %v3597_v13 = vsel %vm3588_vm6, %v3564_v26, %v8473_v51  ;;  %v3598_v56 = vsel %vm3588_vm6, %v3565_v63, %v8474_v58  ;;  %v8279_v37 = vunpack.i.h.bf16 %v16190_v19  ;;  %v8278_v41 = vunpack.i.l.bf16 %v16190_v19  ;;  %v16194_v51 = vld [vmem:[#allocation57_spill] sm:$0xff] }
 0x39a   : > { %v8499_v43 = vunpack.i.h.bf16 %v8497_v6  ;;  %v8498_v3 = vunpack.i.l.bf16 %v8497_v6  ;;  %v8482_v23 = vpop.permute.xlu1 %8481  ;;  %v3625_v49 = vpack.c.bf16 %v3598_v56, %v3597_v13  ;;  %v3417_v44 = vsel %vm1816_vm7, %v3385_v9, %v8273_v62 }
 0x39b   : > { %v3418_v15 = vsel %vm1816_vm7, %v3386_v17, %v16191_v53  ;;  %v8284_v30 = vunpack.i.h.bf16 %v16192_v59  ;;  %v16193_v58 = vunpack.i.h.bf16 %v16185_v2  ;;  %v3447_v63 = vsel %vm1882_vm9, %v3415_v18, %v16195_v29  ;;  %v16196_v2 = vld [vmem:[#allocation23_spill] sm:$0xff] }
 0x39c   : > { %v3601_v39 = vsel %vm3588_vm6, %v3568_v36, %v8498_v3  ;;  %v3602_v7 = vsel %vm3588_vm6, %v3569_v21, %v8499_v43  ;;  %7210 = vmatprep.mubr.msk.bf16.mxu1 %vm3670_vm8, %v3625_v49  ;;  %v8484_v26 = vunpack.i.h.bf16 %v8482_v23  ;;  %v8483_v6 = vunpack.i.l.bf16 %v8482_v23 }
 0x39d   : > { %v8507_v12 = vpop.permute.xlu0 %8506  ;;  %v3627_v48 = vpack.c.bf16 %v3602_v7, %v3601_v39  ;;  %7211 = vmatmul.mubr.msk.bf16.gmra.mrb[8].mxu1 %vm3670_vm8, %v3626_v1  ;;  %v3384_v62 = vsel %vm1750_vm5, %v16194_v51, %v16193_v58  ;;  %v8304_v43 = vunpack.i.h.bf16 %v16196_v2  ;;  %v8303_v3 = vunpack.i.l.bf16 %v16196_v2 }
 0x39e   : > { %v8492_v31 = vpop.permute.xlu1 %8491  ;;  %v3416_v8 = vsel %vm1816_vm7, %v3384_v62, %v8294_v14  ;;  %v8509_v57 = vunpack.i.h.bf16 %v8507_v12  ;;  %v8508_v13 = vunpack.i.l.bf16 %v8507_v12  ;;  %v8314_v35 = vunpack.i.h.bf16 %v16197_v25 }
 0x39f   : > { %7214 = vmatprep.mubr.msk.bf16.mxu1 %vm3670_vm8, %v3627_v48  ;;  %v8494_v56 = vunpack.i.h.bf16 %v8492_v31  ;;  %v8493_v61 = vunpack.i.l.bf16 %v8492_v31  ;;  %v8313_v36 = vunpack.i.l.bf16 %v16197_v25  ;;  %v16198_v21 = vunpack.i.h.bf16 %v16181_v47 }
 0x3a0   : > { %v3479_v7 = vsel %vm1948_vm11, %v3447_v63, %v8278_v41  ;;  %v3537_v1 = vsel %vm3522_vm15, %v13004_v24, %v8483_v6  ;;  %v3538_v34 = vsel %vm3522_vm15, %v13007_v52, %v8484_v26  ;;  %v3539_v9 = vsel %vm3522_vm15, %v13026_v28, %v8508_v13 }
 0x3a1   : > { %v8517_v10 = vpop.permute.xlu0 %8516  ;;  %v3448_v49 = vsel %vm1882_vm9, %v3416_v8, %v16198_v21  ;;  %v3540_v47 = vsel %vm3522_vm15, %v13029_v55, %v8509_v57  ;;  %v3570_v18 = vsel %vm3555_vm3, %v3537_v1, %v8493_v61  ;;  %v3571_v12 = vsel %vm3555_vm3, %v3538_v34, %v8494_v56 }
 0x3a2   : > { %v8519_v14 = vunpack.i.h.bf16 %v8517_v10  ;;  %v8518_v39 = vunpack.i.l.bf16 %v8517_v10  ;;  %v8502_v23 = vpop.permute.xlu1 %8501  ;;  %v8319_v52 = vunpack.i.h.bf16 %v12743_v22  ;;  %v8318_v55 = vunpack.i.l.bf16 %v12743_v22 }
 0x3a3   : > { %v8504_v17 = vunpack.i.h.bf16 %v8502_v23  ;;  %v8503_v27 = vunpack.i.l.bf16 %v8502_v23  ;;  %v3480_v29 = vsel %vm1948_vm11, %v3448_v49, %v8279_v37  ;;  %v8283_v63 = vunpack.i.l.bf16 %v16192_v59  ;;  %v16199_v59 = vld [vmem:[#allocation61_spill] sm:$0xff] }
 0x3a4   : > { %v3572_v58 = vsel %vm3555_vm3, %v3539_v9, %v8518_v39  ;;  %v3573_v28 = vsel %vm3555_vm3, %v3540_v47, %v8519_v14  ;;  %v3478_v26 = vsel %vm1948_vm11, %v13037_v50, %v8299_v46  ;;  %v3510_v6 = vsel %vm3489_vm14, %v3477_v11, %v8303_v3 }
 0x3a5   : > { %v8527_v48 = vpop.permute.xlu0 %8526  ;;  %v3603_v19 = vsel %vm3588_vm6, %v3570_v18, %v8503_v27  ;;  %v3604_v24 = vsel %vm3588_vm6, %v3571_v12, %v8504_v17  ;;  %v3511_v56 = vsel %vm3489_vm14, %v3478_v26, %v8304_v43  ;;  %v3449_v22 = vsel %vm1882_vm9, %v3417_v44, %v8313_v36  ;;  %v16200_v43 = vld [vmem:[#allocation70_spill] sm:$0xff] }
 0x3a6   : > { %v8529_v41 = vunpack.i.h.bf16 %v8527_v48  ;;  %v8528_v53 = vunpack.i.l.bf16 %v8527_v48  ;;  %v8512_v51 = vpop.permute.xlu1 %8511  ;;  %v3628_v62 = vpack.c.bf16 %v3604_v24, %v3603_v19  ;;  %v3450_v61 = vsel %vm1882_vm9, %v3418_v15, %v8314_v35 }
 0x3a7   : > { %v8309_v10 = vunpack.i.h.bf16 %v12729_v38  ;;  %v8308_v37 = vunpack.i.l.bf16 %v12729_v38  ;;  %v3390_v2 = vsel %vm1750_vm5, %v16199_v59, %v8319_v52  ;;  %v13199_v46 = vsel %vm3489_vm14, %v3479_v7, %v8283_v63 }
 0x3a8   : > { %v3605_v31 = vsel %vm3588_vm6, %v3572_v58, %v8528_v53  ;;  %v3606_v8 = vsel %vm3588_vm6, %v3573_v28, %v8529_v41  ;;  %7215 = vmatmul.mubr.msk.bf16.gmra.mrb[12].mxu1 %vm3670_vm8, %v3628_v62  ;;  %v13202_v11 = vsel %vm3489_vm14, %v3480_v29, %v8284_v30  ;;  %v3389_v44 = vsel %vm1750_vm5, %v16200_v43, %v8318_v55 }
 0x3a9   : > { %v8537_v57 = vpop.permute.xlu0 %8536  ;;  %v3629_v13 = vpack.c.bf16 %v3606_v8, %v3605_v31  ;;  %v8329_v15 = vunpack.i.h.bf16 %v12755_v5  ;;  %v8514_v3 = vunpack.i.h.bf16 %v8512_v51  ;;  %v8513_v25 = vunpack.i.l.bf16 %v8512_v51  ;;  %v16201_v31 = vld [vmem:[#allocation71_spill] sm:$0xff] }
 0x3aa   : > { %v8522_v50 = vpop.permute.xlu1 %8521  ;;  %v8539_v35 = vunpack.i.h.bf16 %v8537_v57  ;;  %v8538_v36 = vunpack.i.l.bf16 %v8537_v57  ;;  %v8324_v39 = vunpack.i.h.bf16 %v12767_v0  ;;  %v8323_v23 = vunpack.i.l.bf16 %v12767_v0 }
 0x3ab   : > { %7218 = vmatprep.mubr.msk.bf16.mxu1 %vm3670_vm8, %v3629_v13  ;;  %v8524_v21 = vunpack.i.h.bf16 %v8522_v50  ;;  %v8523_v49 = vunpack.i.l.bf16 %v8522_v50  ;;  %v8349_v7 = vunpack.i.h.bf16 %v12787_v42  ;;  %v8348_v30 = vunpack.i.l.bf16 %v12787_v42 }
 0x3ac   : > { %v8338_v1 = vunpack.i.l.bf16 %v12811_v32  ;;  %v8343_v34 = vunpack.i.l.bf16 %v12835_v33  ;;  %v3541_v47 = vsel %vm3522_vm15, %v13044_v40, %v8513_v25  ;;  %v3542_v18 = vsel %vm3522_vm15, %v13047_v4, %v8514_v3 }
 0x3ad   : > { %v8547_v14 = vpop.permute.xlu0 %8546  ;;  %v3543_v0 = vsel %vm3522_vm15, %v3510_v6, %v8538_v36  ;;  %v3544_v19 = vsel %vm3522_vm15, %v3511_v56, %v8539_v35  ;;  %v3574_v42 = vsel %vm3555_vm3, %v3541_v47, %v8523_v49  ;;  %v3575_v24 = vsel %vm3555_vm3, %v3542_v18, %v8524_v21  ;;  %v16202_v35 = vld [vmem:[#allocation62_spill] sm:$0xff] }
 0x3ae   : > { %v8549_v17 = vunpack.i.h.bf16 %v8547_v14  ;;  %v8548_v27 = vunpack.i.l.bf16 %v8547_v14  ;;  %v8532_v9 = vpop.permute.xlu1 %8531  ;;  %v8339_v28 = vunpack.i.h.bf16 %v12811_v32  ;;  %v3387_v8 = vsel %vm1750_vm5, %v16201_v31, %v8338_v1 }
 0x3af   : > { %v8534_v12 = vunpack.i.h.bf16 %v8532_v9  ;;  %v8533_v48 = vunpack.i.l.bf16 %v8532_v9  ;;  %v8344_v29 = vunpack.i.h.bf16 %v12835_v33  ;;  %v8328_v6 = vunpack.i.l.bf16 %v12755_v5 }
 0x3b0   : > { %v3576_v4 = vsel %vm3555_vm3, %v3543_v0, %v8548_v27  ;;  %v3577_v51 = vsel %vm3555_vm3, %v3544_v19, %v8549_v17  ;;  %v3421_v57 = vsel %vm1816_vm7, %v3389_v44, %v8323_v23  ;;  %v3419_v32 = vsel %vm1816_vm7, %v3387_v8, %v8343_v34 }
 0x3b1   : > { %v8557_v41 = vpop.permute.xlu0 %8556  ;;  %v3607_v53 = vsel %vm3588_vm6, %v3574_v42, %v8533_v48  ;;  %v3608_v52 = vsel %vm3588_vm6, %v3575_v24, %v8534_v12  ;;  %v3422_v59 = vsel %vm1816_vm7, %v3390_v2, %v8324_v39  ;;  %v8334_v50 = vunpack.i.h.bf16 %v12777_v60 }
 0x3b2   : > { %v8559_v58 = vunpack.i.h.bf16 %v8557_v41  ;;  %v8558_v40 = vunpack.i.l.bf16 %v8557_v41  ;;  %v8542_v62 = vpop.permute.xlu1 %8541  ;;  %v3630_v55 = vpack.c.bf16 %v3608_v52, %v3607_v53  ;;  %v8354_v33 = vunpack.i.h.bf16 %v12825_v45 }
 0x3b3   : > { %v8353_v43 = vunpack.i.l.bf16 %v12825_v45  ;;  %v8333_v3 = vunpack.i.l.bf16 %v12777_v60  ;;  %v3481_v25 = vsel %vm1948_vm11, %v3449_v22, %v8348_v30  ;;  %v3482_v44 = vsel %vm1948_vm11, %v3450_v61, %v8349_v7 }
 0x3b4   : > { %v3609_v63 = vsel %vm3588_vm6, %v3576_v4, %v8558_v40  ;;  %v3610_v26 = vsel %vm3588_vm6, %v3577_v51, %v8559_v58  ;;  %7219 = vmatmul.mubr.msk.bf16.gmra.mrb[16].mxu1 %vm3670_vm8, %v3630_v55  ;;  %v3388_v36 = vsel %vm1750_vm5, %v16202_v35, %v8339_v28  ;;  %v3451_v49 = vsel %vm1882_vm9, %v3419_v32, %v8308_v37 }
 0x3b5   : > { %v8567_v13 = vpop.permute.xlu0 %8566  ;;  %v3631_v56 = vpack.c.bf16 %v3610_v26, %v3609_v63  ;;  %v3420_v2 = vsel %vm1816_vm7, %v3388_v36, %v8344_v29  ;;  %v8544_v14 = vunpack.i.h.bf16 %v8542_v62  ;;  %v8543_v45 = vunpack.i.l.bf16 %v8542_v62  ;;  %v16203_v63 = vld [vmem:[#allocation18_spill] sm:$0xff] }
 0x3b6   : > { %v8552_v21 = vpop.permute.xlu1 %8551  ;;  %v8569_v39 = vunpack.i.h.bf16 %v8567_v13  ;;  %v8568_v23 = vunpack.i.l.bf16 %v8567_v13  ;;  %v3514_v61 = vsel %vm3489_vm14, %v3481_v25, %v8353_v43  ;;  %v3515_v7 = vsel %vm3489_vm14, %v3482_v44, %v8354_v33 }
 0x3b7   : > { %7222 = vmatprep.mubr.msk.bf16.mxu1 %vm3670_vm8, %v3631_v56  ;;  %v8554_v1 = vunpack.i.h.bf16 %v8552_v21  ;;  %v8553_v22 = vunpack.i.l.bf16 %v8552_v21  ;;  %v8364_v34 = vunpack.i.h.bf16 %v12845_v16  ;;  %v8363_v17 = vunpack.i.l.bf16 %v12845_v16  ;;  %v16205_v56 = vld [vmem:[#allocation20_spill] sm:$0xff] }
 0x3b8   : > { %v3452_v27 = vsel %vm1882_vm9, %v3420_v2, %v8309_v10  ;;  %v3483_v18 = vsel %vm1948_vm11, %v3451_v49, %v8328_v6  ;;  %v3545_v12 = vsel %vm3522_vm15, %v13199_v46, %v8543_v45  ;;  %v3546_v48 = vsel %vm3522_vm15, %v13202_v11, %v8544_v14 }
 0x3b9   : > { %v8577_v30 = vpop.permute.xlu0 %8576  ;;  %v3547_v42 = vsel %vm3522_vm15, %v3514_v61, %v8568_v23  ;;  %v3548_v16 = vsel %vm3522_vm15, %v3515_v7, %v8569_v39  ;;  %v3578_v38 = vsel %vm3555_vm3, %v3545_v12, %v8553_v22  ;;  %v3579_v10 = vsel %vm3555_vm3, %v3546_v48, %v8554_v1  ;;  %v16206_v23 = vld [vmem:[#allocation68_spill] sm:$0xff]  ;;  %v16207_v1 = vld [vmem:[#allocation75_spill] sm:$0xff] }
 0x3ba   : > { %v8579_v37 = vunpack.i.h.bf16 %v8577_v30  ;;  %v8578_v9 = vunpack.i.l.bf16 %v8577_v30  ;;  %v8562_v47 = vpop.permute.xlu1 %8561  ;;  %v3484_v28 = vsel %vm1948_vm11, %v3452_v27, %v8329_v15  ;;  %v8389_v51 = vunpack.i.h.bf16 %v12871_v20  ;;  %v16204_v15 = vld [vmem:[#allocation88_spill] sm:$0xff] }
 0x3bb   : > { %v8564_v0 = vunpack.i.h.bf16 %v8562_v47  ;;  %v8563_v19 = vunpack.i.l.bf16 %v8562_v47  ;;  %v8388_v62 = vunpack.i.l.bf16 %v12871_v20  ;;  %v3453_v8 = vsel %vm1882_vm9, %v3421_v57, %v8363_v17 }
 0x3bc   : > { %v3580_v58 = vsel %vm3555_vm3, %v3547_v42, %v8578_v9  ;;  %v3581_v11 = vsel %vm3555_vm3, %v3548_v16, %v8579_v37  ;;  %v3454_v29 = vsel %vm1882_vm9, %v3422_v59, %v8364_v34  ;;  %v8359_v26 = vunpack.i.h.bf16 %v16203_v63 }
 0x3bd   : > { %v8587_v24 = vpop.permute.xlu0 %8586  ;;  %v3611_v41 = vsel %vm3588_vm6, %v3578_v38, %v8563_v19  ;;  %v3612_v53 = vsel %vm3588_vm6, %v3579_v10, %v8564_v0  ;;  %v8394_v32 = vunpack.i.h.bf16 %v16204_v15  ;;  %v8393_v13 = vunpack.i.l.bf16 %v16204_v15 }
 0x3be   : > { %v8589_v52 = vunpack.i.h.bf16 %v8587_v24  ;;  %v8588_v46 = vunpack.i.l.bf16 %v8587_v24  ;;  %v8572_v40 = vpop.permute.xlu1 %8571  ;;  %v3632_v4 = vpack.c.bf16 %v3612_v53, %v3611_v41  ;;  %v8379_v20 = vunpack.i.h.bf16 %v16205_v56 }
 0x3bf   : > { %v8378_v33 = vunpack.i.l.bf16 %v16205_v56  ;;  %v8384_v43 = vunpack.i.h.bf16 %v12959_v54  ;;  %v8383_v57 = vunpack.i.l.bf16 %v12959_v54  ;;  %v3516_v59 = vsel %vm3489_vm14, %v3483_v18, %v8333_v3 }
 0x3c0   : > { %v3613_v55 = vsel %vm3588_vm6, %v3580_v58, %v8588_v46  ;;  %v3614_v31 = vsel %vm3588_vm6, %v3581_v11, %v8589_v52  ;;  %7223 = vmatmul.mubr.msk.bf16.gmra.mrb[20].mxu1 %vm3670_vm8, %v3632_v4  ;;  %v3517_v25 = vsel %vm3489_vm14, %v3484_v28, %v8334_v50  ;;  %v3485_v35 = vsel %vm1948_vm11, %v3453_v8, %v8388_v62 }
 0x3c1   : > { %v8597_v5 = vpop.permute.xlu0 %8596  ;;  %v3633_v6 = vpack.c.bf16 %v3614_v31, %v3613_v55  ;;  %v3486_v36 = vsel %vm1948_vm11, %v3454_v29, %v8389_v51  ;;  %v8574_v21 = vunpack.i.h.bf16 %v8572_v40  ;;  %v8573_v2 = vunpack.i.l.bf16 %v8572_v40  ;;  %v16209_v51 = vld [vmem:[#allocation19_spill] sm:$0xff] }
 0x3c2   : > { %v8582_v44 = vpop.permute.xlu1 %8581  ;;  %v8599_v49 = vunpack.i.h.bf16 %v8597_v5  ;;  %v8598_v14 = vunpack.i.l.bf16 %v8597_v5  ;;  %v3518_v3 = vsel %vm3489_vm14, %v3485_v35, %v8393_v13  ;;  %v3519_v60 = vsel %vm3489_vm14, %v3486_v36, %v8394_v32 }
 0x3c3   : > { %7226 = vmatprep.mubr.msk.bf16.mxu1 %vm3670_vm8, %v3633_v6  ;;  %v8584_v45 = vunpack.i.h.bf16 %v8582_v44  ;;  %v8583_v39 = vunpack.i.l.bf16 %v8582_v44  ;;  %v3392_v50 = vsel %vm1750_vm5, %v16206_v23, %v8379_v20  ;;  %v3391_v22 = vsel %vm1750_vm5, %v16207_v1, %v8378_v33 }
 0x3c4   : > { %v3423_v30 = vsel %vm1816_vm7, %v3391_v22, %v8383_v57  ;;  %v3424_v61 = vsel %vm1816_vm7, %v3392_v50, %v8384_v43  ;;  %v3549_v27 = vsel %vm3522_vm15, %v3516_v59, %v8573_v2  ;;  %v3550_v37 = vsel %vm3522_vm15, %v3517_v25, %v8574_v21 }
 0x3c5   : > { %v8607_v54 = vpop.permute.xlu0 %8606  ;;  %v3551_v18 = vsel %vm3522_vm15, %v3518_v3, %v8598_v14  ;;  %v3552_v12 = vsel %vm3522_vm15, %v3519_v60, %v8599_v49  ;;  %v3582_v48 = vsel %vm3555_vm3, %v3549_v27, %v8583_v39  ;;  %v3583_v0 = vsel %vm3555_vm3, %v3550_v37, %v8584_v45  ;;  %v13360_v49 = vld [vmem:[%s15479_s4] ss:$0 sm:$0xff] }
 0x3c6   : > { %v8609_v7 = vunpack.i.h.bf16 %v8607_v54  ;;  %v8608_v34 = vunpack.i.l.bf16 %v8607_v54  ;;  %v8592_v17 = vpop.permute.xlu1 %8591  ;;  %v8358_v24 = vunpack.i.l.bf16 %v16203_v63  ;;  %v3456_v28 = vsel %vm1882_vm9, %v3424_v61, %v8359_v26  ;;  %v16211_v26 = vld [vmem:[#allocation7_spill] sm:$0xff] }
 0x3c7   : > { %v8594_v9 = vunpack.i.h.bf16 %v8592_v17  ;;  %v8593_v47 = vunpack.i.l.bf16 %v8592_v17  ;;  %v8369_v62 = vunpack.i.h.bf16 %v16209_v51  ;;  %v8368_v55 = vunpack.i.l.bf16 %v16209_v51 }
 0x3c8   : > { %v3584_v41 = vsel %vm3555_vm3, %v3551_v18, %v8608_v34  ;;  %v3585_v53 = vsel %vm3555_vm3, %v3552_v12, %v8609_v7  ;;  %v3455_v40 = vsel %vm1882_vm9, %v3423_v30, %v8358_v24  ;;  %v8374_v6 = vunpack.i.h.bf16 %v16211_v26 }
 0x3c9   : > { %v8617_v19 = vpop.permute.xlu0 %8616  ;;  %v3615_v42 = vsel %vm3588_vm6, %v3582_v48, %v8593_v47  ;;  %v3616_v16 = vsel %vm3588_vm6, %v3583_v0, %v8594_v9  ;;  %v3487_v63 = vsel %vm1948_vm11, %v3455_v40, %v8368_v55  ;;  %v3488_v5 = vsel %vm1948_vm11, %v3456_v28, %v8369_v62 }
 0x3ca   : > { %v8619_v38 = vunpack.i.h.bf16 %v8617_v19  ;;  %v8618_v10 = vunpack.i.l.bf16 %v8617_v19  ;;  %v13312_v52 = vpop.permute.xlu1 %8601  ;;  %v3634_v46 = vpack.c.bf16 %v3616_v16, %v3615_v42  ;;  %v8373_v15 = vunpack.i.l.bf16 %v16211_v26 }
 0x3cb   : > { %16208 = vst [vmem:[#allocation15_spill] sm:$0xff] %v13312_v52  ;;  %v15721_v8 = vunpack.i.h.bf16 %v13312_v52  ;;  %v15722_v29 = vunpack.i.l.bf16 %v13312_v52  ;;  %v3521_v20 = vsel %vm3489_vm14, %v3488_v5, %v8374_v6 }
 0x3cc   : > { %v3617_v58 = vsel %vm3588_vm6, %v3584_v41, %v8618_v10  ;;  %v3618_v11 = vsel %vm3588_vm6, %v3585_v53, %v8619_v38  ;;  %7227 = vmatmul.mubr.msk.bf16.gmra.mrb[24].mxu1 %vm3670_vm8, %v3634_v46  ;;  %v3520_v56 = vsel %vm3489_vm14, %v3487_v63, %v8373_v15 }
 0x3cd   : > { %v3635_v4 = vpack.c.bf16 %v3618_v11, %v3617_v58  ;;  %v3553_v43 = vsel %vm3522_vm15, %v3520_v56, %v15722_v29  ;;  %v3554_v57 = vsel %vm3522_vm15, %v3521_v20, %v15721_v8  ;;  %v16217_v29 = vld [vmem:[#allocation25_spill] sm:$0xff] }
 0x3ce   : > { %v13321_v31 = vpop.permute.xlu1 %8611 }
 0x3cf   : > { %16210 = vst [vmem:[#allocation28_spill] sm:$0xff] %v13321_v31  ;;  %7230 = vmatprep.mubr.msk.bf16.mxu1 %vm3670_vm8, %v3635_v4  ;;  %v15719_v32 = vunpack.i.h.bf16 %v13321_v31  ;;  %v15720_v13 = vunpack.i.l.bf16 %v13321_v31  ;;  %v16218_v31 = vld [vmem:[#allocation11_spill] sm:$0xff] }
 0x3d1   : > { %v3586_v44 = vsel %vm3555_vm3, %v3553_v43, %v15720_v13  ;;  %v3587_v35 = vsel %vm3555_vm3, %v3554_v57, %v15719_v32 }
 0x3d2   : > { %v13334_v33 = vpop.permute.xlu1 %8621 }
 0x3d3   : > { %16212 = vst [vmem:[#allocation31_spill] sm:$0xff] %v13334_v33  ;;  %v15717_v59 = vunpack.i.h.bf16 %v13334_v33  ;;  %v15718_v25 = vunpack.i.l.bf16 %v13334_v33 }
 0x3d5   : > { %v3619_v36 = vsel %vm3588_vm6, %v3586_v44, %v15718_v25  ;;  %v3620_v21 = vsel %vm3588_vm6, %v3587_v35, %v15717_v59 }
 0x3d6   : > { %v3636_v2 = vpack.c.bf16 %v3620_v21, %v3619_v36 }
 0x3d8   : > { %7231 = vmatmul.mubr.msk.bf16.gmra.mrb[28].mxu1 %vm3670_vm8, %v3636_v2 }
 0x460   : > { %v7204_v14 = vpop.f32.mrb[0].mxu1 }
 0x461   : > { %v13363_v45 = vadd.f32 %v7204_v14, %v13360_v49  ;;  %v3757_v39 = vpop.f32.mrb[1].mxu1 }
 0x462   : > { %v7205_v54 = vpop.f32.mrb[2].mxu1  ;;  %v13367_v3 = vadd.f32 %v13360_v49, %v3757_v39 }
 0x463   : > { %9258 = vtanh.f32 %v13363_v45  ;;  %v3760_v60 = vpop.f32.mrb[3].mxu1  ;;  %v13370_v23 = vadd.f32 %v7205_v54, %v13360_v49 }
 0x464   : > { %9260 = vtanh.f32 %v13367_v3  ;;  %v13375_v50 = vadd.f32 %v13360_v49, %v3760_v60 }
 0x465   : > { %9262 = vtanh.f32 %v13370_v23 }
 0x468   : > { %v7208_v1 = vpop.f32.mrb[4].mxu1 }
 0x469   : > { %v13378_v22 = vadd.f32 %v7208_v1, %v13360_v49  ;;  %v3773_v30 = vpop.f32.mrb[5].mxu1 }
 0x46a   : > { %v7209_v61 = vpop.f32.mrb[6].mxu1  ;;  %v13382_v7 = vadd.f32 %v13360_v49, %v3773_v30 }
 0x46b   : > { %9264 = vtanh.f32 %v13378_v22  ;;  %v3776_v34 = vpop.f32.mrb[7].mxu1  ;;  %v13386_v17 = vadd.f32 %v7209_v61, %v13360_v49 }
 0x46c   : > { %9266 = vtanh.f32 %v13375_v50  ;;  %v13392_v47 = vadd.f32 %v13360_v49, %v3776_v34 }
 0x46d   : > { %v9259_v27 = vpop.eup %9258  ;;  %9268 = vtanh.f32 %v13382_v7 }
 0x46e   : > { %4144 = vrot.lane.b32.xlu0 %v9259_v27, %s9599_s19  ;;  %9270 = vtanh.f32 %v13386_v17  ;;  %v9261_v9 = vpop.eup %9260 }
 0x46f   : > { %v9263_v12 = vpop.eup %9262  ;;  %9272 = vtanh.f32 %v13392_v47 }
 0x470   : > { %v7212_v37 = vpop.f32.mrb[8].mxu1  ;;  %4146 = vrot.lane.b32.xlu1 %v9263_v12, %s9599_s19 }
 0x471   : > { %v3789_v18 = vpop.f32.mrb[9].mxu1  ;;  %v13397_v19 = vadd.f32 %v7212_v37, %v13360_v49 }
 0x472   : > { %v7213_v48 = vpop.f32.mrb[10].mxu1  ;;  %4140 = vrot.lane.b32.xlu0 %v9261_v9, %s9599_s19  ;;  %v13404_v10 = vadd.f32 %v13360_v49, %v3789_v18 }
 0x473   : > { %v3792_v0 = vpop.f32.mrb[11].mxu1  ;;  %9274 = vtanh.f32 %v13397_v19  ;;  %v13409_v53 = vadd.f32 %v7213_v48, %v13360_v49 }
 0x474   : > { %9276 = vtanh.f32 %v13404_v10  ;;  %v13414_v28 = vadd.f32 %v13360_v49, %v3792_v0 }
 0x475   : > { %v9265_v42 = vpop.eup %9264  ;;  %9278 = vtanh.f32 %v13409_v53 }
 0x476   : > { %v9267_v16 = vpop.eup %9266  ;;  %4152 = vrot.lane.b32.xlu0 %v9265_v42, %s9599_s19  ;;  %9280 = vtanh.f32 %v13414_v28 }
 0x477   : > { %4142 = vrot.lane.b32.xlu1 %v9267_v16, %s9599_s19  ;;  %v9269_v38 = vpop.eup %9268 }
 0x478   : > { %v9271_v24 = vpop.eup %9270 }
 0x479   : > { %v9273_v40 = vpop.eup %9272 }
 0x47a   : > { %4148 = vrot.lane.b32.xlu0 %v9269_v38, %s9599_s19 }
 0x47b   : > { %4154 = vrot.lane.b32.xlu1 %v9271_v24, %s9599_s19  ;;  %v7216_v41 = vpop.f32.mrb[12].mxu1 }
 0x47c   : > { %v3805_v46 = vpop.f32.mrb[13].mxu1  ;;  %v13418_v4 = vadd.f32 %v7216_v41, %v13360_v49 }
 0x47d   : > { %v7217_v58 = vpop.f32.mrb[14].mxu1  ;;  %v9275_v51 = vpop.eup %9274  ;;  %v13424_v62 = vadd.f32 %v13360_v49, %v3805_v46 }
 0x47e   : > { %v3808_v11 = vpop.f32.mrb[15].mxu1  ;;  %4160 = vrot.lane.b32.xlu0 %v9275_v51, %s9599_s19  ;;  %9282 = vtanh.f32 %v13418_v4  ;;  %v13427_v55 = vadd.f32 %v7217_v58, %v13360_v49  ;;  %v9277_v63 = vpop.eup %9276 }
 0x47f   : > { %4150 = vrot.lane.b32.xlu1 %v9273_v40, %s9599_s19  ;;  %9284 = vtanh.f32 %v13424_v62  ;;  %v9279_v15 = vpop.eup %9278  ;;  %v13433_v56 = vadd.f32 %v13360_v49, %v3808_v11 }
 0x480   : > { %9286 = vtanh.f32 %v13427_v55  ;;  %v9281_v57 = vpop.eup %9280 }
 0x481   : > { %9288 = vtanh.f32 %v13433_v56 }
 0x482   : > { %4156 = vrot.lane.b32.xlu0 %v9277_v63, %s9599_s19 }
 0x483   : > { %4162 = vrot.lane.b32.xlu1 %v9279_v15, %s9599_s19 }
 0x487   : > { %v7220_v5 = vpop.f32.mrb[16].mxu1  ;;  %4158 = vrot.lane.b32.xlu1 %v9281_v57, %s9599_s19 }
 0x488   : > { %v3821_v26 = vpop.f32.mrb[17].mxu1  ;;  %v13437_v43 = vadd.f32 %v7220_v5, %v13360_v49  ;;  %v9283_v44 = vpop.eup %9282 }
 0x489   : > { %v7221_v6 = vpop.f32.mrb[18].mxu1  ;;  %4168 = vrot.lane.b32.xlu0 %v9283_v44, %s9599_s19  ;;  %v13444_v35 = vadd.f32 %v13360_v49, %v3821_v26  ;;  %v9285_v36 = vpop.eup %9284 }
 0x48a   : > { %v3824_v20 = vpop.f32.mrb[19].mxu1  ;;  %9290 = vtanh.f32 %v13437_v43  ;;  %v13447_v21 = vadd.f32 %v7221_v6, %v13360_v49  ;;  %v9287_v14 = vpop.eup %9286 }
 0x48b   : > { %9292 = vtanh.f32 %v13444_v35  ;;  %4170 = vrot.lane.b32.xlu1 %v9287_v14, %s9599_s19  ;;  %v13454_v1 = vadd.f32 %v13360_v49, %v3824_v20  ;;  %v9289_v30 = vpop.eup %9288 }
 0x48c   : > { %9294 = vtanh.f32 %v13447_v21 }
 0x48d   : > { %4164 = vrot.lane.b32.xlu0 %v9285_v36, %s9599_s19  ;;  %9296 = vtanh.f32 %v13454_v1 }
 0x48f   : > { %4166 = vrot.lane.b32.xlu1 %v9289_v30, %s9599_s19  ;;  %v6989_v30 = vmul.f32 -1.442695, %v13363_v45  ;;  %v6991_v45 = vmul.f32 -1.442695, %v13382_v7 }
 0x493   : > { %v7224_v2 = vpop.f32.mrb[20].mxu1 }
 0x494   : > { %v3837_v39 = vpop.f32.mrb[21].mxu1  ;;  %v13458_v61 = vadd.f32 %v7224_v2, %v13360_v49  ;;  %v9291_v34 = vpop.eup %9290 }
 0x495   : > { %v7225_v54 = vpop.f32.mrb[22].mxu1  ;;  %4176 = vrot.lane.b32.xlu0 %v9291_v34, %s9599_s19  ;;  %v13464_v27 = vadd.f32 %v13360_v49, %v3837_v39  ;;  %v9293_v37 = vpop.eup %9292 }
 0x496   : > { %v3840_v60 = vpop.f32.mrb[23].mxu1  ;;  %9298 = vtanh.f32 %v13458_v61  ;;  %v13467_v9 = vadd.f32 %v7225_v54, %v13360_v49  ;;  %v9295_v48 = vpop.eup %9294 }
 0x497   : > { %9300 = vtanh.f32 %v13464_v27  ;;  %4178 = vrot.lane.b32.xlu1 %v9295_v48, %s9599_s19  ;;  %v13474_v16 = vadd.f32 %v13360_v49, %v3840_v60  ;;  %v9297_v38 = vpop.eup %9296  ;;  %v6993_v48 = vmul.f32 -1.442695, %v13378_v22 }
 0x498   : > { %9302 = vtanh.f32 %v13467_v9 }
 0x499   : > { %4172 = vrot.lane.b32.xlu0 %v9293_v37, %s9599_s19  ;;  %9304 = vtanh.f32 %v13474_v16  ;;  %v6987_v37 = vmul.f32 -1.442695, %v13367_v3  ;;  %v6994_v3 = vmul.f32 -1.442695, %v13386_v17 }
 0x49b   : > { %4174 = vrot.lane.b32.xlu1 %v9297_v38, %s9599_s19 }
 0x49f   : > { %v7228_v18 = vpop.f32.mrb[24].mxu1 }
 0x4a0   : > { %v3853_v12 = vpop.f32.mrb[25].mxu1  ;;  %v13477_v24 = vadd.f32 %v7228_v18, %v13360_v49  ;;  %v9299_v41 = vpop.eup %9298 }
 0x4a1   : > { %v7229_v0 = vpop.f32.mrb[26].mxu1  ;;  %4184 = vrot.lane.b32.xlu0 %v9299_v41, %s9599_s19  ;;  %v13484_v46 = vadd.f32 %v13360_v49, %v3853_v12  ;;  %v9301_v58 = vpop.eup %9300  ;;  %v6988_v12 = vmul.f32 -1.442695, %v13375_v50  ;;  %v6997_v50 = vmul.f32 -1.442695, %v13397_v19 }
 0x4a2   : > { %v3856_v42 = vpop.f32.mrb[27].mxu1  ;;  %9306 = vtanh.f32 %v13477_v24  ;;  %v13487_v11 = vadd.f32 %v7229_v0, %v13360_v49  ;;  %v9303_v63 = vpop.eup %9302 }
 0x4a3   : > { %9308 = vtanh.f32 %v13484_v46  ;;  %4186 = vrot.lane.b32.xlu1 %v9303_v63, %s9599_s19  ;;  %v13494_v6 = vadd.f32 %v13360_v49, %v3856_v42  ;;  %v9305_v15 = vpop.eup %9304  ;;  %v6992_v42 = vmul.f32 -1.442695, %v13392_v47  ;;  %v6995_v47 = vmul.f32 -1.442695, %v13404_v10 }
 0x4a4   : > { %9310 = vtanh.f32 %v13487_v11  ;;  %v7001_v10 = vmul.f32 -1.442695, %v13418_v4 }
 0x4a5   : > { %4180 = vrot.lane.b32.xlu0 %v9301_v58, %s9599_s19  ;;  %9312 = vtanh.f32 %v13494_v6 }
 0x4a7   : > { %4182 = vrot.lane.b32.xlu1 %v9305_v15, %s9599_s19 }
 0x4ab   : > { %v7232_v40 = vpop.f32.mrb[28].mxu1 }
 0x4ac   : > { %v3869_v51 = vpop.f32.mrb[29].mxu1  ;;  %v13497_v20 = vadd.f32 %v7232_v40, %v13360_v49  ;;  %v9307_v57 = vpop.eup %9306 }
 0x4ad   : > { %v7233_v5 = vpop.f32.mrb[30].mxu1  ;;  %4192 = vrot.lane.b32.xlu0 %v9307_v57, %s9599_s19  ;;  %v13504_v44 = vadd.f32 %v13360_v49, %v3869_v51  ;;  %v9309_v36 = vpop.eup %9308 }
 0x4ae   : > { %v3872_v26 = vpop.f32.mrb[31].mxu1  ;;  %9314 = vtanh.f32 %v13497_v20  ;;  %v13507_v2 = vadd.f32 %v7233_v5, %v13360_v49  ;;  %v9311_v14 = vpop.eup %9310 }
 0x4af   : > { %9316 = vtanh.f32 %v13504_v44  ;;  %4194 = vrot.lane.b32.xlu1 %v9311_v14, %s9599_s19  ;;  %v13514_v39 = vadd.f32 %v13360_v49, %v3872_v26  ;;  %v9313_v54 = vpop.eup %9312  ;;  %v6990_v49 = vmul.f32 -1.442695, %v13370_v23  ;;  %v6998_v14 = vmul.f32 -1.442695, %v13409_v53 }
 0x4b0   : > { %9318 = vtanh.f32 %v13507_v2 }
 0x4b1   : > { %4188 = vrot.lane.b32.xlu0 %v9309_v36, %s9599_s19  ;;  %9320 = vtanh.f32 %v13514_v39 }
 0x4b2   : > { %9322 = vpow2.f32 %v6989_v30 }
 0x4b3   : > { %4190 = vrot.lane.b32.xlu1 %v9313_v54, %s9599_s19  ;;  %9324 = vpow2.f32 %v6987_v37 }
 0x4b4   : > { %9326 = vpow2.f32 %v6990_v49 }
 0x4b5   : > { %9328 = vpow2.f32 %v6988_v12 }
 0x4b6   : > { %9330 = vpow2.f32 %v6993_v48  ;;  %v7002_v48 = vmul.f32 -1.442695, %v13427_v55 }
 0x4b7   : > { %9332 = vpow2.f32 %v6991_v45 }
 0x4b8   : > { %v9315_v60 = vpop.eup %9314  ;;  %9334 = vpow2.f32 %v6994_v3  ;;  %v7000_v3 = vmul.f32 -1.442695, %v13433_v56 }
 0x4b9   : > { %4200 = vrot.lane.b32.xlu0 %v9315_v60, %s9599_s19  ;;  %v9317_v34 = vpop.eup %9316  ;;  %9336 = vpow2.f32 %v6992_v42  ;;  %v6996_v60 = vmul.f32 -1.442695, %v13414_v28  ;;  %v6999_v28 = vmul.f32 -1.442695, %v13424_v62 }
 0x4ba   : > { %v9319_v18 = vpop.eup %9318  ;;  %9338 = vpow2.f32 %v6997_v50 }
 0x4bb   : > { %4202 = vrot.lane.b32.xlu1 %v9319_v18, %s9599_s19  ;;  %v9321_v0 = vpop.eup %9320 }
 0x4bc   : > { %v9323_v23 = vpop.eup %9322 }
 0x4bd   : > { %4196 = vrot.lane.b32.xlu0 %v9317_v34, %s9599_s19  ;;  %v9325_v38 = vpop.eup %9324  ;;  %v3982_v22 = vadd.f32 1.0, %v9323_v23 }
 0x4be   : > { %v9327_v41 = vpop.eup %9326  ;;  %v3980_v7 = vadd.f32 1.0, %v9325_v38 }
 0x4bf   : > { %4198 = vrot.lane.b32.xlu1 %v9321_v0, %s9599_s19  ;;  %v9329_v58 = vpop.eup %9328  ;;  %9340 = vrcp.f32 %v3982_v22  ;;  %v3983_v17 = vadd.f32 1.0, %v9327_v41 }
 0x4c0   : > { %v9331_v40 = vpop.eup %9330  ;;  %v3981_v63 = vadd.f32 1.0, %v9329_v58  ;;  %9342 = vrcp.f32 %v3980_v7  ;;  %v7005_v7 = vmul.f32 -1.442695, %v13437_v43  ;;  %v7003_v43 = vmul.f32 -1.442695, %v13444_v35 }
 0x4c1   : > { %v9333_v51 = vpop.eup %9332  ;;  %v3986_v15 = vadd.f32 1.0, %v9331_v40  ;;  %9344 = vrcp.f32 %v3983_v17 }
 0x4c2   : > { %v9335_v5 = vpop.eup %9334  ;;  %v3984_v19 = vadd.f32 1.0, %v9333_v51  ;;  %9346 = vrcp.f32 %v3981_v63 }
 0x4c3   : > { %v9337_v26 = vpop.eup %9336  ;;  %v3987_v57 = vadd.f32 1.0, %v9335_v5  ;;  %9348 = vpow2.f32 %v6995_v47 }
 0x4c4   : > { %v3985_v36 = vadd.f32 1.0, %v9337_v26  ;;  %9350 = vrcp.f32 %v3986_v15  ;;  %v9339_v54 = vpop.eup %9338 }
 0x4c5   : > { %9352 = vrcp.f32 %v3984_v19  ;;  %v3990_v37 = vadd.f32 1.0, %v9339_v54  ;;  %v7006_v54 = vmul.f32 -1.442695, %v13447_v21 }
 0x4c6   : > { %9354 = vrcp.f32 %v3987_v57 }
 0x4c7   : > { %9356 = vrcp.f32 %v3985_v36 }
 0x4c8   : > { %9358 = vpow2.f32 %v6998_v14 }
 0x4c9   : > { %v13534_v30 = vpop.eup %9340  ;;  %9360 = vpow2.f32 %v6996_v60 }
 0x4ca   : > { %v13545_v18 = vpop.eup %9342 }
 0x4cb   : > { %v13549_v4 = vpop.eup %9344 }
 0x4cc   : > { %v13551_v12 = vpop.eup %9346 }
 0x4cd   : > { %v9349_v62 = vpop.eup %9348 }
 0x4ce   : > { %v13557_v23 = vpop.eup %9350  ;;  %v3988_v22 = vadd.f32 1.0, %v9349_v62 }
 0x4cf   : > { %v13561_v50 = vpop.eup %9352 }
 0x4d0   : > { %v13565_v38 = vpop.eup %9354 }
 0x4d1   : > { %v13568_v58 = vpop.eup %9356 }
 0x4d2   : > { %v9359_v17 = vpop.eup %9358 }
 0x4d3   : > { %v9361_v51 = vpop.eup %9360  ;;  %v3991_v36 = vadd.f32 1.0, %v9359_v17 }
 0x4d4   : > { %v3989_v35 = vadd.f32 1.0, %v9361_v51 }
 0x4e0   : > { %v4145_v34 = vpop.permute.xlu0 %4144 }
 0x4e1   : > { %v4238_v53 = vmul.f32 %v13534_v30, %v4145_v34 }
 0x4e2   : > { %v4147_v0 = vpop.permute.xlu1 %4146 }
 0x4e3   : > { %9362 = vtanh.f32 %v4238_v53  ;;  %4622 = vst.msk [vmem:[%s13541_s27 + $0x10] sm:$0xff] %vm1750_vm5, %v4238_v53  ;;  %v4239_v42 = vmul.f32 %v13549_v4, %v4147_v0 }
 0x4e4   : > { %9364 = vpow2.f32 %v7001_v10  ;;  %v4141_v49 = vpop.permute.xlu0 %4140 }
 0x4e5   : > { %9366 = vrcp.f32 %v3990_v37  ;;  %v4236_v45 = vmul.f32 %v13545_v18, %v4141_v49  ;;  %4623 = vst.msk [vmem:[%s13541_s27 + $0x18] sm:$0xff] %vm1750_vm5, %v4239_v42 }
 0x4e6   : > { %9368 = vpow2.f32 %v6999_v28 }
 0x4e7   : > { %9370 = vtanh.f32 %v4236_v45  ;;  %4620 = vst.msk [vmem:[%s13541_s27] sm:$0xff] %vm1750_vm5, %v4236_v45 }
 0x4e8   : > { %9372 = vtanh.f32 %v4239_v42  ;;  %v4153_v55 = vpop.permute.xlu0 %4152 }
 0x4e9   : > { %9374 = vpow2.f32 %v7002_v48  ;;  %v4143_v56 = vpop.permute.xlu1 %4142  ;;  %v4242_v41 = vmul.f32 %v13557_v23, %v4153_v55  ;;  %v7004_v55 = vmul.f32 -1.442695, %v13454_v1 }
 0x4ea   : > { %9376 = vpow2.f32 %v7000_v3  ;;  %v4237_v40 = vmul.f32 %v13551_v12, %v4143_v56 }
 0x4eb   : > { %9378 = vtanh.f32 %v4242_v41  ;;  %4626 = vst.msk [vmem:[%s13541_s27 + $0x30] sm:$0xff] %vm1750_vm5, %v4242_v41 }
 0x4ec   : > { %9380 = vtanh.f32 %v4237_v40  ;;  %4621 = vst.msk [vmem:[%s13541_s27 + $0x8] sm:$0xff] %vm1750_vm5, %v4237_v40  ;;  %v4149_v63 = vpop.permute.xlu0 %4148  ;;  %v7009_v40 = vmul.f32 -1.442695, %v13458_v61 }
 0x4ed   : > { %v9363_v5 = vpop.eup %9362  ;;  %9382 = vrcp.f32 %v3988_v22  ;;  %v4155_v47 = vpop.permute.xlu1 %4154  ;;  %v4240_v26 = vmul.f32 %v13561_v50, %v4149_v63 }
 0x4ee   : > { %v9365_v15 = vpop.eup %9364  ;;  %9384 = vpow2.f32 %v7005_v7  ;;  %v4243_v19 = vmul.f32 %v13565_v38, %v4155_v47  ;;  %4336 = vrot.lane.b32.xlu0 %v9363_v5, %s9592_s24  ;;  %v7007_v47 = vmul.f32 -1.442695, %v13464_v27 }
 0x4ef   : > { %v13580_v57 = vpop.eup %9366  ;;  %9386 = vtanh.f32 %v4240_v26  ;;  %4624 = vst.msk [vmem:[%s13541_s27 + $0x20] sm:$0xff] %vm1750_vm5, %v4240_v26  ;;  %v3994_v53 = vadd.f32 1.0, %v9365_v15  ;;  %v7010_v15 = vmul.f32 -1.442695, %v13467_v9 }
 0x4f0   : > { %v9369_v14 = vpop.eup %9368  ;;  %9388 = vtanh.f32 %v4243_v19  ;;  %4627 = vst.msk [vmem:[%s13541_s27 + $0x38] sm:$0xff] %vm1750_vm5, %v4243_v19  ;;  %v4161_v0 = vpop.permute.xlu0 %4160 }
 0x4f1   : > { %v9371_v60 = vpop.eup %9370  ;;  %9390 = vpow2.f32 %v7003_v43  ;;  %v4151_v34 = vpop.permute.xlu1 %4150  ;;  %v3992_v48 = vadd.f32 1.0, %v9369_v14  ;;  %v4246_v3 = vmul.f32 %v13580_v57, %v4161_v0 }
 0x4f2   : > { %v9373_v10 = vpop.eup %9372  ;;  %4332 = vrot.lane.b32.xlu0 %v9371_v60, %s9592_s24  ;;  %9392 = vrcp.f32 %v3991_v36  ;;  %v4241_v28 = vmul.f32 %v13568_v58, %v4151_v34 }
 0x4f3   : > { %v9375_v37 = vpop.eup %9374  ;;  %4338 = vrot.lane.b32.xlu1 %v9373_v10, %s9592_s24  ;;  %9394 = vpow2.f32 %v7006_v54  ;;  %4630 = vst.msk [vmem:[%s13541_s27 + $0x50] sm:$0xff] %vm1750_vm5, %v4246_v3 }
 0x4f4   : > { %v9377_v49 = vpop.eup %9376  ;;  %9396 = vtanh.f32 %v4241_v28  ;;  %4625 = vst.msk [vmem:[%s13541_s27 + $0x28] sm:$0xff] %vm1750_vm5, %v4241_v28  ;;  %v3995_v62 = vadd.f32 1.0, %v9375_v37  ;;  %v4157_v17 = vpop.permute.xlu0 %4156  ;;  %v7008_v37 = vmul.f32 -1.442695, %v13474_v16 }
 0x4f5   : > { %v9379_v21 = vpop.eup %9378  ;;  %9398 = vrcp.f32 %v3989_v35  ;;  %v3993_v56 = vadd.f32 1.0, %v9377_v49  ;;  %v4163_v26 = vpop.permute.xlu1 %4162  ;;  %v7013_v49 = vmul.f32 -1.442695, %v13477_v24 }
 0x4f6   : > { %v9381_v45 = vpop.eup %9380  ;;  %4344 = vrot.lane.b32.xlu0 %v9379_v21, %s9592_s24  ;;  %9400 = vrcp.f32 %v3994_v53 }
 0x4f7   : > { %v13594_v42 = vpop.eup %9382  ;;  %4334 = vrot.lane.b32.xlu1 %v9381_v45, %s9592_s24  ;;  %9402 = vtanh.f32 %v4246_v3 }
 0x4f8   : > { %v9385_v22 = vpop.eup %9384  ;;  %9404 = vrcp.f32 %v3992_v48  ;;  %v4244_v1 = vmul.f32 %v13594_v42, %v4157_v17 }
 0x4f9   : > { %v9387_v41 = vpop.eup %9386  ;;  %9406 = vrcp.f32 %v3995_v62  ;;  %v3998_v51 = vadd.f32 1.0, %v9385_v22  ;;  %v4159_v54 = vpop.permute.xlu1 %4158 }
 0x4fa   : > { %v9389_v7 = vpop.eup %9388  ;;  %4340 = vrot.lane.b32.xlu0 %v9387_v41, %s9592_s24  ;;  %9408 = vpow2.f32 %v7004_v55  ;;  %4628 = vst.msk [vmem:[%s13541_s27 + $0x40] sm:$0xff] %vm1750_vm5, %v4244_v1 }
 0x4fb   : > { %4346 = vrot.lane.b32.xlu1 %v9389_v7, %s9592_s24  ;;  %v9391_v63 = vpop.eup %9390  ;;  %9410 = vrcp.f32 %v3993_v56  ;;  %v4169_v35 = vpop.permute.xlu0 %4168  ;;  %v7011_v56 = vmul.f32 -1.442695, %v13484_v46 }
 0x4fc   : > { %v13604_v5 = vpop.eup %9392  ;;  %9412 = vtanh.f32 %v4244_v1  ;;  %v3996_v36 = vadd.f32 1.0, %v9391_v63  ;;  %v7014_v1 = vmul.f32 -1.442695, %v13487_v11 }
 0x4fd   : > { %v9395_v61 = vpop.eup %9394  ;;  %9414 = vpow2.f32 %v7009_v40  ;;  %v4247_v43 = vmul.f32 %v13604_v5, %v4163_v26  ;;  %v4171_v45 = vpop.permute.xlu1 %4170 }
 0x4fe   : > { %v9397_v19 = vpop.eup %9396  ;;  %9416 = vrcp.f32 %v3998_v51  ;;  %v3999_v9 = vadd.f32 1.0, %v9395_v61 }
 0x4ff   : > { %v13611_v14 = vpop.eup %9398  ;;  %9418 = vtanh.f32 %v4247_v43  ;;  %4631 = vst.msk [vmem:[%s13541_s27 + $0x58] sm:$0xff] %vm1750_vm5, %v4247_v43  ;;  %4342 = vrot.lane.b32.xlu1 %v9397_v19, %s9592_s24  ;;  %v4165_v16 = vpop.permute.xlu0 %4164 }
 0x500   : > { %v13616_v27 = vpop.eup %9400  ;;  %9420 = vpow2.f32 %v7007_v47  ;;  %v4245_v10 = vmul.f32 %v13611_v14, %v4159_v54 }
 0x501   : > { %v9403_v60 = vpop.eup %9402  ;;  %9422 = vpow2.f32 %v7010_v15  ;;  %v4250_v53 = vmul.f32 %v13616_v27, %v4169_v35  ;;  %v4167_v17 = vpop.permute.xlu1 %4166 }
 0x502   : > { %v13619_v34 = vpop.eup %9404  ;;  %9424 = vrcp.f32 %v3996_v36  ;;  %4352 = vrot.lane.b32.xlu0 %v9403_v60, %s9592_s24  ;;  %4629 = vst.msk [vmem:[%s13541_s27 + $0x48] sm:$0xff] %vm1750_vm5, %v4245_v10  ;;  %v7012_v36 = vmul.f32 -1.442695, %v13494_v6 }
 0x503   : > { %v13624_v28 = vpop.eup %9406  ;;  %9426 = vtanh.f32 %v4245_v10  ;;  %4634 = vst.msk [vmem:[%s13541_s27 + $0x70] sm:$0xff] %vm1750_vm5, %v4250_v53  ;;  %v4248_v62 = vmul.f32 %v13619_v34, %v4165_v16 }
 0x504   : > { %v9409_v21 = vpop.eup %9408  ;;  %9428 = vtanh.f32 %v4250_v53  ;;  %v4251_v55 = vmul.f32 %v13624_v28, %v4171_v45 }
 0x505   : > { %v13631_v48 = vpop.eup %9410  ;;  %9430 = vrcp.f32 %v3999_v9  ;;  %v3997_v24 = vadd.f32 1.0, %v9409_v21  ;;  %4632 = vst.msk [vmem:[%s13541_s27 + $0x60] sm:$0xff] %vm1750_vm5, %v4248_v62  ;;  %v7017_v9 = vmul.f32 -1.442695, %v13497_v20 }
 0x506   : > { %v9413_v0 = vpop.eup %9412  ;;  %9432 = vpow2.f32 %v7008_v37  ;;  %4635 = vst.msk [vmem:[%s13541_s27 + $0x78] sm:$0xff] %vm1750_vm5, %v4251_v55  ;;  %v4249_v63 = vmul.f32 %v13631_v48, %v4167_v17 }
 0x507   : > { %v9415_v3 = vpop.eup %9414  ;;  %9434 = vpow2.f32 %v7013_v49  ;;  %4348 = vrot.lane.b32.xlu0 %v9413_v0, %s9592_s24  ;;  %v4177_v61 = vpop.permute.xlu0 %4176  ;;  %v7015_v0 = vmul.f32 -1.442695, %v13504_v44 }
 0x508   : > { %v13636_v22 = vpop.eup %9416  ;;  %9436 = vtanh.f32 %v4248_v62  ;;  %v4002_v40 = vadd.f32 1.0, %v9415_v3  ;;  %4633 = vst.msk [vmem:[%s13541_s27 + $0x68] sm:$0xff] %vm1750_vm5, %v4249_v63  ;;  %v7018_v3 = vmul.f32 -1.442695, %v13507_v2 }
 0x509   : > { %v9419_v41 = vpop.eup %9418  ;;  %9438 = vtanh.f32 %v4251_v55  ;;  %v4254_v19 = vmul.f32 %v13636_v22, %v4177_v61  ;;  %v4179_v6 = vpop.permute.xlu1 %4178 }
 0x50a   : > { %v9421_v7 = vpop.eup %9420  ;;  %4354 = vrot.lane.b32.xlu1 %v9419_v41, %s9592_s24  ;;  %9440 = vrcp.f32 %v3997_v24 }
 0x50b   : > { %v9423_v51 = vpop.eup %9422  ;;  %9442 = vpow2.f32 %v7011_v56  ;;  %v4000_v26 = vadd.f32 1.0, %v9421_v7  ;;  %4638 = vst.msk [vmem:[%s13541_s27 + $0x90] sm:$0xff] %vm1750_vm5, %v4254_v19  ;;  %v4173_v10 = vpop.permute.xlu0 %4172 }
 0x50c   : > { %v13646_v46 = vpop.eup %9424  ;;  %9444 = vtanh.f32 %v4249_v63  ;;  %v4003_v43 = vadd.f32 1.0, %v9423_v51  ;;  %v7016_v51 = vmul.f32 -1.442695, %v13514_v39 }
 0x50d   : > { %v9427_v47 = vpop.eup %9426  ;;  %9446 = vrcp.f32 %v4002_v40  ;;  %v4252_v37 = vmul.f32 %v13646_v46, %v4173_v10  ;;  %v4175_v24 = vpop.permute.xlu1 %4174 }
 0x50e   : > { %v9429_v15 = vpop.eup %9428  ;;  %4350 = vrot.lane.b32.xlu1 %v9427_v47, %s9592_s24  ;;  %9448 = vpow2.f32 %v7014_v1 }
 0x50f   : > { %v13652_v11 = vpop.eup %9430  ;;  %4360 = vrot.lane.b32.xlu0 %v9429_v15, %s9592_s24  ;;  %9450 = vtanh.f32 %v4254_v19  ;;  %4636 = vst.msk [vmem:[%s13541_s27 + $0x80] sm:$0xff] %vm1750_vm5, %v4252_v37 }
 0x510   : > { %v9433_v54 = vpop.eup %9432  ;;  %9452 = vrcp.f32 %v4000_v26  ;;  %v4255_v16 = vmul.f32 %v13652_v11, %v4179_v6 }
 0x511   : > { %v9435_v60 = vpop.eup %9434  ;;  %9454 = vrcp.f32 %v4003_v43  ;;  %v4001_v49 = vadd.f32 1.0, %v9433_v54 }
 0x512   : > { %v9437_v35 = vpop.eup %9436  ;;  %9456 = vpow2.f32 %v7012_v36  ;;  %v4006_v21 = vadd.f32 1.0, %v9435_v60  ;;  %4639 = vst.msk [vmem:[%s13541_s27 + $0x98] sm:$0xff] %vm1750_vm5, %v4255_v16 }
 0x513   : > { %v9439_v53 = vpop.eup %9438  ;;  %4356 = vrot.lane.b32.xlu0 %v9437_v35, %s9592_s24  ;;  %9458 = vtanh.f32 %v4252_v37  ;;  %v4185_v44 = vpop.permute.xlu0 %4184 }
 0x514   : > { %4362 = vrot.lane.b32.xlu1 %v9439_v53, %s9592_s24  ;;  %v13665_v20 = vpop.eup %9440  ;;  %9460 = vpow2.f32 %v7017_v9 }
 0x515   : > { %v9443_v45 = vpop.eup %9442  ;;  %9462 = vtanh.f32 %v4255_v16  ;;  %v4253_v56 = vmul.f32 %v13665_v20, %v4175_v24  ;;  %v4187_v19 = vpop.permute.xlu1 %4186 }
 0x516   : > { %v9445_v62 = vpop.eup %9444  ;;  %9464 = vrcp.f32 %v4001_v49  ;;  %v4004_v40 = vadd.f32 1.0, %v9443_v45 }
 0x517   : > { %v13671_v55 = vpop.eup %9446  ;;  %9466 = vrcp.f32 %v4006_v21  ;;  %4637 = vst.msk [vmem:[%s13541_s27 + $0x88] sm:$0xff] %vm1750_vm5, %v4253_v56  ;;  %v4181_v26 = vpop.permute.xlu0 %4180 }
 0x518   : > { %4358 = vrot.lane.b32.xlu1 %v9445_v62, %s9592_s24  ;;  %v9449_v41 = vpop.eup %9448  ;;  %9468 = vpow2.f32 %v7015_v0  ;;  %v4258_v17 = vmul.f32 %v13671_v55, %v4185_v44 }
 0x519   : > { %v9451_v7 = vpop.eup %9450  ;;  %9470 = vtanh.f32 %v4253_v56  ;;  %v4007_v47 = vadd.f32 1.0, %v9449_v41  ;;  %v4183_v37 = vpop.permute.xlu1 %4182 }
 0x51a   : > { %v13678_v2 = vpop.eup %9452  ;;  %9472 = vpow2.f32 %v7018_v3  ;;  %4368 = vrot.lane.b32.xlu0 %v9451_v7, %s9592_s24  ;;  %4642 = vst.msk [vmem:[%s13541_s27 + $0xb0] sm:$0xff] %vm1750_vm5, %v4258_v17 }
 0x51b   : > { %v13682_v1 = vpop.eup %9454  ;;  %9474 = vtanh.f32 %v4258_v17  ;;  %v4256_v15 = vmul.f32 %v13678_v2, %v4181_v26 }
 0x51c   : > { %v9457_v63 = vpop.eup %9456  ;;  %9476 = vrcp.f32 %v4004_v40  ;;  %v4259_v36 = vmul.f32 %v13682_v1, %v4187_v19 }
 0x51d   : > { %v9459_v61 = vpop.eup %9458  ;;  %9478 = vpow2.f32 %v7016_v51  ;;  %4640 = vst.msk [vmem:[%s13541_s27 + $0xa0] sm:$0xff] %vm1750_vm5, %v4256_v15  ;;  %v4005_v60 = vadd.f32 1.0, %v9457_v63 }
 0x51e   : > { %v9461_v43 = vpop.eup %9460  ;;  %4364 = vrot.lane.b32.xlu0 %v9459_v61, %s9592_s24  ;;  %9480 = vtanh.f32 %v4256_v15  ;;  %4643 = vst.msk [vmem:[%s13541_s27 + $0xb8] sm:$0xff] %vm1750_vm5, %v4259_v36 }
 0x51f   : > { %v9463_v39 = vpop.eup %9462  ;;  %9482 = vrcp.f32 %v4007_v47  ;;  %v4010_v35 = vadd.f32 1.0, %v9461_v43  ;;  %v4193_v21 = vpop.permute.xlu0 %4192 }
 0x520   : > { %v13691_v54 = vpop.eup %9464  ;;  %4370 = vrot.lane.b32.xlu1 %v9463_v39, %s9592_s24  ;;  %9484 = vtanh.f32 %v4259_v36 }
 0x521   : > { %v13694_v9 = vpop.eup %9466  ;;  %v4257_v49 = vmul.f32 %v13691_v54, %v4183_v37  ;;  %9486 = vrcp.f32 %v4005_v60  ;;  %v4195_v40 = vpop.permute.xlu1 %4194 }
 0x522   : > { %v9469_v10 = vpop.eup %9468  ;;  %v4262_v0 = vmul.f32 %v13694_v9, %v4193_v21 }
 0x523   : > { %v9471_v53 = vpop.eup %9470  ;;  %9488 = vtanh.f32 %v4257_v49  ;;  %4641 = vst.msk [vmem:[%s13541_s27 + $0xa8] sm:$0xff] %vm1750_vm5, %v4257_v49  ;;  %v4008_v45 = vadd.f32 1.0, %v9469_v10  ;;  %v4189_v56 = vpop.permute.xlu0 %4188 }
 0x524   : > { %v9473_v6 = vpop.eup %9472  ;;  %4366 = vrot.lane.b32.xlu1 %v9471_v53, %s9592_s24  ;;  %9490 = vrcp.f32 %v4010_v35  ;;  %4646 = vst.msk [vmem:[%s13541_s27 + $0xd0] sm:$0xff] %vm1750_vm5, %v4262_v0 }
 0x525   : > { %v9475_v16 = vpop.eup %9474  ;;  %9492 = vtanh.f32 %v4262_v0  ;;  %v4011_v24 = vadd.f32 1.0, %v9473_v6  ;;  %v4191_v26 = vpop.permute.xlu1 %4190 }
 0x526   : > { %4376 = vrot.lane.b32.xlu0 %v9475_v16, %s9592_s24  ;;  %v13704_v62 = vpop.eup %9476  ;;  %9494 = vrcp.f32 %v4008_v45 }
 0x527   : > { %v9479_v3 = vpop.eup %9478  ;;  %v4260_v44 = vmul.f32 %v13704_v62, %v4189_v56 }
 0x528   : > { %v9481_v41 = vpop.eup %9480  ;;  %v4009_v63 = vadd.f32 1.0, %v9479_v3 }
 0x529   : > { %v13709_v7 = vpop.eup %9482  ;;  %9496 = vtanh.f32 %v4260_v44  ;;  %4644 = vst.msk [vmem:[%s13541_s27 + $0xc0] sm:$0xff] %vm1750_vm5, %v4260_v44 }
 0x52a   : > { %4372 = vrot.lane.b32.xlu0 %v9481_v41, %s9592_s24  ;;  %v9485_v17 = vpop.eup %9484  ;;  %v4263_v51 = vmul.f32 %v13709_v7, %v4195_v40  ;;  %9498 = vrcp.f32 %v4011_v24 }
 0x52b   : > { %4378 = vrot.lane.b32.xlu1 %v9485_v17, %s9592_s24  ;;  %v13718_v47 = vpop.eup %9486  ;;  %v4201_v19 = vpop.permute.xlu0 %4200 }
 0x52c   : > { %9500 = vtanh.f32 %v4263_v51  ;;  %4647 = vst.msk [vmem:[%s13541_s27 + $0xd8] sm:$0xff] %vm1750_vm5, %v4263_v51  ;;  %v4261_v15 = vmul.f32 %v13718_v47, %v4191_v26 }
 0x52d   : > { %v9489_v61 = vpop.eup %9488  ;;  %9502 = vrcp.f32 %v4009_v63  ;;  %v4203_v49 = vpop.permute.xlu1 %4202 }
 0x52e   : > { %v13721_v43 = vpop.eup %9490  ;;  %9504 = vtanh.f32 %v4261_v15  ;;  %4645 = vst.msk [vmem:[%s13541_s27 + $0xc8] sm:$0xff] %vm1750_vm5, %v4261_v15 }
 0x52f   : > { %4374 = vrot.lane.b32.xlu1 %v9489_v61, %s9592_s24  ;;  %v9493_v39 = vpop.eup %9492  ;;  %v4266_v36 = vmul.f32 %v13721_v43, %v4201_v19  ;;  %v4197_v10 = vpop.permute.xlu0 %4196 }
 0x530   : > { %4384 = vrot.lane.b32.xlu0 %v9493_v39, %s9592_s24  ;;  %v13730_v60 = vpop.eup %9494 }
 0x531   : > { %9506 = vtanh.f32 %v4266_v36  ;;  %4650 = vst.msk [vmem:[%s13541_s27 + $0xf0] sm:$0xff] %vm1750_vm5, %v4266_v36  ;;  %v4264_v37 = vmul.f32 %v13730_v60, %v4197_v10  ;;  %v4199_v0 = vpop.permute.xlu1 %4198 }
 0x533   : > { %v9497_v35 = vpop.eup %9496  ;;  %9508 = vtanh.f32 %v4264_v37  ;;  %4648 = vst.msk [vmem:[%s13541_s27 + $0xe0] sm:$0xff] %vm1750_vm5, %v4264_v37 }
 0x534   : > { %v13733_v53 = vpop.eup %9498  ;;  %4380 = vrot.lane.b32.xlu0 %v9497_v35, %s9592_s24 }
 0x535   : > { %v4267_v21 = vmul.f32 %v13733_v53, %v4203_v49 }
 0x536   : > { %v9501_v6 = vpop.eup %9500 }
 0x537   : > { %4386 = vrot.lane.b32.xlu1 %v9501_v6, %s9592_s24  ;;  %9510 = vtanh.f32 %v4267_v21  ;;  %4651 = vst.msk [vmem:[%s13541_s27 + $0xf8] sm:$0xff] %vm1750_vm5, %v4267_v21  ;;  %v13742_v16 = vpop.eup %9502 }
 0x538   : > { %v9505_v45 = vpop.eup %9504  ;;  %v4265_v3 = vmul.f32 %v13742_v16, %v4199_v0 }
 0x53a   : > { %9512 = vtanh.f32 %v4265_v3  ;;  %4649 = vst.msk [vmem:[%s13541_s27 + $0xe8] sm:$0xff] %vm1750_vm5, %v4265_v3 }
 0x53b   : > { %4382 = vrot.lane.b32.xlu1 %v9505_v45, %s9592_s24  ;;  %v9507_v24 = vpop.eup %9506 }
 0x53c   : > { %4392 = vrot.lane.b32.xlu0 %v9507_v24, %s9592_s24 }
 0x53d   : > { %v9509_v56 = vpop.eup %9508 }
 0x540   : > { %4388 = vrot.lane.b32.xlu0 %v9509_v56, %s9592_s24 }
 0x541   : > { %v9511_v41 = vpop.eup %9510 }
 0x542   : > { %4394 = vrot.lane.b32.xlu1 %v9511_v41, %s9592_s24 }
 0x544   : > { %v9513_v44 = vpop.eup %9512 }
 0x546   : > { %4390 = vrot.lane.b32.xlu1 %v9513_v44, %s9592_s24 }
 0x560   : > { %v4337_v40 = vpop.permute.xlu0 %4336 }
 0x561   : > { %v4430_v17 = vmul.f32 %v13534_v30, %v4337_v40 }
 0x563   : > { %4496 = vrot.lane.b32.xlu0 %v4430_v17, %s9600_s16 }
 0x564   : > { %v4333_v51 = vpop.permute.xlu0 %4332 }
 0x565   : > { %v4339_v63 = vpop.permute.xlu1 %4338  ;;  %v4428_v26 = vmul.f32 %v13545_v18, %v4333_v51 }
 0x566   : > { %v4431_v61 = vmul.f32 %v13549_v4, %v4339_v63 }
 0x567   : > { %4492 = vrot.lane.b32.xlu0 %v4428_v26, %s9600_s16 }
 0x568   : > { %4498 = vrot.lane.b32.xlu1 %v4431_v61, %s9600_s16  ;;  %v4345_v15 = vpop.permute.xlu0 %4344 }
 0x569   : > { %v4335_v19 = vpop.permute.xlu1 %4334  ;;  %v4434_v39 = vmul.f32 %v13557_v23, %v4345_v15 }
 0x56a   : > { %v4429_v36 = vmul.f32 %v13551_v12, %v4335_v19 }
 0x56b   : > { %4504 = vrot.lane.b32.xlu0 %v4434_v39, %s9600_s16 }
 0x56c   : > { %4494 = vrot.lane.b32.xlu1 %v4429_v36, %s9600_s16  ;;  %v4341_v30 = vpop.permute.xlu0 %4340 }
 0x56d   : > { %v4347_v10 = vpop.permute.xlu1 %4346  ;;  %v4432_v18 = vmul.f32 %v13561_v50, %v4341_v30 }
 0x56e   : > { %v4435_v4 = vmul.f32 %v13565_v38, %v4347_v10 }
 0x56f   : > { %4500 = vrot.lane.b32.xlu0 %v4432_v18, %s9600_s16 }
 0x570   : > { %4506 = vrot.lane.b32.xlu1 %v4435_v4, %s9600_s16 }
 0x571   : > { %v4343_v35 = vpop.permute.xlu1 %4342 }
 0x572   : > { %v4433_v37 = vmul.f32 %v13568_v58, %v4343_v35 }
 0x574   : > { %v4353_v23 = vpop.permute.xlu0 %4352  ;;  %4502 = vrot.lane.b32.xlu1 %v4433_v37, %s9600_s16 }
 0x575   : > { %v4438_v12 = vmul.f32 %v13580_v57, %v4353_v23 }
 0x577   : > { %4512 = vrot.lane.b32.xlu0 %v4438_v12, %s9600_s16 }
 0x579   : > { %v4349_v49 = vpop.permute.xlu0 %4348 }
 0x57a   : > { %v4436_v6 = vmul.f32 %v13594_v42, %v4349_v49 }
 0x57c   : > { %v4355_v50 = vpop.permute.xlu1 %4354  ;;  %4508 = vrot.lane.b32.xlu0 %v4436_v6, %s9600_s16 }
 0x57d   : > { %v4439_v38 = vmul.f32 %v13604_v5, %v4355_v50 }
 0x57f   : > { %4514 = vrot.lane.b32.xlu1 %v4439_v38, %s9600_s16 }
 0x580   : > { %v4351_v21 = vpop.permute.xlu1 %4350 }
 0x581   : > { %v4437_v58 = vmul.f32 %v13611_v14, %v4351_v21  ;;  %v4361_v0 = vpop.permute.xlu0 %4360 }
 0x582   : > { %v4442_v45 = vmul.f32 %v13616_v27, %v4361_v0 }
 0x583   : > { %4510 = vrot.lane.b32.xlu1 %v4437_v58, %s9600_s16 }
 0x584   : > { %4520 = vrot.lane.b32.xlu0 %v4442_v45, %s9600_s16 }
 0x585   : > { %v4357_v57 = vpop.permute.xlu0 %4356 }
 0x586   : > { %v4363_v3 = vpop.permute.xlu1 %4362  ;;  %v4440_v42 = vmul.f32 %v13619_v34, %v4357_v57 }
 0x587   : > { %v4443_v24 = vmul.f32 %v13624_v28, %v4363_v3 }
 0x588   : > { %4516 = vrot.lane.b32.xlu0 %v4440_v42, %s9600_s16 }
 0x589   : > { %4522 = vrot.lane.b32.xlu1 %v4443_v24, %s9600_s16 }
 0x58a   : > { %v4359_v5 = vpop.permute.xlu1 %4358 }
 0x58b   : > { %v4441_v14 = vmul.f32 %v13631_v48, %v4359_v5 }
 0x58c   : > { %v4369_v27 = vpop.permute.xlu0 %4368 }
 0x58d   : > { %4518 = vrot.lane.b32.xlu1 %v4441_v14, %s9600_s16  ;;  %v4446_v56 = vmul.f32 %v13636_v22, %v4369_v27 }
 0x58f   : > { %4528 = vrot.lane.b32.xlu0 %v4446_v56, %s9600_s16 }
 0x590   : > { %v4365_v41 = vpop.permute.xlu0 %4364 }
 0x591   : > { %v4444_v44 = vmul.f32 %v13646_v46, %v4365_v41 }
 0x592   : > { %v4371_v34 = vpop.permute.xlu1 %4370 }
 0x593   : > { %v4447_v28 = vmul.f32 %v13652_v11, %v4371_v34  ;;  %4524 = vrot.lane.b32.xlu0 %v4444_v44, %s9600_s16 }
 0x595   : > { %4530 = vrot.lane.b32.xlu1 %v4447_v28, %s9600_s16 }
 0x596   : > { %v4367_v40 = vpop.permute.xlu1 %4366 }
 0x597   : > { %v4445_v48 = vmul.f32 %v13665_v20, %v4367_v40 }
 0x598   : > { %v4377_v17 = vpop.permute.xlu0 %4376 }
 0x599   : > { %4526 = vrot.lane.b32.xlu1 %v4445_v48, %s9600_s16  ;;  %v4450_v22 = vmul.f32 %v13671_v55, %v4377_v17 }
 0x59b   : > { %4536 = vrot.lane.b32.xlu0 %v4450_v22, %s9600_s16 }
 0x59c   : > { %v4373_v51 = vpop.permute.xlu0 %4372 }
 0x59d   : > { %v4448_v46 = vmul.f32 %v13678_v2, %v4373_v51  ;;  %v4379_v63 = vpop.permute.xlu1 %4378 }
 0x59e   : > { %v4451_v11 = vmul.f32 %v13682_v1, %v4379_v63 }
 0x59f   : > { %4532 = vrot.lane.b32.xlu0 %v4448_v46, %s9600_s16 }
 0x5a0   : > { %4538 = vrot.lane.b32.xlu1 %v4451_v11, %s9600_s16 }
 0x5a1   : > { %v4375_v26 = vpop.permute.xlu1 %4374 }
 0x5a2   : > { %v4449_v20 = vmul.f32 %v13691_v54, %v4375_v26  ;;  %v4385_v61 = vpop.permute.xlu0 %4384 }
 0x5a3   : > { %v4454_v55 = vmul.f32 %v13694_v9, %v4385_v61 }
 0x5a4   : > { %4534 = vrot.lane.b32.xlu1 %v4449_v20, %s9600_s16 }
 0x5a5   : > { %4544 = vrot.lane.b32.xlu0 %v4454_v55, %s9600_s16 }
 0x5a6   : > { %v4381_v15 = vpop.permute.xlu0 %4380 }
 0x5a7   : > { %v4452_v2 = vmul.f32 %v13704_v62, %v4381_v15 }
 0x5a9   : > { %v4387_v19 = vpop.permute.xlu1 %4386  ;;  %4540 = vrot.lane.b32.xlu0 %v4452_v2, %s9600_s16 }
 0x5aa   : > { %v4455_v1 = vmul.f32 %v13709_v7, %v4387_v19 }
 0x5ac   : > { %4546 = vrot.lane.b32.xlu1 %v4455_v1, %s9600_s16 }
 0x5ad   : > { %v4383_v39 = vpop.permute.xlu1 %4382 }
 0x5ae   : > { %v4453_v54 = vmul.f32 %v13718_v47, %v4383_v39  ;;  %v4393_v36 = vpop.permute.xlu0 %4392 }
 0x5af   : > { %v4458_v9 = vmul.f32 %v13721_v43, %v4393_v36 }
 0x5b0   : > { %4542 = vrot.lane.b32.xlu1 %v4453_v54, %s9600_s16 }
 0x5b1   : > { %4552 = vrot.lane.b32.xlu0 %v4458_v9, %s9600_s16 }
 0x5b2   : > { %v4389_v30 = vpop.permute.xlu0 %4388 }
 0x5b3   : > { %v4456_v62 = vmul.f32 %v13730_v60, %v4389_v30 }
 0x5b4   : > { %v4395_v10 = vpop.permute.xlu1 %4394 }
 0x5b5   : > { %v4459_v7 = vmul.f32 %v13733_v53, %v4395_v10  ;;  %4548 = vrot.lane.b32.xlu0 %v4456_v62, %s9600_s16 }
 0x5b7   : > { %4554 = vrot.lane.b32.xlu1 %v4459_v7, %s9600_s16 }
 0x5b8   : > { %v4391_v18 = vpop.permute.xlu1 %4390 }
 0x5b9   : > { %v4457_v47 = vmul.f32 %v13742_v16, %v4391_v18 }
 0x5bb   : > { %4550 = vrot.lane.b32.xlu1 %v4457_v47, %s9600_s16 }
 0x5d5   : > { %v4497_v43 = vpop.permute.xlu0 %4496 }
 0x5d6   : > { %4590 = vst.msk [vmem:[%s13820_s21 + $0x10] sm:$0xff] %vm1750_vm5, %v4497_v43  ;;  %v4665_v60 = vrot.slane %v4497_v43, 7 }
 0x5d8   : > { %v13827_v16 = vsel %vm609_vm0, 0.0, %v4665_v60 }
 0x5d9   : > { %v4493_v53 = vpop.permute.xlu0 %4492  ;;  %v4824_v49 = vrot.slane %v13827_v16, 1  ;;  %v4989_v14 = vrot.slane %v13827_v16, 2 }
 0x5da   : > { %v4499_v4 = vpop.permute.xlu1 %4498  ;;  %4588 = vst.msk [vmem:[%s13820_s21] sm:$0xff] %vm1750_vm5, %v4493_v53  ;;  %v4662_v21 = vrot.slane %v4493_v53, 7 }
 0x5db   : > { %4591 = vst.msk [vmem:[%s13820_s21 + $0x18] sm:$0xff] %vm1750_vm5, %v4499_v4  ;;  %v4666_v35 = vrot.slane %v4499_v4, 7  ;;  %v9248_v4 = vld [vmem:[%s15480_s5] sm:$0xff]  }
 0x5dc   : > { %v13854_v27 = vsel %vm609_vm0, 0.0, %v4662_v21  ;;  %7234 = vmatprep.subr.bf16.mxu0 %v9248_v4 }
 0x5dd   : > { %v13832_v37 = vsel %vm609_vm0, %v4665_v60, %v4666_v35  ;;  %v4774_v23 = vsel %vm609_vm0, %v4666_v35, 0.0  ;;  %v4505_v12 = vpop.permute.xlu0 %4504  ;;  %v4984_v63 = vrot.slane %v13854_v27, 2  ;;  %v4819_v15 = vrot.slane %v13854_v27, 1  ;;  %v9249_v35 = vld [vmem:[%s15482_s7] sm:$0xff]   ;;  %7235 = vmatpush3.bf16.msra.mxu0 %v9248_v4 }
 0x5de   : > { %v4495_v6 = vpop.permute.xlu1 %4494  ;;  %v8630_v50 = vpack.i.bf16 %v13832_v37, %v13827_v16  ;;  %4594 = vst.msk [vmem:[%s13820_s21 + $0x30] sm:$0xff] %vm1750_vm5, %v4505_v12  ;;  %v4827_v38 = vrot.slane %v4774_v23, 1  ;;  %v4825_v0 = vrot.slane %v13832_v37, 1  ;;  %v4992_v45 = vrot.slane %v4774_v23, 2  ;;  %7276 = vmatprep.subr.bf16.mxu1 %v9249_v35 }
 0x5df   : > { %4589 = vst.msk [vmem:[%s13820_s21 + $0x8] sm:$0xff] %vm1750_vm5, %v4495_v6  ;;  %v4663_v58 = vrot.slane %v4495_v6, 7  ;;  %v4990_v24 = vrot.slane %v13832_v37, 2  ;;  %v4671_v2 = vrot.slane %v4505_v12, 7  ;;  %7277 = vmatpush3.bf16.msra.mxu1 %v9249_v35 }
 0x5e0   : > { %8631 = vrot.lane.b32.xlu0 %v8630_v50, %s9595_s23  ;;  %8626 = vrot.lane.b32.xlu1 %v8630_v50, %s9592_s24  ;;  %v4826_v3 = vsel %vm775_vm1, %v4824_v49, %v4825_v0  ;;  %v4828_v56 = vsel %vm775_vm1, %v4825_v0, %v4827_v38  ;;  %v9250_v0 = vld [vmem:[%s15480_s5 + $0x8] sm:$0xff]  }
 0x5e1   : > { %v13846_v57 = vsel %vm609_vm0, %v4662_v21, %v4663_v58  ;;  %v4501_v42 = vpop.permute.xlu0 %4500  ;;  %v8640_v41 = vpack.i.bf16 %v4828_v56, %v4826_v3  ;;  %v4991_v34 = vsel %vm952_vm2, %v4989_v14, %v4990_v24  ;;  %v4993_v28 = vsel %vm952_vm2, %v4990_v24, %v4992_v45  ;;  %v9251_v45 = vld [vmem:[%s15482_s7 + $0x8] sm:$0xff]   ;;  %7236 = vmatprep.subr.bf16.mxu0 %v9250_v0 }
 0x5e2   : > { %v4507_v5 = vpop.permute.xlu1 %4506  ;;  %4592 = vst.msk [vmem:[%s13820_s21 + $0x20] sm:$0xff] %vm1750_vm5, %v4501_v42  ;;  %v8635_v44 = vpack.i.bf16 %v13846_v57, %v13854_v27  ;;  %v4773_v40 = vsel %vm609_vm0, %v4663_v58, 0.0  ;;  %v8645_v17 = vpack.i.bf16 %v4993_v28, %v4991_v34  ;;  %v4985_v22 = vrot.slane %v13846_v57, 2  ;;  %7278 = vmatprep.subr.bf16.mxu1 %v9251_v45  ;;  %7237 = vmatpush3.bf16.msra.mxu0 %v9250_v0 }
 0x5e3   : > { %4595 = vst.msk [vmem:[%s13820_s21 + $0x38] sm:$0xff] %vm1750_vm5, %v4507_v5  ;;  %v4987_v51 = vrot.slane %v4773_v40, 2  ;;  %v4820_v11 = vrot.slane %v13846_v57, 1  ;;  %v4822_v26 = vrot.slane %v4773_v40, 1  ;;  %v4672_v20 = vrot.slane %v4507_v5, 7  ;;  %7279 = vmatpush3.bf16.msra.mxu1 %v9251_v45 }
 0x5e4   : > { %8641 = vrot.lane.b32.xlu1 %v8640_v41, %s9588_s20  ;;  %8636 = vrot.lane.b32.xlu0 %v8635_v44, %s9592_s24  ;;  %v4986_v61 = vsel %vm952_vm2, %v4984_v63, %v4985_v22  ;;  %v13903_v10 = vsel %vm609_vm0, 0.0, %v4671_v2  ;;  %v4668_v7 = vrot.slane %v4501_v42, 7  ;;  %v9253_v44 = vld [vmem:[%s15482_s7 + $0x10] sm:$0xff]   ;;  %v9254_v63 = vld [vmem:[%s15480_s5 + $0x18] sm:$0xff]  }
 0x5e5   : > { %v4988_v55 = vsel %vm952_vm2, %v4985_v22, %v4987_v51  ;;  %v13892_v39 = vsel %vm609_vm0, %v4671_v2, %v4672_v20  ;;  %v4821_v36 = vsel %vm775_vm1, %v4819_v15, %v4820_v11  ;;  %v4823_v9 = vsel %vm775_vm1, %v4820_v11, %v4822_v26  ;;  %7280 = vmatprep.subr.bf16.mxu1 %v9253_v44  ;;  %v9255_v11 = vld [vmem:[%s15482_s7 + $0x18] sm:$0xff]  }
 0x5e6   : > { %v13866_v48 = vpop.permute.xlu1 %4502  ;;  %v8675_v1 = vpack.i.bf16 %v4988_v55, %v4986_v61  ;;  %v4776_v30 = vsel %vm609_vm0, %v4672_v20, 0.0  ;;  %v8670_v18 = vpack.i.bf16 %v4823_v9, %v4821_v36  ;;  %v8690_v47 = vpack.i.bf16 %v13892_v39, %v13903_v10  ;;  %v9256_v36 = vld [vmem:[%s15480_s5 + $0x20] ss:$0 sps:$4 sm:$0xff]  }
 0x5e7   : > { %4593 = vst.msk [vmem:[%s13820_s21 + $0x28] sm:$0xff] %vm1750_vm5, %v13866_v48  ;;  %v4669_v54 = vrot.slane %v13866_v48, 7  ;;  %v4837_v43 = vrot.slane %v4776_v30, 1  ;;  %v4835_v53 = vrot.slane %v13892_v39, 1  ;;  %v4834_v12 = vrot.slane %v13903_v10, 1  ;;  %7281 = vmatpush3.bf16.msra.mxu1 %v9253_v44 }
 0x5e8   : > { %8651 = vrot.lane.b32.xlu1 %v8640_v41, %s9594_s18  ;;  %8646 = vrot.lane.b32.xlu0 %v8645_v17, %s9590_s22  ;;  %v13926_v49 = vsel %vm609_vm0, 0.0, %v4668_v7  ;;  %v5002_v24 = vrot.slane %v4776_v30, 2  ;;  %v5000_v5 = vrot.slane %v13892_v39, 2  ;;  %v4999_v56 = vrot.slane %v13903_v10, 2  ;;  %v9257_v9 = vld [vmem:[%s15482_s7 + $0x20] ss:$0 sps:$4 sm:$0xff]  }
 0x5e9   : > { %v13874_v46 = vpop.permute.xlu0 %4512  ;;  %v13911_v60 = vsel %vm609_vm0, %v4668_v7, %v4669_v54  ;;  %v4836_v38 = vsel %vm775_vm1, %v4834_v12, %v4835_v53  ;;  %v4838_v21 = vsel %vm775_vm1, %v4835_v53, %v4837_v43  ;;  %v4775_v14 = vsel %vm609_vm0, %v4669_v54, 0.0  ;;  %7282 = vmatprep.subr.bf16.mxu1 %v9255_v11 }
 0x5ea   : > { %4598 = vst.msk [vmem:[%s13820_s21 + $0x50] sm:$0xff] %vm1750_vm5, %v13874_v46  ;;  %v8705_v50 = vpack.i.bf16 %v13911_v60, %v13926_v49  ;;  %v8710_v42 = vpack.i.bf16 %v4838_v21, %v4836_v38  ;;  %v4997_v28 = vrot.slane %v4775_v14, 2  ;;  %v5001_v40 = vsel %vm952_vm2, %v4999_v56, %v5000_v5 }
 0x5eb   : > { %v5003_v48 = vsel %vm952_vm2, %v5000_v5, %v5002_v24  ;;  %v4994_v22 = vrot.slane %v13926_v49, 2  ;;  %v4832_v20 = vrot.slane %v4775_v14, 1  ;;  %v4830_v15 = vrot.slane %v13911_v60, 1  ;;  %7283 = vmatpush3.bf16.msra.mxu1 %v9255_v11 }
 0x5ec   : > { %8656 = vrot.lane.b32.xlu1 %v8645_v17, %s9596_s25  ;;  %8661 = vrot.lane.b32.xlu0 %v8640_v41, %s9597_s28  ;;  %v9252_v41 = vld [vmem:[%s15480_s5 + $0x10] sm:$0xff]   ;;  %v8725_v26 = vpack.i.bf16 %v5003_v48, %v5001_v40  ;;  %v4829_v2 = vrot.slane %v13926_v49, 1  ;;  %v4677_v4 = vrot.slane %v13874_v46, 7  ;;  %v6069_v12 = vsel %vm3719_vm13, %v9256_v36, 0 }
 0x5ed   : > { %7238 = vmatprep.subr.bf16.mxu0 %v9252_v41  ;;  %7321 = vmatprep.subr.msk.bf16.mxu1 %vm3719_vm13, %v9257_v9 }
 0x5ee   : > { %v13886_v19 = vpop.permute.xlu0 %4508  ;;  %7239 = vmatpush3.bf16.msra.mxu0 %v9252_v41  ;;  %v4831_v7 = vsel %vm775_vm1, %v4829_v2, %v4830_v15  ;;  %v14043_v46 = vsel %vm609_vm0, 0.0, %v4677_v4 }
 0x5ef   : > { %4596 = vst.msk [vmem:[%s13820_s21 + $0x40] sm:$0xff] %vm1750_vm5, %v13886_v19  ;;  %7240 = vmatprep.subr.bf16.mxu0 %v9254_v63  ;;  %v4674_v0 = vrot.slane %v13886_v19, 7  ;;  %v4844_v19 = vrot.slane %v14043_v46, 1 }
 0x5f0   : > { %8666 = vrot.lane.b32.xlu0 %v8645_v17, %s9598_s30  ;;  %8676 = vrot.lane.b32.xlu1 %v8675_v1, %s9590_s22  ;;  %v4995_v17 = vrot.slane %v13911_v60, 2 }
 0x5f1   : > { %v13898_v62 = vpop.permute.xlu1 %4514  ;;  %v14066_v56 = vsel %vm609_vm0, 0.0, %v4674_v0 }
 0x5f2   : > { %4599 = vst.msk [vmem:[%s13820_s21 + $0x58] sm:$0xff] %vm1750_vm5, %v13898_v62  ;;  %v4996_v61 = vsel %vm952_vm2, %v4994_v22, %v4995_v17  ;;  %v4998_v55 = vsel %vm952_vm2, %v4995_v17, %v4997_v28  ;;  %7241 = vmatpush3.bf16.msra.mxu0 %v9254_v63  ;;  %v4678_v43 = vrot.slane %v13898_v62, 7 }
 0x5f3   : > { %v8745_v54 = vpack.i.bf16 %v4998_v55, %v4996_v61  ;;  %7320 = vmatprep.subr.msk.bf16.mxu0 %vm3719_vm13, %v9256_v36 }
 0x5f4   : > { %8671 = vrot.lane.b32.xlu0 %v8670_v18, %s9588_s20  ;;  %8691 = vrot.lane.b32.xlu1 %v8690_v47, %s9592_s24  ;;  %v14036_v62 = vsel %vm609_vm0, %v4677_v4, %v4678_v43  ;;  %v4778_v21 = vsel %vm609_vm0, %v4678_v43, 0.0 }
 0x5f5   : > { %v13920_v23 = vpop.permute.xlu1 %4510  ;;  %v4845_v14 = vrot.slane %v14036_v62, 1  ;;  %v5012_v22 = vrot.slane %v4778_v21, 2  ;;  %v5010_v63 = vrot.slane %v14036_v62, 2 }
 0x5f6   : > { %4597 = vst.msk [vmem:[%s13820_s21 + $0x48] sm:$0xff] %vm1750_vm5, %v13920_v23  ;;  %v13931_v6 = vpop.permute.xlu0 %4520  ;;  %7243 = vmatpush3.bf16.msra.mxu0 %v6069_v12  ;;  %v4675_v38 = vrot.slane %v13920_v23, 7  ;;  %v8770_v23 = vpack.i.bf16 %v14036_v62, %v14043_v46  ;;  %v4839_v12 = vrot.slane %v14066_v56, 1 }
 0x5f7   : > { %4602 = vst.msk [vmem:[%s13820_s21 + $0x70] sm:$0xff] %vm1750_vm5, %v13931_v6  ;;  %v4846_v28 = vsel %vm775_vm1, %v4844_v19, %v4845_v14  ;;  %v5013_v2 = vsel %vm952_vm2, %v5010_v63, %v5012_v22 }
 0x5f8   : > { %8681 = vrot.lane.b32.xlu0 %v8670_v18, %s9594_s18  ;;  %8706 = vrot.lane.b32.xlu1 %v8705_v50, %s9595_s23  ;;  %v4833_v18 = vsel %vm775_vm1, %v4830_v15, %v4832_v20  ;;  %v14054_v24 = vsel %vm609_vm0, %v4674_v0, %v4675_v38  ;;  %v4777_v11 = vsel %vm609_vm0, %v4675_v38, 0.0 }
 0x5f9   : > { %v8780_v41 = vpack.i.bf16 %v14054_v24, %v14066_v56  ;;  %v5007_v61 = vrot.slane %v4777_v11, 2  ;;  %v5005_v36 = vrot.slane %v14054_v24, 2  ;;  %v4840_v4 = vrot.slane %v14054_v24, 1 }
 0x5fa   : > { %v13942_v58 = vpop.permute.xlu0 %4516 }
 0x5fb   : > { %v13950_v3 = vpop.permute.xlu1 %4522  ;;  %4600 = vst.msk [vmem:[%s13820_s21 + $0x60] sm:$0xff] %vm1750_vm5, %v13942_v58  ;;  %v5008_v43 = vsel %vm952_vm2, %v5005_v36, %v5007_v61 }
 0x5fc   : > { %4603 = vst.msk [vmem:[%s13820_s21 + $0x78] sm:$0xff] %vm1750_vm5, %v13950_v3  ;;  %8686 = vrot.lane.b32.xlu0 %v8675_v1, %s9596_s25  ;;  %8711 = vrot.lane.b32.xlu1 %v8710_v42, %s9588_s20 }
 0x5ff   : > { %v13969_v34 = vpop.permute.xlu1 %4518 }
 0x600   : > { %4601 = vst.msk [vmem:[%s13820_s21 + $0x68] sm:$0xff] %vm1750_vm5, %v13969_v34  ;;  %8696 = vrot.lane.b32.xlu0 %v8690_v47, %s9595_s23  ;;  %8721 = vrot.lane.b32.xlu1 %v8710_v42, %s9594_s18  ;;  %v8750_v47 = vpack.i.bf16 %v4833_v18, %v4831_v7  ;;  %v4842_v7 = vrot.slane %v4777_v11, 1 }
 0x601   : > { %v13980_v51 = vpop.permute.xlu0 %4528 }
 0x602   : > { %4606 = vst.msk [vmem:[%s13820_s21 + $0x90] sm:$0xff] %vm1750_vm5, %v13980_v51  ;;  %v4843_v0 = vsel %vm775_vm1, %v4840_v4, %v4842_v7 }
 0x604   : > { %8726 = vrot.lane.b32.xlu1 %v8725_v26, %s9596_s25  ;;  %8701 = vrot.lane.b32.xlu0 %v8705_v50, %s9592_s24  ;;  %v6276_v50 = vsel %vm3719_vm13, %v9257_v9, 0 }
 0x605   : > { %v13997_v1 = vpop.permute.xlu0 %4524  ;;  %7285 = vmatpush3.bf16.msra.mxu1 %v6276_v50 }
 0x606   : > { %4604 = vst.msk [vmem:[%s13820_s21 + $0x80] sm:$0xff] %vm1750_vm5, %v13997_v1 }
 0x607   : > { %v14008_v30 = vpop.permute.xlu1 %4530 }
 0x608   : > { %4607 = vst.msk [vmem:[%s13820_s21 + $0x98] sm:$0xff] %vm1750_vm5, %v14008_v30  ;;  %8716 = vrot.lane.b32.xlu0 %v8725_v26, %s9590_s22  ;;  %8746 = vrot.lane.b32.xlu1 %v8745_v54, %s9590_s22 }
 0x60b   : > { %v14020_v53 = vpop.permute.xlu1 %4526 }
 0x60c   : > { %4605 = vst.msk [vmem:[%s13820_s21 + $0x88] sm:$0xff] %vm1750_vm5, %v14020_v53  ;;  %8731 = vrot.lane.b32.xlu0 %v8710_v42, %s9597_s28  ;;  %8751 = vrot.lane.b32.xlu1 %v8750_v47, %s9597_s28  ;;  %v4847_v42 = vrot.slane %v4778_v21, 1  ;;  %v4841_v21 = vsel %vm775_vm1, %v4839_v12, %v4840_v4 }
 0x60d   : > { %v14028_v35 = vpop.permute.xlu0 %4536 }
 0x60e   : > { %4610 = vst.msk [vmem:[%s13820_s21 + $0xb0] sm:$0xff] %vm1750_vm5, %v14028_v35  ;;  %v4848_v40 = vsel %vm775_vm1, %v4845_v14, %v4847_v42  ;;  %v8830_v42 = vpack.i.bf16 %v4843_v0, %v4841_v21  ;;  %v4684_v14 = vrot.slane %v13950_v3, 7 }
 0x60f   : > { %v8790_v17 = vpack.i.bf16 %v4848_v40, %v4846_v28  ;;  %v4681_v40 = vrot.slane %v13969_v34, 7 }
 0x610   : > { %8736 = vrot.lane.b32.xlu0 %v8725_v26, %s9598_s30  ;;  %8756 = vrot.lane.b32.xlu1 %v8745_v54, %s9598_s30  ;;  %v5009_v26 = vrot.slane %v14043_v46, 2  ;;  %v4780_v3 = vsel %vm609_vm0, %v4684_v14, 0.0 }
 0x611   : > { %v14046_v45 = vpop.permute.xlu0 %4532  ;;  %v4857_v34 = vrot.slane %v4780_v3, 1 }
 0x612   : > { %4608 = vst.msk [vmem:[%s13820_s21 + $0xa0] sm:$0xff] %vm1750_vm5, %v14046_v45  ;;  %v14056_v5 = vpop.permute.xlu1 %4538  ;;  %v5011_v15 = vsel %vm952_vm2, %v5009_v26, %v5010_v63 }
 0x613   : > { %4611 = vst.msk [vmem:[%s13820_s21 + $0xb8] sm:$0xff] %vm1750_vm5, %v14056_v5  ;;  %v8805_v9 = vpack.i.bf16 %v5013_v2, %v5011_v15 }
 0x614   : > { %8741 = vrot.lane.b32.xlu0 %v8750_v47, %s9588_s20  ;;  %8771 = vrot.lane.b32.xlu1 %v8770_v23, %s9592_s24 }
 0x616   : > { %v14070_v44 = vpop.permute.xlu1 %4534 }
 0x617   : > { %4609 = vst.msk [vmem:[%s13820_s21 + $0xa8] sm:$0xff] %vm1750_vm5, %v14070_v44  ;;  %v14079_v48 = vpop.permute.xlu0 %4544  ;;  %v4693_v8 = vrot.slane %v14070_v44, 7 }
 0x618   : > { %8761 = vrot.lane.b32.xlu0 %v8750_v47, %s9594_s18  ;;  %8781 = vrot.lane.b32.xlu1 %v8780_v41, %s9595_s23  ;;  %4614 = vst.msk [vmem:[%s13820_s21 + $0xd0] sm:$0xff] %vm1750_vm5, %v14079_v48 }
 0x61b   : > { %v14089_v20 = vpop.permute.xlu0 %4540 }
 0x61c   : > { %8766 = vrot.lane.b32.xlu0 %v8745_v54, %s9596_s25  ;;  %8791 = vrot.lane.b32.xlu1 %v8790_v17, %s9588_s20  ;;  %4612 = vst.msk [vmem:[%s13820_s21 + $0xc0] sm:$0xff] %vm1750_vm5, %v14089_v20  ;;  %v5004_v54 = vrot.slane %v14066_v56, 2 }
 0x61e   : > { %v14094_v55 = vpop.permute.xlu1 %4546  ;;  %v5006_v47 = vsel %vm952_vm2, %v5004_v54, %v5005_v36 }
 0x61f   : > { %4615 = vst.msk [vmem:[%s13820_s21 + $0xd8] sm:$0xff] %vm1750_vm5, %v14094_v55  ;;  %v8825_v38 = vpack.i.bf16 %v5008_v43, %v5006_v47  ;;  %v4779_v47 = vsel %vm609_vm0, %v4681_v40, 0.0 }
 0x620   : > { %8776 = vrot.lane.b32.xlu0 %v8770_v23, %s9595_s23  ;;  %8801 = vrot.lane.b32.xlu1 %v8790_v17, %s9594_s18  ;;  %v5017_v4 = vrot.slane %v4779_v47, 2 }
 0x622   : > { %v14105_v18 = vpop.permute.xlu1 %4542 }
 0x623   : > { %4613 = vst.msk [vmem:[%s13820_s21 + $0xc8] sm:$0xff] %vm1750_vm5, %v14105_v18  ;;  %v14116_v50 = vpop.permute.xlu0 %4552 }
 0x624   : > { %8786 = vrot.lane.b32.xlu0 %v8780_v41, %s9592_s24  ;;  %8806 = vrot.lane.b32.xlu1 %v8805_v9, %s9596_s25  ;;  %4618 = vst.msk [vmem:[%s13820_s21 + $0xf0] sm:$0xff] %vm1750_vm5, %v14116_v50  ;;  %v4683_v41 = vrot.slane %v13931_v6, 7  ;;  %v4680_v6 = vrot.slane %v13942_v58, 7 }
 0x626   : > { %v14140_v28 = vsel %vm609_vm0, %v4683_v41, %v4684_v14  ;;  %v14158_v11 = vsel %vm609_vm0, %v4680_v6, %v4681_v40  ;;  %v14165_v15 = vsel %vm609_vm0, 0.0, %v4680_v6 }
 0x627   : > { %v14125_v23 = vpop.permute.xlu0 %4548  ;;  %v4855_v26 = vrot.slane %v14140_v28, 1  ;;  %v8860_v58 = vpack.i.bf16 %v14158_v11, %v14165_v15  ;;  %v5020_v7 = vrot.slane %v14140_v28, 2  ;;  %v5015_v0 = vrot.slane %v14158_v11, 2 }
 0x628   : > { %8796 = vrot.lane.b32.xlu0 %v8805_v9, %s9590_s22  ;;  %8826 = vrot.lane.b32.xlu1 %v8825_v38, %s9590_s22  ;;  %4616 = vst.msk [vmem:[%s13820_s21 + $0xe0] sm:$0xff] %vm1750_vm5, %v14125_v23  ;;  %v4849_v6 = vrot.slane %v14165_v15, 1 }
 0x629   : > { %v14131_v19 = vpop.permute.xlu1 %4554  ;;  %v4858_v36 = vsel %vm775_vm1, %v4855_v26, %v4857_v34  ;;  %v5018_v40 = vsel %vm952_vm2, %v5015_v0, %v5017_v4 }
 0x62a   : > { %4619 = vst.msk [vmem:[%s13820_s21 + $0xf8] sm:$0xff] %vm1750_vm5, %v14131_v19 }
 0x62c   : > { %8811 = vrot.lane.b32.xlu0 %v8790_v17, %s9597_s28  ;;  %8831 = vrot.lane.b32.xlu1 %v8830_v42, %s9597_s28  ;;  %v14152_v17 = vsel %vm609_vm0, 0.0, %v4683_v41  ;;  %v4852_v41 = vrot.slane %v4779_v47, 1 }
 0x62d   : > { %v14143_v22 = vpop.permute.xlu1 %4550  ;;  %v8850_v63 = vpack.i.bf16 %v14140_v28, %v14152_v17  ;;  %v4854_v61 = vrot.slane %v14152_v17, 1  ;;  %v5019_v43 = vrot.slane %v14152_v17, 2 }
 0x62e   : > { %4617 = vst.msk [vmem:[%s13820_s21 + $0xe8] sm:$0xff] %vm1750_vm5, %v14143_v22 }
 0x62f   : > { %v4856_v2 = vsel %vm775_vm1, %v4854_v61, %v4855_v26  ;;  %v5021_v12 = vsel %vm952_vm2, %v5019_v43, %v5020_v7 }
 0x630   : > { %8816 = vrot.lane.b32.xlu0 %v8805_v9, %s9598_s30  ;;  %8836 = vrot.lane.b32.xlu1 %v8825_v38, %s9598_s30  ;;  %v8870_v54 = vpack.i.bf16 %v4858_v36, %v4856_v2  ;;  %v5022_v9 = vrot.slane %v4780_v3, 2  ;;  %v4850_v3 = vrot.slane %v14158_v11, 1  ;;  %v4690_v2 = vrot.slane %v14008_v30, 7 }
 0x632   : > { %v5023_v21 = vsel %vm952_vm2, %v5020_v7, %v5022_v9  ;;  %v4853_v26 = vsel %vm775_vm1, %v4850_v3, %v4852_v41  ;;  %v4687_v9 = vrot.slane %v14020_v53, 7  ;;  %v4782_v7 = vsel %vm609_vm0, %v4690_v2, 0.0 }
 0x633   : > { %v8885_v14 = vpack.i.bf16 %v5023_v21, %v5021_v12  ;;  %v4867_v4 = vrot.slane %v4782_v7, 1 }
 0x634   : > { %8821 = vrot.lane.b32.xlu0 %v8830_v42, %s9588_s20  ;;  %8851 = vrot.lane.b32.xlu1 %v8850_v63, %s9592_s24 }
 0x638   : > { %8841 = vrot.lane.b32.xlu0 %v8830_v42, %s9594_s18  ;;  %8861 = vrot.lane.b32.xlu1 %v8860_v58, %s9595_s23  ;;  %v5014_v42 = vrot.slane %v14165_v15, 2 }
 0x63c   : > { %8846 = vrot.lane.b32.xlu0 %v8825_v38, %s9596_s25  ;;  %8871 = vrot.lane.b32.xlu1 %v8870_v54, %s9588_s20  ;;  %v5016_v38 = vsel %vm952_vm2, %v5014_v42, %v5015_v0 }
 0x63d   : > { %v8905_v34 = vpack.i.bf16 %v5018_v40, %v5016_v38 }
 0x640   : > { %8856 = vrot.lane.b32.xlu0 %v8850_v63, %s9595_s23  ;;  %8881 = vrot.lane.b32.xlu1 %v8870_v54, %s9594_s18  ;;  %v4851_v63 = vsel %vm775_vm1, %v4849_v6, %v4850_v3 }
 0x641   : > { %v8910_v61 = vpack.i.bf16 %v4853_v26, %v4851_v63  ;;  %v5032_v63 = vrot.slane %v4782_v7, 2 }
 0x644   : > { %8866 = vrot.lane.b32.xlu0 %v8860_v58, %s9592_s24  ;;  %8886 = vrot.lane.b32.xlu1 %v8885_v14, %s9596_s25  ;;  %v4689_v58 = vrot.slane %v13980_v51, 7  ;;  %v4686_v51 = vrot.slane %v13997_v1, 7 }
 0x646   : > { %v14199_v36 = vsel %vm609_vm0, %v4689_v58, %v4690_v2  ;;  %v14216_v53 = vsel %vm609_vm0, %v4686_v51, %v4687_v9  ;;  %v14223_v0 = vsel %vm609_vm0, 0.0, %v4686_v51  ;;  %v4781_v2 = vsel %vm609_vm0, %v4687_v9, 0.0 }
 0x647   : > { %16213 = vst [vmem:[#allocation26_spill] sm:$0xff] %v14199_v36  ;;  %v4865_v12 = vrot.slane %v14199_v36, 1  ;;  %16215 = vst [vmem:[#allocation22_spill] sm:$0xff] %v14223_v0  ;;  %v5030_v26 = vrot.slane %v14199_v36, 2  ;;  %v5025_v7 = vrot.slane %v14216_v53, 2  ;;  %v4862_v59 = vrot.slane %v4781_v2, 1 }
 0x648   : > { %8876 = vrot.lane.b32.xlu0 %v8885_v14, %s9590_s22  ;;  %8906 = vrot.lane.b32.xlu1 %v8905_v34, %s9590_s22 }
 0x649   : > { %v4868_v38 = vsel %vm775_vm1, %v4865_v12, %v4867_v4  ;;  %v5027_v4 = vrot.slane %v4781_v2, 2 }
 0x64c   : > { %8891 = vrot.lane.b32.xlu0 %v8870_v54, %s9597_s28  ;;  %8911 = vrot.lane.b32.xlu1 %v8910_v61, %s9597_s28  ;;  %v14210_v54 = vsel %vm609_vm0, 0.0, %v4689_v58 }
 0x64d   : > { %16214 = vst [vmem:[#allocation21_spill] sm:$0xff] %v14210_v54  ;;  %v8930_v43 = vpack.i.bf16 %v14199_v36, %v14210_v54  ;;  %v4864_v21 = vrot.slane %v14210_v54, 1  ;;  %v5029_v58 = vrot.slane %v14210_v54, 2 }
 0x64f   : > { %v4866_v41 = vsel %vm775_vm1, %v4864_v21, %v4865_v12  ;;  %v5031_v12 = vsel %vm952_vm2, %v5029_v58, %v5030_v26  ;;  %v5033_v21 = vsel %vm952_vm2, %v5030_v26, %v5032_v63  ;;  %v5028_v58 = vsel %vm952_vm2, %v5025_v7, %v5027_v4 }
 0x650   : > { %8896 = vrot.lane.b32.xlu0 %v8885_v14, %s9598_s30  ;;  %8916 = vrot.lane.b32.xlu1 %v8905_v34, %s9598_s30  ;;  %v8940_v14 = vpack.i.bf16 %v14216_v53, %v14223_v0  ;;  %v8950_v6 = vpack.i.bf16 %v4868_v38, %v4866_v41  ;;  %v8965_v38 = vpack.i.bf16 %v5033_v21, %v5031_v12  ;;  %v4860_v63 = vrot.slane %v14216_v53, 1 }
 0x651   : > { %v4696_v12 = vrot.slane %v14056_v5, 7  ;;  %v4695_v4 = vrot.slane %v14028_v35, 7 }
 0x652   : > { %v14205_v47 = vpop.permute.xlu1 %8626  ;;  %v14207_v30 = vpop.permute.xlu0 %8631  ;;  %v4863_v21 = vsel %vm775_vm1, %v4860_v63, %v4862_v59 }
 0x653   : > { %v14281_v5 = vsel %vm609_vm0, %v4696_v12, 0.0  ;;  %v14285_v59 = vsel %vm609_vm0, 0.0, %v4695_v4 }
 0x654   : > { %8901 = vrot.lane.b32.xlu0 %v8910_v61, %s9588_s20  ;;  %8931 = vrot.lane.b32.xlu1 %v8930_v43, %s9592_s24  ;;  %16216 = vst [vmem:[#allocation24_spill] sm:$0xff] %v14285_v59 }
 0x656   : > { %v14225_v42 = vpop.permute.xlu1 %8641  ;;  %v14227_v1 = vpop.permute.xlu0 %8636 }
 0x658   : > { %8921 = vrot.lane.b32.xlu0 %v8910_v61, %s9594_s18  ;;  %8941 = vrot.lane.b32.xlu1 %v8940_v14, %s9595_s23 }
 0x65a   : > { %v14235_v40 = vpop.permute.xlu1 %8651  ;;  %v14237_v3 = vpop.permute.xlu0 %8646 }
 0x65c   : > { %8926 = vrot.lane.b32.xlu0 %v8905_v34, %s9596_s25  ;;  %8951 = vrot.lane.b32.xlu1 %v8950_v6, %s9588_s20  ;;  %v5024_v34 = vrot.slane %v14223_v0, 2 }
 0x65e   : > { %v14244_v51 = vpop.permute.xlu1 %8656  ;;  %v14246_v61 = vpop.permute.xlu0 %8661  ;;  %v5026_v25 = vsel %vm952_vm2, %v5024_v34, %v5025_v7 }
 0x65f   : > { %v14266_v13 = vpack.i.bf16 %v5028_v58, %v5026_v25  ;;  %v8638_v58 = vunpack.i.l.bf16 %v14227_v1 }
 0x660   : > { %8936 = vrot.lane.b32.xlu0 %v8930_v43, %s9595_s23  ;;  %8961 = vrot.lane.b32.xlu1 %v8950_v6, %s9594_s18  ;;  %v4859_v43 = vrot.slane %v14223_v0, 1 }
 0x661   : > { %v5779_v52 = vsel %vm1882_vm9, %v16218_v31, %v8638_v58 }
 0x662   : > { %v14254_v9 = vpop.permute.xlu1 %8676  ;;  %v14256_v41 = vpop.permute.xlu0 %8666  ;;  %v4861_v2 = vsel %vm775_vm1, %v4859_v43, %v4860_v63  ;;  %v14291_v43 = vsel %vm609_vm0, %v4695_v4, %v4696_v12 }
 0x663   : > { %v14278_v25 = vpack.i.bf16 %v4863_v21, %v4861_v2  ;;  %v4692_v2 = vrot.slane %v14046_v45, 7  ;;  %v4877_v21 = vrot.slane %v14281_v5, 1  ;;  %v8633_v45 = vunpack.i.l.bf16 %v14207_v30 }
 0x664   : > { %8946 = vrot.lane.b32.xlu0 %v8940_v14, %s9592_s24  ;;  %8966 = vrot.lane.b32.xlu1 %v8965_v38, %s9596_s25  ;;  %v8639_v14 = vunpack.i.h.bf16 %v14227_v1  ;;  %v8634_v1 = vunpack.i.h.bf16 %v14207_v30  ;;  %v14313_v31 = vpack.i.bf16 %v14291_v43, %v14285_v59  ;;  %v8664_v30 = vunpack.i.h.bf16 %v14246_v61 }
 0x666   : > { %v14264_v26 = vpop.permute.xlu1 %8691  ;;  %v8672_v32 = vpop.permute.xlu0 %8671  ;;  %v5780_v33 = vsel %vm1882_vm9, %v16217_v29, %v8639_v14 }
 0x667   : > { %v8674_v54 = vunpack.i.h.bf16 %v8672_v32  ;;  %v8673_v36 = vunpack.i.l.bf16 %v8672_v32  ;;  %v8663_v32 = vunpack.i.l.bf16 %v14246_v61 }
 0x668   : > { %8956 = vrot.lane.b32.xlu0 %v8965_v38, %s9590_s22  ;;  %8986 = vrot.lane.b32.xlu1 %v14266_v13, %s9590_s22 }
 0x669   : > { %v5719_v61 = vsel %vm1750_vm5, %v13854_v27, %v8673_v36  ;;  %v4874_v36 = vrot.slane %v14285_v59, 1 }
 0x66a   : > { %v14276_v7 = vpop.permute.xlu1 %8706  ;;  %v8682_v34 = vpop.permute.xlu0 %8681 }
 0x66b   : > { %v8684_v35 = vunpack.i.h.bf16 %v8682_v34  ;;  %v8683_v63 = vunpack.i.l.bf16 %v8682_v34 }
 0x66c   : > { %8971 = vrot.lane.b32.xlu0 %v8950_v6, %s9597_s28  ;;  %8991 = vrot.lane.b32.xlu1 %v14278_v25, %s9597_s28 }
 0x66d   : > { %v5811_v0 = vsel %vm1948_vm11, %v5779_v52, %v8683_v63  ;;  %v5812_v44 = vsel %vm1948_vm11, %v5780_v33, %v8684_v35  ;;  %v8669_v35 = vunpack.i.h.bf16 %v14256_v41  ;;  %v8668_v63 = vunpack.i.l.bf16 %v14256_v41 }
 0x66e   : > { %v14299_v34 = vpop.permute.xlu1 %8711  ;;  %v8687_v6 = vpop.permute.xlu0 %8686  ;;  %v8679_v41 = vunpack.i.h.bf16 %v14254_v9 }
 0x66f   : > { %v8689_v12 = vunpack.i.h.bf16 %v8687_v6  ;;  %v8688_v4 = vunpack.i.l.bf16 %v8687_v6  ;;  %v5720_v6 = vsel %vm1750_vm5, %v13846_v57, %v8674_v54  ;;  %v14345_v54 = vsel %vm609_vm0, 0.0, %v4692_v2 }
 0x670   : > { %8976 = vrot.lane.b32.xlu0 %v8965_v38, %s9598_s30  ;;  %8996 = vrot.lane.b32.xlu1 %v14266_v13, %s9598_s30 }
 0x671   : > { %v5843_v29 = vsel %vm3489_vm14, %v5811_v0, %v8688_v4  ;;  %v5844_v14 = vsel %vm3489_vm14, %v5812_v44, %v8689_v12  ;;  %v14324_v0 = vsel %vm609_vm0, %v4692_v2, %v4693_v8  ;;  %v4875_v4 = vrot.slane %v14291_v43, 1 }
 0x672   : > { %v5875_v52 = vsel %vm3522_vm15, %v5843_v29, %v8633_v45  ;;  %v5876_v33 = vsel %vm3522_vm15, %v5844_v14, %v8634_v1  ;;  %v14319_v38 = vpop.permute.xlu1 %8721  ;;  %v14321_v58 = vpop.permute.xlu0 %8696  ;;  %v8678_v45 = vunpack.i.l.bf16 %v14254_v9  ;;  %v9020_v9 = vpack.i.bf16 %v14324_v0, %v14345_v54 }
 0x673   : > { %v5907_v1 = vsel %vm3555_vm3, %v5875_v52, %v8663_v32  ;;  %v5908_v12 = vsel %vm3555_vm3, %v5876_v33, %v8664_v30  ;;  %v5750_v30 = vsel %vm1816_vm7, %v5720_v6, %v8679_v41  ;;  %v8629_v52 = vunpack.i.h.bf16 %v14205_v47 }
 0x674   : > { %8981 = vrot.lane.b32.xlu0 %v14278_v25, %s9588_s20  ;;  %9011 = vrot.lane.b32.xlu1 %v14313_v31, %s9592_s24  ;;  %v5939_v57 = vsel %vm3588_vm6, %v5907_v1, %v8668_v63  ;;  %v5940_v27 = vsel %vm3588_vm6, %v5908_v12, %v8669_v35  ;;  %v5749_v32 = vsel %vm1816_vm7, %v5719_v61, %v8678_v45  ;;  %v8628_v33 = vunpack.i.l.bf16 %v14205_v47 }
 0x675   : > { %v5971_v14 = vpack.c.bf16 %v5940_v27, %v5939_v57  ;;  %v4876_v2 = vsel %vm775_vm1, %v4874_v36, %v4875_v4  ;;  %v4878_v35 = vsel %vm775_vm1, %v4875_v4, %v4877_v21  ;;  %v5042_v63 = vrot.slane %v14281_v5, 2 }
 0x676   : > { %v14347_v44 = vpop.permute.xlu1 %8726  ;;  %v14349_v29 = vpop.permute.xlu0 %8701  ;;  %v4783_v6 = vsel %vm609_vm0, %v4693_v8, 0.0  ;;  %v5782_v61 = vsel %vm1882_vm9, %v5750_v30, %v8629_v52  ;;  %v5781_v47 = vsel %vm1882_vm9, %v5749_v32, %v8628_v33  ;;  %v5040_v41 = vrot.slane %v14291_v43, 2 }
 0x677   : > { %7244 = vmatprep.mubr.msk.bf16.mxu0 %vm3670_vm8, %v5971_v14  ;;  %7286 = vmatprep.mubr.msk.bf16.mxu1 %vm3670_vm8, %v5971_v14  ;;  %v8654_v21 = vunpack.i.h.bf16 %v14235_v40  ;;  %v8653_v5 = vunpack.i.l.bf16 %v14235_v40  ;;  %v14375_v4 = vpack.i.bf16 %v4878_v35, %v4876_v2  ;;  %v5037_v45 = vrot.slane %v4783_v6, 2 }
 0x678   : > { %9001 = vrot.lane.b32.xlu0 %v14278_v25, %s9594_s18  ;;  %9021 = vrot.lane.b32.xlu1 %v9020_v9, %s9595_s23  ;;  %v5039_v25 = vrot.slane %v14285_v59, 2  ;;  %v8659_v27 = vunpack.i.h.bf16 %v14244_v51  ;;  %v8658_v36 = vunpack.i.l.bf16 %v14244_v51  ;;  %v8709_v32 = vunpack.i.h.bf16 %v14276_v7 }
 0x679   : > { %v5813_v8 = vsel %vm1948_vm11, %v5781_v47, %v8653_v5  ;;  %v5814_v57 = vsel %vm1948_vm11, %v5782_v61, %v8654_v21  ;;  %v8708_v52 = vunpack.i.l.bf16 %v14276_v7  ;;  %v5043_v33 = vsel %vm952_vm2, %v5040_v41, %v5042_v63 }
 0x67a   : > { %v14368_v1 = vpop.permute.xlu1 %8746  ;;  %v14370_v12 = vpop.permute.xlu0 %8716  ;;  %v5041_v30 = vsel %vm952_vm2, %v5039_v25, %v5040_v41  ;;  %v5845_v2 = vsel %vm3489_vm14, %v5813_v8, %v8658_v36  ;;  %v5846_v35 = vsel %vm3489_vm14, %v5814_v57, %v8659_v27  ;;  %v5034_v51 = vrot.slane %v14345_v54, 2 }
 0x67b   : > { %v4872_v21 = vrot.slane %v4783_v6, 1  ;;  %v14402_v63 = vpack.i.bf16 %v5043_v33, %v5041_v30  ;;  %v4870_v41 = vrot.slane %v14324_v0, 1  ;;  %v5877_v25 = vsel %vm3522_vm15, %v5845_v2, %v8708_v52 }
 0x67c   : > { %9006 = vrot.lane.b32.xlu0 %v14266_v13, %s9596_s25  ;;  %9031 = vrot.lane.b32.xlu1 %v14375_v4, %s9588_s20  ;;  %v5035_v13 = vrot.slane %v14324_v0, 2  ;;  %v5878_v8 = vsel %vm3522_vm15, %v5846_v35, %v8709_v32  ;;  %v4701_v59 = vrot.slane %v14079_v48, 7  ;;  %v4869_v32 = vrot.slane %v14345_v54, 1 }
 0x67d   : > { %v4702_v52 = vrot.slane %v14094_v55, 7  ;;  %v8644_v55 = vunpack.i.h.bf16 %v14225_v42 }
 0x67e   : > { %v8752_v40 = vpop.permute.xlu1 %8751  ;;  %v14386_v14 = vpop.permute.xlu0 %8731  ;;  %v5038_v6 = vsel %vm952_vm2, %v5035_v13, %v5037_v45  ;;  %v4871_v48 = vsel %vm775_vm1, %v4869_v32, %v4870_v41  ;;  %v8699_v32 = vunpack.i.h.bf16 %v14321_v58 }
 0x67f   : > { %v8754_v61 = vunpack.i.h.bf16 %v8752_v40  ;;  %v8753_v47 = vunpack.i.l.bf16 %v8752_v40  ;;  %v5036_v40 = vsel %vm952_vm2, %v5034_v51, %v5035_v13  ;;  %v14428_v13 = vsel %vm609_vm0, 0.0, %v4701_v59 }
 0x680   : > { %9016 = vrot.lane.b32.xlu0 %v14313_v31, %s9595_s23  ;;  %9041 = vrot.lane.b32.xlu1 %v14375_v4, %s9594_s18  ;;  %v14421_v45 = vpack.i.bf16 %v5038_v6, %v5036_v40  ;;  %v8643_v51 = vunpack.i.l.bf16 %v14225_v42  ;;  %v8703_v42 = vunpack.i.l.bf16 %v14349_v29 }
 0x681   : > { %v5909_v36 = vsel %vm3555_vm3, %v5877_v25, %v8753_v47  ;;  %v5910_v31 = vsel %vm3555_vm3, %v5878_v8, %v8754_v61  ;;  %v4698_v47 = vrot.slane %v14089_v20, 7 }
 0x682   : > { %v8757_v7 = vpop.permute.xlu1 %8756  ;;  %v14400_v5 = vpop.permute.xlu0 %8736 }
 0x683   : > { %v8759_v57 = vunpack.i.h.bf16 %v8757_v7  ;;  %v8758_v27 = vunpack.i.l.bf16 %v8757_v7  ;;  %v14438_v7 = vsel %vm609_vm0, %v4702_v52, 0.0 }
 0x684   : > { %9026 = vrot.lane.b32.xlu0 %v9020_v9, %s9592_s24  ;;  %9046 = vrot.lane.b32.xlu1 %v14402_v63, %s9596_s25  ;;  %v4873_v9 = vsel %vm775_vm1, %v4870_v41, %v4872_v21  ;;  %v8649_v21 = vunpack.i.h.bf16 %v14237_v3  ;;  %v8648_v41 = vunpack.i.l.bf16 %v14237_v3  ;;  %v4887_v6 = vrot.slane %v14438_v7, 1 }
 0x685   : > { %v5941_v30 = vsel %vm3588_vm6, %v5909_v36, %v8758_v27  ;;  %v5942_v33 = vsel %vm3588_vm6, %v5910_v31, %v8759_v57  ;;  %v8704_v57 = vunpack.i.h.bf16 %v14349_v29  ;;  %v9070_v27 = vpack.i.bf16 %v4873_v9, %v4871_v48 }
 0x686   : > { %v5972_v2 = vpack.c.bf16 %v5942_v33, %v5941_v30  ;;  %v14419_v35 = vpop.permute.xlu1 %8771  ;;  %v8742_v61 = vpop.permute.xlu0 %8741  ;;  %v14447_v36 = vsel %vm609_vm0, %v4701_v59, %v4702_v52  ;;  %v4699_v30 = vrot.slane %v14105_v18, 7  ;;  %v5722_v3 = vsel %vm1750_vm5, %v13832_v37, %v8644_v55 }
 0x687   : > { %v5721_v33 = vsel %vm1750_vm5, %v13827_v16, %v8643_v51  ;;  %v5752_v59 = vsel %vm1816_vm7, %v5722_v3, %v8649_v21  ;;  %v8698_v52 = vunpack.i.l.bf16 %v14321_v58  ;;  %v8743_v51 = vunpack.i.l.bf16 %v8742_v61 }
 0x688   : > { %7245 = vmatmul.mubr.msk.bf16.vlgmr.msra.gmra.mrb[32].mxu0 %vm3670_vm8, %v5972_v2  ;;  %7287 = vmatmul.mubr.msk.bf16.vlgmr.msra.gmra.mrb[32].mxu1 %vm3670_vm8, %v5972_v2  ;;  %v5751_v29 = vsel %vm1816_vm7, %v5721_v33, %v8648_v41  ;;  %v5784_v16 = vsel %vm1882_vm9, %v5752_v59, %v8704_v57  ;;  %v14474_v58 = vpack.i.bf16 %v14447_v36, %v14428_v13  ;;  %v8734_v57 = vunpack.i.h.bf16 %v14386_v14 }
 0x689   : > { %9036 = vrot.lane.b32.xlu0 %v14402_v63, %s9590_s22  ;;  %9066 = vrot.lane.b32.xlu1 %v14421_v45, %s9590_s22  ;;  %v5783_v37 = vsel %vm1882_vm9, %v5751_v29, %v8703_v42  ;;  %v8733_v42 = vunpack.i.l.bf16 %v14386_v14  ;;  %v8739_v14 = vunpack.i.h.bf16 %v14400_v5  ;;  %v8738_v59 = vunpack.i.l.bf16 %v14400_v5 }
 0x68a   : > { %v14442_v25 = vpop.permute.xlu1 %8781  ;;  %v8762_v8 = vpop.permute.xlu0 %8761  ;;  %v4885_v29 = vrot.slane %v14447_v36, 1 }
 0x68b   : > { %v8764_v31 = vunpack.i.h.bf16 %v8762_v8  ;;  %v8763_v40 = vunpack.i.l.bf16 %v8762_v8 }
 0x68d   : > { %9051 = vrot.lane.b32.xlu0 %v14375_v4, %s9597_s28  ;;  %9071 = vrot.lane.b32.xlu1 %v9070_v27, %s9597_s28  ;;  %v8744_v4 = vunpack.i.h.bf16 %v8742_v61  ;;  %v5815_v8 = vsel %vm1948_vm11, %v5783_v37, %v8763_v40  ;;  %v5816_v21 = vsel %vm1948_vm11, %v5784_v16, %v8764_v31  ;;  %v8749_v16 = vunpack.i.h.bf16 %v14368_v1 }
 0x68e   : > { %v14462_v2 = vpop.permute.xlu1 %8791  ;;  %v8767_v48 = vpop.permute.xlu0 %8766 }
 0x68f   : > { %v8769_v9 = vunpack.i.h.bf16 %v8767_v48  ;;  %v8768_v55 = vunpack.i.l.bf16 %v8767_v48 }
 0x691   : > { %v5847_v41 = vsel %vm3489_vm14, %v5815_v8, %v8768_v55  ;;  %v5848_v3 = vsel %vm3489_vm14, %v5816_v21, %v8769_v9  ;;  %9056 = vrot.lane.b32.xlu0 %v14402_v63, %s9598_s30  ;;  %9076 = vrot.lane.b32.xlu1 %v14421_v45, %s9598_s30  ;;  %v14491_v63 = vsel %vm609_vm0, %v4698_v47, %v4699_v30  ;;  %v8748_v9 = vunpack.i.l.bf16 %v14368_v1 }
 0x692   : > { %v5879_v61 = vsel %vm3522_vm15, %v5847_v41, %v8698_v52  ;;  %v5880_v40 = vsel %vm3522_vm15, %v5848_v3, %v8699_v32  ;;  %v14482_v31 = vpop.permute.xlu1 %8801  ;;  %v14484_v33 = vpop.permute.xlu0 %8776  ;;  %v5724_v32 = vsel %vm1750_vm5, %v13911_v60, %v8744_v4  ;;  %v5723_v52 = vsel %vm1750_vm5, %v13926_v49, %v8743_v51 }
 0x693   : > { %v5911_v48 = vsel %vm3555_vm3, %v5879_v61, %v8733_v42  ;;  %v5912_v37 = vsel %vm3555_vm3, %v5880_v40, %v8734_v57  ;;  %v4884_v8 = vrot.slane %v14428_v13, 1  ;;  %v14517_v1 = vsel %vm609_vm0, 0.0, %v4698_v47 }
 0x694   : > { %v5943_v5 = vsel %vm3588_vm6, %v5911_v48, %v8738_v59  ;;  %v5944_v55 = vsel %vm3588_vm6, %v5912_v37, %v8739_v14  ;;  %v5754_v51 = vsel %vm1816_vm7, %v5724_v32, %v8749_v16  ;;  %v5753_v21 = vsel %vm1816_vm7, %v5723_v52, %v8748_v9 }
 0x695   : > { %9061 = vrot.lane.b32.xlu0 %v9070_v27, %s9588_s20  ;;  %9091 = vrot.lane.b32.xlu1 %v14474_v58, %s9592_s24  ;;  %v5973_v4 = vpack.c.bf16 %v5944_v55, %v5943_v5  ;;  %v8694_v41 = vunpack.i.h.bf16 %v14264_v26  ;;  %v8693_v3 = vunpack.i.l.bf16 %v14264_v26  ;;  %v9100_v57 = vpack.i.bf16 %v14491_v63, %v14517_v1 }
 0x696   : > { %v14510_v60 = vpop.permute.xlu1 %8806  ;;  %v14512_v49 = vpop.permute.xlu0 %8786  ;;  %v4886_v20 = vsel %vm775_vm1, %v4884_v8, %v4885_v29  ;;  %v4888_v47 = vsel %vm775_vm1, %v4885_v29, %v4887_v6  ;;  %v5052_v42 = vrot.slane %v14438_v7, 2  ;;  %v8724_v59 = vunpack.i.h.bf16 %v14319_v38 }
 0x697   : > { %7248 = vmatprep.mubr.msk.bf16.mxu0 %vm3670_vm8, %v5973_v4  ;;  %7290 = vmatprep.mubr.msk.bf16.mxu1 %vm3670_vm8, %v5973_v4  ;;  %v5786_v61 = vsel %vm1882_vm9, %v5754_v51, %v8694_v41  ;;  %v5785_v40 = vsel %vm1882_vm9, %v5753_v21, %v8693_v3  ;;  %v5050_v32 = vrot.slane %v14447_v36, 2  ;;  %v14541_v52 = vpack.i.bf16 %v4888_v47, %v4886_v20 }
 0x698   : > { %v5049_v7 = vrot.slane %v14428_v13, 2  ;;  %v5818_v29 = vsel %vm1948_vm11, %v5786_v61, %v8724_v59  ;;  %v4785_v48 = vsel %vm609_vm0, %v4699_v30, 0.0  ;;  %v8729_v37 = vunpack.i.h.bf16 %v14347_v44 }
 0x699   : > { %9081 = vrot.lane.b32.xlu0 %v9070_v27, %s9594_s18  ;;  %9101 = vrot.lane.b32.xlu1 %v9100_v57, %s9595_s23  ;;  %v8723_v27 = vunpack.i.l.bf16 %v14319_v38  ;;  %v8728_v38 = vunpack.i.l.bf16 %v14347_v44  ;;  %v8784_v5 = vunpack.i.h.bf16 %v14442_v25  ;;  %v8783_v55 = vunpack.i.l.bf16 %v14442_v25 }
 0x69a   : > { %v14534_v26 = vpop.permute.xlu1 %8826  ;;  %v14536_v14 = vpop.permute.xlu0 %8796  ;;  %v5053_v18 = vsel %vm952_vm2, %v5050_v32, %v5052_v42  ;;  %v5850_v8 = vsel %vm3489_vm14, %v5818_v29, %v8729_v37  ;;  %v5044_v51 = vrot.slane %v14517_v1, 2  ;;  %v5047_v21 = vrot.slane %v4785_v48, 2 }
 0x69b   : > { %v5817_v6 = vsel %vm1948_vm11, %v5785_v40, %v8723_v27  ;;  %v5045_v41 = vrot.slane %v14491_v63, 2  ;;  %v4882_v3 = vrot.slane %v4785_v48, 1  ;;  %v4707_v25 = vrot.slane %v14116_v50, 7 }
 0x69c   : > { %v5849_v30 = vsel %vm3489_vm14, %v5817_v6, %v8728_v38  ;;  %v5882_v40 = vsel %vm3522_vm15, %v5850_v8, %v8784_v5  ;;  %v4879_v38 = vrot.slane %v14517_v1, 1  ;;  %v8714_v8 = vunpack.i.h.bf16 %v14299_v34 }
 0x69d   : > { %9086 = vrot.lane.b32.xlu0 %v14421_v45, %s9596_s25  ;;  %9111 = vrot.lane.b32.xlu1 %v14541_v52, %s9588_s20  ;;  %v5051_v45 = vsel %vm952_vm2, %v5049_v7, %v5050_v32  ;;  %v5881_v61 = vsel %vm3522_vm15, %v5849_v30, %v8783_v55  ;;  %v4880_v7 = vrot.slane %v14491_v63, 1  ;;  %v5046_v48 = vsel %vm952_vm2, %v5044_v51, %v5045_v41 }
 0x69e   : > { %v8832_v16 = vpop.permute.xlu1 %8831  ;;  %v14555_v9 = vpop.permute.xlu0 %8811  ;;  %v14572_v42 = vpack.i.bf16 %v5053_v18, %v5051_v45  ;;  %v5048_v37 = vsel %vm952_vm2, %v5045_v41, %v5047_v21  ;;  %v14591_v55 = vsel %vm609_vm0, 0.0, %v4707_v25  ;;  %v4704_v45 = vrot.slane %v14125_v23, 7 }
 0x69f   : > { %v8834_v4 = vunpack.i.h.bf16 %v8832_v16  ;;  %v8833_v44 = vunpack.i.l.bf16 %v8832_v16  ;;  %v14594_v18 = vpack.i.bf16 %v5048_v37, %v5046_v48  ;;  %v8719_v21 = vunpack.i.h.bf16 %v14370_v12 }
 0x6a0   : > { %v8718_v41 = vunpack.i.l.bf16 %v14370_v12  ;;  %v5726_v12 = vsel %vm1750_vm5, %v13892_v39, %v8714_v8  ;;  %v8774_v23 = vunpack.i.h.bf16 %v14419_v35 }
 0x6a1   : > { %9096 = vrot.lane.b32.xlu0 %v14474_v58, %s9595_s23  ;;  %9121 = vrot.lane.b32.xlu1 %v14541_v52, %s9594_s18  ;;  %v4708_v58 = vrot.slane %v14131_v19, 7  ;;  %v5913_v32 = vsel %vm3555_vm3, %v5881_v61, %v8833_v44  ;;  %v5914_v50 = vsel %vm3555_vm3, %v5882_v40, %v8834_v4  ;;  %v8713_v4 = vunpack.i.l.bf16 %v14299_v34 }
 0x6a2   : > { %v8837_v20 = vpop.permute.xlu1 %8836  ;;  %v14570_v47 = vpop.permute.xlu0 %8816  ;;  %v4883_v44 = vsel %vm775_vm1, %v4880_v7, %v4882_v3  ;;  %v8789_v34 = vunpack.i.h.bf16 %v14512_v49  ;;  %v8788_v61 = vunpack.i.l.bf16 %v14512_v49  ;;  %v5756_v49 = vsel %vm1816_vm7, %v5726_v12, %v8719_v21 }
 0x6a3   : > { %v8839_v59 = vunpack.i.h.bf16 %v8837_v20  ;;  %v8838_v27 = vunpack.i.l.bf16 %v8837_v20  ;;  %v14600_v30 = vsel %vm609_vm0, %v4707_v25, %v4708_v58  ;;  %v14608_v51 = vsel %vm609_vm0, %v4708_v58, 0.0 }
 0x6a4   : > { %v5248_v40 = vrot.slane %v14600_v30, 1  ;;  %v5250_v58 = vrot.slane %v14608_v51, 1  ;;  %v8814_v21 = vunpack.i.h.bf16 %v14555_v9 }
 0x6a5   : > { %v5945_v6 = vsel %vm3588_vm6, %v5913_v32, %v8838_v27  ;;  %v5946_v29 = vsel %vm3588_vm6, %v5914_v50, %v8839_v59  ;;  %9106 = vrot.lane.b32.xlu0 %v9100_v57, %s9592_s24  ;;  %9126 = vrot.lane.b32.xlu1 %v14572_v42, %s9596_s25  ;;  %v4881_v57 = vsel %vm775_vm1, %v4879_v38, %v4880_v7  ;;  %v4705_v32 = vrot.slane %v14143_v22, 7 }
 0x6a6   : > { %v5974_v16 = vpack.c.bf16 %v5946_v29, %v5945_v6  ;;  %v14588_v19 = vpop.permute.xlu1 %8851  ;;  %v8822_v5 = vpop.permute.xlu0 %8821  ;;  %v9150_v27 = vpack.i.bf16 %v4883_v44, %v4881_v57  ;;  %v5725_v50 = vsel %vm1750_vm5, %v13903_v10, %v8713_v4  ;;  %v8779_v6 = vunpack.i.h.bf16 %v14484_v33 }
 0x6a7   : > { %v5755_v7 = vsel %vm1816_vm7, %v5725_v50, %v8718_v41  ;;  %v8778_v29 = vunpack.i.l.bf16 %v14484_v33  ;;  %v5788_v10 = vsel %vm1882_vm9, %v5756_v49, %v8789_v34  ;;  %v14644_v44 = vpack.i.bf16 %v14600_v30, %v14591_v55 }
 0x6a8   : > { %7249 = vmatmul.mubr.msk.bf16.gmra.mrb[36].mxu0 %vm3670_vm8, %v5974_v16  ;;  %7291 = vmatmul.mubr.msk.bf16.gmra.mrb[36].mxu1 %vm3670_vm8, %v5974_v16  ;;  %v5787_v39 = vsel %vm1882_vm9, %v5755_v7, %v8788_v61  ;;  %v8823_v16 = vunpack.i.l.bf16 %v8822_v5  ;;  %v8813_v41 = vunpack.i.l.bf16 %v14555_v9  ;;  %v8819_v9 = vunpack.i.h.bf16 %v14570_v47 }
 0x6a9   : > { %9116 = vrot.lane.b32.xlu0 %v14572_v42, %s9590_s22  ;;  %9146 = vrot.lane.b32.xlu1 %v14594_v18, %s9590_s22 }
 0x6aa   : > { %v14614_v25 = vpop.permute.xlu1 %8861  ;;  %v8842_v20 = vpop.permute.xlu0 %8841  ;;  %v5727_v50 = vsel %vm1750_vm5, %v14066_v56, %v8823_v16 }
 0x6ab   : > { %v8844_v3 = vunpack.i.h.bf16 %v8842_v20  ;;  %v8843_v59 = vunpack.i.l.bf16 %v8842_v20 }
 0x6ad   : > { %9131 = vrot.lane.b32.xlu0 %v14541_v52, %s9597_s28  ;;  %9151 = vrot.lane.b32.xlu1 %v9150_v27, %s9597_s28  ;;  %v8824_v52 = vunpack.i.h.bf16 %v8822_v5  ;;  %v5819_v57 = vsel %vm1948_vm11, %v5787_v39, %v8843_v59  ;;  %v5820_v8 = vsel %vm1948_vm11, %v5788_v10, %v8844_v3  ;;  %v4787_v3 = vsel %vm609_vm0, %v4705_v32, 0.0 }
 0x6ae   : > { %v14632_v22 = vpop.permute.xlu1 %8871  ;;  %v8847_v48 = vpop.permute.xlu0 %8846  ;;  %v8818_v59 = vunpack.i.l.bf16 %v14570_v47  ;;  %v5057_v10 = vrot.slane %v4787_v3, 2 }
 0x6af   : > { %v8849_v37 = vunpack.i.h.bf16 %v8847_v48  ;;  %v8848_v38 = vunpack.i.l.bf16 %v8847_v48  ;;  %v5728_v12 = vsel %vm1750_vm5, %v14054_v24, %v8824_v52  ;;  %v5247_v48 = vrot.slane %v14591_v55, 1 }
 0x6b0   : > { %v14679_v24 = vsel %vm609_vm0, 0.0, %v4704_v45 }
 0x6b1   : > { %v5851_v4 = vsel %vm3489_vm14, %v5819_v57, %v8848_v38  ;;  %v5852_v33 = vsel %vm3489_vm14, %v5820_v8, %v8849_v37  ;;  %9136 = vrot.lane.b32.xlu0 %v14572_v42, %s9598_s30  ;;  %9156 = vrot.lane.b32.xlu1 %v14594_v18, %s9598_s30  ;;  %v14659_v42 = vsel %vm609_vm0, %v4704_v45, %v4705_v32  ;;  %v8773_v45 = vunpack.i.l.bf16 %v14419_v35 }
 0x6b2   : > { %v5883_v5 = vsel %vm3522_vm15, %v5851_v4, %v8778_v29  ;;  %v5884_v20 = vsel %vm3522_vm15, %v5852_v33, %v8779_v6  ;;  %v14652_v34 = vpop.permute.xlu1 %8881  ;;  %v14654_v61 = vpop.permute.xlu0 %8856  ;;  %v8829_v6 = vunpack.i.h.bf16 %v14534_v26  ;;  %v8828_v29 = vunpack.i.l.bf16 %v14534_v26 }
 0x6b3   : > { %v5915_v49 = vsel %vm3555_vm3, %v5883_v5, %v8813_v41  ;;  %v5916_v7 = vsel %vm3555_vm3, %v5884_v20, %v8814_v21  ;;  %v5055_v52 = vrot.slane %v14659_v42, 2  ;;  %v9175_v16 = vpack.i.bf16 %v14659_v42, %v14679_v24 }
 0x6b4   : > { %v5947_v32 = vsel %vm3588_vm6, %v5915_v49, %v8818_v59  ;;  %v5948_v47 = vsel %vm3588_vm6, %v5916_v7, %v8819_v9  ;;  %v5758_v37 = vsel %vm1816_vm7, %v5728_v12, %v8829_v6  ;;  %v5757_v38 = vsel %vm1816_vm7, %v5727_v50, %v8828_v29 }
 0x6b5   : > { %9141 = vrot.lane.b32.xlu0 %v9150_v27, %s9588_s20  ;;  %9171 = vrot.lane.b32.xlu1 %v14644_v44, %s9592_s24  ;;  %v5975_v26 = vpack.c.bf16 %v5948_v47, %v5947_v32  ;;  %v5054_v57 = vrot.slane %v14679_v24, 2  ;;  %v5249_v8 = vsel %vm775_vm1, %v5247_v48, %v5248_v40  ;;  %v5251_v35 = vsel %vm775_vm1, %v5248_v40, %v5250_v58 }
 0x6b6   : > { %v14683_v56 = vpop.permute.xlu1 %8886  ;;  %v14685_v39 = vpop.permute.xlu0 %8866  ;;  %v4892_v4 = vrot.slane %v4787_v3, 1  ;;  %v5790_v33 = vsel %vm1882_vm9, %v5758_v37, %v8774_v23  ;;  %v5789_v21 = vsel %vm1882_vm9, %v5757_v38, %v8773_v45  ;;  %v4890_v5 = vrot.slane %v14659_v42, 1 }
 0x6b7   : > { %7252 = vmatprep.mubr.msk.bf16.mxu0 %vm3670_vm8, %v5975_v26  ;;  %7294 = vmatprep.mubr.msk.bf16.mxu1 %vm3670_vm8, %v5975_v26  ;;  %v8804_v20 = vunpack.i.h.bf16 %v14482_v31  ;;  %v8803_v9 = vunpack.i.l.bf16 %v14482_v31  ;;  %v5056_v59 = vsel %vm952_vm2, %v5054_v57, %v5055_v52  ;;  %v5058_v40 = vsel %vm952_vm2, %v5055_v52, %v5057_v10 }
 0x6b8   : > { %v14718_v58 = vpack.i.bf16 %v5251_v35, %v5249_v8  ;;  %v4889_v3 = vrot.slane %v14679_v24, 1  ;;  %v8809_v49 = vunpack.i.h.bf16 %v14510_v60  ;;  %v8808_v7 = vunpack.i.l.bf16 %v14510_v60 }
 0x6b9   : > { %9161 = vrot.lane.b32.xlu0 %v9150_v27, %s9594_s18  ;;  %9176 = vrot.lane.b32.xlu1 %v9175_v16, %s9595_s23  ;;  %v5821_v12 = vsel %vm1948_vm11, %v5789_v21, %v8803_v9  ;;  %v5822_v50 = vsel %vm1948_vm11, %v5790_v33, %v8804_v20  ;;  %v14731_v29 = vpack.i.bf16 %v5058_v40, %v5056_v59  ;;  %v8864_v32 = vunpack.i.h.bf16 %v14614_v25 }
 0x6ba   : > { %v14709_v41 = vpop.permute.xlu1 %8906  ;;  %v14711_v27 = vpop.permute.xlu0 %8876  ;;  %v8863_v47 = vunpack.i.l.bf16 %v14614_v25  ;;  %v4891_v48 = vsel %vm775_vm1, %v4889_v3, %v4890_v5  ;;  %v5853_v26 = vsel %vm3489_vm14, %v5821_v12, %v8808_v7  ;;  %v5854_v60 = vsel %vm3489_vm14, %v5822_v50, %v8809_v49 }
 0x6bb   : > { %v5886_v45 = vsel %vm3522_vm15, %v5854_v60, %v8864_v32  ;;  %v5349_v33 = vrot.slane %v14600_v30, 2  ;;  %v5348_v40 = vrot.slane %v14591_v55, 2  ;;  %v8794_v30 = vunpack.i.h.bf16 %v14462_v2 }
 0x6bc   : > { %v5885_v25 = vsel %vm3522_vm15, %v5853_v26, %v8863_v47  ;;  %v8799_v50 = vunpack.i.h.bf16 %v14536_v14  ;;  %v8798_v49 = vunpack.i.l.bf16 %v14536_v14  ;;  %v8859_v60 = vunpack.i.h.bf16 %v14654_v61 }
 0x6bd   : > { %9166 = vrot.lane.b32.xlu0 %v14594_v18, %s9596_s25  ;;  %9186 = vrot.lane.b32.xlu1 %v14718_v58, %s9594_s18  ;;  %v4893_v18 = vsel %vm775_vm1, %v4890_v5, %v4892_v4  ;;  %v5350_v3 = vsel %vm952_vm2, %v5348_v40, %v5349_v33 }
 0x6be   : > { %v8912_v31 = vpop.permute.xlu1 %8911  ;;  %v14729_v6 = vpop.permute.xlu0 %8891  ;;  %v9190_v23 = vpack.i.bf16 %v4893_v18, %v4891_v48  ;;  %v5730_v48 = vsel %vm1750_vm5, %v14036_v62, %v8794_v30 }
 0x6bf   : > { %v8914_v10 = vunpack.i.h.bf16 %v8912_v31  ;;  %v8913_v37 = vunpack.i.l.bf16 %v8912_v31  ;;  %v8869_v31 = vunpack.i.h.bf16 %v14685_v39  ;;  %v5760_v14 = vsel %vm1816_vm7, %v5730_v48, %v8799_v50 }
 0x6c0   : > { %v8884_v48 = vunpack.i.h.bf16 %v14652_v34 }
 0x6c1   : > { %9181 = vrot.lane.b32.xlu0 %v9175_v16, %s9592_s24  ;;  %9196 = vrot.lane.b32.xlu1 %v14731_v29, %s9590_s22  ;;  %v5917_v35 = vsel %vm3555_vm3, %v5885_v25, %v8913_v37  ;;  %v5918_v4 = vsel %vm3555_vm3, %v5886_v45, %v8914_v10  ;;  %v5351_v16 = vrot.slane %v14608_v51, 2  ;;  %v8793_v51 = vunpack.i.l.bf16 %v14462_v2  ;;  %s15190_s22 = scalar_lea.vmem %s15485_s10, %s9695_s15 }
 0x6c2   : > { %v8917_v38 = vpop.permute.xlu1 %8916  ;;  %v14742_v52 = vpop.permute.xlu0 %8896  ;;  %v8868_v2 = vunpack.i.l.bf16 %v14685_v39  ;;  %v8858_v10 = vunpack.i.l.bf16 %v14654_v61 }
 0x6c3   : > { %v8919_v57 = vunpack.i.h.bf16 %v8917_v38  ;;  %v8918_v8 = vunpack.i.l.bf16 %v8917_v38  ;;  %v5352_v12 = vsel %vm952_vm2, %v5349_v33, %v5351_v16  ;;  %v5729_v18 = vsel %vm1750_vm5, %v14043_v46, %v8793_v51 }
 0x6c4   : > { %v9210_v47 = vpack.i.bf16 %v5352_v12, %v5350_v3  ;;  %v5759_v26 = vsel %vm1816_vm7, %v5729_v18, %v8798_v49  ;;  %v5792_v38 = vsel %vm1882_vm9, %v5760_v14, %v8869_v31  ;;  %v8893_v33 = vunpack.i.l.bf16 %v14729_v6 }
 0x6c5   : > { %v5949_v21 = vsel %vm3588_vm6, %v5917_v35, %v8918_v8  ;;  %v5950_v5 = vsel %vm3588_vm6, %v5918_v4, %v8919_v57  ;;  %9191 = vrot.lane.b32.xlu0 %v9190_v23, %s9588_s20  ;;  %9201 = vrot.lane.b32.xlu1 %v9190_v23, %s9597_s28  ;;  %v5791_v62 = vsel %vm1882_vm9, %v5759_v26, %v8868_v2  ;;  %v8894_v4 = vunpack.i.h.bf16 %v14729_v6 }
 0x6c6   : > { %v5976_v20 = vpack.c.bf16 %v5950_v5, %v5949_v21  ;;  %v14754_v9 = vpop.permute.xlu1 %8931  ;;  %v8902_v59 = vpop.permute.xlu0 %8901  ;;  %v8898_v40 = vunpack.i.l.bf16 %v14742_v52  ;;  %v8908_v3 = vunpack.i.l.bf16 %v14709_v41  ;;  %v8854_v31 = vunpack.i.h.bf16 %v14588_v19 }
 0x6c7   : > { %v8903_v45 = vunpack.i.l.bf16 %v8902_v59  ;;  %v8853_v2 = vunpack.i.l.bf16 %v14588_v19  ;;  %v8883_v18 = vunpack.i.l.bf16 %v14652_v34  ;;  %v8889_v26 = vunpack.i.h.bf16 %v14683_v56 }
 0x6c8   : > { %7253 = vmatmul.mubr.msk.bf16.gmra.mrb[40].mxu0 %vm3670_vm8, %v5976_v20  ;;  %7295 = vmatmul.mubr.msk.bf16.gmra.mrb[40].mxu1 %vm3670_vm8, %v5976_v20 }
 0x6c9   : > { %9216 = vrot.lane.b32.xlu0 %v14644_v44, %s9595_s23  ;;  %9206 = vrot.lane.b32.xlu1 %v14731_v29, %s9598_s30  ;;  %v5731_v6 = vsel %vm1750_vm5, %v14165_v15, %v8903_v45 }
 0x6ca   : > { %v14769_v55 = vpop.permute.xlu1 %8941  ;;  %v8922_v7 = vpop.permute.xlu0 %8921 }
 0x6cb   : > { %v8924_v32 = vunpack.i.h.bf16 %v8922_v7  ;;  %v8923_v44 = vunpack.i.l.bf16 %v8922_v7  ;;  %v5761_v7 = vsel %vm1816_vm7, %v5731_v6, %v8908_v3  ;;  %v8873_v6 = vunpack.i.l.bf16 %v14632_v22 }
 0x6cd   : > { %9221 = vrot.lane.b32.xlu0 %v9190_v23, %s9594_s18  ;;  %9211 = vrot.lane.b32.xlu1 %v9210_v47, %s9596_s25  ;;  %v8904_v23 = vunpack.i.h.bf16 %v8902_v59  ;;  %v5823_v57 = vsel %vm1948_vm11, %v5791_v62, %v8923_v44  ;;  %v5824_v8 = vsel %vm1948_vm11, %v5792_v38, %v8924_v32  ;;  %v8899_v59 = vunpack.i.h.bf16 %v14742_v52 }
 0x6ce   : > { %v14783_v39 = vpop.permute.xlu1 %8951  ;;  %v8927_v37 = vpop.permute.xlu0 %8926  ;;  %v5793_v32 = vsel %vm1882_vm9, %v5761_v7, %v8853_v2  ;;  %v8944_v62 = vunpack.i.h.bf16 %v14769_v55  ;;  %v8943_v38 = vunpack.i.l.bf16 %v14769_v55 }
 0x6cf   : > { %v8929_v46 = vunpack.i.h.bf16 %v8927_v37  ;;  %v8928_v25 = vunpack.i.l.bf16 %v8927_v37  ;;  %v5825_v14 = vsel %vm1948_vm11, %v5793_v32, %v8883_v18 }
 0x6d1   : > { %v5855_v35 = vsel %vm3489_vm14, %v5823_v57, %v8928_v25  ;;  %v5856_v61 = vsel %vm3489_vm14, %v5824_v8, %v8929_v46  ;;  %9226 = vrot.lane.b32.xlu0 %v14731_v29, %s9596_s25  ;;  %9231 = vrot.lane.b32.xlu1 %v14718_v58, %s9597_s28  ;;  %v5732_v29 = vsel %vm1750_vm5, %v14158_v11, %v8904_v23  ;;  %v8909_v58 = vunpack.i.h.bf16 %v14709_v41  ;;  %s15144_s28 = scalar_lea.vmem %s15486_s11, %s9695_s15 }
 0x6d2   : > { %v5887_v16 = vsel %vm3522_vm15, %v5855_v35, %v8858_v10  ;;  %v5888_v21 = vsel %vm3522_vm15, %v5856_v61, %v8859_v60  ;;  %v14799_v5 = vpop.permute.xlu1 %8961  ;;  %v14801_v20 = vpop.permute.xlu0 %8936  ;;  %v8888_v60 = vunpack.i.l.bf16 %v14683_v56 }
 0x6d3   : > { %v5919_v30 = vsel %vm3555_vm3, %v5887_v16, %v8893_v33  ;;  %v5920_v51 = vsel %vm3555_vm3, %v5888_v21, %v8894_v4  ;;  %v5762_v15 = vsel %vm1816_vm7, %v5732_v29, %v8909_v58  ;;  %v8874_v29 = vunpack.i.h.bf16 %v14632_v22 }
 0x6d4   : > { %v5951_v12 = vsel %vm3588_vm6, %v5919_v30, %v8898_v40  ;;  %v5952_v52 = vsel %vm3588_vm6, %v5920_v51, %v8899_v59  ;;  %v5794_v41 = vsel %vm1882_vm9, %v5762_v15, %v8854_v31  ;;  %v5857_v46 = vsel %vm3489_vm14, %v5825_v14, %v8888_v60 }
 0x6d5   : > { %9236 = vrot.lane.b32.xlu0 %v9210_v47, %s9598_s30  ;;  %v5977_v49 = vpack.c.bf16 %v5952_v52, %v5951_v12  ;;  %v5826_v19 = vsel %vm1948_vm11, %v5794_v41, %v8884_v48  ;;  %v5889_v8 = vsel %vm3522_vm15, %v5857_v46, %v8943_v38  ;;  %v8879_v30 = vunpack.i.h.bf16 %v14711_v27 }
 0x6d6   : > { %v14816_v50 = vpop.permute.xlu1 %8966  ;;  %v8947_v11 = vpop.permute.xlu0 %8946  ;;  %v5858_v25 = vsel %vm3489_vm14, %v5826_v19, %v8889_v26  ;;  %v8878_v51 = vunpack.i.l.bf16 %v14711_v27  ;;  %v5734_v7 = vsel %vm1750_vm5, %v14140_v28, %v8874_v29  ;;  %v5733_v31 = vsel %vm1750_vm5, %v14152_v17, %v8873_v6 }
 0x6d7   : > { %7256 = vmatprep.mubr.msk.bf16.mxu0 %vm3670_vm8, %v5977_v49  ;;  %7298 = vmatprep.mubr.msk.bf16.mxu1 %vm3670_vm8, %v5977_v49  ;;  %v5890_v35 = vsel %vm3522_vm15, %v5858_v25, %v8944_v62  ;;  %v8949_v12 = vunpack.i.h.bf16 %v8947_v11  ;;  %v8948_v52 = vunpack.i.l.bf16 %v8947_v11  ;;  %v5764_v2 = vsel %vm1816_vm7, %v5734_v7, %v8879_v30 }
 0x6d8   : > { %v5763_v22 = vsel %vm1816_vm7, %v5733_v31, %v8878_v51  ;;  %v8939_v14 = vunpack.i.h.bf16 %v14801_v20  ;;  %v8938_v28 = vunpack.i.l.bf16 %v14801_v20  ;;  %v8933_v51 = vunpack.i.l.bf16 %v14754_v9 }
 0x6d9   : > { %v5795_v32 = vsel %vm1882_vm9, %v5763_v22, %v8948_v52  ;;  %v5796_v48 = vsel %vm1882_vm9, %v5764_v2, %v8949_v12 }
 0x6da   : > { %v14826_v44 = vpop.permute.xlu1 %8986  ;;  %v14828_v47 = vpop.permute.xlu0 %8956 }
 0x6de   : > { %v8992_v10 = vpop.permute.xlu1 %8991  ;;  %v8972_v37 = vpop.permute.xlu0 %8971 }
 0x6df   : > { %v8994_v23 = vunpack.i.h.bf16 %v8992_v10  ;;  %v8993_v34 = vunpack.i.l.bf16 %v8992_v10  ;;  %v8974_v38 = vunpack.i.h.bf16 %v8972_v37  ;;  %v8973_v46 = vunpack.i.l.bf16 %v8972_v37 }
 0x6e1   : > { %v5921_v4 = vsel %vm3555_vm3, %v5889_v8, %v8993_v34  ;;  %v5922_v33 = vsel %vm3555_vm3, %v5890_v35, %v8994_v23 }
 0x6e2   : > { %v8997_v45 = vpop.permute.xlu1 %8996  ;;  %v8977_v57 = vpop.permute.xlu0 %8976 }
 0x6e3   : > { %v8999_v61 = vunpack.i.h.bf16 %v8997_v45  ;;  %v8998_v56 = vunpack.i.l.bf16 %v8997_v45  ;;  %v8979_v20 = vunpack.i.h.bf16 %v8977_v57  ;;  %v8978_v8 = vunpack.i.l.bf16 %v8977_v57 }
 0x6e5   : > { %v5953_v55 = vsel %vm3588_vm6, %v5921_v4, %v8998_v56  ;;  %v5954_v16 = vsel %vm3588_vm6, %v5922_v33, %v8999_v61  ;;  %v16219_v4 = vld [vmem:[#allocation22_spill] sm:$0xff] }
 0x6e6   : > { %v5978_v21 = vpack.c.bf16 %v5954_v16, %v5953_v55  ;;  %v14846_v59 = vpop.permute.xlu1 %9011  ;;  %v8982_v40 = vpop.permute.xlu0 %8981  ;;  %v8989_v16 = vunpack.i.h.bf16 %v14826_v44 }
 0x6e7   : > { %v8984_v26 = vunpack.i.h.bf16 %v8982_v40  ;;  %v8983_v60 = vunpack.i.l.bf16 %v8982_v40 }
 0x6e8   : > { %7257 = vmatmul.mubr.msk.bf16.gmra.mrb[44].mxu0 %vm3670_vm8, %v5978_v21  ;;  %7299 = vmatmul.mubr.msk.bf16.gmra.mrb[44].mxu1 %vm3670_vm8, %v5978_v21  ;;  %v8988_v21 = vunpack.i.l.bf16 %v14826_v44 }
 0x6e9   : > { %v5736_v56 = vsel %vm1750_vm5, %v14216_v53, %v8984_v26  ;;  %v5735_v37 = vsel %vm1750_vm5, %v16219_v4, %v8983_v60  ;;  %v8934_v53 = vunpack.i.h.bf16 %v14754_v9  ;;  %v8969_v9 = vunpack.i.h.bf16 %v14816_v50 }
 0x6ea   : > { %v14854_v58 = vpop.permute.xlu1 %9021  ;;  %v9002_v3 = vpop.permute.xlu0 %9001  ;;  %v5766_v6 = vsel %vm1816_vm7, %v5736_v56, %v8989_v16  ;;  %v5765_v30 = vsel %vm1816_vm7, %v5735_v37, %v8988_v21  ;;  %v16220_v21 = vld [vmem:[#allocation26_spill] sm:$0xff] }
 0x6eb   : > { %v9004_v49 = vunpack.i.h.bf16 %v9002_v3  ;;  %v9003_v15 = vunpack.i.l.bf16 %v9002_v3  ;;  %v5798_v44 = vsel %vm1882_vm9, %v5766_v6, %v8934_v53  ;;  %v5797_v52 = vsel %vm1882_vm9, %v5765_v30, %v8933_v51  ;;  %v16221_v6 = vld [vmem:[#allocation21_spill] sm:$0xff] }
 0x6ed   : > { %v5827_v19 = vsel %vm1948_vm11, %v5795_v32, %v9003_v15  ;;  %v5828_v17 = vsel %vm1948_vm11, %v5796_v48, %v9004_v49  ;;  %v8964_v49 = vunpack.i.h.bf16 %v14799_v5  ;;  %v8963_v15 = vunpack.i.l.bf16 %v14799_v5 }
 0x6ee   : > { %v14862_v41 = vpop.permute.xlu1 %9031  ;;  %v9007_v27 = vpop.permute.xlu0 %9006  ;;  %v9024_v32 = vunpack.i.h.bf16 %v14854_v58  ;;  %v9023_v48 = vunpack.i.l.bf16 %v14854_v58 }
 0x6ef   : > { %v9009_v11 = vunpack.i.h.bf16 %v9007_v27  ;;  %v9008_v18 = vunpack.i.l.bf16 %v9007_v27  ;;  %v5829_v7 = vsel %vm1948_vm11, %v5797_v52, %v8963_v15  ;;  %v5830_v31 = vsel %vm1948_vm11, %v5798_v44, %v8964_v49 }
 0x6f0   : > { %v8968_v27 = vunpack.i.l.bf16 %v14816_v50 }
 0x6f1   : > { %v5859_v10 = vsel %vm3489_vm14, %v5827_v19, %v9008_v18  ;;  %v5860_v62 = vsel %vm3489_vm14, %v5828_v17, %v9009_v11  ;;  %v5862_v18 = vsel %vm3489_vm14, %v5830_v31, %v8969_v9 }
 0x6f2   : > { %v5891_v25 = vsel %vm3522_vm15, %v5859_v10, %v8938_v28  ;;  %v5892_v23 = vsel %vm3522_vm15, %v5860_v62, %v8939_v14  ;;  %v14874_v34 = vpop.permute.xlu1 %9041  ;;  %v14876_v45 = vpop.permute.xlu0 %9016  ;;  %v5861_v11 = vsel %vm3489_vm14, %v5829_v7, %v8968_v27  ;;  %v5894_v26 = vsel %vm3522_vm15, %v5862_v18, %v9024_v32 }
 0x6f3   : > { %v5923_v35 = vsel %vm3555_vm3, %v5891_v25, %v8973_v46  ;;  %v5924_v61 = vsel %vm3555_vm3, %v5892_v23, %v8974_v38  ;;  %v5893_v17 = vsel %vm3522_vm15, %v5861_v11, %v9023_v48  ;;  %v9019_v51 = vunpack.i.h.bf16 %v14876_v45 }
 0x6f4   : > { %v5955_v33 = vsel %vm3588_vm6, %v5923_v35, %v8978_v8  ;;  %v5956_v55 = vsel %vm3588_vm6, %v5924_v61, %v8979_v20  ;;  %v8954_v20 = vunpack.i.h.bf16 %v14783_v39  ;;  %v8953_v8 = vunpack.i.l.bf16 %v14783_v39 }
 0x6f5   : > { %v5979_v29 = vpack.c.bf16 %v5956_v55, %v5955_v33  ;;  %v8959_v35 = vunpack.i.h.bf16 %v14828_v47  ;;  %v8958_v61 = vunpack.i.l.bf16 %v14828_v47  ;;  %v9018_v47 = vunpack.i.l.bf16 %v14876_v45 }
 0x6f6   : > { %v14888_v40 = vpop.permute.xlu1 %9046  ;;  %v9027_v57 = vpop.permute.xlu0 %9026  ;;  %v5737_v39 = vsel %vm1750_vm5, %v16221_v6, %v8953_v8 }
 0x6f7   : > { %7260 = vmatprep.mubr.msk.bf16.mxu0 %vm3670_vm8, %v5979_v29  ;;  %7302 = vmatprep.mubr.msk.bf16.mxu1 %vm3670_vm8, %v5979_v29  ;;  %v9029_v4 = vunpack.i.h.bf16 %v9027_v57  ;;  %v9028_v37 = vunpack.i.l.bf16 %v9027_v57  ;;  %v5738_v29 = vsel %vm1750_vm5, %v16220_v21, %v8954_v20  ;;  %v5767_v53 = vsel %vm1816_vm7, %v5737_v39, %v8958_v61 }
 0x6f8   : > { %v5768_v30 = vsel %vm1816_vm7, %v5738_v29, %v8959_v35  ;;  %v9014_v35 = vunpack.i.h.bf16 %v14846_v59  ;;  %v9049_v6 = vunpack.i.h.bf16 %v14888_v40 }
 0x6f9   : > { %v5799_v57 = vsel %vm1882_vm9, %v5767_v53, %v9028_v37  ;;  %v5800_v52 = vsel %vm1882_vm9, %v5768_v30, %v9029_v4  ;;  %v9044_v37 = vunpack.i.h.bf16 %v14874_v34 }
 0x6fb   : > { %v14896_v3 = vpop.permute.xlu1 %9066  ;;  %v14898_v12 = vpop.permute.xlu0 %9036 }
 0x6ff   : > { %v9072_v2 = vpop.permute.xlu1 %9071  ;;  %v14906_v22 = vpop.permute.xlu0 %9051 }
 0x700   : > { %v9074_v5 = vunpack.i.h.bf16 %v9072_v2  ;;  %v9073_v14 = vunpack.i.l.bf16 %v9072_v2  ;;  %v9054_v31 = vunpack.i.h.bf16 %v14906_v22  ;;  %v9053_v2 = vunpack.i.l.bf16 %v14906_v22 }
 0x702   : > { %v5925_v50 = vsel %vm3555_vm3, %v5893_v17, %v9073_v14  ;;  %v5926_v62 = vsel %vm3555_vm3, %v5894_v26, %v9074_v5 }
 0x703   : > { %v9057_v28 = vpop.permute.xlu0 %9056  ;;  %v9077_v19 = vpop.permute.xlu1 %9076 }
 0x704   : > { %v9079_v60 = vunpack.i.h.bf16 %v9077_v19  ;;  %v9078_v10 = vunpack.i.l.bf16 %v9077_v19  ;;  %v9059_v18 = vunpack.i.h.bf16 %v9057_v28  ;;  %v9058_v5 = vunpack.i.l.bf16 %v9057_v28 }
 0x706   : > { %v5957_v58 = vsel %vm3588_vm6, %v5925_v50, %v9078_v10  ;;  %v5958_v38 = vsel %vm3588_vm6, %v5926_v62, %v9079_v60 }
 0x707   : > { %v9062_v46 = vpop.permute.xlu0 %9061  ;;  %v5980_v25 = vpack.c.bf16 %v5958_v38, %v5957_v58  ;;  %v14920_v23 = vpop.permute.xlu1 %9091  ;;  %v9069_v38 = vunpack.i.h.bf16 %v14896_v3 }
 0x708   : > { %v9064_v32 = vunpack.i.h.bf16 %v9062_v46  ;;  %v9063_v48 = vunpack.i.l.bf16 %v9062_v46  ;;  %v9068_v46 = vunpack.i.l.bf16 %v14896_v3 }
 0x709   : > { %7261 = vmatmul.mubr.msk.bf16.gmra.mrb[48].mxu0 %vm3670_vm8, %v5980_v25  ;;  %7303 = vmatmul.mubr.msk.bf16.gmra.mrb[48].mxu1 %vm3670_vm8, %v5980_v25 }
 0x70a   : > { %v5740_v62 = vsel %vm1750_vm5, %v14324_v0, %v9064_v32  ;;  %v5739_v28 = vsel %vm1750_vm5, %v14345_v54, %v9063_v48  ;;  %v9013_v54 = vunpack.i.l.bf16 %v14846_v59  ;;  %v9048_v59 = vunpack.i.l.bf16 %v14888_v40 }
 0x70b   : > { %v9082_v56 = vpop.permute.xlu0 %9081  ;;  %v14928_v33 = vpop.permute.xlu1 %9101  ;;  %v5770_v8 = vsel %vm1816_vm7, %v5740_v62, %v9069_v38  ;;  %v5769_v0 = vsel %vm1816_vm7, %v5739_v28, %v9068_v46  ;;  %v9094_v38 = vunpack.i.h.bf16 %v14920_v23 }
 0x70c   : > { %v9084_v55 = vunpack.i.h.bf16 %v9082_v56  ;;  %v9083_v16 = vunpack.i.l.bf16 %v9082_v56  ;;  %v5802_v3 = vsel %vm1882_vm9, %v5770_v8, %v9014_v35  ;;  %v5801_v56 = vsel %vm1882_vm9, %v5769_v0, %v9013_v54 }
 0x70d   : > { %v5834_v21 = vsel %vm1948_vm11, %v5802_v3, %v9044_v37  ;;  %v9104_v30 = vunpack.i.h.bf16 %v14928_v33  ;;  %v9103_v53 = vunpack.i.l.bf16 %v14928_v33  ;;  %v9034_v33 = vunpack.i.h.bf16 %v14862_v41 }
 0x70e   : > { %v5831_v9 = vsel %vm1948_vm11, %v5799_v57, %v9083_v16  ;;  %v5832_v27 = vsel %vm1948_vm11, %v5800_v52, %v9084_v55  ;;  %v9043_v55 = vunpack.i.l.bf16 %v14874_v34  ;;  %v9093_v54 = vunpack.i.l.bf16 %v14920_v23 }
 0x70f   : > { %v9087_v44 = vpop.permute.xlu0 %9086  ;;  %v14940_v49 = vpop.permute.xlu1 %9111 }
 0x710   : > { %v9089_v15 = vunpack.i.h.bf16 %v9087_v44  ;;  %v9088_v7 = vunpack.i.l.bf16 %v9087_v44  ;;  %v5833_v16 = vsel %vm1948_vm11, %v5801_v56, %v9043_v55 }
 0x712   : > { %v5863_v45 = vsel %vm3489_vm14, %v5831_v9, %v9088_v7  ;;  %v5864_v11 = vsel %vm3489_vm14, %v5832_v27, %v9089_v15  ;;  %v9033_v27 = vunpack.i.l.bf16 %v14862_v41  ;;  %v5742_v41 = vsel %vm1750_vm5, %v14291_v43, %v9034_v33 }
 0x713   : > { %v5895_v14 = vsel %vm3522_vm15, %v5863_v45, %v9018_v47  ;;  %v5896_v19 = vsel %vm3522_vm15, %v5864_v11, %v9019_v51  ;;  %v14950_v17 = vpop.permute.xlu0 %9096  ;;  %v14952_v26 = vpop.permute.xlu1 %9121  ;;  %v5865_v51 = vsel %vm3489_vm14, %v5833_v16, %v9048_v59  ;;  %v5866_v47 = vsel %vm3489_vm14, %v5834_v21, %v9049_v6 }
 0x714   : > { %v5927_v22 = vsel %vm3555_vm3, %v5895_v14, %v9053_v2  ;;  %v5928_v60 = vsel %vm3555_vm3, %v5896_v19, %v9054_v31  ;;  %v5897_v15 = vsel %vm3522_vm15, %v5865_v51, %v9103_v53  ;;  %v5898_v7 = vsel %vm3522_vm15, %v5866_v47, %v9104_v30 }
 0x715   : > { %v5959_v10 = vsel %vm3588_vm6, %v5927_v22, %v9058_v5  ;;  %v5960_v50 = vsel %vm3588_vm6, %v5928_v60, %v9059_v18  ;;  %v9039_v11 = vunpack.i.h.bf16 %v14898_v12  ;;  %v9038_v18 = vunpack.i.l.bf16 %v14898_v12  ;;  %v16222_v60 = vld [vmem:[#allocation24_spill] sm:$0xff] }
 0x716   : > { %v5981_v58 = vpack.c.bf16 %v5960_v50, %v5959_v10  ;;  %v5741_v10 = vsel %vm1750_vm5, %v16222_v60, %v9033_v27  ;;  %v9099_v37 = vunpack.i.h.bf16 %v14950_v17  ;;  %v9098_v55 = vunpack.i.l.bf16 %v14950_v17 }
 0x717   : > { %v14964_v25 = vpop.permute.xlu0 %9106  ;;  %v14966_v20 = vpop.permute.xlu1 %9126  ;;  %v5772_v28 = vsel %vm1816_vm7, %v5742_v41, %v9039_v11  ;;  %v9113_v27 = vunpack.i.l.bf16 %v14940_v49 }
 0x718   : > { %7264 = vmatprep.mubr.msk.bf16.mxu0 %vm3670_vm8, %v5981_v58  ;;  %7306 = vmatprep.mubr.msk.bf16.mxu1 %vm3670_vm8, %v5981_v58  ;;  %v9109_v50 = vunpack.i.h.bf16 %v14964_v25  ;;  %v9108_v62 = vunpack.i.l.bf16 %v14964_v25  ;;  %v5771_v58 = vsel %vm1816_vm7, %v5741_v10, %v9038_v18  ;;  %v9114_v25 = vunpack.i.h.bf16 %v14940_v49 }
 0x71a   : > { %v5803_v16 = vsel %vm1882_vm9, %v5771_v58, %v9108_v62  ;;  %v5804_v21 = vsel %vm1882_vm9, %v5772_v28, %v9109_v50 }
 0x71b   : > { %v14974_v61 = vpop.permute.xlu0 %9116  ;;  %v9147_v4 = vpop.permute.xlu1 %9146 }
 0x71c   : > { %v9149_v3 = vunpack.i.h.bf16 %v9147_v4  ;;  %v9148_v56 = vunpack.i.l.bf16 %v9147_v4  ;;  %v9118_v49 = vunpack.i.l.bf16 %v14974_v61 }
 0x71f   : > { %v14982_v29 = vpop.permute.xlu0 %9131  ;;  %v9152_v39 = vpop.permute.xlu1 %9151 }
 0x720   : > { %v9154_v34 = vunpack.i.h.bf16 %v9152_v39  ;;  %v9153_v44 = vunpack.i.l.bf16 %v9152_v39  ;;  %v9134_v30 = vunpack.i.h.bf16 %v14982_v29  ;;  %v9133_v4 = vunpack.i.l.bf16 %v14982_v29 }
 0x722   : > { %v5929_v2 = vsel %vm3555_vm3, %v5897_v15, %v9153_v44  ;;  %v5930_v9 = vsel %vm3555_vm3, %v5898_v7, %v9154_v34 }
 0x723   : > { %v14990_v57 = vpop.permute.xlu0 %9136  ;;  %v9157_v52 = vpop.permute.xlu1 %9156 }
 0x724   : > { %v9159_v31 = vunpack.i.h.bf16 %v9157_v52  ;;  %v9158_v40 = vunpack.i.l.bf16 %v9157_v52  ;;  %v9139_v51 = vunpack.i.h.bf16 %v14990_v57  ;;  %v9138_v47 = vunpack.i.l.bf16 %v14990_v57 }
 0x726   : > { %v5961_v32 = vsel %vm3588_vm6, %v5929_v2, %v9158_v40  ;;  %v5962_v48 = vsel %vm3588_vm6, %v5930_v9, %v9159_v31  ;;  %v9124_v40 = vunpack.i.h.bf16 %v14952_v26  ;;  %v9123_v2 = vunpack.i.l.bf16 %v14952_v26 }
 0x727   : > { %v9142_v45 = vpop.permute.xlu0 %9141  ;;  %v5982_v5 = vpack.c.bf16 %v5962_v48, %v5961_v32  ;;  %v15002_v14 = vpop.permute.xlu1 %9171  ;;  %v9129_v26 = vunpack.i.h.bf16 %v14966_v20 }
 0x728   : > { %v9144_v19 = vunpack.i.h.bf16 %v9142_v45  ;;  %v9143_v22 = vunpack.i.l.bf16 %v9142_v45  ;;  %v5746_v45 = vsel %vm1750_vm5, %v14447_v36, %v9114_v25  ;;  %v9173_v25 = vunpack.i.l.bf16 %v15002_v14 }
 0x729   : > { %7265 = vmatmul.mubr.msk.bf16.gmra.mrb[52].mxu0 %vm3670_vm8, %v5982_v5  ;;  %7307 = vmatmul.mubr.msk.bf16.gmra.mrb[52].mxu1 %vm3670_vm8, %v5982_v5 }
 0x72a   : > { %v5744_v8 = vsel %vm1750_vm5, %v14491_v63, %v9144_v19  ;;  %v5743_v43 = vsel %vm1750_vm5, %v14517_v1, %v9143_v22  ;;  %v9128_v19 = vunpack.i.l.bf16 %v14966_v20  ;;  %v9119_v22 = vunpack.i.h.bf16 %v14974_v61 }
 0x72b   : > { %v9162_v12 = vpop.permute.xlu0 %9161  ;;  %v15015_v46 = vpop.permute.xlu1 %9176  ;;  %v5774_v6 = vsel %vm1816_vm7, %v5744_v8, %v9149_v3  ;;  %v5773_v1 = vsel %vm1816_vm7, %v5743_v43, %v9148_v56  ;;  %v5745_v43 = vsel %vm1750_vm5, %v14428_v13, %v9113_v27  ;;  %v16223_v27 = vld [vmem:[#allocation15_spill] sm:$0xff] }
 0x72c   : > { %v9164_v0 = vunpack.i.h.bf16 %v9162_v12  ;;  %v9163_v35 = vunpack.i.l.bf16 %v9162_v12  ;;  %v5806_v52 = vsel %vm1882_vm9, %v5774_v6, %v9094_v38  ;;  %v5805_v15 = vsel %vm1882_vm9, %v5773_v1, %v9093_v54 }
 0x72d   : > { %v5837_v11 = vsel %vm1948_vm11, %v5805_v15, %v9123_v2  ;;  %v5838_v18 = vsel %vm1948_vm11, %v5806_v52, %v9124_v40  ;;  %v9179_v60 = vunpack.i.h.bf16 %v15015_v46  ;;  %v9178_v10 = vunpack.i.l.bf16 %v15015_v46 }
 0x72e   : > { %v5835_v53 = vsel %vm1948_vm11, %v5803_v16, %v9163_v35  ;;  %v5836_v17 = vsel %vm1948_vm11, %v5804_v21, %v9164_v0  ;;  %v5869_v12 = vsel %vm3489_vm14, %v5837_v11, %v9128_v19  ;;  %v5870_v20 = vsel %vm3489_vm14, %v5838_v18, %v9129_v26 }
 0x72f   : > { %v9167_v63 = vpop.permute.xlu0 %9166  ;;  %v15029_v59 = vpop.permute.xlu1 %9186  ;;  %v5776_v0 = vsel %vm1816_vm7, %v5746_v45, %v9119_v22  ;;  %v9174_v35 = vunpack.i.h.bf16 %v15002_v14  ;;  %v5775_v21 = vsel %vm1816_vm7, %v5745_v43, %v9118_v49  ;;  %v16225_v45 = vunpack.i.h.bf16 %v16223_v27 }
 0x730   : > { %v9169_v23 = vunpack.i.h.bf16 %v9167_v63  ;;  %v9168_v39 = vunpack.i.l.bf16 %v9167_v63 }
 0x732   : > { %v5867_v34 = vsel %vm3489_vm14, %v5835_v53, %v9168_v39  ;;  %v5868_v44 = vsel %vm3489_vm14, %v5836_v17, %v9169_v23  ;;  %v9189_v53 = vunpack.i.h.bf16 %v15029_v59  ;;  %v9188_v17 = vunpack.i.l.bf16 %v15029_v59 }
 0x733   : > { %v5899_v7 = vsel %vm3522_vm15, %v5867_v34, %v9098_v55  ;;  %v5900_v29 = vsel %vm3522_vm15, %v5868_v44, %v9099_v37  ;;  %v15043_v31 = vpop.permute.xlu0 %9181  ;;  %v9197_v9 = vpop.permute.xlu1 %9196  ;;  %v5901_v55 = vsel %vm3522_vm15, %v5869_v12, %v9178_v10 }
 0x734   : > { %v5931_v57 = vsel %vm3555_vm3, %v5899_v7, %v9133_v4  ;;  %v5932_v33 = vsel %vm3555_vm3, %v5900_v29, %v9134_v30  ;;  %v9199_v28 = vunpack.i.h.bf16 %v9197_v9  ;;  %v9198_v58 = vunpack.i.l.bf16 %v9197_v9 }
 0x735   : > { %v5963_v32 = vsel %vm3588_vm6, %v5931_v57, %v9138_v47  ;;  %v5964_v48 = vsel %vm3588_vm6, %v5932_v33, %v9139_v51  ;;  %v9183_v3 = vunpack.i.l.bf16 %v15043_v31  ;;  %v9184_v63 = vunpack.i.h.bf16 %v15043_v31 }
 0x736   : > { %v5983_v5 = vpack.c.bf16 %v5964_v48, %v5963_v32  ;;  %v16224_v32 = vunpack.i.l.bf16 %v16223_v27  ;;  %v6538_v27 = vld [vmem:[%s15180_s17 + $0x18] sm:$0xff] }
 0x737   : > { %v9192_v41 = vpop.permute.xlu0 %9191  ;;  %v9202_v50 = vpop.permute.xlu1 %9201  ;;  %v5807_v51 = vsel %vm1882_vm9, %v5775_v21, %v9183_v3  ;;  %v5808_v29 = vsel %vm1882_vm9, %v5776_v0, %v9184_v63  ;;  %v16229_v0 = vld [vmem:[#allocation31_spill] sm:$0xff] }
 0x738   : > { %v9194_v36 = vunpack.i.h.bf16 %v9192_v41  ;;  %v9193_v62 = vunpack.i.l.bf16 %v9192_v41  ;;  %7268 = vmatprep.mubr.msk.bf16.mxu0 %vm3670_vm8, %v5983_v5  ;;  %7310 = vmatprep.mubr.msk.bf16.mxu1 %vm3670_vm8, %v5983_v5  ;;  %v9204_v38 = vunpack.i.h.bf16 %v9202_v50  ;;  %v9203_v61 = vunpack.i.l.bf16 %v9202_v50  ;;  %v16226_v50 = vld [vmem:[#allocation28_spill] sm:$0xff] }
 0x739   : > { %v16228_v12 = vunpack.i.h.bf16 %v16226_v50 }
 0x73a   : > { %v5748_v8 = vsel %vm1750_vm5, %v14659_v42, %v9194_v36  ;;  %v5747_v46 = vsel %vm1750_vm5, %v14679_v24, %v9193_v62  ;;  %v5902_v24 = vsel %vm3522_vm15, %v5870_v20, %v9179_v60  ;;  %v5933_v6 = vsel %vm3555_vm3, %v5901_v55, %v9203_v61 }
 0x73b   : > { %v9217_v54 = vpop.permute.xlu0 %9216  ;;  %v5778_v56 = vsel %vm1816_vm7, %v5748_v8, %v9199_v28  ;;  %v5777_v37 = vsel %vm1816_vm7, %v5747_v46, %v9198_v58  ;;  %v9207_v42 = vpop.permute.xlu1 %9206  ;;  %v5934_v14 = vsel %vm3555_vm3, %v5902_v24, %v9204_v38  ;;  %v16227_v36 = vunpack.i.l.bf16 %v16226_v50  ;;  %v15133_v24 = vld [vmem:[%s15481_s6] ss:$0 sm:$0xff] }
 0x73c   : > { %v9209_v16 = vunpack.i.h.bf16 %v9207_v42  ;;  %v9208_v13 = vunpack.i.l.bf16 %v9207_v42  ;;  %v5809_v39 = vsel %vm1882_vm9, %v5777_v37, %v9173_v25  ;;  %v5810_v30 = vsel %vm1882_vm9, %v5778_v56, %v9174_v35 }
 0x73d   : > { %v5841_v31 = vsel %vm1948_vm11, %v5809_v39, %v9188_v17  ;;  %v5842_v40 = vsel %vm1948_vm11, %v5810_v30, %v9189_v53  ;;  %v9219_v2 = vunpack.i.h.bf16 %v9217_v54  ;;  %v9218_v59 = vunpack.i.l.bf16 %v9217_v54 }
 0x73e   : > { %v5965_v1 = vsel %vm3588_vm6, %v5933_v6, %v9208_v13  ;;  %v5966_v23 = vsel %vm3588_vm6, %v5934_v14, %v9209_v16  ;;  %v16230_v35 = vunpack.i.l.bf16 %v16229_v0  ;;  %v16231_v25 = vunpack.i.h.bf16 %v16229_v0  ;;  %v15138_v16 = vld [vmem:[%s15483_s8] ss:$0 sm:$0xff] }
 0x73f   : > { %v9222_v4 = vpop.permute.xlu0 %9221  ;;  %v5984_v47 = vpack.c.bf16 %v5966_v23, %v5965_v1  ;;  %v9212_v34 = vpop.permute.xlu1 %9211 }
 0x740   : > { %v9214_v44 = vunpack.i.h.bf16 %v9212_v34  ;;  %v9213_v52 = vunpack.i.l.bf16 %v9212_v34  ;;  %v9224_v15 = vunpack.i.h.bf16 %v9222_v4  ;;  %v9223_v7 = vunpack.i.l.bf16 %v9222_v4 }
 0x741   : > { %7269 = vmatmul.mubr.msk.bf16.gmra.mrb[56].mxu0 %vm3670_vm8, %v5984_v47  ;;  %7311 = vmatmul.mubr.msk.bf16.gmra.mrb[56].mxu1 %vm3670_vm8, %v5984_v47 }
 0x742   : > { %v5873_v9 = vsel %vm3489_vm14, %v5841_v31, %v9213_v52  ;;  %v5874_v57 = vsel %vm3489_vm14, %v5842_v40, %v9214_v44  ;;  %v5839_v19 = vsel %vm1948_vm11, %v5807_v51, %v9223_v7  ;;  %v5840_v22 = vsel %vm1948_vm11, %v5808_v29, %v9224_v15 }
 0x743   : > { %v9227_v33 = vpop.permute.xlu0 %9226  ;;  %v5905_v48 = vsel %vm3522_vm15, %v5873_v9, %v16224_v32  ;;  %v5906_v11 = vsel %vm3522_vm15, %v5874_v57, %v16225_v45  ;;  %v9232_v18 = vpop.permute.xlu1 %9231  ;;  %v6537_v9 = vld [vmem:[%s15180_s17 + $0x10] sm:$0xff]  ;;  %v6535_v57 = vld [vmem:[%s15180_s17] sm:$0xff]  ;;  %v6536_v45 = vld [vmem:[%s15180_s17 + $0x8] sm:$0xff] }
 0x744   : > { %v9229_v5 = vunpack.i.h.bf16 %v9227_v33  ;;  %v9228_v26 = vunpack.i.l.bf16 %v9227_v33  ;;  %v9234_v49 = vunpack.i.h.bf16 %v9232_v18  ;;  %v9233_v41 = vunpack.i.l.bf16 %v9232_v18 }
 0x745   : > { %v5937_v62 = vsel %vm3555_vm3, %v5905_v48, %v16227_v36  ;;  %v5938_v20 = vsel %vm3555_vm3, %v5906_v11, %v16228_v12 }
 0x746   : > { %v5871_v60 = vsel %vm3489_vm14, %v5839_v19, %v9228_v26  ;;  %v5872_v10 = vsel %vm3489_vm14, %v5840_v22, %v9229_v5  ;;  %v5969_v54 = vsel %vm3588_vm6, %v5937_v62, %v16230_v35  ;;  %v5970_v3 = vsel %vm3588_vm6, %v5938_v20, %v16231_v25 }
 0x747   : > { %v5903_v28 = vsel %vm3522_vm15, %v5871_v60, %v9218_v59  ;;  %v5904_v58 = vsel %vm3522_vm15, %v5872_v10, %v9219_v2  ;;  %v9237_v38 = vpop.permute.xlu0 %9236  ;;  %v5986_v55 = vpack.c.bf16 %v5970_v3, %v5969_v54 }
 0x748   : > { %v9239_v61 = vunpack.i.h.bf16 %v9237_v38  ;;  %v9238_v8 = vunpack.i.l.bf16 %v9237_v38  ;;  %v5935_v46 = vsel %vm3555_vm3, %v5903_v28, %v9233_v41  ;;  %v5936_v43 = vsel %vm3555_vm3, %v5904_v58, %v9234_v49 }
 0x74a   : > { %v5967_v56 = vsel %vm3588_vm6, %v5935_v46, %v9238_v8  ;;  %v5968_v37 = vsel %vm3588_vm6, %v5936_v43, %v9239_v61 }
 0x74b   : > { %v5985_v42 = vpack.c.bf16 %v5968_v37, %v5967_v56 }
 0x74d   : > { %7272 = vmatprep.mubr.msk.bf16.mxu0 %vm3670_vm8, %v5985_v42  ;;  %7314 = vmatprep.mubr.msk.bf16.mxu1 %vm3670_vm8, %v5985_v42 }
 0x74e   : > { %7273 = vmatmul.mubr.msk.bf16.gmra.mrb[60].mxu0 %vm3670_vm8, %v5986_v55  ;;  %7315 = vmatmul.mubr.msk.bf16.gmra.mrb[60].mxu1 %vm3670_vm8, %v5986_v55 }
 0x75b   : > { %v7246_v13 = vpop.f32.mrb[32].mxu0  ;;  %v7288_v21 = vpop.f32.mrb[32].mxu1 }
 0x75c   : > { %v6114_v63 = vadd.f32 %v7246_v13, %v15133_v24  ;;  %v6321_v6 = vadd.f32 %v7288_v21, %v15138_v16  ;;  %v6105_v14 = vpop.f32.mrb[33].mxu0  ;;  %v6312_v1 = vpop.f32.mrb[33].mxu1 }
 0x75d   : > { %v6106_v23 = vadd.f32 %v15133_v24, %v6105_v14  ;;  %v6313_v39 = vadd.f32 %v15138_v16, %v6312_v1  ;;  %v7247_v30 = vpop.f32.mrb[34].mxu0  ;;  %v7289_v4 = vpop.f32.mrb[34].mxu1  ;;  %v6542_v1 = vld [vmem:[%s15180_s17 + $0x38] sm:$0xff] }
 0x75e   : > { %6665 = vst.msk [vmem:[%s15144_s28 + $0x10] sm:$0xff] %vm1717_vm4, %v6114_v63  ;;  %v6441_v53 = vmul.f32 0.5, %v6321_v6  ;;  %6697 = vst.msk [vmem:[%s15150_s26 + $0x10] sm:$0xff] %vm1717_vm4, %v6321_v6  ;;  %v6117_v17 = vadd.f32 %v7247_v30, %v15133_v24  ;;  %v6324_v51 = vadd.f32 %v7289_v4, %v15138_v16  ;;  %v6108_v47 = vpop.f32.mrb[35].mxu0  ;;  %v6315_v34 = vpop.f32.mrb[35].mxu1  ;;  %v6539_v6 = vld [vmem:[%s15180_s17 + $0x20] sm:$0xff] }
 0x75f   : > { %6663 = vst.msk [vmem:[%s15144_s28] sm:$0xff] %vm1717_vm4, %v6106_v23  ;;  %v6439_v44 = vmul.f32 0.5, %v6313_v39  ;;  %6695 = vst.msk [vmem:[%s15150_s26] sm:$0xff] %vm1717_vm4, %v6313_v39  ;;  %v6109_v52 = vadd.f32 %v15133_v24, %v6108_v47  ;;  %v6316_v15 = vadd.f32 %v15138_v16, %v6315_v34  ;;  %v6540_v30 = vld [vmem:[%s15180_s17 + $0x28] sm:$0xff] }
 0x760   : > { %v6475_v7 = vmul.f32 1.442695, %v6441_v53  ;;  %6666 = vst.msk [vmem:[%s15144_s28 + $0x18] sm:$0xff] %vm1717_vm4, %v6117_v17  ;;  %v6442_v29 = vmul.f32 0.5, %v6324_v51  ;;  %6698 = vst.msk [vmem:[%s15150_s26 + $0x18] sm:$0xff] %vm1717_vm4, %v6324_v51 }
 0x761   : > { %v6471_v31 = vmul.f32 1.442695, %v6439_v44  ;;  %6664 = vst.msk [vmem:[%s15144_s28 + $0x8] sm:$0xff] %vm1717_vm4, %v6109_v52  ;;  %v6440_v40 = vmul.f32 0.5, %v6316_v15  ;;  %6696 = vst.msk [vmem:[%s15150_s26 + $0x8] sm:$0xff] %vm1717_vm4, %v6316_v15 }
 0x762   : > { %9514 = vpow2.f32 %v6475_v7  ;;  %v6477_v2 = vmul.f32 1.442695, %v6442_v29 }
 0x763   : > { %9516 = vpow2.f32 %v6471_v31  ;;  %v6473_v59 = vmul.f32 1.442695, %v6440_v40 }
 0x764   : > { %9518 = vpow2.f32 %v6477_v2 }
 0x765   : > { %9520 = vpow2.f32 %v6473_v59 }
 0x76c   : > { %v9515_v33 = vpop.eup %9514 }
 0x76d   : > { %v9517_v32 = vpop.eup %9516  ;;  %v6569_v48 = vmul.f32 %v9515_v33, %v6537_v9 }
 0x76e   : > { %v9519_v11 = vpop.eup %9518  ;;  %v6567_v18 = vmul.f32 %v9517_v32, %v6535_v57 }
 0x76f   : > { %v9521_v5 = vpop.eup %9520  ;;  %v6601_v26 = vadd.f32 %v6569_v48, %v6114_v63  ;;  %v6570_v19 = vmul.f32 %v9519_v11, %v6538_v27  ;;  %v6541_v63 = vld [vmem:[%s15180_s17 + $0x30] sm:$0xff] }
 0x770   : > { %v6599_v22 = vadd.f32 %v6567_v18, %v6106_v23  ;;  %v6568_v49 = vmul.f32 %v9521_v5, %v6536_v45 }
 0x771   : > { %6633 = vst.msk [vmem:[%s15190_s22 + $0x10] sm:$0xff] %vm1717_vm4, %v6601_v26  ;;  %v6602_v41 = vadd.f32 %v6570_v19, %v6117_v17 }
 0x772   : > { %6631 = vst.msk [vmem:[%s15190_s22] sm:$0xff] %vm1717_vm4, %v6599_v22  ;;  %v6600_v60 = vadd.f32 %v6568_v49, %v6109_v52 }
 0x773   : > { %6634 = vst.msk [vmem:[%s15190_s22 + $0x18] sm:$0xff] %vm1717_vm4, %v6602_v41 }
 0x774   : > { %6632 = vst.msk [vmem:[%s15190_s22 + $0x8] sm:$0xff] %vm1717_vm4, %v6600_v60 }
 0x77b   : > { %v7250_v10 = vpop.f32.mrb[36].mxu0  ;;  %v7292_v50 = vpop.f32.mrb[36].mxu1 }
 0x77c   : > { %v6130_v36 = vadd.f32 %v7250_v10, %v15133_v24  ;;  %v6337_v62 = vadd.f32 %v7292_v50, %v15138_v16  ;;  %v6121_v12 = vpop.f32.mrb[37].mxu0  ;;  %v6328_v20 = vpop.f32.mrb[37].mxu1 }
 0x77d   : > { %v6122_v28 = vadd.f32 %v15133_v24, %v6121_v12  ;;  %v6329_v58 = vadd.f32 %v15138_v16, %v6328_v20  ;;  %v7251_v38 = vpop.f32.mrb[38].mxu0  ;;  %v7293_v61 = vpop.f32.mrb[38].mxu1  ;;  %v6546_v20 = vld [vmem:[%s15180_s17 + $0x58] sm:$0xff] }
 0x77e   : > { %6669 = vst.msk [vmem:[%s15144_s28 + $0x30] sm:$0xff] %vm1717_vm4, %v6130_v36  ;;  %v6445_v8 = vmul.f32 0.5, %v6337_v62  ;;  %6701 = vst.msk [vmem:[%s15150_s26 + $0x30] sm:$0xff] %vm1717_vm4, %v6337_v62  ;;  %v6133_v46 = vadd.f32 %v7251_v38, %v15133_v24  ;;  %v6340_v43 = vadd.f32 %v7293_v61, %v15138_v16  ;;  %v6124_v0 = vpop.f32.mrb[39].mxu0  ;;  %v6331_v35 = vpop.f32.mrb[39].mxu1  ;;  %v6543_v62 = vld [vmem:[%s15180_s17 + $0x40] sm:$0xff] }
 0x77f   : > { %6667 = vst.msk [vmem:[%s15144_s28 + $0x20] sm:$0xff] %vm1717_vm4, %v6122_v28  ;;  %v6443_v54 = vmul.f32 0.5, %v6329_v58  ;;  %6699 = vst.msk [vmem:[%s15150_s26 + $0x20] sm:$0xff] %vm1717_vm4, %v6329_v58  ;;  %v6125_v25 = vadd.f32 %v15133_v24, %v6124_v0  ;;  %v6332_v3 = vadd.f32 %v15138_v16, %v6331_v35  ;;  %v6544_v38 = vld [vmem:[%s15180_s17 + $0x48] sm:$0xff] }
 0x780   : > { %v6483_v56 = vmul.f32 1.442695, %v6445_v8  ;;  %6670 = vst.msk [vmem:[%s15144_s28 + $0x38] sm:$0xff] %vm1717_vm4, %v6133_v46  ;;  %v6446_v37 = vmul.f32 0.5, %v6340_v43  ;;  %6702 = vst.msk [vmem:[%s15150_s26 + $0x38] sm:$0xff] %vm1717_vm4, %v6340_v43 }
 0x781   : > { %v6479_v42 = vmul.f32 1.442695, %v6443_v54  ;;  %6668 = vst.msk [vmem:[%s15144_s28 + $0x28] sm:$0xff] %vm1717_vm4, %v6125_v25  ;;  %v6444_v55 = vmul.f32 0.5, %v6332_v3  ;;  %6700 = vst.msk [vmem:[%s15150_s26 + $0x28] sm:$0xff] %vm1717_vm4, %v6332_v3 }
 0x782   : > { %9522 = vpow2.f32 %v6483_v56  ;;  %v6485_v13 = vmul.f32 1.442695, %v6446_v37 }
 0x783   : > { %9524 = vpow2.f32 %v6479_v42  ;;  %v6481_v21 = vmul.f32 1.442695, %v6444_v55 }
 0x784   : > { %9526 = vpow2.f32 %v6485_v13 }
 0x785   : > { %9528 = vpow2.f32 %v6481_v21 }
 0x78c   : > { %v9523_v14 = vpop.eup %9522 }
 0x78d   : > { %v9525_v23 = vpop.eup %9524  ;;  %v6573_v39 = vmul.f32 %v9523_v14, %v6541_v63 }
 0x78e   : > { %v9527_v4 = vpop.eup %9526  ;;  %v6571_v53 = vmul.f32 %v9525_v23, %v6539_v6 }
 0x78f   : > { %v9529_v17 = vpop.eup %9528  ;;  %v6605_v51 = vadd.f32 %v6573_v39, %v6130_v36  ;;  %v6574_v47 = vmul.f32 %v9527_v4, %v6542_v1  ;;  %v6545_v36 = vld [vmem:[%s15180_s17 + $0x50] sm:$0xff] }
 0x790   : > { %v6603_v34 = vadd.f32 %v6571_v53, %v6122_v28  ;;  %v6572_v44 = vmul.f32 %v9529_v17, %v6540_v30 }
 0x791   : > { %6637 = vst.msk [vmem:[%s15190_s22 + $0x30] sm:$0xff] %vm1717_vm4, %v6605_v51  ;;  %v6606_v52 = vadd.f32 %v6574_v47, %v6133_v46 }
 0x792   : > { %6635 = vst.msk [vmem:[%s15190_s22 + $0x20] sm:$0xff] %vm1717_vm4, %v6603_v34  ;;  %v6604_v15 = vadd.f32 %v6572_v44, %v6125_v25 }
 0x793   : > { %6638 = vst.msk [vmem:[%s15190_s22 + $0x38] sm:$0xff] %vm1717_vm4, %v6606_v52 }
 0x794   : > { %6636 = vst.msk [vmem:[%s15190_s22 + $0x28] sm:$0xff] %vm1717_vm4, %v6604_v15 }
 0x79b   : > { %v7254_v7 = vpop.f32.mrb[40].mxu0  ;;  %v7296_v29 = vpop.f32.mrb[40].mxu1 }
 0x79c   : > { %v6146_v31 = vadd.f32 %v7254_v7, %v15133_v24  ;;  %v6353_v40 = vadd.f32 %v7296_v29, %v15138_v16  ;;  %v6137_v2 = vpop.f32.mrb[41].mxu0  ;;  %v6344_v59 = vpop.f32.mrb[41].mxu1 }
 0x79d   : > { %v6138_v9 = vadd.f32 %v15133_v24, %v6137_v2  ;;  %v6345_v57 = vadd.f32 %v15138_v16, %v6344_v59  ;;  %v7255_v33 = vpop.f32.mrb[42].mxu0  ;;  %v7297_v27 = vpop.f32.mrb[42].mxu1  ;;  %v6550_v59 = vld [vmem:[%s15180_s17 + $0x78] sm:$0xff] }
 0x79e   : > { %6673 = vst.msk [vmem:[%s15144_s28 + $0x50] sm:$0xff] %vm1717_vm4, %v6146_v31  ;;  %v6449_v32 = vmul.f32 0.5, %v6353_v40  ;;  %6705 = vst.msk [vmem:[%s15150_s26 + $0x50] sm:$0xff] %vm1717_vm4, %v6353_v40  ;;  %v6149_v48 = vadd.f32 %v7255_v33, %v15133_v24  ;;  %v6356_v45 = vadd.f32 %v7297_v27, %v15138_v16  ;;  %v6140_v11 = vpop.f32.mrb[43].mxu0  ;;  %v6347_v18 = vpop.f32.mrb[43].mxu1  ;;  %v6547_v40 = vld [vmem:[%s15180_s17 + $0x60] sm:$0xff] }
 0x79f   : > { %6671 = vst.msk [vmem:[%s15144_s28 + $0x40] sm:$0xff] %vm1717_vm4, %v6138_v9  ;;  %v6447_v5 = vmul.f32 0.5, %v6345_v57  ;;  %6703 = vst.msk [vmem:[%s15150_s26 + $0x40] sm:$0xff] %vm1717_vm4, %v6345_v57  ;;  %v6141_v26 = vadd.f32 %v15133_v24, %v6140_v11  ;;  %v6348_v19 = vadd.f32 %v15138_v16, %v6347_v18  ;;  %v6548_v33 = vld [vmem:[%s15180_s17 + $0x68] sm:$0xff] }
 0x7a0   : > { %v6491_v22 = vmul.f32 1.442695, %v6449_v32  ;;  %6674 = vst.msk [vmem:[%s15144_s28 + $0x58] sm:$0xff] %vm1717_vm4, %v6149_v48  ;;  %v6450_v49 = vmul.f32 0.5, %v6356_v45  ;;  %6706 = vst.msk [vmem:[%s15150_s26 + $0x58] sm:$0xff] %vm1717_vm4, %v6356_v45 }
 0x7a1   : > { %v6487_v41 = vmul.f32 1.442695, %v6447_v5  ;;  %6672 = vst.msk [vmem:[%s15144_s28 + $0x48] sm:$0xff] %vm1717_vm4, %v6141_v26  ;;  %v6448_v60 = vmul.f32 0.5, %v6348_v19  ;;  %6704 = vst.msk [vmem:[%s15150_s26 + $0x48] sm:$0xff] %vm1717_vm4, %v6348_v19 }
 0x7a2   : > { %9530 = vpow2.f32 %v6491_v22  ;;  %v6493_v10 = vmul.f32 1.442695, %v6450_v49 }
 0x7a3   : > { %9532 = vpow2.f32 %v6487_v41  ;;  %v6489_v50 = vmul.f32 1.442695, %v6448_v60 }
 0x7a4   : > { %9534 = vpow2.f32 %v6493_v10 }
 0x7a5   : > { %9536 = vpow2.f32 %v6489_v50 }
 0x7ac   : > { %v9531_v12 = vpop.eup %9530 }
 0x7ad   : > { %v9533_v28 = vpop.eup %9532  ;;  %v6577_v58 = vmul.f32 %v9531_v12, %v6545_v36 }
 0x7ae   : > { %v9535_v61 = vpop.eup %9534  ;;  %v6575_v8 = vmul.f32 %v9533_v28, %v6543_v62 }
 0x7af   : > { %v9537_v46 = vpop.eup %9536  ;;  %v6609_v43 = vadd.f32 %v6577_v58, %v6146_v31  ;;  %v6578_v0 = vmul.f32 %v9535_v61, %v6546_v20  ;;  %v6549_v31 = vld [vmem:[%s15180_s17 + $0x70] sm:$0xff] }
 0x7b0   : > { %v6607_v35 = vadd.f32 %v6575_v8, %v6138_v9  ;;  %v6576_v54 = vmul.f32 %v9537_v46, %v6544_v38 }
 0x7b1   : > { %6641 = vst.msk [vmem:[%s15190_s22 + $0x50] sm:$0xff] %vm1717_vm4, %v6609_v43  ;;  %v6610_v25 = vadd.f32 %v6578_v0, %v6149_v48 }
 0x7b2   : > { %6639 = vst.msk [vmem:[%s15190_s22 + $0x40] sm:$0xff] %vm1717_vm4, %v6607_v35  ;;  %v6608_v3 = vadd.f32 %v6576_v54, %v6141_v26 }
 0x7b3   : > { %6642 = vst.msk [vmem:[%s15190_s22 + $0x58] sm:$0xff] %vm1717_vm4, %v6610_v25 }
 0x7b4   : > { %6640 = vst.msk [vmem:[%s15190_s22 + $0x48] sm:$0xff] %vm1717_vm4, %v6608_v3 }
 0x7bb   : > { %v7258_v56 = vpop.f32.mrb[44].mxu0  ;;  %v7300_v37 = vpop.f32.mrb[44].mxu1 }
 0x7bc   : > { %v6162_v42 = vadd.f32 %v7258_v56, %v15133_v24  ;;  %v6369_v55 = vadd.f32 %v7300_v37, %v15138_v16  ;;  %v6153_v13 = vpop.f32.mrb[45].mxu0  ;;  %v6360_v21 = vpop.f32.mrb[45].mxu1 }
 0x7bd   : > { %v6154_v63 = vadd.f32 %v15133_v24, %v6153_v13  ;;  %v6361_v6 = vadd.f32 %v15138_v16, %v6360_v21  ;;  %v7259_v14 = vpop.f32.mrb[46].mxu0  ;;  %v7301_v1 = vpop.f32.mrb[46].mxu1  ;;  %v6554_v21 = vld [vmem:[%s15180_s17 + $0x98] sm:$0xff] }
 0x7be   : > { %6677 = vst.msk [vmem:[%s15144_s28 + $0x70] sm:$0xff] %vm1717_vm4, %v6162_v42  ;;  %v6453_v23 = vmul.f32 0.5, %v6369_v55  ;;  %6709 = vst.msk [vmem:[%s15150_s26 + $0x70] sm:$0xff] %vm1717_vm4, %v6369_v55  ;;  %v6165_v39 = vadd.f32 %v7259_v14, %v15133_v24  ;;  %v6372_v30 = vadd.f32 %v7301_v1, %v15138_v16  ;;  %v6156_v4 = vpop.f32.mrb[47].mxu0  ;;  %v6363_v53 = vpop.f32.mrb[47].mxu1  ;;  %v6551_v55 = vld [vmem:[%s15180_s17 + $0x80] sm:$0xff] }
 0x7bf   : > { %6675 = vst.msk [vmem:[%s15144_s28 + $0x60] sm:$0xff] %vm1717_vm4, %v6154_v63  ;;  %v6451_v17 = vmul.f32 0.5, %v6361_v6  ;;  %6707 = vst.msk [vmem:[%s15150_s26 + $0x60] sm:$0xff] %vm1717_vm4, %v6361_v6  ;;  %v6157_v51 = vadd.f32 %v15133_v24, %v6156_v4  ;;  %v6364_v47 = vadd.f32 %v15138_v16, %v6363_v53  ;;  %v6552_v14 = vld [vmem:[%s15180_s17 + $0x88] sm:$0xff] }
 0x7c0   : > { %v6499_v34 = vmul.f32 1.442695, %v6453_v23  ;;  %6678 = vst.msk [vmem:[%s15144_s28 + $0x78] sm:$0xff] %vm1717_vm4, %v6165_v39  ;;  %v6454_v44 = vmul.f32 0.5, %v6372_v30  ;;  %6710 = vst.msk [vmem:[%s15150_s26 + $0x78] sm:$0xff] %vm1717_vm4, %v6372_v30 }
 0x7c1   : > { %v6495_v52 = vmul.f32 1.442695, %v6451_v17  ;;  %6676 = vst.msk [vmem:[%s15144_s28 + $0x68] sm:$0xff] %vm1717_vm4, %v6157_v51  ;;  %v6452_v15 = vmul.f32 0.5, %v6364_v47  ;;  %6708 = vst.msk [vmem:[%s15150_s26 + $0x68] sm:$0xff] %vm1717_vm4, %v6364_v47 }
 0x7c2   : > { %9538 = vpow2.f32 %v6499_v34  ;;  %v6501_v7 = vmul.f32 1.442695, %v6454_v44 }
 0x7c3   : > { %9540 = vpow2.f32 %v6495_v52  ;;  %v6497_v29 = vmul.f32 1.442695, %v6452_v15 }
 0x7c4   : > { %9542 = vpow2.f32 %v6501_v7 }
 0x7c5   : > { %9544 = vpow2.f32 %v6497_v29 }
 0x7cc   : > { %v9539_v2 = vpop.eup %9538 }
 0x7cd   : > { %v9541_v9 = vpop.eup %9540  ;;  %v6581_v57 = vmul.f32 %v9539_v2, %v6549_v31 }
 0x7ce   : > { %v9543_v27 = vpop.eup %9542  ;;  %v6579_v32 = vmul.f32 %v9541_v9, %v6547_v40 }
 0x7cf   : > { %v9545_v48 = vpop.eup %9544  ;;  %v6613_v45 = vadd.f32 %v6581_v57, %v6162_v42  ;;  %v6582_v11 = vmul.f32 %v9543_v27, %v6550_v59  ;;  %v6553_v42 = vld [vmem:[%s15180_s17 + $0x90] sm:$0xff] }
 0x7d0   : > { %v6611_v18 = vadd.f32 %v6579_v32, %v6154_v63  ;;  %v6580_v5 = vmul.f32 %v9545_v48, %v6548_v33 }
 0x7d1   : > { %6645 = vst.msk [vmem:[%s15190_s22 + $0x70] sm:$0xff] %vm1717_vm4, %v6613_v45  ;;  %v6614_v26 = vadd.f32 %v6582_v11, %v6165_v39 }
 0x7d2   : > { %6643 = vst.msk [vmem:[%s15190_s22 + $0x60] sm:$0xff] %vm1717_vm4, %v6611_v18  ;;  %v6612_v19 = vadd.f32 %v6580_v5, %v6157_v51 }
 0x7d3   : > { %6646 = vst.msk [vmem:[%s15190_s22 + $0x78] sm:$0xff] %vm1717_vm4, %v6614_v26 }
 0x7d4   : > { %6644 = vst.msk [vmem:[%s15190_s22 + $0x68] sm:$0xff] %vm1717_vm4, %v6612_v19 }
 0x7dc   : > { %v7262_v22 = vpop.f32.mrb[48].mxu0  ;;  %v7304_v49 = vpop.f32.mrb[48].mxu1 }
 0x7dd   : > { %v6178_v41 = vadd.f32 %v7262_v22, %v15133_v24  ;;  %v6385_v60 = vadd.f32 %v7304_v49, %v15138_v16  ;;  %v6169_v10 = vpop.f32.mrb[49].mxu0  ;;  %v6376_v50 = vpop.f32.mrb[49].mxu1 }
 0x7de   : > { %v6170_v36 = vadd.f32 %v15133_v24, %v6169_v10  ;;  %v6377_v62 = vadd.f32 %v15138_v16, %v6376_v50  ;;  %v7263_v12 = vpop.f32.mrb[50].mxu0  ;;  %v7305_v20 = vpop.f32.mrb[50].mxu1  ;;  %v6558_v50 = vld [vmem:[%s15180_s17 + $0xb8] sm:$0xff] }
 0x7df   : > { %6681 = vst.msk [vmem:[%s15144_s28 + $0x90] sm:$0xff] %vm1717_vm4, %v6178_v41  ;;  %v6457_v28 = vmul.f32 0.5, %v6385_v60  ;;  %6713 = vst.msk [vmem:[%s15150_s26 + $0x90] sm:$0xff] %vm1717_vm4, %v6385_v60  ;;  %v6181_v58 = vadd.f32 %v7263_v12, %v15133_v24  ;;  %v6388_v38 = vadd.f32 %v7305_v20, %v15138_v16  ;;  %v6172_v61 = vpop.f32.mrb[51].mxu0  ;;  %v6379_v8 = vpop.f32.mrb[51].mxu1  ;;  %v6555_v60 = vld [vmem:[%s15180_s17 + $0xa0] sm:$0xff] }
 0x7e0   : > { %6679 = vst.msk [vmem:[%s15144_s28 + $0x80] sm:$0xff] %vm1717_vm4, %v6170_v36  ;;  %v6455_v46 = vmul.f32 0.5, %v6377_v62  ;;  %6711 = vst.msk [vmem:[%s15150_s26 + $0x80] sm:$0xff] %vm1717_vm4, %v6377_v62  ;;  %v6173_v43 = vadd.f32 %v15133_v24, %v6172_v61  ;;  %v6380_v0 = vadd.f32 %v15138_v16, %v6379_v8  ;;  %v6556_v12 = vld [vmem:[%s15180_s17 + $0xa8] sm:$0xff] }
 0x7e1   : > { %v6507_v35 = vmul.f32 1.442695, %v6457_v28  ;;  %6682 = vst.msk [vmem:[%s15144_s28 + $0x98] sm:$0xff] %vm1717_vm4, %v6181_v58  ;;  %v6458_v54 = vmul.f32 0.5, %v6388_v38  ;;  %6714 = vst.msk [vmem:[%s15150_s26 + $0x98] sm:$0xff] %vm1717_vm4, %v6388_v38 }
 0x7e2   : > { %v6503_v25 = vmul.f32 1.442695, %v6455_v46  ;;  %6680 = vst.msk [vmem:[%s15144_s28 + $0x88] sm:$0xff] %vm1717_vm4, %v6173_v43  ;;  %v6456_v3 = vmul.f32 0.5, %v6380_v0  ;;  %6712 = vst.msk [vmem:[%s15150_s26 + $0x88] sm:$0xff] %vm1717_vm4, %v6380_v0 }
 0x7e3   : > { %9546 = vpow2.f32 %v6507_v35  ;;  %v6509_v56 = vmul.f32 1.442695, %v6458_v54 }
 0x7e4   : > { %9548 = vpow2.f32 %v6503_v25  ;;  %v6505_v37 = vmul.f32 1.442695, %v6456_v3 }
 0x7e5   : > { %9550 = vpow2.f32 %v6509_v56 }
 0x7e6   : > { %9552 = vpow2.f32 %v6505_v37 }
 0x7ed   : > { %v9547_v13 = vpop.eup %9546 }
 0x7ee   : > { %v9549_v63 = vpop.eup %9548  ;;  %v6585_v6 = vmul.f32 %v9547_v13, %v6553_v42 }
 0x7ef   : > { %v9551_v1 = vpop.eup %9550  ;;  %v6583_v23 = vmul.f32 %v9549_v63, %v6551_v55 }
 0x7f0   : > { %v9553_v39 = vpop.eup %9552  ;;  %v6617_v30 = vadd.f32 %v6585_v6, %v6178_v41  ;;  %v6586_v4 = vmul.f32 %v9551_v1, %v6554_v21  ;;  %v6557_v41 = vld [vmem:[%s15180_s17 + $0xb0] sm:$0xff] }
 0x7f1   : > { %v6615_v53 = vadd.f32 %v6583_v23, %v6170_v36  ;;  %v6584_v17 = vmul.f32 %v9553_v39, %v6552_v14 }
 0x7f2   : > { %6649 = vst.msk [vmem:[%s15190_s22 + $0x90] sm:$0xff] %vm1717_vm4, %v6617_v30  ;;  %v6618_v51 = vadd.f32 %v6586_v4, %v6181_v58 }
 0x7f3   : > { %6647 = vst.msk [vmem:[%s15190_s22 + $0x80] sm:$0xff] %vm1717_vm4, %v6615_v53  ;;  %v6616_v47 = vadd.f32 %v6584_v17, %v6173_v43 }
 0x7f4   : > { %6650 = vst.msk [vmem:[%s15190_s22 + $0x98] sm:$0xff] %vm1717_vm4, %v6618_v51 }
 0x7f5   : > { %6648 = vst.msk [vmem:[%s15190_s22 + $0x88] sm:$0xff] %vm1717_vm4, %v6616_v47 }
 0x7fc   : > { %v7266_v34 = vpop.f32.mrb[52].mxu0  ;;  %v7308_v44 = vpop.f32.mrb[52].mxu1 }
 0x7fd   : > { %v6194_v52 = vadd.f32 %v7266_v34, %v15133_v24  ;;  %v6401_v15 = vadd.f32 %v7308_v44, %v15138_v16  ;;  %v6185_v7 = vpop.f32.mrb[53].mxu0  ;;  %v6392_v29 = vpop.f32.mrb[53].mxu1 }
 0x7fe   : > { %v6186_v31 = vadd.f32 %v15133_v24, %v6185_v7  ;;  %v6393_v40 = vadd.f32 %v15138_v16, %v6392_v29  ;;  %v7267_v2 = vpop.f32.mrb[54].mxu0  ;;  %v7309_v59 = vpop.f32.mrb[54].mxu1 }
 0x7ff   : > { %6685 = vst.msk [vmem:[%s15144_s28 + $0xb0] sm:$0xff] %vm1717_vm4, %v6194_v52  ;;  %v6461_v9 = vmul.f32 0.5, %v6401_v15  ;;  %6717 = vst.msk [vmem:[%s15150_s26 + $0xb0] sm:$0xff] %vm1717_vm4, %v6401_v15  ;;  %v6197_v57 = vadd.f32 %v7267_v2, %v15133_v24  ;;  %v6404_v33 = vadd.f32 %v7309_v59, %v15138_v16  ;;  %v6188_v27 = vpop.f32.mrb[55].mxu0  ;;  %v6395_v32 = vpop.f32.mrb[55].mxu1 }
 0x800   : > { %6683 = vst.msk [vmem:[%s15144_s28 + $0xa0] sm:$0xff] %vm1717_vm4, %v6186_v31  ;;  %v6459_v48 = vmul.f32 0.5, %v6393_v40  ;;  %6715 = vst.msk [vmem:[%s15150_s26 + $0xa0] sm:$0xff] %vm1717_vm4, %v6393_v40  ;;  %v6189_v45 = vadd.f32 %v15133_v24, %v6188_v27  ;;  %v6396_v11 = vadd.f32 %v15138_v16, %v6395_v32 }
 0x801   : > { %v6515_v18 = vmul.f32 1.442695, %v6461_v9  ;;  %6686 = vst.msk [vmem:[%s15144_s28 + $0xb8] sm:$0xff] %vm1717_vm4, %v6197_v57  ;;  %v6462_v5 = vmul.f32 0.5, %v6404_v33  ;;  %6718 = vst.msk [vmem:[%s15150_s26 + $0xb8] sm:$0xff] %vm1717_vm4, %v6404_v33  ;;  %v6561_v33 = vld [vmem:[%s15180_s17 + $0xd0] sm:$0xff] }
 0x802   : > { %v6511_v26 = vmul.f32 1.442695, %v6459_v48  ;;  %6684 = vst.msk [vmem:[%s15144_s28 + $0xa8] sm:$0xff] %vm1717_vm4, %v6189_v45  ;;  %v6460_v19 = vmul.f32 0.5, %v6396_v11  ;;  %6716 = vst.msk [vmem:[%s15150_s26 + $0xa8] sm:$0xff] %vm1717_vm4, %v6396_v11 }
 0x803   : > { %9554 = vpow2.f32 %v6515_v18  ;;  %v6517_v22 = vmul.f32 1.442695, %v6462_v5  ;;  %v6559_v18 = vld [vmem:[%s15180_s17 + $0xc0] sm:$0xff] }
 0x804   : > { %9556 = vpow2.f32 %v6511_v26  ;;  %v6513_v49 = vmul.f32 1.442695, %v6460_v19 }
 0x805   : > { %9558 = vpow2.f32 %v6517_v22 }
 0x806   : > { %9560 = vpow2.f32 %v6513_v49  ;;  %v6562_v49 = vld [vmem:[%s15180_s17 + $0xd8] sm:$0xff] }
 0x80d   : > { %v9555_v10 = vpop.eup %9554 }
 0x80e   : > { %v9557_v36 = vpop.eup %9556  ;;  %v6589_v62 = vmul.f32 %v9555_v10, %v6557_v41 }
 0x80f   : > { %v9559_v20 = vpop.eup %9558  ;;  %v6587_v28 = vmul.f32 %v9557_v36, %v6555_v60  ;;  %v6560_v36 = vld [vmem:[%s15180_s17 + $0xc8] sm:$0xff] }
 0x810   : > { %v9561_v58 = vpop.eup %9560  ;;  %v6621_v38 = vadd.f32 %v6589_v62, %v6194_v52  ;;  %v6590_v61 = vmul.f32 %v9559_v20, %v6558_v50 }
 0x811   : > { %v6619_v8 = vadd.f32 %v6587_v28, %v6186_v31  ;;  %v6588_v46 = vmul.f32 %v9561_v58, %v6556_v12 }
 0x812   : > { %6653 = vst.msk [vmem:[%s15190_s22 + $0xb0] sm:$0xff] %vm1717_vm4, %v6621_v38  ;;  %v6622_v43 = vadd.f32 %v6590_v61, %v6197_v57 }
 0x813   : > { %6651 = vst.msk [vmem:[%s15190_s22 + $0xa0] sm:$0xff] %vm1717_vm4, %v6619_v8  ;;  %v6620_v0 = vadd.f32 %v6588_v46, %v6189_v45 }
 0x814   : > { %6654 = vst.msk [vmem:[%s15190_s22 + $0xb8] sm:$0xff] %vm1717_vm4, %v6622_v43  ;;  %v7270_v35 = vpop.f32.mrb[56].mxu0  ;;  %v7312_v54 = vpop.f32.mrb[56].mxu1 }
 0x815   : > { %6652 = vst.msk [vmem:[%s15190_s22 + $0xa8] sm:$0xff] %vm1717_vm4, %v6620_v0  ;;  %v15381_v25 = vadd.f32 %v7270_v35, %v15133_v24  ;;  %v6417_v3 = vadd.f32 %v7312_v54, %v15138_v16  ;;  %v6201_v56 = vpop.f32.mrb[57].mxu0  ;;  %v6408_v37 = vpop.f32.mrb[57].mxu1  ;;  %v6565_v35 = vld [vmem:[%s15180_s17 + $0xf0] sm:$0xff]  ;;  %v6563_v54 = vld [vmem:[%s15180_s17 + $0xe0] sm:$0xff] }
 0x816   : > { %v15385_v42 = vadd.f32 %v15133_v24, %v6201_v56  ;;  %v6409_v55 = vadd.f32 %v15138_v16, %v6408_v37  ;;  %v7271_v13 = vpop.f32.mrb[58].mxu0  ;;  %v7313_v21 = vpop.f32.mrb[58].mxu1 }
 0x817   : > { %6689 = vst.msk [vmem:[%s15144_s28 + $0xd0] sm:$0xff] %vm1717_vm4, %v15381_v25  ;;  %v6465_v63 = vmul.f32 0.5, %v6417_v3  ;;  %6721 = vst.msk [vmem:[%s15150_s26 + $0xd0] sm:$0xff] %vm1717_vm4, %v6417_v3  ;;  %v15394_v6 = vadd.f32 %v7271_v13, %v15133_v24  ;;  %v6420_v14 = vadd.f32 %v7313_v21, %v15138_v16  ;;  %v6204_v1 = vpop.f32.mrb[59].mxu0  ;;  %v6411_v23 = vpop.f32.mrb[59].mxu1  ;;  %v6566_v3 = vld [vmem:[%s15180_s17 + $0xf8] sm:$0xff] }
 0x818   : > { %6687 = vst.msk [vmem:[%s15144_s28 + $0xc0] sm:$0xff] %vm1717_vm4, %v15385_v42  ;;  %v6463_v39 = vmul.f32 0.5, %v6409_v55  ;;  %6719 = vst.msk [vmem:[%s15150_s26 + $0xc0] sm:$0xff] %vm1717_vm4, %v6409_v55  ;;  %v15403_v30 = vadd.f32 %v15133_v24, %v6204_v1  ;;  %v6412_v4 = vadd.f32 %v15138_v16, %v6411_v23 }
 0x819   : > { %v6523_v53 = vmul.f32 1.442695, %v6465_v63  ;;  %6690 = vst.msk [vmem:[%s15144_s28 + $0xd8] sm:$0xff] %vm1717_vm4, %v15394_v6  ;;  %v6466_v17 = vmul.f32 0.5, %v6420_v14  ;;  %6722 = vst.msk [vmem:[%s15150_s26 + $0xd8] sm:$0xff] %vm1717_vm4, %v6420_v14 }
 0x81a   : > { %v6519_v51 = vmul.f32 1.442695, %v6463_v39  ;;  %6688 = vst.msk [vmem:[%s15144_s28 + $0xc8] sm:$0xff] %vm1717_vm4, %v15403_v30  ;;  %v6464_v47 = vmul.f32 0.5, %v6412_v4  ;;  %6720 = vst.msk [vmem:[%s15150_s26 + $0xc8] sm:$0xff] %vm1717_vm4, %v6412_v4 }
 0x81b   : > { %9562 = vpow2.f32 %v6523_v53  ;;  %v6525_v34 = vmul.f32 1.442695, %v6466_v17 }
 0x81c   : > { %9564 = vpow2.f32 %v6519_v51  ;;  %v6521_v44 = vmul.f32 1.442695, %v6464_v47 }
 0x81d   : > { %9566 = vpow2.f32 %v6525_v34 }
 0x81e   : > { %9568 = vpow2.f32 %v6521_v44 }
 0x821   : > { %v7274_v52 = vpop.f32.mrb[60].mxu0  ;;  %v7316_v15 = vpop.f32.mrb[60].mxu1 }
 0x822   : > { %v15417_v7 = vadd.f32 %v7274_v52, %v15133_v24  ;;  %v6433_v29 = vadd.f32 %v7316_v15, %v15138_v16  ;;  %v6217_v31 = vpop.f32.mrb[61].mxu0  ;;  %v6424_v40 = vpop.f32.mrb[61].mxu1 }
 0x823   : > { %v6218_v2 = vadd.f32 %v15133_v24, %v6217_v31  ;;  %v6425_v59 = vadd.f32 %v15138_v16, %v6424_v40  ;;  %v7275_v9 = vpop.f32.mrb[62].mxu0  ;;  %v7317_v57 = vpop.f32.mrb[62].mxu1 }
 0x824   : > { %6693 = vst.msk [vmem:[%s15144_s28 + $0xf0] sm:$0xff] %vm1717_vm4, %v15417_v7  ;;  %v6469_v27 = vmul.f32 0.5, %v6433_v29  ;;  %6725 = vst.msk [vmem:[%s15150_s26 + $0xf0] sm:$0xff] %vm1717_vm4, %v6433_v29  ;;  %v6229_v32 = vadd.f32 %v7275_v9, %v15133_v24  ;;  %v6436_v48 = vadd.f32 %v7317_v57, %v15138_v16  ;;  %v6220_v45 = vpop.f32.mrb[63].mxu0  ;;  %v6427_v11 = vpop.f32.mrb[63].mxu1 }
 0x825   : > { %6691 = vst.msk [vmem:[%s15144_s28 + $0xe0] sm:$0xff] %vm1717_vm4, %v6218_v2  ;;  %v6467_v5 = vmul.f32 0.5, %v6425_v59  ;;  %6723 = vst.msk [vmem:[%s15150_s26 + $0xe0] sm:$0xff] %vm1717_vm4, %v6425_v59  ;;  %v6221_v26 = vadd.f32 %v15133_v24, %v6220_v45  ;;  %v6428_v19 = vadd.f32 %v15138_v16, %v6427_v11  ;;  %v9563_v22 = vpop.eup %9562 }
 0x826   : > { %v6531_v41 = vmul.f32 1.442695, %v6469_v27  ;;  %6694 = vst.msk [vmem:[%s15144_s28 + $0xf8] sm:$0xff] %vm1717_vm4, %v6229_v32  ;;  %v6470_v60 = vmul.f32 0.5, %v6436_v48  ;;  %6726 = vst.msk [vmem:[%s15150_s26 + $0xf8] sm:$0xff] %vm1717_vm4, %v6436_v48  ;;  %v9565_v10 = vpop.eup %9564  ;;  %v6593_v50 = vmul.f32 %v9563_v22, %v6561_v33 }
 0x827   : > { %v6527_v62 = vmul.f32 1.442695, %v6467_v5  ;;  %6692 = vst.msk [vmem:[%s15144_s28 + $0xe8] sm:$0xff] %vm1717_vm4, %v6221_v26  ;;  %v6468_v12 = vmul.f32 0.5, %v6428_v19  ;;  %6724 = vst.msk [vmem:[%s15150_s26 + $0xe8] sm:$0xff] %vm1717_vm4, %v6428_v19  ;;  %v9567_v24 = vpop.eup %9566  ;;  %v6591_v16 = vmul.f32 %v9565_v10, %v6559_v18 }
 0x828   : > { %9570 = vpow2.f32 %v6531_v41  ;;  %v6533_v20 = vmul.f32 1.442695, %v6470_v60  ;;  %v9569_v28 = vpop.eup %9568  ;;  %v6625_v58 = vadd.f32 %v6593_v50, %v15381_v25  ;;  %v6594_v38 = vmul.f32 %v9567_v24, %v6562_v49 }
 0x829   : > { %9572 = vpow2.f32 %v6527_v62  ;;  %v6529_v61 = vmul.f32 1.442695, %v6468_v12  ;;  %v6623_v8 = vadd.f32 %v6591_v16, %v15385_v42  ;;  %v6592_v46 = vmul.f32 %v9569_v28, %v6560_v36  ;;  %v6564_v42 = vld [vmem:[%s15180_s17 + $0xe8] sm:$0xff] }
 0x82a   : > { %9574 = vpow2.f32 %v6533_v20  ;;  %6657 = vst.msk [vmem:[%s15190_s22 + $0xd0] sm:$0xff] %vm1717_vm4, %v6625_v58  ;;  %v6626_v43 = vadd.f32 %v6594_v38, %v15394_v6 }
 0x82b   : > { %9576 = vpow2.f32 %v6529_v61  ;;  %6655 = vst.msk [vmem:[%s15190_s22 + $0xc0] sm:$0xff] %vm1717_vm4, %v6623_v8  ;;  %v6624_v0 = vadd.f32 %v6592_v46, %v15403_v30 }
 0x82c   : > { %6658 = vst.msk [vmem:[%s15190_s22 + $0xd8] sm:$0xff] %vm1717_vm4, %v6626_v43 }
 0x82d   : > { %6656 = vst.msk [vmem:[%s15190_s22 + $0xc8] sm:$0xff] %vm1717_vm4, %v6624_v0 }
 0x832   : > { %v9571_v25 = vpop.eup %9570 }
 0x833   : > { %v9573_v56 = vpop.eup %9572  ;;  %v6597_v37 = vmul.f32 %v9571_v25, %v6565_v35 }
 0x834   : > { %v9575_v55 = vpop.eup %9574  ;;  %v6595_v13 = vmul.f32 %v9573_v56, %v6563_v54 }
 0x835   : > { %v9577_v21 = vpop.eup %9576  ;;  %v6629_v63 = vadd.f32 %v6597_v37, %v15417_v7  ;;  %v6598_v6 = vmul.f32 %v9575_v55, %v6566_v3 }
 0x836   : > { %v6627_v14 = vadd.f32 %v6595_v13, %v6218_v2  ;;  %v6596_v1 = vmul.f32 %v9577_v21, %v6564_v42 }
 0x837   : > { %6661 = vst.msk [vmem:[%s15190_s22 + $0xf0] sm:$0xff] %vm1717_vm4, %v6629_v63  ;;  %v6630_v23 = vadd.f32 %v6598_v6, %v6229_v32 }
 0x838   : > { %6659 = vst.msk [vmem:[%s15190_s22 + $0xe0] sm:$0xff] %vm1717_vm4, %v6627_v14  ;;  %v6628_v39 = vadd.f32 %v6596_v1, %v6221_v26 }
 0x839   : > { %6662 = vst.msk [vmem:[%s15190_s22 + $0xf8] sm:$0xff] %vm1717_vm4, %v6630_v23 }
 0x83a   : > { %6660 = vst.msk [vmem:[%s15190_s22 + $0xe8] sm:$0xff] %vm1717_vm4, %v6628_v39 }
 0x83b PF: > { %s25_s29 = sadd.s32 1, %s9584_s29  }
 0x83c   : > { %p22_p4 = scmp.ge.s32.totalorder %s25_s29, 4  }
 0x83e   :  { %24 = sbr.rel (!%p22_p4) target bundleno = 1 (0x1), region = 141 }

</bundles_post_ra>
